<compile_context>
chip_gen: v5e
topology: v5e:2x2
jax: 0.10.0
libtpu: 0.0.40
codegen_flags: <defaults>
</compile_context>

<pallas_src>
import functools

import jax
import jax.numpy as jnp
from jax.experimental import pallas as pl
from jax.experimental.pallas import tpu as pltpu

HIDDEN = 1024


def _round_up(x, m):
    return ((x + m - 1) // m) * m


def _sigmoid_f32(z):
    # sigmoid(z) = 1 / (1 + exp(-z)).  exp and the approximate reciprocal both
    # run on the EUP slot; no full-precision VALU divide.
    return pl.reciprocal(1.0 + jnp.exp(-z), approx=True)


def _fused_ae_kernel(
    x_ref,
    w1_ref, b1_ref,
    w2_ref, b2_ref,
    w3_ref, b3_ref,
    w4_ref, b4_ref,
    e_ref, d_ref,
    *scratch,
    overlap_decoder_dma: bool,
):
    """One batch tile: all four linear+sigmoid layers chained on-chip."""
    if overlap_decoder_dma:
        # Decoder weights live in HBM (memory_space=pl.ANY); start their DMA
        # now so it overlaps with the two encoder matmuls below.
        w3_buf, w4_buf, sem = scratch
        cp3 = pltpu.make_async_copy(w3_ref, w3_buf, sem.at[0])
        cp4 = pltpu.make_async_copy(w4_ref, w4_buf, sem.at[1])
        cp3.start()
        cp4.start()

    mxu_dtype = w1_ref.dtype  # bf16 by default; both dot operands in this dtype

    x = x_ref[...].astype(mxu_dtype)
    h1 = _sigmoid_f32(
        jnp.dot(x, w1_ref[...], preferred_element_type=jnp.float32) + b1_ref[...]
    )
    e = _sigmoid_f32(
        jnp.dot(h1.astype(mxu_dtype), w2_ref[...],
                preferred_element_type=jnp.float32) + b2_ref[...]
    )
    e_ref[...] = e.astype(e_ref.dtype)

    if overlap_decoder_dma:
        cp3.wait()
        cp4.wait()
        w3 = w3_buf[...]
        w4 = w4_buf[...]
    else:
        w3 = w3_ref[...]
        w4 = w4_ref[...]

    h2 = _sigmoid_f32(
        jnp.dot(e.astype(mxu_dtype), w3,
                preferred_element_type=jnp.float32) + b3_ref[...]
    )
    d = _sigmoid_f32(
        jnp.dot(h2.astype(mxu_dtype), w4,
                preferred_element_type=jnp.float32) + b4_ref[...]
    )
    d_ref[...] = d.astype(d_ref.dtype)


def _pick_tm(M, vmem_cap_bytes):
    """Largest 8-aligned divisor of M under the per-generation cap, preferring
    >= 2 grid steps (megacore sharding on v7x + DMA/compute overlap)."""
    cap = 256 if vmem_cap_bytes <= (64 << 20) else 1024
    if M <= 8 or M % 8 != 0:
        return M
    best_single, best_multi = 8, 0
    t = 8
    while t <= min(M, cap):
        if M % t == 0:
            best_single = t
            if M // t >= 2:
                best_multi = t
        t += 8
    if best_multi:
        return best_multi
    return M if M <= cap else best_single


def autoencoder_forward_fused(
    params,
    x,
    *,
    tm=None,
    weights_dtype=jnp.bfloat16,
    out_dtype=None,
    single_buffer_weights=True,
    overlap_decoder_dma=True,
):
    """(e, d) = Autoencoder.forward(x) via a single fused Pallas kernel."""
    M, n_inp = x.shape
    w1, b1 = params["encoder_fc1"]["w"], params["encoder_fc1"]["b"]
    w2, b2 = params["encoder_fc2"]["w"], params["encoder_fc2"]["b"]
    w3, b3 = params["decoder_fc1"]["w"], params["decoder_fc1"]["b"]
    w4, b4 = params["decoder_fc2"]["w"], params["decoder_fc2"]["b"]

    H = w1.shape[1]
    n_enc = w2.shape[1]
    assert w1.shape == (n_inp, H)
    assert w2.shape == (H, n_enc)
    assert w3.shape == (n_enc, H)
    assert w4.shape == (H, n_inp)
    assert H % 128 == 0

    # --- Pad feature dims to lane multiples (no-op for already-aligned dims).
    n_inp_p = _round_up(n_inp, 128)
    n_enc_p = _round_up(n_enc, 128)
    if n_inp_p != n_inp:
        x = jnp.pad(x, ((0, 0), (0, n_inp_p - n_inp)))
        w1 = jnp.pad(w1, ((0, n_inp_p - n_inp), (0, 0)))
        w4 = jnp.pad(w4, ((0, 0), (0, n_inp_p - n_inp)))
        b4 = jnp.pad(b4, (0, n_inp_p - n_inp))
    if n_enc_p != n_enc:
        w2 = jnp.pad(w2, ((0, 0), (0, n_enc_p - n_enc)))
        b2 = jnp.pad(b2, (0, n_enc_p - n_enc))
        w3 = jnp.pad(w3, ((0, n_enc_p - n_enc), (0, 0)))

    # --- bf16 weights (both dot operands end up bf16; f32 accumulation).
    w1, w2, w3, w4 = (w.astype(weights_dtype) for w in (w1, w2, w3, w4))
    b1r, b2r, b3r, b4r = (
        b.astype(jnp.float32).reshape(1, -1) for b in (b1, b2, b3, b4)
    )

    # --- Per-generation sizing.
    try:
        vmem_cap = int(pltpu.get_tpu_info().vmem_capacity_bytes)
    except Exception:  # pragma: no cover - conservative default (v7x per-TC)
        vmem_cap = 64 << 20

    if tm is None:
        tm = _pick_tm(M, vmem_cap)
    assert M % tm == 0, (M, tm)
    assert tm == M or tm % 8 == 0, "tm must be 8-aligned or the full batch"
    grid_steps = M // tm

    # Manual decoder-weight DMA only makes sense when the grid has a single
    # step (otherwise BlockSpec residency avoids re-fetching and megacore
    # sharding would break a program_id-gated copy).
    manual = bool(overlap_decoder_dma and grid_steps == 1)

    def resident(shape):
        idx = lambda *_: (0,) * len(shape)
        if single_buffer_weights:
            # Grid-invariant block: single-buffer it to halve resident VMEM.
            return pl.BlockSpec(shape, idx, pipeline_mode=pl.Buffered(1))
        return pl.BlockSpec(shape, idx)

    in_specs = [
        pl.BlockSpec((tm, n_inp_p), lambda i: (i, 0)),           # x tile
        resident(w1.shape), resident(b1r.shape),
        resident(w2.shape), resident(b2r.shape),
        (pl.BlockSpec(memory_space=pl.ANY) if manual else resident(w3.shape)),
        resident(b3r.shape),
        (pl.BlockSpec(memory_space=pl.ANY) if manual else resident(w4.shape)),
        resident(b4r.shape),
    ]
    out_specs = [
        pl.BlockSpec((tm, n_enc_p), lambda i: (i, 0)),           # e
        pl.BlockSpec((tm, n_inp_p), lambda i: (i, 0)),           # d
    ]
    scratch_shapes = ()
    if manual:
        scratch_shapes = (
            pltpu.VMEM(w3.shape, w3.dtype),
            pltpu.VMEM(w4.shape, w4.dtype),
            pltpu.SemaphoreType.DMA((2,)),
        )

    if out_dtype is None:
        out_dtype = x.dtype
    out_itemsize = jnp.dtype(out_dtype).itemsize

    # --- VMEM footprint estimate -> scoped-VMEM limit.
    w_item = jnp.dtype(weights_dtype).itemsize
    wbytes = w_item * (n_inp_p * H + H * n_enc_p + n_enc_p * H + H * n_inp_p)
    bbytes = 4 * (2 * H + n_enc_p + n_inp_p)
    wmult = 1 if single_buffer_weights else 2
    io_bytes = 2 * (4 * tm * n_inp_p + out_itemsize * tm * (n_enc_p + n_inp_p))
    inter_bytes = 4 * tm * (2 * H + n_enc_p)
    vmem_est = wmult * (wbytes + bbytes) + io_bytes + inter_bytes
    vmem_ceiling = (100 << 20) if vmem_cap > (64 << 20) else (56 << 20)
    vmem_limit = int(min(max(vmem_est * 3 // 2, 16 << 20), vmem_ceiling))

    flops = 2 * M * (n_inp_p * H + H * n_enc_p + n_enc_p * H + H * n_inp_p)
    transcendentals = M * (2 * H + n_enc_p + n_inp_p)
    bytes_accessed = (
        4 * M * n_inp_p
        + out_itemsize * M * (n_enc_p + n_inp_p)
        + wbytes + bbytes
    )

    kernel = functools.partial(_fused_ae_kernel, overlap_decoder_dma=manual)

    e, d = pl.pallas_call(
        kernel,
        out_shape=(
            jax.ShapeDtypeStruct((M, n_enc_p), out_dtype),
            jax.ShapeDtypeStruct((M, n_inp_p), out_dtype),
        ),
        grid_spec=pltpu.PrefetchScalarGridSpec(
            num_scalar_prefetch=0,
            grid=(grid_steps,),
            in_specs=in_specs,
            out_specs=out_specs,
            scratch_shapes=scratch_shapes,
        ),
        compiler_params=pltpu.CompilerParams(
            dimension_semantics=("parallel",),
            vmem_limit_bytes=vmem_limit,
        ),
        cost_estimate=pl.CostEstimate(
            flops=int(flops),
            transcendentals=int(transcendentals),
            bytes_accessed=int(bytes_accessed),
        ),
    )(x, w1, b1r, w2, b2r, w3, b3r, w4, b4r)

    if n_enc_p != n_enc:
        e = e[:, :n_enc]
    if n_inp_p != n_inp:
        d = d[:, :n_inp]
    return e, d


@functools.partial(
    jax.jit, static_argnames=("single_buffer_weights", "overlap_decoder_dma")
)
def autoencoder_forward(params, x, *, single_buffer_weights=True,
                        overlap_decoder_dma=True):
    return autoencoder_forward_fused(
        params, x,
        single_buffer_weights=single_buffer_weights,
        overlap_decoder_dma=overlap_decoder_dma,
    )


def init_autoencoder_params(key, n_inp, n_encoded, hidden=HIDDEN):
    """Params matching torch.nn.Linear default init, stored as (in, out)."""
    dims = [
        ("encoder_fc1", n_inp, hidden),
        ("encoder_fc2", hidden, n_encoded),
        ("decoder_fc1", n_encoded, hidden),
        ("decoder_fc2", hidden, n_inp),
    ]
    params = {}
    for name, fan_in, fan_out in dims:
        key, kw, kb = jax.random.split(key, 3)
        bound = 1.0 / jnp.sqrt(jnp.float32(fan_in))
        params[name] = {
            "w": jax.random.uniform(
                kw, (fan_in, fan_out), jnp.float32, -bound, bound
            ),
            "b": jax.random.uniform(kb, (fan_out,), jnp.float32, -bound, bound),
        }
    return params


def _reference_forward(params, x):
    def lin_sig(h, p):
        return jax.nn.sigmoid(h @ p["w"] + p["b"])

    e = lin_sig(lin_sig(x, params["encoder_fc1"]), params["encoder_fc2"])
    d = lin_sig(lin_sig(e, params["decoder_fc1"]), params["decoder_fc2"])
    return e, d


if __name__ == "__main__":
    # Small shapes consistent with the module (hidden layer fixed at 1024).
    n_inp, n_encoded = 256, 128

    key = jax.random.PRNGKey(0)
    key, kx1, kx2 = jax.random.split(key, 3)
    params = init_autoencoder_params(key, n_inp, n_encoded)

    def run(x):
        try:
            out = autoencoder_forward(params, x)
            jax.block_until_ready(out)
        except Exception:
            # Fallback: plain double-buffered BlockSpec residency, no manual DMA
            # (still bf16 MXU + fused layers).
            out = autoencoder_forward(
                params, x, single_buffer_weights=False, overlap_decoder_dma=False
            )
            jax.block_until_ready(out)
        return out

    # grid == 1 path (decoder-weight DMA overlapped with the encoder).
    x_small = jax.random.uniform(kx1, (8, n_inp), jnp.float32)
    e1, d1 = run(x_small)

    # grid > 1 path (batch-tiled, resident weights, megacore-shardable).
    x_big = jax.random.uniform(kx2, (32, n_inp), jnp.float32)
    e2, d2 = run(x_big)

    for x_in, (e, d) in ((x_small, (e1, d1)), (x_big, (e2, d2))):
        e_ref, d_ref = _reference_forward(params, x_in)
        assert e.shape == e_ref.shape and d.shape == d_ref.shape
        # bf16 matmul operands + approx reciprocal -> relaxed tolerance vs f32.
        assert jnp.allclose(e, e_ref, atol=2e-2), "encoded mismatch"
        assert jnp.allclose(d, d_ref, atol=2e-2), "decoded mismatch"

    print("KERNEL_OK")
</pallas_src>

<mosaic_0001>
module attributes {stable_mosaic.version = 11 : i64} {
  func.func @_fused_ae_kernel(%arg0: i32, %arg1: memref<8x256xf32, #tpu.memory_space<vmem>>, %arg2: memref<256x1024xbf16, #tpu.memory_space<vmem>>, %arg3: memref<1x1024xf32, #tpu.memory_space<vmem>>, %arg4: memref<1024x128xbf16, #tpu.memory_space<vmem>>, %arg5: memref<1x128xf32, #tpu.memory_space<vmem>>, %arg6: memref<128x1024xbf16, #tpu.memory_space<any>>, %arg7: memref<1x1024xf32, #tpu.memory_space<vmem>>, %arg8: memref<1024x256xbf16, #tpu.memory_space<any>>, %arg9: memref<1x256xf32, #tpu.memory_space<vmem>>, %arg10: memref<8x128xf32, #tpu.memory_space<vmem>>, %arg11: memref<8x256xf32, #tpu.memory_space<vmem>>, %arg12: memref<128x1024xbf16, #tpu.memory_space<vmem>>, %arg13: memref<1024x256xbf16, #tpu.memory_space<vmem>>, %arg14: memref<2x!tpu.dma_semaphore, #tpu.memory_space<semaphore_mem>>) attributes {dimension_semantics = [#tpu.dimension_semantics<parallel>], iteration_bounds = array<i64: 1>, scalar_prefetch = 0 : i64, scratch_operands = 3 : i64, tpu.core_type = #tpu.core_type<tc>, window_params = [{transform_indices = @transform_0, window_bounds = array<i64: 8, 256>}, {pipeline_mode = #tpu.pipeline_mode<synchronous>, transform_indices = @transform_1, window_bounds = array<i64: 256, 1024>}, {pipeline_mode = #tpu.pipeline_mode<synchronous>, transform_indices = @transform_2, window_bounds = array<i64: 1, 1024>}, {pipeline_mode = #tpu.pipeline_mode<synchronous>, transform_indices = @transform_3, window_bounds = array<i64: 1024, 128>}, {pipeline_mode = #tpu.pipeline_mode<synchronous>, transform_indices = @transform_4, window_bounds = array<i64: 1, 128>}, {}, {pipeline_mode = #tpu.pipeline_mode<synchronous>, transform_indices = @transform_6, window_bounds = array<i64: 1, 1024>}, {}, {pipeline_mode = #tpu.pipeline_mode<synchronous>, transform_indices = @transform_8, window_bounds = array<i64: 1, 256>}, {transform_indices = @transform_9, window_bounds = array<i64: 8, 128>}, {transform_indices = @transform_10, window_bounds = array<i64: 8, 256>}]} {
    %c0_i32 = arith.constant 0 : i32
    %0 = tpu.memref_slice %arg14[%c0_i32] : memref<2x!tpu.dma_semaphore, #tpu.memory_space<semaphore_mem>> -> memref<1x!tpu.dma_semaphore, #tpu.memory_space<semaphore_mem>>
    %1 = tpu.memref_squeeze %0 : memref<1x!tpu.dma_semaphore, #tpu.memory_space<semaphore_mem>> -> memref<!tpu.dma_semaphore, #tpu.memory_space<semaphore_mem>>
    tpu.enqueue_dma source(%arg6 : memref<128x1024xbf16, #tpu.memory_space<any>>) target(%arg12 : memref<128x1024xbf16, #tpu.memory_space<vmem>>) target_semaphore(%1 : memref<!tpu.dma_semaphore, #tpu.memory_space<semaphore_mem>>)
    %c1_i32 = arith.constant 1 : i32
    %2 = tpu.memref_slice %arg14[%c1_i32] : memref<2x!tpu.dma_semaphore, #tpu.memory_space<semaphore_mem>> -> memref<1x!tpu.dma_semaphore, #tpu.memory_space<semaphore_mem>>
    %3 = tpu.memref_squeeze %2 : memref<1x!tpu.dma_semaphore, #tpu.memory_space<semaphore_mem>> -> memref<!tpu.dma_semaphore, #tpu.memory_space<semaphore_mem>>
    tpu.enqueue_dma source(%arg8 : memref<1024x256xbf16, #tpu.memory_space<any>>) target(%arg13 : memref<1024x256xbf16, #tpu.memory_space<vmem>>) target_semaphore(%3 : memref<!tpu.dma_semaphore, #tpu.memory_space<semaphore_mem>>)
    %c0 = arith.constant 0 : index
    %c0_0 = arith.constant 0 : index
    %4 = vector.load %arg1[%c0, %c0_0] : memref<8x256xf32, #tpu.memory_space<vmem>>, vector<8x256xf32>
    %5 = arith.truncf %4 : vector<8x256xf32> to vector<8x256xbf16>
    %c0_1 = arith.constant 0 : index
    %c0_2 = arith.constant 0 : index
    %6 = vector.load %arg2[%c0_1, %c0_2] : memref<256x1024xbf16, #tpu.memory_space<vmem>>, vector<256x1024xbf16>
    %cst = arith.constant dense<0.000000e+00> : vector<8x1024xf32>
    %7 = tpu.matmul %5, %6, %cst {dimension_numbers = #tpu.dot_dimension_numbers<[1], [0], [0], [1], [0, 0, 1, 1], [], []>} : vector<8x256xbf16>, vector<256x1024xbf16>, vector<8x1024xf32> -> vector<8x1024xf32>
    %c0_3 = arith.constant 0 : index
    %c0_4 = arith.constant 0 : index
    %8 = vector.load %arg3[%c0_3, %c0_4] : memref<1x1024xf32, #tpu.memory_space<vmem>>, vector<1x1024xf32>
    %9 = vector.broadcast %8 : vector<1x1024xf32> to vector<8x1024xf32>
    %10 = arith.addf %7, %9 : vector<8x1024xf32>
    %cst_5 = arith.constant 0.000000e+00 : f32
    %11 = vector.broadcast %cst_5 : f32 to vector<8x1024xf32>
    %12 = arith.subf %11, %10 : vector<8x1024xf32>
    %13 = math.exp %12 : vector<8x1024xf32>
    %cst_6 = arith.constant 1.000000e+00 : f32
    %14 = vector.broadcast %cst_6 : f32 to vector<8x1024xf32>
    %15 = arith.addf %14, %13 : vector<8x1024xf32>
    %16 = tpu.reciprocal %15 {approx = true} : vector<8x1024xf32> -> vector<8x1024xf32>
    %17 = arith.truncf %16 : vector<8x1024xf32> to vector<8x1024xbf16>
    %c0_7 = arith.constant 0 : index
    %c0_8 = arith.constant 0 : index
    %18 = vector.load %arg4[%c0_7, %c0_8] : memref<1024x128xbf16, #tpu.memory_space<vmem>>, vector<1024x128xbf16>
    %cst_9 = arith.constant dense<0.000000e+00> : vector<8x128xf32>
    %19 = tpu.matmul %17, %18, %cst_9 {dimension_numbers = #tpu.dot_dimension_numbers<[1], [0], [0], [1], [0, 0, 1, 1], [], []>} : vector<8x1024xbf16>, vector<1024x128xbf16>, vector<8x128xf32> -> vector<8x128xf32>
    %c0_10 = arith.constant 0 : index
    %c0_11 = arith.constant 0 : index
    %20 = vector.load %arg5[%c0_10, %c0_11] : memref<1x128xf32, #tpu.memory_space<vmem>>, vector<1x128xf32>
    %21 = vector.broadcast %20 : vector<1x128xf32> to vector<8x128xf32>
    %22 = arith.addf %19, %21 : vector<8x128xf32>
    %cst_12 = arith.constant 0.000000e+00 : f32
    %23 = vector.broadcast %cst_12 : f32 to vector<8x128xf32>
    %24 = arith.subf %23, %22 : vector<8x128xf32>
    %25 = math.exp %24 : vector<8x128xf32>
    %cst_13 = arith.constant 1.000000e+00 : f32
    %26 = vector.broadcast %cst_13 : f32 to vector<8x128xf32>
    %27 = arith.addf %26, %25 : vector<8x128xf32>
    %28 = tpu.reciprocal %27 {approx = true} : vector<8x128xf32> -> vector<8x128xf32>
    %c0_14 = arith.constant 0 : index
    %c0_15 = arith.constant 0 : index
    %29 = vector.load %arg10[%c0_14, %c0_15] : memref<8x128xf32, #tpu.memory_space<vmem>>, vector<8x128xf32>
    tpu.vector_store %arg10[%c0_14, %c0_15], %28 {strides = array<i32>} : memref<8x128xf32, #tpu.memory_space<vmem>>, vector<8x128xf32>,
    %c0_i32_16 = arith.constant 0 : i32
    %30 = tpu.memref_slice %arg14[%c0_i32_16] : memref<2x!tpu.dma_semaphore, #tpu.memory_space<semaphore_mem>> -> memref<1x!tpu.dma_semaphore, #tpu.memory_space<semaphore_mem>>
    %31 = tpu.memref_squeeze %30 : memref<1x!tpu.dma_semaphore, #tpu.memory_space<semaphore_mem>> -> memref<!tpu.dma_semaphore, #tpu.memory_space<semaphore_mem>>
    tpu.wait_dma2 semaphore(%31 : memref<!tpu.dma_semaphore, #tpu.memory_space<semaphore_mem>>) src(%arg6 : memref<128x1024xbf16, #tpu.memory_space<any>>) dst(%arg12 : memref<128x1024xbf16, #tpu.memory_space<vmem>>)
    %c1_i32_17 = arith.constant 1 : i32
    %32 = tpu.memref_slice %arg14[%c1_i32_17] : memref<2x!tpu.dma_semaphore, #tpu.memory_space<semaphore_mem>> -> memref<1x!tpu.dma_semaphore, #tpu.memory_space<semaphore_mem>>
    %33 = tpu.memref_squeeze %32 : memref<1x!tpu.dma_semaphore, #tpu.memory_space<semaphore_mem>> -> memref<!tpu.dma_semaphore, #tpu.memory_space<semaphore_mem>>
    tpu.wait_dma2 semaphore(%33 : memref<!tpu.dma_semaphore, #tpu.memory_space<semaphore_mem>>) src(%arg8 : memref<1024x256xbf16, #tpu.memory_space<any>>) dst(%arg13 : memref<1024x256xbf16, #tpu.memory_space<vmem>>)
    %c0_18 = arith.constant 0 : index
    %c0_19 = arith.constant 0 : index
    %34 = vector.load %arg12[%c0_18, %c0_19] : memref<128x1024xbf16, #tpu.memory_space<vmem>>, vector<128x1024xbf16>
    %c0_20 = arith.constant 0 : index
    %c0_21 = arith.constant 0 : index
    %35 = vector.load %arg13[%c0_20, %c0_21] : memref<1024x256xbf16, #tpu.memory_space<vmem>>, vector<1024x256xbf16>
    %36 = arith.truncf %28 : vector<8x128xf32> to vector<8x128xbf16>
    %cst_22 = arith.constant dense<0.000000e+00> : vector<8x1024xf32>
    %37 = tpu.matmul %36, %34, %cst_22 {dimension_numbers = #tpu.dot_dimension_numbers<[1], [0], [0], [1], [0, 0, 1, 1], [], []>} : vector<8x128xbf16>, vector<128x1024xbf16>, vector<8x1024xf32> -> vector<8x1024xf32>
    %c0_23 = arith.constant 0 : index
    %c0_24 = arith.constant 0 : index
    %38 = vector.load %arg7[%c0_23, %c0_24] : memref<1x1024xf32, #tpu.memory_space<vmem>>, vector<1x1024xf32>
    %39 = vector.broadcast %38 : vector<1x1024xf32> to vector<8x1024xf32>
    %40 = arith.addf %37, %39 : vector<8x1024xf32>
    %cst_25 = arith.constant 0.000000e+00 : f32
    %41 = vector.broadcast %cst_25 : f32 to vector<8x1024xf32>
    %42 = arith.subf %41, %40 : vector<8x1024xf32>
    %43 = math.exp %42 : vector<8x1024xf32>
    %cst_26 = arith.constant 1.000000e+00 : f32
    %44 = vector.broadcast %cst_26 : f32 to vector<8x1024xf32>
    %45 = arith.addf %44, %43 : vector<8x1024xf32>
    %46 = tpu.reciprocal %45 {approx = true} : vector<8x1024xf32> -> vector<8x1024xf32>
    %47 = arith.truncf %46 : vector<8x1024xf32> to vector<8x1024xbf16>
    %cst_27 = arith.constant dense<0.000000e+00> : vector<8x256xf32>
    %48 = tpu.matmul %47, %35, %cst_27 {dimension_numbers = #tpu.dot_dimension_numbers<[1], [0], [0], [1], [0, 0, 1, 1], [], []>} : vector<8x1024xbf16>, vector<1024x256xbf16>, vector<8x256xf32> -> vector<8x256xf32>
    %c0_28 = arith.constant 0 : index
    %c0_29 = arith.constant 0 : index
    %49 = vector.load %arg9[%c0_28, %c0_29] : memref<1x256xf32, #tpu.memory_space<vmem>>, vector<1x256xf32>
    %50 = vector.broadcast %49 : vector<1x256xf32> to vector<8x256xf32>
    %51 = arith.addf %48, %50 : vector<8x256xf32>
    %cst_30 = arith.constant 0.000000e+00 : f32
    %52 = vector.broadcast %cst_30 : f32 to vector<8x256xf32>
    %53 = arith.subf %52, %51 : vector<8x256xf32>
    %54 = math.exp %53 : vector<8x256xf32>
    %cst_31 = arith.constant 1.000000e+00 : f32
    %55 = vector.broadcast %cst_31 : f32 to vector<8x256xf32>
    %56 = arith.addf %55, %54 : vector<8x256xf32>
    %57 = tpu.reciprocal %56 {approx = true} : vector<8x256xf32> -> vector<8x256xf32>
    %c0_32 = arith.constant 0 : index
    %c0_33 = arith.constant 0 : index
    %58 = vector.load %arg11[%c0_32, %c0_33] : memref<8x256xf32, #tpu.memory_space<vmem>>, vector<8x256xf32>
    tpu.vector_store %arg11[%c0_32, %c0_33], %57 {strides = array<i32>} : memref<8x256xf32, #tpu.memory_space<vmem>>, vector<8x256xf32>,
    return
  }
  func.func @transform_0(%arg0: i32) -> (i32, i32) {
    %c0_i32 = arith.constant 0 : i32
    %c0_i32_0 = arith.constant 0 : i32
    return %arg0, %c0_i32 : i32, i32
  }
  func.func @transform_1(%arg0: i32) -> (i32, i32) {
    %c0_i32 = arith.constant 0 : i32
    %c0_i32_0 = arith.constant 0 : i32
    %c0_i32_1 = arith.constant 0 : i32
    return %c0_i32, %c0_i32_0 : i32, i32
  }
  func.func @transform_2(%arg0: i32) -> (i32, i32) {
    %c0_i32 = arith.constant 0 : i32
    %c0_i32_0 = arith.constant 0 : i32
    %c0_i32_1 = arith.constant 0 : i32
    return %c0_i32, %c0_i32_0 : i32, i32
  }
  func.func @transform_3(%arg0: i32) -> (i32, i32) {
    %c0_i32 = arith.constant 0 : i32
    %c0_i32_0 = arith.constant 0 : i32
    %c0_i32_1 = arith.constant 0 : i32
    return %c0_i32, %c0_i32_0 : i32, i32
  }
  func.func @transform_4(%arg0: i32) -> (i32, i32) {
    %c0_i32 = arith.constant 0 : i32
    %c0_i32_0 = arith.constant 0 : i32
    %c0_i32_1 = arith.constant 0 : i32
    return %c0_i32, %c0_i32_0 : i32, i32
  }
  func.func @transform_6(%arg0: i32) -> (i32, i32) {
    %c0_i32 = arith.constant 0 : i32
    %c0_i32_0 = arith.constant 0 : i32
    %c0_i32_1 = arith.constant 0 : i32
    return %c0_i32, %c0_i32_0 : i32, i32
  }
  func.func @transform_8(%arg0: i32) -> (i32, i32) {
    %c0_i32 = arith.constant 0 : i32
    %c0_i32_0 = arith.constant 0 : i32
    %c0_i32_1 = arith.constant 0 : i32
    return %c0_i32, %c0_i32_0 : i32, i32
  }
  func.func @transform_9(%arg0: i32) -> (i32, i32) {
    %c0_i32 = arith.constant 0 : i32
    %c0_i32_0 = arith.constant 0 : i32
    return %arg0, %c0_i32 : i32, i32
  }
  func.func @transform_10(%arg0: i32) -> (i32, i32) {
    %c0_i32 = arith.constant 0 : i32
    %c0_i32_0 = arith.constant 0 : i32
    return %arg0, %c0_i32 : i32, i32
  }
}

module attributes {stable_mosaic.version = 11 : i64} {
  func.func @_fused_ae_kernel(%arg0: i32, %arg1: memref<8x256xf32, #tpu.memory_space<vmem>>, %arg2: memref<256x1024xbf16, #tpu.memory_space<vmem>>, %arg3: memref<1x1024xf32, #tpu.memory_space<vmem>>, %arg4: memref<1024x128xbf16, #tpu.memory_space<vmem>>, %arg5: memref<1x128xf32, #tpu.memory_space<vmem>>, %arg6: memref<128x1024xbf16, #tpu.memory_space<vmem>>, %arg7: memref<1x1024xf32, #tpu.memory_space<vmem>>, %arg8: memref<1024x256xbf16, #tpu.memory_space<vmem>>, %arg9: memref<1x256xf32, #tpu.memory_space<vmem>>, %arg10: memref<8x128xf32, #tpu.memory_space<vmem>>, %arg11: memref<8x256xf32, #tpu.memory_space<vmem>>) attributes {dimension_semantics = [#tpu.dimension_semantics<parallel>], iteration_bounds = array<i64: 1>, scalar_prefetch = 0 : i64, scratch_operands = 0 : i64, tpu.core_type = #tpu.core_type<tc>, window_params = [{transform_indices = @transform_0, window_bounds = array<i64: 8, 256>}, {pipeline_mode = #tpu.pipeline_mode<synchronous>, transform_indices = @transform_1, window_bounds = array<i64: 256, 1024>}, {pipeline_mode = #tpu.pipeline_mode<synchronous>, transform_indices = @transform_2, window_bounds = array<i64: 1, 1024>}, {pipeline_mode = #tpu.pipeline_mode<synchronous>, transform_indices = @transform_3, window_bounds = array<i64: 1024, 128>}, {pipeline_mode = #tpu.pipeline_mode<synchronous>, transform_indices = @transform_4, window_bounds = array<i64: 1, 128>}, {pipeline_mode = #tpu.pipeline_mode<synchronous>, transform_indices = @transform_5, window_bounds = array<i64: 128, 1024>}, {pipeline_mode = #tpu.pipeline_mode<synchronous>, transform_indices = @transform_6, window_bounds = array<i64: 1, 1024>}, {pipeline_mode = #tpu.pipeline_mode<synchronous>, transform_indices = @transform_7, window_bounds = array<i64: 1024, 256>}, {pipeline_mode = #tpu.pipeline_mode<synchronous>, transform_indices = @transform_8, window_bounds = array<i64: 1, 256>}, {transform_indices = @transform_9, window_bounds = array<i64: 8, 128>}, {transform_indices = @transform_10, window_bounds = array<i64: 8, 256>}]} {
    %c0 = arith.constant 0 : index
    %c0_0 = arith.constant 0 : index
    %0 = vector.load %arg1[%c0, %c0_0] : memref<8x256xf32, #tpu.memory_space<vmem>>, vector<8x256xf32>
    %1 = arith.truncf %0 : vector<8x256xf32> to vector<8x256xbf16>
    %c0_1 = arith.constant 0 : index
    %c0_2 = arith.constant 0 : index
    %2 = vector.load %arg2[%c0_1, %c0_2] : memref<256x1024xbf16, #tpu.memory_space<vmem>>, vector<256x1024xbf16>
    %cst = arith.constant dense<0.000000e+00> : vector<8x1024xf32>
    %3 = tpu.matmul %1, %2, %cst {dimension_numbers = #tpu.dot_dimension_numbers<[1], [0], [0], [1], [0, 0, 1, 1], [], []>} : vector<8x256xbf16>, vector<256x1024xbf16>, vector<8x1024xf32> -> vector<8x1024xf32>
    %c0_3 = arith.constant 0 : index
    %c0_4 = arith.constant 0 : index
    %4 = vector.load %arg3[%c0_3, %c0_4] : memref<1x1024xf32, #tpu.memory_space<vmem>>, vector<1x1024xf32>
    %5 = vector.broadcast %4 : vector<1x1024xf32> to vector<8x1024xf32>
    %6 = arith.addf %3, %5 : vector<8x1024xf32>
    %cst_5 = arith.constant 0.000000e+00 : f32
    %7 = vector.broadcast %cst_5 : f32 to vector<8x1024xf32>
    %8 = arith.subf %7, %6 : vector<8x1024xf32>
    %9 = math.exp %8 : vector<8x1024xf32>
    %cst_6 = arith.constant 1.000000e+00 : f32
    %10 = vector.broadcast %cst_6 : f32 to vector<8x1024xf32>
    %11 = arith.addf %10, %9 : vector<8x1024xf32>
    %12 = tpu.reciprocal %11 {approx = true} : vector<8x1024xf32> -> vector<8x1024xf32>
    %13 = arith.truncf %12 : vector<8x1024xf32> to vector<8x1024xbf16>
    %c0_7 = arith.constant 0 : index
    %c0_8 = arith.constant 0 : index
    %14 = vector.load %arg4[%c0_7, %c0_8] : memref<1024x128xbf16, #tpu.memory_space<vmem>>, vector<1024x128xbf16>
    %cst_9 = arith.constant dense<0.000000e+00> : vector<8x128xf32>
    %15 = tpu.matmul %13, %14, %cst_9 {dimension_numbers = #tpu.dot_dimension_numbers<[1], [0], [0], [1], [0, 0, 1, 1], [], []>} : vector<8x1024xbf16>, vector<1024x128xbf16>, vector<8x128xf32> -> vector<8x128xf32>
    %c0_10 = arith.constant 0 : index
    %c0_11 = arith.constant 0 : index
    %16 = vector.load %arg5[%c0_10, %c0_11] : memref<1x128xf32, #tpu.memory_space<vmem>>, vector<1x128xf32>
    %17 = vector.broadcast %16 : vector<1x128xf32> to vector<8x128xf32>
    %18 = arith.addf %15, %17 : vector<8x128xf32>
    %cst_12 = arith.constant 0.000000e+00 : f32
    %19 = vector.broadcast %cst_12 : f32 to vector<8x128xf32>
    %20 = arith.subf %19, %18 : vector<8x128xf32>
    %21 = math.exp %20 : vector<8x128xf32>
    %cst_13 = arith.constant 1.000000e+00 : f32
    %22 = vector.broadcast %cst_13 : f32 to vector<8x128xf32>
    %23 = arith.addf %22, %21 : vector<8x128xf32>
    %24 = tpu.reciprocal %23 {approx = true} : vector<8x128xf32> -> vector<8x128xf32>
    %c0_14 = arith.constant 0 : index
    %c0_15 = arith.constant 0 : index
    %25 = vector.load %arg10[%c0_14, %c0_15] : memref<8x128xf32, #tpu.memory_space<vmem>>, vector<8x128xf32>
    tpu.vector_store %arg10[%c0_14, %c0_15], %24 {strides = array<i32>} : memref<8x128xf32, #tpu.memory_space<vmem>>, vector<8x128xf32>,
    %c0_16 = arith.constant 0 : index
    %c0_17 = arith.constant 0 : index
    %26 = vector.load %arg6[%c0_16, %c0_17] : memref<128x1024xbf16, #tpu.memory_space<vmem>>, vector<128x1024xbf16>
    %c0_18 = arith.constant 0 : index
    %c0_19 = arith.constant 0 : index
    %27 = vector.load %arg8[%c0_18, %c0_19] : memref<1024x256xbf16, #tpu.memory_space<vmem>>, vector<1024x256xbf16>
    %28 = arith.truncf %24 : vector<8x128xf32> to vector<8x128xbf16>
    %cst_20 = arith.constant dense<0.000000e+00> : vector<8x1024xf32>
    %29 = tpu.matmul %28, %26, %cst_20 {dimension_numbers = #tpu.dot_dimension_numbers<[1], [0], [0], [1], [0, 0, 1, 1], [], []>} : vector<8x128xbf16>, vector<128x1024xbf16>, vector<8x1024xf32> -> vector<8x1024xf32>
    %c0_21 = arith.constant 0 : index
    %c0_22 = arith.constant 0 : index
    %30 = vector.load %arg7[%c0_21, %c0_22] : memref<1x1024xf32, #tpu.memory_space<vmem>>, vector<1x1024xf32>
    %31 = vector.broadcast %30 : vector<1x1024xf32> to vector<8x1024xf32>
    %32 = arith.addf %29, %31 : vector<8x1024xf32>
    %cst_23 = arith.constant 0.000000e+00 : f32
    %33 = vector.broadcast %cst_23 : f32 to vector<8x1024xf32>
    %34 = arith.subf %33, %32 : vector<8x1024xf32>
    %35 = math.exp %34 : vector<8x1024xf32>
    %cst_24 = arith.constant 1.000000e+00 : f32
    %36 = vector.broadcast %cst_24 : f32 to vector<8x1024xf32>
    %37 = arith.addf %36, %35 : vector<8x1024xf32>
    %38 = tpu.reciprocal %37 {approx = true} : vector<8x1024xf32> -> vector<8x1024xf32>
    %39 = arith.truncf %38 : vector<8x1024xf32> to vector<8x1024xbf16>
    %cst_25 = arith.constant dense<0.000000e+00> : vector<8x256xf32>
    %40 = tpu.matmul %39, %27, %cst_25 {dimension_numbers = #tpu.dot_dimension_numbers<[1], [0], [0], [1], [0, 0, 1, 1], [], []>} : vector<8x1024xbf16>, vector<1024x256xbf16>, vector<8x256xf32> -> vector<8x256xf32>
    %c0_26 = arith.constant 0 : index
    %c0_27 = arith.constant 0 : index
    %41 = vector.load %arg9[%c0_26, %c0_27] : memref<1x256xf32, #tpu.memory_space<vmem>>, vector<1x256xf32>
    %42 = vector.broadcast %41 : vector<1x256xf32> to vector<8x256xf32>
    %43 = arith.addf %40, %42 : vector<8x256xf32>
    %cst_28 = arith.constant 0.000000e+00 : f32
    %44 = vector.broadcast %cst_28 : f32 to vector<8x256xf32>
    %45 = arith.subf %44, %43 : vector<8x256xf32>
    %46 = math.exp %45 : vector<8x256xf32>
    %cst_29 = arith.constant 1.000000e+00 : f32
    %47 = vector.broadcast %cst_29 : f32 to vector<8x256xf32>
    %48 = arith.addf %47, %46 : vector<8x256xf32>
    %49 = tpu.reciprocal %48 {approx = true} : vector<8x256xf32> -> vector<8x256xf32>
    %c0_30 = arith.constant 0 : index
    %c0_31 = arith.constant 0 : index
    %50 = vector.load %arg11[%c0_30, %c0_31] : memref<8x256xf32, #tpu.memory_space<vmem>>, vector<8x256xf32>
    tpu.vector_store %arg11[%c0_30, %c0_31], %49 {strides = array<i32>} : memref<8x256xf32, #tpu.memory_space<vmem>>, vector<8x256xf32>,
    return
  }
  func.func @transform_0(%arg0: i32) -> (i32, i32) {
    %c0_i32 = arith.constant 0 : i32
    %c0_i32_0 = arith.constant 0 : i32
    return %arg0, %c0_i32 : i32, i32
  }
  func.func @transform_1(%arg0: i32) -> (i32, i32) {
    %c0_i32 = arith.constant 0 : i32
    %c0_i32_0 = arith.constant 0 : i32
    %c0_i32_1 = arith.constant 0 : i32
    return %c0_i32, %c0_i32_0 : i32, i32
  }
  func.func @transform_2(%arg0: i32) -> (i32, i32) {
    %c0_i32 = arith.constant 0 : i32
    %c0_i32_0 = arith.constant 0 : i32
    %c0_i32_1 = arith.constant 0 : i32
    return %c0_i32, %c0_i32_0 : i32, i32
  }
  func.func @transform_3(%arg0: i32) -> (i32, i32) {
    %c0_i32 = arith.constant 0 : i32
    %c0_i32_0 = arith.constant 0 : i32
    %c0_i32_1 = arith.constant 0 : i32
    return %c0_i32, %c0_i32_0 : i32, i32
  }
  func.func @transform_4(%arg0: i32) -> (i32, i32) {
    %c0_i32 = arith.constant 0 : i32
    %c0_i32_0 = arith.constant 0 : i32
    %c0_i32_1 = arith.constant 0 : i32
    return %c0_i32, %c0_i32_0 : i32, i32
  }
  func.func @transform_5(%arg0: i32) -> (i32, i32) {
    %c0_i32 = arith.constant 0 : i32
    %c0_i32_0 = arith.constant 0 : i32
    %c0_i32_1 = arith.constant 0 : i32
    return %c0_i32, %c0_i32_0 : i32, i32
  }
  func.func @transform_6(%arg0: i32) -> (i32, i32) {
    %c0_i32 = arith.constant 0 : i32
    %c0_i32_0 = arith.constant 0 : i32
    %c0_i32_1 = arith.constant 0 : i32
    return %c0_i32, %c0_i32_0 : i32, i32
  }
  func.func @transform_7(%arg0: i32) -> (i32, i32) {
    %c0_i32 = arith.constant 0 : i32
    %c0_i32_0 = arith.constant 0 : i32
    %c0_i32_1 = arith.constant 0 : i32
    return %c0_i32, %c0_i32_0 : i32, i32
  }
  func.func @transform_8(%arg0: i32) -> (i32, i32) {
    %c0_i32 = arith.constant 0 : i32
    %c0_i32_0 = arith.constant 0 : i32
    %c0_i32_1 = arith.constant 0 : i32
    return %c0_i32, %c0_i32_0 : i32, i32
  }
  func.func @transform_9(%arg0: i32) -> (i32, i32) {
    %c0_i32 = arith.constant 0 : i32
    %c0_i32_0 = arith.constant 0 : i32
    return %arg0, %c0_i32 : i32, i32
  }
  func.func @transform_10(%arg0: i32) -> (i32, i32) {
    %c0_i32 = arith.constant 0 : i32
    %c0_i32_0 = arith.constant 0 : i32
    return %arg0, %c0_i32 : i32, i32
  }
}

</mosaic_0001>

<bundles_post_ra>
// kernel: autoencoder_forward.1
= control target key start
LH: loop header
LB: loop body
LE: loop exit
PB: predicated region body
PF: predicated region fallthrough
CT: control target
= control target key end

     0   :  { %16 = vsyncpa [#allocation6], 0  ;;  %s7492_s0 = inlined_call_operand.vmem [shape: f32[8,256], index: 0, kind: input, shape index: {}]   ;;  %s7493_s1 = inlined_call_operand.vmem [shape: bf16[256,1024], index: 1, kind: input, shape index: {}]   ;;  %s7494_s2 = inlined_call_operand.vmem [shape: f32[1,1024], index: 2, kind: input, shape index: {}]   ;;  %s7495_s3 = inlined_call_operand.vmem [shape: bf16[1024,128], index: 3, kind: input, shape index: {}]   ;;  %s7496_s4 = inlined_call_operand.vmem [shape: f32[1,128], index: 4, kind: input, shape index: {}]   ;;  %s7497_s5 = inlined_call_operand.vmem [shape: bf16[128,1024], index: 5, kind: input, shape index: {}]   ;;  %s7498_s6 = inlined_call_operand.vmem [shape: f32[1,1024], index: 6, kind: input, shape index: {}]   ;;  %s7499_s7 = inlined_call_operand.vmem [shape: bf16[1024,256], index: 7, kind: input, shape index: {}]   ;;  %s7500_s8 = inlined_call_operand.vmem [shape: f32[1,256], index: 8, kind: input, shape index: {}]   ;;  %s7501_s9 = inlined_call_operand.hbm [shape: f32[8,128], index: 9, kind: output, shape index: {0}]   ;;  %s7502_s10 = inlined_call_operand.hbm [shape: f32[8,256], index: 10, kind: output, shape index: {1}]  }
   0x1   :  { %17 = vsyncpa [#allocation8], 0  ;;  %v42_v0 = vld [vmem:[%s7497_s5] sm:$0xff]  ;;  %v44_v1 = vld [vmem:[%s7497_s5 + $0x8] sm:$0xff] }
   0x2   :  { %43 = vst [vmem:[#allocation2] sm:$0xff] %v42_v0  ;;  %v46_v2 = vld [vmem:[%s7497_s5 + $0x10] sm:$0xff]  ;;  %v48_v3 = vld [vmem:[%s7497_s5 + $0x18] sm:$0xff]  ;;  %v50_v4 = vld [vmem:[%s7497_s5 + $0x20] sm:$0xff] }
   0x3   :  { %45 = vst [vmem:[#allocation2 + $0x8] sm:$0xff] %v44_v1  ;;  %v52_v5 = vld [vmem:[%s7497_s5 + $0x28] sm:$0xff]  ;;  %v54_v6 = vld [vmem:[%s7497_s5 + $0x30] sm:$0xff]  ;;  %v56_v7 = vld [vmem:[%s7497_s5 + $0x38] sm:$0xff] }
   0x4   :  { %47 = vst [vmem:[#allocation2 + $0x10] sm:$0xff] %v46_v2  ;;  %v58_v8 = vld [vmem:[%s7497_s5 + $0x40] sm:$0xff]  ;;  %v60_v9 = vld [vmem:[%s7497_s5 + $0x48] sm:$0xff]  ;;  %v62_v10 = vld [vmem:[%s7497_s5 + $0x50] sm:$0xff] }
   0x5   :  { %49 = vst [vmem:[#allocation2 + $0x18] sm:$0xff] %v48_v3  ;;  %v64_v11 = vld [vmem:[%s7497_s5 + $0x58] sm:$0xff]  ;;  %v66_v12 = vld [vmem:[%s7497_s5 + $0x60] sm:$0xff]  ;;  %v68_v13 = vld [vmem:[%s7497_s5 + $0x68] sm:$0xff] }
   0x6   :  { %51 = vst [vmem:[#allocation2 + $0x20] sm:$0xff] %v50_v4  ;;  %v70_v14 = vld [vmem:[%s7497_s5 + $0x70] sm:$0xff]  ;;  %v72_v15 = vld [vmem:[%s7497_s5 + $0x78] sm:$0xff]  ;;  %v74_v16 = vld [vmem:[%s7497_s5 + $0x80] sm:$0xff] }
   0x7   :  { %53 = vst [vmem:[#allocation2 + $0x28] sm:$0xff] %v52_v5  ;;  %v76_v17 = vld [vmem:[%s7497_s5 + $0x88] sm:$0xff]  ;;  %v78_v18 = vld [vmem:[%s7497_s5 + $0x90] sm:$0xff]  ;;  %v80_v19 = vld [vmem:[%s7497_s5 + $0x98] sm:$0xff] }
   0x8   :  { %55 = vst [vmem:[#allocation2 + $0x30] sm:$0xff] %v54_v6  ;;  %v82_v20 = vld [vmem:[%s7497_s5 + $0xa0] sm:$0xff]  ;;  %v84_v21 = vld [vmem:[%s7497_s5 + $0xa8] sm:$0xff]  ;;  %v86_v22 = vld [vmem:[%s7497_s5 + $0xb0] sm:$0xff] }
   0x9   :  { %57 = vst [vmem:[#allocation2 + $0x38] sm:$0xff] %v56_v7  ;;  %v88_v23 = vld [vmem:[%s7497_s5 + $0xb8] sm:$0xff]  ;;  %v90_v24 = vld [vmem:[%s7497_s5 + $0xc0] sm:$0xff]  ;;  %v92_v25 = vld [vmem:[%s7497_s5 + $0xc8] sm:$0xff] }
   0xa   :  { %59 = vst [vmem:[#allocation2 + $0x40] sm:$0xff] %v58_v8  ;;  %v94_v26 = vld [vmem:[%s7497_s5 + $0xd0] sm:$0xff]  ;;  %v96_v27 = vld [vmem:[%s7497_s5 + $0xd8] sm:$0xff]  ;;  %v98_v28 = vld [vmem:[%s7497_s5 + $0xe0] sm:$0xff] }
   0xb   :  { %61 = vst [vmem:[#allocation2 + $0x48] sm:$0xff] %v60_v9  ;;  %v100_v29 = vld [vmem:[%s7497_s5 + $0xe8] sm:$0xff]  ;;  %v102_v30 = vld [vmem:[%s7497_s5 + $0xf0] sm:$0xff]  ;;  %v104_v31 = vld [vmem:[%s7497_s5 + $0xf8] sm:$0xff] }
   0xc   :  { %63 = vst [vmem:[#allocation2 + $0x50] sm:$0xff] %v62_v10  ;;  %v106_v32 = vld [vmem:[%s7497_s5 + $0x100] sm:$0xff]  ;;  %v108_v33 = vld [vmem:[%s7497_s5 + $0x108] sm:$0xff]  ;;  %v110_v34 = vld [vmem:[%s7497_s5 + $0x110] sm:$0xff] }
   0xd   :  { %65 = vst [vmem:[#allocation2 + $0x58] sm:$0xff] %v64_v11  ;;  %v112_v35 = vld [vmem:[%s7497_s5 + $0x118] sm:$0xff]  ;;  %v114_v36 = vld [vmem:[%s7497_s5 + $0x120] sm:$0xff]  ;;  %v116_v37 = vld [vmem:[%s7497_s5 + $0x128] sm:$0xff] }
   0xe   :  { %67 = vst [vmem:[#allocation2 + $0x60] sm:$0xff] %v66_v12  ;;  %v118_v38 = vld [vmem:[%s7497_s5 + $0x130] sm:$0xff]  ;;  %v120_v39 = vld [vmem:[%s7497_s5 + $0x138] sm:$0xff]  ;;  %v122_v40 = vld [vmem:[%s7497_s5 + $0x140] sm:$0xff] }
   0xf   :  { %69 = vst [vmem:[#allocation2 + $0x68] sm:$0xff] %v68_v13  ;;  %v124_v41 = vld [vmem:[%s7497_s5 + $0x148] sm:$0xff]  ;;  %v126_v42 = vld [vmem:[%s7497_s5 + $0x150] sm:$0xff]  ;;  %v128_v43 = vld [vmem:[%s7497_s5 + $0x158] sm:$0xff] }
  0x10   :  { %71 = vst [vmem:[#allocation2 + $0x70] sm:$0xff] %v70_v14  ;;  %v130_v44 = vld [vmem:[%s7497_s5 + $0x160] sm:$0xff]  ;;  %v132_v45 = vld [vmem:[%s7497_s5 + $0x168] sm:$0xff]  ;;  %v134_v46 = vld [vmem:[%s7497_s5 + $0x170] sm:$0xff] }
  0x11   :  { %73 = vst [vmem:[#allocation2 + $0x78] sm:$0xff] %v72_v15  ;;  %v136_v47 = vld [vmem:[%s7497_s5 + $0x178] sm:$0xff]  ;;  %v138_v48 = vld [vmem:[%s7497_s5 + $0x180] sm:$0xff]  ;;  %v140_v49 = vld [vmem:[%s7497_s5 + $0x188] sm:$0xff] }
  0x12   :  { %75 = vst [vmem:[#allocation2 + $0x80] sm:$0xff] %v74_v16  ;;  %v142_v50 = vld [vmem:[%s7497_s5 + $0x190] sm:$0xff]  ;;  %v144_v51 = vld [vmem:[%s7497_s5 + $0x198] sm:$0xff]  ;;  %v146_v52 = vld [vmem:[%s7497_s5 + $0x1a0] sm:$0xff] }
  0x13   :  { %77 = vst [vmem:[#allocation2 + $0x88] sm:$0xff] %v76_v17  ;;  %v148_v53 = vld [vmem:[%s7497_s5 + $0x1a8] sm:$0xff]  ;;  %v150_v54 = vld [vmem:[%s7497_s5 + $0x1b0] sm:$0xff]  ;;  %v152_v55 = vld [vmem:[%s7497_s5 + $0x1b8] sm:$0xff] }
  0x14   :  { %79 = vst [vmem:[#allocation2 + $0x90] sm:$0xff] %v78_v18  ;;  %v154_v56 = vld [vmem:[%s7497_s5 + $0x1c0] sm:$0xff]  ;;  %v156_v57 = vld [vmem:[%s7497_s5 + $0x1c8] sm:$0xff]  ;;  %v158_v58 = vld [vmem:[%s7497_s5 + $0x1d0] sm:$0xff] }
  0x15   :  { %81 = vst [vmem:[#allocation2 + $0x98] sm:$0xff] %v80_v19  ;;  %v160_v59 = vld [vmem:[%s7497_s5 + $0x1d8] sm:$0xff]  ;;  %v162_v60 = vld [vmem:[%s7497_s5 + $0x1e0] sm:$0xff]  ;;  %v164_v61 = vld [vmem:[%s7497_s5 + $0x1e8] sm:$0xff] }
  0x16   :  { %83 = vst [vmem:[#allocation2 + $0xa0] sm:$0xff] %v82_v20  ;;  %v166_v62 = vld [vmem:[%s7497_s5 + $0x1f0] sm:$0xff]  ;;  %v168_v63 = vld [vmem:[%s7497_s5 + $0x1f8] sm:$0xff] }
  0x17   :  { %85 = vst [vmem:[#allocation2 + $0xa8] sm:$0xff] %v84_v21 }
  0x18   :  { %87 = vst [vmem:[#allocation2 + $0xb0] sm:$0xff] %v86_v22 }
  0x19   :  { %89 = vst [vmem:[#allocation2 + $0xb8] sm:$0xff] %v88_v23 }
  0x1a   :  { %91 = vst [vmem:[#allocation2 + $0xc0] sm:$0xff] %v90_v24 }
  0x1b   :  { %93 = vst [vmem:[#allocation2 + $0xc8] sm:$0xff] %v92_v25 }
  0x1c   :  { %95 = vst [vmem:[#allocation2 + $0xd0] sm:$0xff] %v94_v26 }
  0x1d   :  { %97 = vst [vmem:[#allocation2 + $0xd8] sm:$0xff] %v96_v27 }
  0x1e   :  { %99 = vst [vmem:[#allocation2 + $0xe0] sm:$0xff] %v98_v28 }
  0x1f   :  { %101 = vst [vmem:[#allocation2 + $0xe8] sm:$0xff] %v100_v29 }
  0x20   :  { %103 = vst [vmem:[#allocation2 + $0xf0] sm:$0xff] %v102_v30 }
  0x21   :  { %105 = vst [vmem:[#allocation2 + $0xf8] sm:$0xff] %v104_v31 }
  0x22   :  { %107 = vst [vmem:[#allocation2 + $0x100] sm:$0xff] %v106_v32 }
  0x23   :  { %109 = vst [vmem:[#allocation2 + $0x108] sm:$0xff] %v108_v33 }
  0x24   :  { %111 = vst [vmem:[#allocation2 + $0x110] sm:$0xff] %v110_v34 }
  0x25   :  { %113 = vst [vmem:[#allocation2 + $0x118] sm:$0xff] %v112_v35 }
  0x26   :  { %115 = vst [vmem:[#allocation2 + $0x120] sm:$0xff] %v114_v36 }
  0x27   :  { %117 = vst [vmem:[#allocation2 + $0x128] sm:$0xff] %v116_v37 }
  0x28   :  { %119 = vst [vmem:[#allocation2 + $0x130] sm:$0xff] %v118_v38 }
  0x29   :  { %121 = vst [vmem:[#allocation2 + $0x138] sm:$0xff] %v120_v39 }
  0x2a   :  { %123 = vst [vmem:[#allocation2 + $0x140] sm:$0xff] %v122_v40 }
  0x2b   :  { %125 = vst [vmem:[#allocation2 + $0x148] sm:$0xff] %v124_v41 }
  0x2c   :  { %127 = vst [vmem:[#allocation2 + $0x150] sm:$0xff] %v126_v42 }
  0x2d   :  { %129 = vst [vmem:[#allocation2 + $0x158] sm:$0xff] %v128_v43 }
  0x2e   :  { %131 = vst [vmem:[#allocation2 + $0x160] sm:$0xff] %v130_v44 }
  0x2f   :  { %133 = vst [vmem:[#allocation2 + $0x168] sm:$0xff] %v132_v45 }
  0x30   :  { %135 = vst [vmem:[#allocation2 + $0x170] sm:$0xff] %v134_v46 }
  0x31   :  { %137 = vst [vmem:[#allocation2 + $0x178] sm:$0xff] %v136_v47 }
  0x32   :  { %139 = vst [vmem:[#allocation2 + $0x180] sm:$0xff] %v138_v48 }
  0x33   :  { %141 = vst [vmem:[#allocation2 + $0x188] sm:$0xff] %v140_v49 }
  0x34   :  { %143 = vst [vmem:[#allocation2 + $0x190] sm:$0xff] %v142_v50 }
  0x35   :  { %145 = vst [vmem:[#allocation2 + $0x198] sm:$0xff] %v144_v51 }
  0x36   :  { %147 = vst [vmem:[#allocation2 + $0x1a0] sm:$0xff] %v146_v52 }
  0x37   :  { %149 = vst [vmem:[#allocation2 + $0x1a8] sm:$0xff] %v148_v53 }
  0x38   :  { %151 = vst [vmem:[#allocation2 + $0x1b0] sm:$0xff] %v150_v54 }
  0x39   :  { %153 = vst [vmem:[#allocation2 + $0x1b8] sm:$0xff] %v152_v55 }
  0x3a   :  { %155 = vst [vmem:[#allocation2 + $0x1c0] sm:$0xff] %v154_v56 }
  0x3b   :  { %157 = vst [vmem:[#allocation2 + $0x1c8] sm:$0xff] %v156_v57 }
  0x3c   :  { %159 = vst [vmem:[#allocation2 + $0x1d0] sm:$0xff] %v158_v58 }
  0x3d   :  { %161 = vst [vmem:[#allocation2 + $0x1d8] sm:$0xff] %v160_v59 }
  0x3e   :  { %163 = vst [vmem:[#allocation2 + $0x1e0] sm:$0xff] %v162_v60 }
  0x3f   :  { %165 = vst [vmem:[#allocation2 + $0x1e8] sm:$0xff] %v164_v61 }
  0x40   :  { %167 = vst [vmem:[#allocation2 + $0x1f0] sm:$0xff] %v166_v62 }
  0x41   :  { %169 = vst [vmem:[#allocation2 + $0x1f8] sm:$0xff] %v168_v63 }
  0x42   :  { %175 = vsyncadd [#allocation4], 8192  ;;  %v187_v0 = vld [vmem:[%s7499_s7] sm:$0xff]  ;;  %v189_v1 = vld [vmem:[%s7499_s7 + $0x8] sm:$0xff] }
  0x43   :  { %188 = vst [vmem:[#allocation3] sm:$0xff] %v187_v0  ;;  %v191_v2 = vld [vmem:[%s7499_s7 + $0x10] sm:$0xff]  ;;  %v193_v3 = vld [vmem:[%s7499_s7 + $0x18] sm:$0xff]  ;;  %v195_v4 = vld [vmem:[%s7499_s7 + $0x20] sm:$0xff] }
  0x44   :  { %190 = vst [vmem:[#allocation3 + $0x8] sm:$0xff] %v189_v1  ;;  %v197_v5 = vld [vmem:[%s7499_s7 + $0x28] sm:$0xff]  ;;  %v199_v6 = vld [vmem:[%s7499_s7 + $0x30] sm:$0xff]  ;;  %v201_v7 = vld [vmem:[%s7499_s7 + $0x38] sm:$0xff] }
  0x45   :  { %192 = vst [vmem:[#allocation3 + $0x10] sm:$0xff] %v191_v2  ;;  %v203_v8 = vld [vmem:[%s7499_s7 + $0x40] sm:$0xff]  ;;  %v205_v9 = vld [vmem:[%s7499_s7 + $0x48] sm:$0xff]  ;;  %v207_v10 = vld [vmem:[%s7499_s7 + $0x50] sm:$0xff] }
  0x46   :  { %194 = vst [vmem:[#allocation3 + $0x18] sm:$0xff] %v193_v3  ;;  %v209_v11 = vld [vmem:[%s7499_s7 + $0x58] sm:$0xff]  ;;  %v211_v12 = vld [vmem:[%s7499_s7 + $0x60] sm:$0xff]  ;;  %v213_v13 = vld [vmem:[%s7499_s7 + $0x68] sm:$0xff] }
  0x47   :  { %196 = vst [vmem:[#allocation3 + $0x20] sm:$0xff] %v195_v4  ;;  %v215_v14 = vld [vmem:[%s7499_s7 + $0x70] sm:$0xff]  ;;  %v217_v15 = vld [vmem:[%s7499_s7 + $0x78] sm:$0xff]  ;;  %v219_v16 = vld [vmem:[%s7499_s7 + $0x80] sm:$0xff] }
  0x48   :  { %198 = vst [vmem:[#allocation3 + $0x28] sm:$0xff] %v197_v5  ;;  %v221_v17 = vld [vmem:[%s7499_s7 + $0x88] sm:$0xff]  ;;  %v223_v18 = vld [vmem:[%s7499_s7 + $0x90] sm:$0xff]  ;;  %v225_v19 = vld [vmem:[%s7499_s7 + $0x98] sm:$0xff] }
  0x49   :  { %200 = vst [vmem:[#allocation3 + $0x30] sm:$0xff] %v199_v6  ;;  %v227_v20 = vld [vmem:[%s7499_s7 + $0xa0] sm:$0xff]  ;;  %v229_v21 = vld [vmem:[%s7499_s7 + $0xa8] sm:$0xff]  ;;  %v231_v22 = vld [vmem:[%s7499_s7 + $0xb0] sm:$0xff] }
  0x4a   :  { %202 = vst [vmem:[#allocation3 + $0x38] sm:$0xff] %v201_v7  ;;  %v233_v23 = vld [vmem:[%s7499_s7 + $0xb8] sm:$0xff]  ;;  %v235_v24 = vld [vmem:[%s7499_s7 + $0xc0] sm:$0xff]  ;;  %v237_v25 = vld [vmem:[%s7499_s7 + $0xc8] sm:$0xff] }
  0x4b   :  { %204 = vst [vmem:[#allocation3 + $0x40] sm:$0xff] %v203_v8  ;;  %v239_v26 = vld [vmem:[%s7499_s7 + $0xd0] sm:$0xff]  ;;  %v241_v27 = vld [vmem:[%s7499_s7 + $0xd8] sm:$0xff]  ;;  %v243_v28 = vld [vmem:[%s7499_s7 + $0xe0] sm:$0xff] }
  0x4c   :  { %206 = vst [vmem:[#allocation3 + $0x48] sm:$0xff] %v205_v9  ;;  %v245_v29 = vld [vmem:[%s7499_s7 + $0xe8] sm:$0xff]  ;;  %v247_v30 = vld [vmem:[%s7499_s7 + $0xf0] sm:$0xff]  ;;  %v249_v31 = vld [vmem:[%s7499_s7 + $0xf8] sm:$0xff] }
  0x4d   :  { %208 = vst [vmem:[#allocation3 + $0x50] sm:$0xff] %v207_v10  ;;  %v251_v32 = vld [vmem:[%s7499_s7 + $0x100] sm:$0xff]  ;;  %v253_v33 = vld [vmem:[%s7499_s7 + $0x108] sm:$0xff]  ;;  %v255_v34 = vld [vmem:[%s7499_s7 + $0x110] sm:$0xff] }
  0x4e   :  { %210 = vst [vmem:[#allocation3 + $0x58] sm:$0xff] %v209_v11  ;;  %v257_v35 = vld [vmem:[%s7499_s7 + $0x118] sm:$0xff]  ;;  %v259_v36 = vld [vmem:[%s7499_s7 + $0x120] sm:$0xff]  ;;  %v261_v37 = vld [vmem:[%s7499_s7 + $0x128] sm:$0xff] }
  0x4f   :  { %212 = vst [vmem:[#allocation3 + $0x60] sm:$0xff] %v211_v12  ;;  %v263_v38 = vld [vmem:[%s7499_s7 + $0x130] sm:$0xff]  ;;  %v265_v39 = vld [vmem:[%s7499_s7 + $0x138] sm:$0xff]  ;;  %v267_v40 = vld [vmem:[%s7499_s7 + $0x140] sm:$0xff] }
  0x50   :  { %214 = vst [vmem:[#allocation3 + $0x68] sm:$0xff] %v213_v13  ;;  %v269_v41 = vld [vmem:[%s7499_s7 + $0x148] sm:$0xff]  ;;  %v271_v42 = vld [vmem:[%s7499_s7 + $0x150] sm:$0xff]  ;;  %v273_v43 = vld [vmem:[%s7499_s7 + $0x158] sm:$0xff] }
  0x51   :  { %216 = vst [vmem:[#allocation3 + $0x70] sm:$0xff] %v215_v14  ;;  %v275_v44 = vld [vmem:[%s7499_s7 + $0x160] sm:$0xff]  ;;  %v277_v45 = vld [vmem:[%s7499_s7 + $0x168] sm:$0xff]  ;;  %v279_v46 = vld [vmem:[%s7499_s7 + $0x170] sm:$0xff] }
  0x52   :  { %218 = vst [vmem:[#allocation3 + $0x78] sm:$0xff] %v217_v15  ;;  %v281_v47 = vld [vmem:[%s7499_s7 + $0x178] sm:$0xff]  ;;  %v283_v48 = vld [vmem:[%s7499_s7 + $0x180] sm:$0xff]  ;;  %v285_v49 = vld [vmem:[%s7499_s7 + $0x188] sm:$0xff] }
  0x53   :  { %220 = vst [vmem:[#allocation3 + $0x80] sm:$0xff] %v219_v16  ;;  %v287_v50 = vld [vmem:[%s7499_s7 + $0x190] sm:$0xff]  ;;  %v289_v51 = vld [vmem:[%s7499_s7 + $0x198] sm:$0xff]  ;;  %v291_v52 = vld [vmem:[%s7499_s7 + $0x1a0] sm:$0xff] }
  0x54   :  { %222 = vst [vmem:[#allocation3 + $0x88] sm:$0xff] %v221_v17  ;;  %v293_v53 = vld [vmem:[%s7499_s7 + $0x1a8] sm:$0xff]  ;;  %v295_v54 = vld [vmem:[%s7499_s7 + $0x1b0] sm:$0xff]  ;;  %v297_v55 = vld [vmem:[%s7499_s7 + $0x1b8] sm:$0xff] }
  0x55   :  { %224 = vst [vmem:[#allocation3 + $0x90] sm:$0xff] %v223_v18  ;;  %v299_v56 = vld [vmem:[%s7499_s7 + $0x1c0] sm:$0xff]  ;;  %v301_v57 = vld [vmem:[%s7499_s7 + $0x1c8] sm:$0xff]  ;;  %v303_v58 = vld [vmem:[%s7499_s7 + $0x1d0] sm:$0xff] }
  0x56   :  { %226 = vst [vmem:[#allocation3 + $0x98] sm:$0xff] %v225_v19  ;;  %v305_v59 = vld [vmem:[%s7499_s7 + $0x1d8] sm:$0xff]  ;;  %v307_v60 = vld [vmem:[%s7499_s7 + $0x1e0] sm:$0xff]  ;;  %v309_v61 = vld [vmem:[%s7499_s7 + $0x1e8] sm:$0xff] }
  0x57   :  { %228 = vst [vmem:[#allocation3 + $0xa0] sm:$0xff] %v227_v20  ;;  %v311_v62 = vld [vmem:[%s7499_s7 + $0x1f0] sm:$0xff]  ;;  %v313_v63 = vld [vmem:[%s7499_s7 + $0x1f8] sm:$0xff]  ;;  %v315_v0 = vld [vmem:[%s7499_s7 + $0x200] sm:$0xff] }
  0x58   :  { %230 = vst [vmem:[#allocation3 + $0xa8] sm:$0xff] %v229_v21  ;;  %v317_v1 = vld [vmem:[%s7499_s7 + $0x208] sm:$0xff]  ;;  %v319_v2 = vld [vmem:[%s7499_s7 + $0x210] sm:$0xff]  ;;  %v321_v3 = vld [vmem:[%s7499_s7 + $0x218] sm:$0xff] }
  0x59   :  { %232 = vst [vmem:[#allocation3 + $0xb0] sm:$0xff] %v231_v22  ;;  %v323_v4 = vld [vmem:[%s7499_s7 + $0x220] sm:$0xff]  ;;  %v325_v5 = vld [vmem:[%s7499_s7 + $0x228] sm:$0xff]  ;;  %v327_v6 = vld [vmem:[%s7499_s7 + $0x230] sm:$0xff] }
  0x5a   :  { %234 = vst [vmem:[#allocation3 + $0xb8] sm:$0xff] %v233_v23  ;;  %v329_v7 = vld [vmem:[%s7499_s7 + $0x238] sm:$0xff]  ;;  %v331_v8 = vld [vmem:[%s7499_s7 + $0x240] sm:$0xff]  ;;  %v333_v9 = vld [vmem:[%s7499_s7 + $0x248] sm:$0xff] }
  0x5b   :  { %236 = vst [vmem:[#allocation3 + $0xc0] sm:$0xff] %v235_v24  ;;  %v335_v10 = vld [vmem:[%s7499_s7 + $0x250] sm:$0xff]  ;;  %v337_v11 = vld [vmem:[%s7499_s7 + $0x258] sm:$0xff]  ;;  %v339_v12 = vld [vmem:[%s7499_s7 + $0x260] sm:$0xff] }
  0x5c   :  { %238 = vst [vmem:[#allocation3 + $0xc8] sm:$0xff] %v237_v25  ;;  %v341_v13 = vld [vmem:[%s7499_s7 + $0x268] sm:$0xff]  ;;  %v343_v14 = vld [vmem:[%s7499_s7 + $0x270] sm:$0xff]  ;;  %v345_v15 = vld [vmem:[%s7499_s7 + $0x278] sm:$0xff] }
  0x5d   :  { %240 = vst [vmem:[#allocation3 + $0xd0] sm:$0xff] %v239_v26  ;;  %v347_v16 = vld [vmem:[%s7499_s7 + $0x280] sm:$0xff]  ;;  %v349_v17 = vld [vmem:[%s7499_s7 + $0x288] sm:$0xff]  ;;  %v351_v18 = vld [vmem:[%s7499_s7 + $0x290] sm:$0xff] }
  0x5e   :  { %242 = vst [vmem:[#allocation3 + $0xd8] sm:$0xff] %v241_v27  ;;  %v353_v19 = vld [vmem:[%s7499_s7 + $0x298] sm:$0xff]  ;;  %v355_v20 = vld [vmem:[%s7499_s7 + $0x2a0] sm:$0xff]  ;;  %v357_v21 = vld [vmem:[%s7499_s7 + $0x2a8] sm:$0xff] }
  0x5f   :  { %244 = vst [vmem:[#allocation3 + $0xe0] sm:$0xff] %v243_v28  ;;  %v359_v22 = vld [vmem:[%s7499_s7 + $0x2b0] sm:$0xff]  ;;  %v361_v23 = vld [vmem:[%s7499_s7 + $0x2b8] sm:$0xff]  ;;  %v363_v24 = vld [vmem:[%s7499_s7 + $0x2c0] sm:$0xff] }
  0x60   :  { %246 = vst [vmem:[#allocation3 + $0xe8] sm:$0xff] %v245_v29  ;;  %v365_v25 = vld [vmem:[%s7499_s7 + $0x2c8] sm:$0xff]  ;;  %v367_v26 = vld [vmem:[%s7499_s7 + $0x2d0] sm:$0xff]  ;;  %v369_v27 = vld [vmem:[%s7499_s7 + $0x2d8] sm:$0xff] }
  0x61   :  { %248 = vst [vmem:[#allocation3 + $0xf0] sm:$0xff] %v247_v30  ;;  %v371_v28 = vld [vmem:[%s7499_s7 + $0x2e0] sm:$0xff]  ;;  %v373_v29 = vld [vmem:[%s7499_s7 + $0x2e8] sm:$0xff]  ;;  %v375_v30 = vld [vmem:[%s7499_s7 + $0x2f0] sm:$0xff] }
  0x62   :  { %250 = vst [vmem:[#allocation3 + $0xf8] sm:$0xff] %v249_v31  ;;  %v377_v31 = vld [vmem:[%s7499_s7 + $0x2f8] sm:$0xff] }
  0x63   :  { %252 = vst [vmem:[#allocation3 + $0x100] sm:$0xff] %v251_v32  ;;  %v379_v32 = vld [vmem:[%s7499_s7 + $0x300] sm:$0xff] }
  0x64   :  { %254 = vst [vmem:[#allocation3 + $0x108] sm:$0xff] %v253_v33  ;;  %v381_v33 = vld [vmem:[%s7499_s7 + $0x308] sm:$0xff] }
  0x65   :  { %256 = vst [vmem:[#allocation3 + $0x110] sm:$0xff] %v255_v34  ;;  %v383_v34 = vld [vmem:[%s7499_s7 + $0x310] sm:$0xff] }
  0x66   :  { %258 = vst [vmem:[#allocation3 + $0x118] sm:$0xff] %v257_v35  ;;  %v385_v35 = vld [vmem:[%s7499_s7 + $0x318] sm:$0xff] }
  0x67   :  { %260 = vst [vmem:[#allocation3 + $0x120] sm:$0xff] %v259_v36  ;;  %v387_v36 = vld [vmem:[%s7499_s7 + $0x320] sm:$0xff] }
  0x68   :  { %262 = vst [vmem:[#allocation3 + $0x128] sm:$0xff] %v261_v37  ;;  %v389_v37 = vld [vmem:[%s7499_s7 + $0x328] sm:$0xff] }
  0x69   :  { %264 = vst [vmem:[#allocation3 + $0x130] sm:$0xff] %v263_v38  ;;  %v391_v38 = vld [vmem:[%s7499_s7 + $0x330] sm:$0xff] }
  0x6a   :  { %266 = vst [vmem:[#allocation3 + $0x138] sm:$0xff] %v265_v39  ;;  %v393_v39 = vld [vmem:[%s7499_s7 + $0x338] sm:$0xff] }
  0x6b   :  { %268 = vst [vmem:[#allocation3 + $0x140] sm:$0xff] %v267_v40  ;;  %v395_v40 = vld [vmem:[%s7499_s7 + $0x340] sm:$0xff] }
  0x6c   :  { %270 = vst [vmem:[#allocation3 + $0x148] sm:$0xff] %v269_v41  ;;  %v397_v41 = vld [vmem:[%s7499_s7 + $0x348] sm:$0xff] }
  0x6d   :  { %272 = vst [vmem:[#allocation3 + $0x150] sm:$0xff] %v271_v42  ;;  %v399_v42 = vld [vmem:[%s7499_s7 + $0x350] sm:$0xff] }
  0x6e   :  { %274 = vst [vmem:[#allocation3 + $0x158] sm:$0xff] %v273_v43  ;;  %v401_v43 = vld [vmem:[%s7499_s7 + $0x358] sm:$0xff] }
  0x6f   :  { %276 = vst [vmem:[#allocation3 + $0x160] sm:$0xff] %v275_v44  ;;  %v403_v44 = vld [vmem:[%s7499_s7 + $0x360] sm:$0xff] }
  0x70   :  { %278 = vst [vmem:[#allocation3 + $0x168] sm:$0xff] %v277_v45  ;;  %v405_v45 = vld [vmem:[%s7499_s7 + $0x368] sm:$0xff] }
  0x71   :  { %280 = vst [vmem:[#allocation3 + $0x170] sm:$0xff] %v279_v46  ;;  %v407_v46 = vld [vmem:[%s7499_s7 + $0x370] sm:$0xff] }
  0x72   :  { %282 = vst [vmem:[#allocation3 + $0x178] sm:$0xff] %v281_v47  ;;  %v409_v47 = vld [vmem:[%s7499_s7 + $0x378] sm:$0xff] }
  0x73   :  { %284 = vst [vmem:[#allocation3 + $0x180] sm:$0xff] %v283_v48  ;;  %v411_v48 = vld [vmem:[%s7499_s7 + $0x380] sm:$0xff] }
  0x74   :  { %286 = vst [vmem:[#allocation3 + $0x188] sm:$0xff] %v285_v49  ;;  %v413_v49 = vld [vmem:[%s7499_s7 + $0x388] sm:$0xff] }
  0x75   :  { %288 = vst [vmem:[#allocation3 + $0x190] sm:$0xff] %v287_v50  ;;  %v415_v50 = vld [vmem:[%s7499_s7 + $0x390] sm:$0xff] }
  0x76   :  { %290 = vst [vmem:[#allocation3 + $0x198] sm:$0xff] %v289_v51  ;;  %v417_v51 = vld [vmem:[%s7499_s7 + $0x398] sm:$0xff] }
  0x77   :  { %292 = vst [vmem:[#allocation3 + $0x1a0] sm:$0xff] %v291_v52  ;;  %v419_v52 = vld [vmem:[%s7499_s7 + $0x3a0] sm:$0xff] }
  0x78   :  { %294 = vst [vmem:[#allocation3 + $0x1a8] sm:$0xff] %v293_v53  ;;  %v421_v53 = vld [vmem:[%s7499_s7 + $0x3a8] sm:$0xff] }
  0x79   :  { %296 = vst [vmem:[#allocation3 + $0x1b0] sm:$0xff] %v295_v54  ;;  %v423_v54 = vld [vmem:[%s7499_s7 + $0x3b0] sm:$0xff] }
  0x7a   :  { %298 = vst [vmem:[#allocation3 + $0x1b8] sm:$0xff] %v297_v55  ;;  %v425_v55 = vld [vmem:[%s7499_s7 + $0x3b8] sm:$0xff] }
  0x7b   :  { %300 = vst [vmem:[#allocation3 + $0x1c0] sm:$0xff] %v299_v56  ;;  %v427_v56 = vld [vmem:[%s7499_s7 + $0x3c0] sm:$0xff] }
  0x7c   :  { %302 = vst [vmem:[#allocation3 + $0x1c8] sm:$0xff] %v301_v57  ;;  %v429_v57 = vld [vmem:[%s7499_s7 + $0x3c8] sm:$0xff] }
  0x7d   :  { %304 = vst [vmem:[#allocation3 + $0x1d0] sm:$0xff] %v303_v58  ;;  %v431_v58 = vld [vmem:[%s7499_s7 + $0x3d0] sm:$0xff] }
  0x7e   :  { %306 = vst [vmem:[#allocation3 + $0x1d8] sm:$0xff] %v305_v59  ;;  %v433_v59 = vld [vmem:[%s7499_s7 + $0x3d8] sm:$0xff] }
  0x7f   :  { %308 = vst [vmem:[#allocation3 + $0x1e0] sm:$0xff] %v307_v60  ;;  %v435_v60 = vld [vmem:[%s7499_s7 + $0x3e0] sm:$0xff] }
  0x80   :  { %310 = vst [vmem:[#allocation3 + $0x1e8] sm:$0xff] %v309_v61  ;;  %v437_v61 = vld [vmem:[%s7499_s7 + $0x3e8] sm:$0xff] }
  0x81   :  { %312 = vst [vmem:[#allocation3 + $0x1f0] sm:$0xff] %v311_v62  ;;  %v439_v62 = vld [vmem:[%s7499_s7 + $0x3f0] sm:$0xff] }
  0x82   :  { %314 = vst [vmem:[#allocation3 + $0x1f8] sm:$0xff] %v313_v63  ;;  %v441_v63 = vld [vmem:[%s7499_s7 + $0x3f8] sm:$0xff] }
  0x83   :  { %316 = vst [vmem:[#allocation3 + $0x200] sm:$0xff] %v315_v0 }
  0x84   :  { %318 = vst [vmem:[#allocation3 + $0x208] sm:$0xff] %v317_v1 }
  0x85   :  { %320 = vst [vmem:[#allocation3 + $0x210] sm:$0xff] %v319_v2 }
  0x86   :  { %322 = vst [vmem:[#allocation3 + $0x218] sm:$0xff] %v321_v3 }
  0x87   :  { %324 = vst [vmem:[#allocation3 + $0x220] sm:$0xff] %v323_v4 }
  0x88   :  { %326 = vst [vmem:[#allocation3 + $0x228] sm:$0xff] %v325_v5 }
  0x89   :  { %328 = vst [vmem:[#allocation3 + $0x230] sm:$0xff] %v327_v6 }
  0x8a   :  { %330 = vst [vmem:[#allocation3 + $0x238] sm:$0xff] %v329_v7 }
  0x8b   :  { %332 = vst [vmem:[#allocation3 + $0x240] sm:$0xff] %v331_v8 }
  0x8c   :  { %334 = vst [vmem:[#allocation3 + $0x248] sm:$0xff] %v333_v9 }
  0x8d   :  { %336 = vst [vmem:[#allocation3 + $0x250] sm:$0xff] %v335_v10 }
  0x8e   :  { %338 = vst [vmem:[#allocation3 + $0x258] sm:$0xff] %v337_v11 }
  0x8f   :  { %340 = vst [vmem:[#allocation3 + $0x260] sm:$0xff] %v339_v12 }
  0x90   :  { %342 = vst [vmem:[#allocation3 + $0x268] sm:$0xff] %v341_v13 }
  0x91   :  { %344 = vst [vmem:[#allocation3 + $0x270] sm:$0xff] %v343_v14 }
  0x92   :  { %346 = vst [vmem:[#allocation3 + $0x278] sm:$0xff] %v345_v15 }
  0x93   :  { %348 = vst [vmem:[#allocation3 + $0x280] sm:$0xff] %v347_v16 }
  0x94   :  { %350 = vst [vmem:[#allocation3 + $0x288] sm:$0xff] %v349_v17 }
  0x95   :  { %352 = vst [vmem:[#allocation3 + $0x290] sm:$0xff] %v351_v18 }
  0x96   :  { %354 = vst [vmem:[#allocation3 + $0x298] sm:$0xff] %v353_v19 }
  0x97   :  { %356 = vst [vmem:[#allocation3 + $0x2a0] sm:$0xff] %v355_v20 }
  0x98   :  { %358 = vst [vmem:[#allocation3 + $0x2a8] sm:$0xff] %v357_v21 }
  0x99   :  { %360 = vst [vmem:[#allocation3 + $0x2b0] sm:$0xff] %v359_v22 }
  0x9a   :  { %362 = vst [vmem:[#allocation3 + $0x2b8] sm:$0xff] %v361_v23 }
  0x9b   :  { %364 = vst [vmem:[#allocation3 + $0x2c0] sm:$0xff] %v363_v24 }
  0x9c   :  { %366 = vst [vmem:[#allocation3 + $0x2c8] sm:$0xff] %v365_v25 }
  0x9d   :  { %368 = vst [vmem:[#allocation3 + $0x2d0] sm:$0xff] %v367_v26 }
  0x9e   :  { %370 = vst [vmem:[#allocation3 + $0x2d8] sm:$0xff] %v369_v27 }
  0x9f   :  { %372 = vst [vmem:[#allocation3 + $0x2e0] sm:$0xff] %v371_v28 }
  0xa0   :  { %374 = vst [vmem:[#allocation3 + $0x2e8] sm:$0xff] %v373_v29 }
  0xa1   :  { %376 = vst [vmem:[#allocation3 + $0x2f0] sm:$0xff] %v375_v30 }
  0xa2   :  { %378 = vst [vmem:[#allocation3 + $0x2f8] sm:$0xff] %v377_v31 }
  0xa3   :  { %380 = vst [vmem:[#allocation3 + $0x300] sm:$0xff] %v379_v32 }
  0xa4   :  { %382 = vst [vmem:[#allocation3 + $0x308] sm:$0xff] %v381_v33 }
  0xa5   :  { %384 = vst [vmem:[#allocation3 + $0x310] sm:$0xff] %v383_v34 }
  0xa6   :  { %386 = vst [vmem:[#allocation3 + $0x318] sm:$0xff] %v385_v35 }
  0xa7   :  { %388 = vst [vmem:[#allocation3 + $0x320] sm:$0xff] %v387_v36 }
  0xa8   :  { %390 = vst [vmem:[#allocation3 + $0x328] sm:$0xff] %v389_v37 }
  0xa9   :  { %392 = vst [vmem:[#allocation3 + $0x330] sm:$0xff] %v391_v38 }
  0xaa   :  { %394 = vst [vmem:[#allocation3 + $0x338] sm:$0xff] %v393_v39 }
  0xab   :  { %396 = vst [vmem:[#allocation3 + $0x340] sm:$0xff] %v395_v40 }
  0xac   :  { %398 = vst [vmem:[#allocation3 + $0x348] sm:$0xff] %v397_v41 }
  0xad   :  { %400 = vst [vmem:[#allocation3 + $0x350] sm:$0xff] %v399_v42 }
  0xae   :  { %402 = vst [vmem:[#allocation3 + $0x358] sm:$0xff] %v401_v43 }
  0xaf   :  { %404 = vst [vmem:[#allocation3 + $0x360] sm:$0xff] %v403_v44 }
  0xb0   :  { %406 = vst [vmem:[#allocation3 + $0x368] sm:$0xff] %v405_v45 }
  0xb1   :  { %408 = vst [vmem:[#allocation3 + $0x370] sm:$0xff] %v407_v46 }
  0xb2   :  { %410 = vst [vmem:[#allocation3 + $0x378] sm:$0xff] %v409_v47 }
  0xb3   :  { %412 = vst [vmem:[#allocation3 + $0x380] sm:$0xff] %v411_v48 }
  0xb4   :  { %414 = vst [vmem:[#allocation3 + $0x388] sm:$0xff] %v413_v49 }
  0xb5   :  { %416 = vst [vmem:[#allocation3 + $0x390] sm:$0xff] %v415_v50 }
  0xb6   :  { %418 = vst [vmem:[#allocation3 + $0x398] sm:$0xff] %v417_v51 }
  0xb7   :  { %420 = vst [vmem:[#allocation3 + $0x3a0] sm:$0xff] %v419_v52 }
  0xb8   :  { %422 = vst [vmem:[#allocation3 + $0x3a8] sm:$0xff] %v421_v53 }
  0xb9   :  { %424 = vst [vmem:[#allocation3 + $0x3b0] sm:$0xff] %v423_v54 }
  0xba   :  { %426 = vst [vmem:[#allocation3 + $0x3b8] sm:$0xff] %v425_v55 }
  0xbb   :  { %428 = vst [vmem:[#allocation3 + $0x3c0] sm:$0xff] %v427_v56 }
  0xbc   :  { %430 = vst [vmem:[#allocation3 + $0x3c8] sm:$0xff] %v429_v57 }
  0xbd   :  { %432 = vst [vmem:[#allocation3 + $0x3d0] sm:$0xff] %v431_v58 }
  0xbe   :  { %434 = vst [vmem:[#allocation3 + $0x3d8] sm:$0xff] %v433_v59 }
  0xbf   :  { %436 = vst [vmem:[#allocation3 + $0x3e0] sm:$0xff] %v435_v60 }
  0xc0   :  { %438 = vst [vmem:[#allocation3 + $0x3e8] sm:$0xff] %v437_v61 }
  0xc1   :  { %440 = vst [vmem:[#allocation3 + $0x3f0] sm:$0xff] %v439_v62 }
  0xc2   :  { %442 = vst [vmem:[#allocation3 + $0x3f8] sm:$0xff] %v441_v63 }
  0xc3   :  { %448 = vsyncadd [#allocation4 + $0x1], 16384  ;;  %v3957_v0 = vld [vmem:[%s7493_s1 + $0x1c0] sm:$0xf]  ;;  %v5325_v5 = vld [vmem:[%s7493_s1 + $0x1c4] sm:$0xf] }
  0xc4   :  { %v5329_v1 = vld [vmem:[%s7493_s1 + $0x1dc] sm:$0xf0]  ;;  %v3959_v7 = vld [vmem:[%s7493_s1 + $0x1e0] sm:$0xf0] }
  0xc5   :  { %v3958_v2 = vor.u32 %v5329_v1, %v3957_v0  ;;  %v4213_v3 = vld [vmem:[%s7493_s1 + $0x3c0] sm:$0xf]  ;;  %v5389_v8 = vld [vmem:[%s7493_s1 + $0x3c4] sm:$0xf]  ;;  %v3962_v10 = vor.u32 %v5325_v5, %v3959_v7 }
  0xc6   :  { %v5393_v4 = vld [vmem:[%s7493_s1 + $0x3dc] sm:$0xf0]  ;;  %v4215_v9 = vld [vmem:[%s7493_s1 + $0x3e0] sm:$0xf0] }
  0xc7   :  { %v4214_v6 = vor.u32 %v5393_v4, %v4213_v3  ;;  %1239 = vmatpush.bf16.msra.mxu0 %v3958_v2  ;;  %v4218_v11 = vor.u32 %v5389_v8, %v4215_v9  ;;  %v3925_v12 = vld [vmem:[%s7493_s1 + $0x180] sm:$0xf]  ;;  %v5317_v17 = vld [vmem:[%s7493_s1 + $0x184] sm:$0xf]  ;;  %1265 = vmatpush.bf16.msra.mxu2 %v3962_v10 }
  0xc8   :  { %v5321_v13 = vld [vmem:[%s7493_s1 + $0x19c] sm:$0xf0]  ;;  %v3927_v18 = vld [vmem:[%s7493_s1 + $0x1a0] sm:$0xf0] }
  0xc9   :  { %v4181_v14 = vld [vmem:[%s7493_s1 + $0x380] sm:$0xf]  ;;  %1252 = vmatpush.bf16.msra.mxu1 %v4214_v6  ;;  %v3926_v15 = vor.u32 %v5321_v13, %v3925_v12  ;;  %1278 = vmatpush.bf16.msra.mxu3 %v4218_v11  ;;  %v3930_v20 = vor.u32 %v5317_v17, %v3927_v18  ;;  %v5381_v21 = vld [vmem:[%s7493_s1 + $0x384] sm:$0xf] }
  0xca   :  { %v5385_v16 = vld [vmem:[%s7493_s1 + $0x39c] sm:$0xf0]  ;;  %v4183_v22 = vld [vmem:[%s7493_s1 + $0x3a0] sm:$0xf0] }
  0xcb   :  { %v4182_v19 = vor.u32 %v5385_v16, %v4181_v14  ;;  %v3893_v23 = vld [vmem:[%s7493_s1 + $0x140] sm:$0xf]  ;;  %v4186_v24 = vor.u32 %v5381_v21, %v4183_v22  ;;  %1240 = vmatpush.bf16.msra.mxu0 %v3926_v15  ;;  %v5309_v29 = vld [vmem:[%s7493_s1 + $0x144] sm:$0xf]  ;;  %1266 = vmatpush.bf16.msra.mxu2 %v3930_v20 }
  0xcc   :  { %v5313_v25 = vld [vmem:[%s7493_s1 + $0x15c] sm:$0xf0]  ;;  %v3895_v30 = vld [vmem:[%s7493_s1 + $0x160] sm:$0xf0] }
  0xcd   :  { %v4149_v26 = vld [vmem:[%s7493_s1 + $0x340] sm:$0xf]  ;;  %v3894_v28 = vor.u32 %v5313_v25, %v3893_v23  ;;  %v5373_v31 = vld [vmem:[%s7493_s1 + $0x344] sm:$0xf]  ;;  %1253 = vmatpush.bf16.msra.mxu1 %v4182_v19  ;;  %1279 = vmatpush.bf16.msra.mxu3 %v4186_v24  ;;  %v3898_v36 = vor.u32 %v5309_v29, %v3895_v30  ;;  %v4221_v30 = vld [vmem:[%s7493_s1 + $0x3c8] sm:$0xf] }
  0xce   :  { %v5377_v27 = vld [vmem:[%s7493_s1 + $0x35c] sm:$0xf0]  ;;  %v4151_v33 = vld [vmem:[%s7493_s1 + $0x360] sm:$0xf0] }
  0xcf   :  { %v4150_v32 = vor.u32 %v5377_v27, %v4149_v26  ;;  %v3861_v34 = vld [vmem:[%s7493_s1 + $0x100] sm:$0xf]  ;;  %v4154_v37 = vor.u32 %v5373_v31, %v4151_v33  ;;  %v5301_v40 = vld [vmem:[%s7493_s1 + $0x104] sm:$0xf]  ;;  %1241 = vmatpush.bf16.msra.mxu0 %v3894_v28  ;;  %1267 = vmatpush.bf16.msra.mxu2 %v3898_v36  ;;  %v3965_v26 = vld [vmem:[%s7493_s1 + $0x1c8] sm:$0xf] }
  0xd0   :  { %v5305_v35 = vld [vmem:[%s7493_s1 + $0x11c] sm:$0xf0]  ;;  %v3863_v41 = vld [vmem:[%s7493_s1 + $0x120] sm:$0xf0]  ;;  %v5330_v27 = vld [vmem:[%s7493_s1 + $0x1e4] sm:$0xf0] }
  0xd1   :  { %v4117_v38 = vld [vmem:[%s7493_s1 + $0x300] sm:$0xf]  ;;  %v5365_v42 = vld [vmem:[%s7493_s1 + $0x304] sm:$0xf]  ;;  %v3862_v44 = vor.u32 %v5305_v35, %v3861_v34  ;;  %1254 = vmatpush.bf16.msra.mxu1 %v4150_v32  ;;  %1280 = vmatpush.bf16.msra.mxu3 %v4154_v37  ;;  %v3866_v48 = vor.u32 %v5301_v40, %v3863_v41  ;;  %v5394_v32 = vld [vmem:[%s7493_s1 + $0x3e4] sm:$0xf0]  ;;  %v3966_v36 = vor.u32 %v5330_v27, %v3965_v26 }
  0xd2   :  { %v5369_v39 = vld [vmem:[%s7493_s1 + $0x31c] sm:$0xf0]  ;;  %v4119_v43 = vld [vmem:[%s7493_s1 + $0x320] sm:$0xf0]  ;;  %v5326_v33 = vld [vmem:[%s7493_s1 + $0x1cc] sm:$0xf] }
  0xd3   :  { %v4118_v45 = vor.u32 %v5369_v39, %v4117_v38  ;;  %v3829_v46 = vld [vmem:[%s7493_s1 + $0xc0] sm:$0xf]  ;;  %v4122_v49 = vor.u32 %v5365_v42, %v4119_v43  ;;  %v5293_v52 = vld [vmem:[%s7493_s1 + $0xc4] sm:$0xf]  ;;  %1242 = vmatpush.bf16.msra.mxu0 %v3862_v44  ;;  %1268 = vmatpush.bf16.msra.mxu2 %v3866_v48  ;;  %v3967_v34 = vld [vmem:[%s7493_s1 + $0x1e8] sm:$0xf0]  ;;  %v4222_v43 = vor.u32 %v5394_v32, %v4221_v30 }
  0xd4   :  { %v5297_v47 = vld [vmem:[%s7493_s1 + $0xdc] sm:$0xf0]  ;;  %v3831_v53 = vld [vmem:[%s7493_s1 + $0xe0] sm:$0xf0]  ;;  %v5390_v37 = vld [vmem:[%s7493_s1 + $0x3cc] sm:$0xf]  ;;  %v3970_v44 = vor.u32 %v5326_v33, %v3967_v34 }
  0xd5   :  { %v4085_v50 = vld [vmem:[%s7493_s1 + $0x2c0] sm:$0xf]  ;;  %v5357_v54 = vld [vmem:[%s7493_s1 + $0x2c4] sm:$0xf]  ;;  %v3830_v56 = vor.u32 %v5297_v47, %v3829_v46  ;;  %1255 = vmatpush.bf16.msra.mxu1 %v4118_v45  ;;  %1281 = vmatpush.bf16.msra.mxu3 %v4122_v49  ;;  %v3834_v60 = vor.u32 %v5293_v52, %v3831_v53  ;;  %v4223_v38 = vld [vmem:[%s7493_s1 + $0x3e8] sm:$0xf0] }
  0xd6   :  { %v5361_v51 = vld [vmem:[%s7493_s1 + $0x2dc] sm:$0xf0]  ;;  %v4087_v55 = vld [vmem:[%s7493_s1 + $0x2e0] sm:$0xf0]  ;;  %v3933_v41 = vld [vmem:[%s7493_s1 + $0x188] sm:$0xf]  ;;  %v4226_v46 = vor.u32 %v5390_v37, %v4223_v38 }
  0xd7   :  { %v4086_v57 = vor.u32 %v5361_v51, %v4085_v50  ;;  %v3797_v58 = vld [vmem:[%s7493_s1 + $0x80] sm:$0xf]  ;;  %v4090_v61 = vor.u32 %v5357_v54, %v4087_v55  ;;  %v5285_v0 = vld [vmem:[%s7493_s1 + $0x84] sm:$0xf]  ;;  %1243 = vmatpush.bf16.msra.mxu0 %v3830_v56  ;;  %1269 = vmatpush.bf16.msra.mxu2 %v3834_v60  ;;  %v5322_v42 = vld [vmem:[%s7493_s1 + $0x1a4] sm:$0xf0] }
  0xd8   :  { %v5289_v59 = vld [vmem:[%s7493_s1 + $0x9c] sm:$0xf0]  ;;  %v3799_v1 = vld [vmem:[%s7493_s1 + $0xa0] sm:$0xf0]  ;;  %v4189_v45 = vld [vmem:[%s7493_s1 + $0x388] sm:$0xf]  ;;  %v3934_v50 = vor.u32 %v5322_v42, %v3933_v41 }
  0xd9   :  { %v4053_v62 = vld [vmem:[%s7493_s1 + $0x280] sm:$0xf]  ;;  %v5349_v2 = vld [vmem:[%s7493_s1 + $0x284] sm:$0xf]  ;;  %v3798_v4 = vor.u32 %v5289_v59, %v3797_v58  ;;  %1256 = vmatpush.bf16.msra.mxu1 %v4086_v57  ;;  %1282 = vmatpush.bf16.msra.mxu3 %v4090_v61  ;;  %v3802_v8 = vor.u32 %v5285_v0, %v3799_v1  ;;  %v5386_v47 = vld [vmem:[%s7493_s1 + $0x3a4] sm:$0xf0] }
  0xda   :  { %v5353_v63 = vld [vmem:[%s7493_s1 + $0x29c] sm:$0xf0]  ;;  %v4055_v3 = vld [vmem:[%s7493_s1 + $0x2a0] sm:$0xf0]  ;;  %v5318_v48 = vld [vmem:[%s7493_s1 + $0x18c] sm:$0xf]  ;;  %v4190_v57 = vor.u32 %v5386_v47, %v4189_v45 }
  0xdb   :  { %v4054_v5 = vor.u32 %v5353_v63, %v4053_v62  ;;  %v3765_v6 = vld [vmem:[%s7493_s1 + $0x40] sm:$0xf]  ;;  %v4058_v9 = vor.u32 %v5349_v2, %v4055_v3  ;;  %v5277_v12 = vld [vmem:[%s7493_s1 + $0x44] sm:$0xf]  ;;  %1244 = vmatpush.bf16.msra.mxu0 %v3798_v4  ;;  %1270 = vmatpush.bf16.msra.mxu2 %v3802_v8  ;;  %v3935_v49 = vld [vmem:[%s7493_s1 + $0x1a8] sm:$0xf0] }
  0xdc   :  { %v5281_v7 = vld [vmem:[%s7493_s1 + $0x5c] sm:$0xf0]  ;;  %v3767_v13 = vld [vmem:[%s7493_s1 + $0x60] sm:$0xf0]  ;;  %v5382_v51 = vld [vmem:[%s7493_s1 + $0x38c] sm:$0xf]  ;;  %v3938_v58 = vor.u32 %v5318_v48, %v3935_v49 }
  0xdd   :  { %v4021_v10 = vld [vmem:[%s7493_s1 + $0x240] sm:$0xf]  ;;  %v5341_v14 = vld [vmem:[%s7493_s1 + $0x244] sm:$0xf]  ;;  %v3766_v16 = vor.u32 %v5281_v7, %v3765_v6  ;;  %1257 = vmatpush.bf16.msra.mxu1 %v4054_v5  ;;  %1283 = vmatpush.bf16.msra.mxu3 %v4058_v9  ;;  %v3770_v23 = vor.u32 %v5277_v12, %v3767_v13  ;;  %v4191_v52 = vld [vmem:[%s7493_s1 + $0x3a8] sm:$0xf0] }
  0xde   :  { %v5345_v11 = vld [vmem:[%s7493_s1 + $0x25c] sm:$0xf0]  ;;  %v4023_v15 = vld [vmem:[%s7493_s1 + $0x260] sm:$0xf0]  ;;  %v3901_v54 = vld [vmem:[%s7493_s1 + $0x148] sm:$0xf]  ;;  %v4194_v61 = vor.u32 %v5382_v51, %v4191_v52 }
  0xdf   :  { %v3733_v17 = vld [vmem:[%s7493_s1] sm:$0xf]  ;;  %v4022_v19 = vor.u32 %v5345_v11, %v4021_v10  ;;  %v5269_v22 = vld [vmem:[%s7493_s1 + $0x4] sm:$0xf]  ;;  %v4026_v24 = vor.u32 %v5341_v14, %v4023_v15  ;;  %1245 = vmatpush.bf16.msra.mxu0 %v3766_v16  ;;  %1271 = vmatpush.bf16.msra.mxu2 %v3770_v23  ;;  %v5314_v55 = vld [vmem:[%s7493_s1 + $0x164] sm:$0xf0] }
  0xe0   :  { %v5273_v18 = vld [vmem:[%s7493_s1 + $0x1c] sm:$0xf0]  ;;  %v3735_v25 = vld [vmem:[%s7493_s1 + $0x20] sm:$0xf0]  ;;  %v4157_v59 = vld [vmem:[%s7493_s1 + $0x348] sm:$0xf]  ;;  %v3902_v1 = vor.u32 %v5314_v55, %v3901_v54 }
  0xe1   :  { %v3989_v20 = vld [vmem:[%s7493_s1 + $0x200] sm:$0xf]  ;;  %v5333_v28 = vld [vmem:[%s7493_s1 + $0x204] sm:$0xf]  ;;  %v3734_v31 = vor.u32 %v5273_v18, %v3733_v17  ;;  %1258 = vmatpush.bf16.msra.mxu1 %v4022_v19  ;;  %1284 = vmatpush.bf16.msra.mxu3 %v4026_v24  ;;  %v3738_v39 = vor.u32 %v5269_v22, %v3735_v25  ;;  %v5378_v60 = vld [vmem:[%s7493_s1 + $0x364] sm:$0xf0] }
  0xe2   :  { %v5337_v21 = vld [vmem:[%s7493_s1 + $0x21c] sm:$0xf0]  ;;  %v3991_v29 = vld [vmem:[%s7493_s1 + $0x220] sm:$0xf0]  ;;  %v5310_v62 = vld [vmem:[%s7493_s1 + $0x14c] sm:$0xf]  ;;  %v4158_v7 = vor.u32 %v5378_v60, %v4157_v59 }
  0xe3   :  { %v3990_v35 = vor.u32 %v5337_v21, %v3989_v20  ;;  %v3994_v40 = vor.u32 %v5333_v28, %v3991_v29  ;;  %1246 = vmatpush.bf16.msra.mxu0 %v3734_v31  ;;  %v449_v53 = vld [vmem:[%s7492_s0] sm:$0xff]  ;;  %1272 = vmatpush.bf16.msra.mxu2 %v3738_v39  ;;  %v3903_v63 = vld [vmem:[%s7493_s1 + $0x168] sm:$0xf0]  ;;  %v3869_v5 = vld [vmem:[%s7493_s1 + $0x108] sm:$0xf] }
  0xe4   :  { %v6670_v56 = vpack.c.bf16 %v449_v53, %v449_v53  ;;  %v450_v0 = vld [vmem:[%s7492_s0 + $0x8] sm:$0xff]  ;;  %v3906_v8 = vor.u32 %v5310_v62, %v3903_v63  ;;  %v5331_v62 = vld [vmem:[%s7493_s1 + $0x1ec] sm:$0xf0] }
  0xe5   :  { %1259 = vmatpush.bf16.msra.mxu1 %v3990_v35  ;;  %1285 = vmatpush.bf16.msra.mxu3 %v3994_v40  ;;  %v5374_v2 = vld [vmem:[%s7493_s1 + $0x34c] sm:$0xf]  ;;  %v6695_v4 = vpack.c.bf16 %v450_v0, %v450_v0  ;;  %v5306_v6 = vld [vmem:[%s7493_s1 + $0x124] sm:$0xf0] }
  0xe6   :  { %1247 = vmatmul.bf16.vlgmr.msra.gmra.mxu0 %v6670_v56  ;;  %v4159_v3 = vld [vmem:[%s7493_s1 + $0x368] sm:$0xf0]  ;;  %1273 = vmatmul.bf16.vlgmr.msra.gmra.mxu2 %v6670_v56  ;;  %v4125_v9 = vld [vmem:[%s7493_s1 + $0x308] sm:$0xf]  ;;  %v3870_v14 = vor.u32 %v5306_v6, %v3869_v5  ;;  %v4229_v5 = vld [vmem:[%s7493_s1 + $0x3d0] sm:$0xf] }
  0xe7   :  { %1291 = vmatpush.bf16.msrb.mxu0 %v3966_v36  ;;  %1317 = vmatpush.bf16.msrb.mxu2 %v3970_v44  ;;  %v4162_v10 = vor.u32 %v5374_v2, %v4159_v3  ;;  %v5370_v11 = vld [vmem:[%s7493_s1 + $0x324] sm:$0xf0]  ;;  %v5302_v12 = vld [vmem:[%s7493_s1 + $0x10c] sm:$0xf]  ;;  %v5395_v6 = vld [vmem:[%s7493_s1 + $0x3ec] sm:$0xf0] }
  0xe8   :  { %v3871_v13 = vld [vmem:[%s7493_s1 + $0x128] sm:$0xf0]  ;;  %1260 = vmatmul.bf16.vlgmr.msra.gmra.mxu1 %v6695_v4  ;;  %1286 = vmatmul.bf16.vlgmr.msra.gmra.mxu3 %v6695_v4  ;;  %v3837_v17 = vld [vmem:[%s7493_s1 + $0xc8] sm:$0xf]  ;;  %v4126_v19 = vor.u32 %v5370_v11, %v4125_v9  ;;  %v3975_v9 = vld [vmem:[%s7493_s1 + $0x1f0] sm:$0xf0] }
  0xe9   :  { %1304 = vmatpush.bf16.msrb.mxu1 %v4222_v43  ;;  %1330 = vmatpush.bf16.msrb.mxu3 %v4226_v46  ;;  %v5366_v15 = vld [vmem:[%s7493_s1 + $0x30c] sm:$0xf]  ;;  %v5298_v18 = vld [vmem:[%s7493_s1 + $0xe4] sm:$0xf0]  ;;  %v3874_v20 = vor.u32 %v5302_v12, %v3871_v13  ;;  %v4231_v11 = vld [vmem:[%s7493_s1 + $0x3f0] sm:$0xf0] }
  0xea   :  { %v4127_v16 = vld [vmem:[%s7493_s1 + $0x328] sm:$0xf0]  ;;  %v4093_v21 = vld [vmem:[%s7493_s1 + $0x2c8] sm:$0xf]  ;;  %v3838_v26 = vor.u32 %v5298_v18, %v3837_v17  ;;  %v5323_v17 = vld [vmem:[%s7493_s1 + $0x1ac] sm:$0xf0] }
  0xeb   :  { %1292 = vmatpush.bf16.msrb.mxu0 %v3934_v50  ;;  %1318 = vmatpush.bf16.msrb.mxu2 %v3938_v58  ;;  %v4130_v22 = vor.u32 %v5366_v15, %v4127_v16  ;;  %v5362_v23 = vld [vmem:[%s7493_s1 + $0x2e4] sm:$0xf0]  ;;  %v5294_v24 = vld [vmem:[%s7493_s1 + $0xcc] sm:$0xf]  ;;  %v4230_v15 = vor.u32 %v5395_v6, %v4229_v5  ;;  %v3941_v16 = vld [vmem:[%s7493_s1 + $0x190] sm:$0xf] }
  0xec   :  { %v3839_v25 = vld [vmem:[%s7493_s1 + $0xe8] sm:$0xf0]  ;;  %v3805_v29 = vld [vmem:[%s7493_s1 + $0x88] sm:$0xf]  ;;  %v4094_v31 = vor.u32 %v5362_v23, %v4093_v21  ;;  %v5387_v21 = vld [vmem:[%s7493_s1 + $0x3ac] sm:$0xf0] }
  0xed   :  { %1305 = vmatpush.bf16.msrb.mxu1 %v4190_v57  ;;  %1331 = vmatpush.bf16.msrb.mxu3 %v4194_v61  ;;  %v5358_v27 = vld [vmem:[%s7493_s1 + $0x2cc] sm:$0xf]  ;;  %v5290_v30 = vld [vmem:[%s7493_s1 + $0xa4] sm:$0xf0]  ;;  %v3842_v32 = vor.u32 %v5294_v24, %v3839_v25  ;;  %v3973_v61 = vld [vmem:[%s7493_s1 + $0x1d0] sm:$0xf] }
  0xee   :  { %v4095_v28 = vld [vmem:[%s7493_s1 + $0x2e8] sm:$0xf0]  ;;  %v4061_v33 = vld [vmem:[%s7493_s1 + $0x288] sm:$0xf]  ;;  %v3806_v38 = vor.u32 %v5290_v30, %v3805_v29  ;;  %v3943_v23 = vld [vmem:[%s7493_s1 + $0x1b0] sm:$0xf0] }
  0xef   :  { %1293 = vmatpush.bf16.msrb.mxu0 %v3902_v1  ;;  %1319 = vmatpush.bf16.msrb.mxu2 %v3906_v8  ;;  %v4098_v34 = vor.u32 %v5358_v27, %v4095_v28  ;;  %v5354_v35 = vld [vmem:[%s7493_s1 + $0x2a4] sm:$0xf0]  ;;  %v5286_v36 = vld [vmem:[%s7493_s1 + $0x8c] sm:$0xf]  ;;  %v3974_v8 = vor.u32 %v5331_v62, %v3973_v61  ;;  %v5383_v24 = vld [vmem:[%s7493_s1 + $0x394] sm:$0xf] }
  0xf0   :  { %v3807_v37 = vld [vmem:[%s7493_s1 + $0xa8] sm:$0xf0]  ;;  %v3773_v41 = vld [vmem:[%s7493_s1 + $0x48] sm:$0xf]  ;;  %v4062_v43 = vor.u32 %v5354_v35, %v4061_v33  ;;  %v4199_v25 = vld [vmem:[%s7493_s1 + $0x3b0] sm:$0xf0] }
  0xf1   :  { %1306 = vmatpush.bf16.msrb.mxu1 %v4158_v7  ;;  %1332 = vmatpush.bf16.msrb.mxu3 %v4162_v10  ;;  %v5350_v39 = vld [vmem:[%s7493_s1 + $0x28c] sm:$0xf]  ;;  %v5282_v42 = vld [vmem:[%s7493_s1 + $0x64] sm:$0xf0]  ;;  %v3810_v44 = vor.u32 %v5286_v36, %v3807_v37  ;;  %v5327_v7 = vld [vmem:[%s7493_s1 + $0x1d4] sm:$0xf] }
  0xf2   :  { %v4063_v40 = vld [vmem:[%s7493_s1 + $0x2a8] sm:$0xf0]  ;;  %v4029_v45 = vld [vmem:[%s7493_s1 + $0x248] sm:$0xf]  ;;  %v3774_v50 = vor.u32 %v5282_v42, %v3773_v41  ;;  %v5391_v10 = vld [vmem:[%s7493_s1 + $0x3d4] sm:$0xf]  ;;  %v3978_v18 = vor.u32 %v5327_v7, %v3975_v9 }
  0xf3   :  { %1294 = vmatpush.bf16.msrb.mxu0 %v3870_v14  ;;  %1320 = vmatpush.bf16.msrb.mxu2 %v3874_v20  ;;  %v4066_v46 = vor.u32 %v5350_v39, %v4063_v40  ;;  %v5346_v47 = vld [vmem:[%s7493_s1 + $0x264] sm:$0xf0]  ;;  %v5278_v48 = vld [vmem:[%s7493_s1 + $0x4c] sm:$0xf]  ;;  %v4197_v20 = vld [vmem:[%s7493_s1 + $0x390] sm:$0xf] }
  0xf4   :  { %v3775_v49 = vld [vmem:[%s7493_s1 + $0x68] sm:$0xf0]  ;;  %v3741_v53 = vld [vmem:[%s7493_s1 + $0x8] sm:$0xf]  ;;  %v4030_v58 = vor.u32 %v5346_v47, %v4029_v45  ;;  %v4198_v27 = vor.u32 %v5387_v21, %v4197_v20  ;;  %v3909_v28 = vld [vmem:[%s7493_s1 + $0x150] sm:$0xf] }
  0xf5   :  { %1307 = vmatpush.bf16.msrb.mxu1 %v4126_v19  ;;  %1333 = vmatpush.bf16.msrb.mxu3 %v4130_v22  ;;  %v5342_v51 = vld [vmem:[%s7493_s1 + $0x24c] sm:$0xf]  ;;  %v5274_v54 = vld [vmem:[%s7493_s1 + $0x24] sm:$0xf0]  ;;  %v3778_v59 = vor.u32 %v5278_v48, %v3775_v49  ;;  %v4234_v19 = vor.u32 %v5391_v10, %v4231_v11  ;;  %v5319_v22 = vld [vmem:[%s7493_s1 + $0x194] sm:$0xf] }
  0xf6   :  { %v4031_v52 = vld [vmem:[%s7493_s1 + $0x268] sm:$0xf0]  ;;  %v3997_v55 = vld [vmem:[%s7493_s1 + $0x208] sm:$0xf]  ;;  %v3742_v3 = vor.u32 %v5274_v54, %v3741_v53  ;;  %v5315_v29 = vld [vmem:[%s7493_s1 + $0x16c] sm:$0xf0]  ;;  %v3946_v30 = vor.u32 %v5319_v22, %v3943_v23 }
  0xf7   :  { %1295 = vmatpush.bf16.msrb.mxu0 %v3838_v26  ;;  %1321 = vmatpush.bf16.msrb.mxu2 %v3842_v32  ;;  %v5338_v57 = vld [vmem:[%s7493_s1 + $0x224] sm:$0xf0]  ;;  %v5270_v60 = vld [vmem:[%s7493_s1 + $0xc] sm:$0xf]  ;;  %v4034_v63 = vor.u32 %v5342_v51, %v4031_v52  ;;  %v3942_v26 = vor.u32 %v5323_v17, %v3941_v16  ;;  %v4165_v32 = vld [vmem:[%s7493_s1 + $0x350] sm:$0xf] }
  0xf8   :  { %v3743_v0 = vld [vmem:[%s7493_s1 + $0x28] sm:$0xf0]  ;;  %v3998_v12 = vor.u32 %v5338_v57, %v3997_v55  ;;  %v5379_v33 = vld [vmem:[%s7493_s1 + $0x36c] sm:$0xf0]  ;;  %v3911_v35 = vld [vmem:[%s7493_s1 + $0x170] sm:$0xf0] }
  0xf9   :  { %1308 = vmatpush.bf16.msrb.mxu1 %v4094_v31  ;;  %1334 = vmatpush.bf16.msrb.mxu3 %v4098_v34  ;;  %v5334_v1 = vld [vmem:[%s7493_s1 + $0x20c] sm:$0xf]  ;;  %v3746_v13 = vor.u32 %v5270_v60, %v3743_v0  ;;  %v4202_v31 = vor.u32 %v5383_v24, %v4199_v25  ;;  %v5311_v34 = vld [vmem:[%s7493_s1 + $0x154] sm:$0xf]  ;;  %v4166_v39 = vor.u32 %v5379_v33, %v4165_v32  ;;  %v3877_v40 = vld [vmem:[%s7493_s1 + $0x110] sm:$0xf] }
  0xfa   :  { %v3999_v2 = vld [vmem:[%s7493_s1 + $0x228] sm:$0xf0]  ;;  %v5375_v36 = vld [vmem:[%s7493_s1 + $0x354] sm:$0xf]  ;;  %v5307_v41 = vld [vmem:[%s7493_s1 + $0x12c] sm:$0xf0]  ;;  %v3914_v42 = vor.u32 %v5311_v34, %v3911_v35 }
  0xfb   :  { %1296 = vmatpush.bf16.msrb.mxu0 %v3806_v38  ;;  %1322 = vmatpush.bf16.msrb.mxu2 %v3810_v44  ;;  %v4002_v14 = vor.u32 %v5334_v1, %v3999_v2  ;;  %v4167_v37 = vld [vmem:[%s7493_s1 + $0x370] sm:$0xf0]  ;;  %v3910_v38 = vor.u32 %v5315_v29, %v3909_v28  ;;  %v4133_v44 = vld [vmem:[%s7493_s1 + $0x310] sm:$0xf] }
  0xfc   :  { %v5371_v45 = vld [vmem:[%s7493_s1 + $0x32c] sm:$0xf0]  ;;  %v3879_v47 = vld [vmem:[%s7493_s1 + $0x130] sm:$0xf0] }
  0xfd   :  { %1309 = vmatpush.bf16.msrb.mxu1 %v4062_v43  ;;  %1335 = vmatpush.bf16.msrb.mxu3 %v4066_v46  ;;  %v4170_v43 = vor.u32 %v5375_v36, %v4167_v37  ;;  %v5303_v46 = vld [vmem:[%s7493_s1 + $0x114] sm:$0xf]  ;;  %v4134_v51 = vor.u32 %v5371_v45, %v4133_v44  ;;  %v3845_v52 = vld [vmem:[%s7493_s1 + $0xd0] sm:$0xf]  ;;  %v3981_v36 = vld [vmem:[%s7493_s1 + $0x1d8] sm:$0xf] }
  0xfe   :  { %v5367_v48 = vld [vmem:[%s7493_s1 + $0x314] sm:$0xf]  ;;  %v5299_v53 = vld [vmem:[%s7493_s1 + $0xec] sm:$0xf0]  ;;  %v3882_v54 = vor.u32 %v5303_v46, %v3879_v47  ;;  %v5332_v37 = vld [vmem:[%s7493_s1 + $0x1f4] sm:$0xf0] }
  0xff   :  { %1297 = vmatpush.bf16.msrb.mxu0 %v3774_v50  ;;  %1323 = vmatpush.bf16.msrb.mxu2 %v3778_v59  ;;  %v4135_v49 = vld [vmem:[%s7493_s1 + $0x330] sm:$0xf0]  ;;  %v3878_v50 = vor.u32 %v5307_v41, %v3877_v40  ;;  %v4101_v57 = vld [vmem:[%s7493_s1 + $0x2d0] sm:$0xf]  ;;  %v5328_v40 = vld [vmem:[%s7493_s1 + $0x1dc] sm:$0xf] }
 0x100   :  { %v4138_v55 = vor.u32 %v5367_v48, %v4135_v49  ;;  %v5295_v59 = vld [vmem:[%s7493_s1 + $0xd4] sm:$0xf]  ;;  %v3813_v1 = vld [vmem:[%s7493_s1 + $0x90] sm:$0xf]  ;;  %v5392_v44 = vld [vmem:[%s7493_s1 + $0x3dc] sm:$0xf]  ;;  %v3982_v48 = vor.u32 %v5332_v37, %v3981_v36 }
 0x101   :  { %1310 = vmatpush.bf16.msrb.mxu1 %v4030_v58  ;;  %1336 = vmatpush.bf16.msrb.mxu3 %v4034_v63  ;;  %v5363_v58 = vld [vmem:[%s7493_s1 + $0x2ec] sm:$0xf0]  ;;  %v3847_v60 = vld [vmem:[%s7493_s1 + $0xf0] sm:$0xf0]  ;;  %v3846_v63 = vor.u32 %v5299_v53, %v3845_v52  ;;  %v4239_v45 = vld [vmem:[%s7493_s1 + $0x3f8] sm:$0xf0] }
 0x102   :  { %v5359_v61 = vld [vmem:[%s7493_s1 + $0x2d4] sm:$0xf]  ;;  %v4102_v0 = vor.u32 %v5363_v58, %v4101_v57  ;;  %v5291_v2 = vld [vmem:[%s7493_s1 + $0xac] sm:$0xf0]  ;;  %v4242_v53 = vor.u32 %v5392_v44, %v4239_v45  ;;  %v5320_v57 = vld [vmem:[%s7493_s1 + $0x19c] sm:$0xf] }
 0x103   :  { %1298 = vmatpush.bf16.msrb.mxu0 %v3742_v3  ;;  %1324 = vmatpush.bf16.msrb.mxu2 %v3746_v13  ;;  %v4103_v62 = vld [vmem:[%s7493_s1 + $0x2f0] sm:$0xf0]  ;;  %v3850_v3 = vor.u32 %v5295_v59, %v3847_v60  ;;  %v4069_v6 = vld [vmem:[%s7493_s1 + $0x290] sm:$0xf]  ;;  %v3951_v58 = vld [vmem:[%s7493_s1 + $0x1b8] sm:$0xf0] }
 0x104   :  { %v4106_v5 = vor.u32 %v5359_v61, %v4103_v62  ;;  %v5355_v7 = vld [vmem:[%s7493_s1 + $0x2ac] sm:$0xf0]  ;;  %v3815_v9 = vld [vmem:[%s7493_s1 + $0xb0] sm:$0xf0]  ;;  %v5384_v59 = vld [vmem:[%s7493_s1 + $0x39c] sm:$0xf] }
 0x105   :  { %1311 = vmatpush.bf16.msrb.mxu1 %v3998_v12  ;;  %1337 = vmatpush.bf16.msrb.mxu3 %v4002_v14  ;;  %v5351_v10 = vld [vmem:[%s7493_s1 + $0x294] sm:$0xf]  ;;  %v3814_v12 = vor.u32 %v5291_v2, %v3813_v1  ;;  %v4070_v13 = vor.u32 %v5355_v7, %v4069_v6  ;;  %v3781_v14 = vld [vmem:[%s7493_s1 + $0x50] sm:$0xf]  ;;  %v4207_v60 = vld [vmem:[%s7493_s1 + $0x3b8] sm:$0xf0]  ;;  %v3954_v1 = vor.u32 %v5320_v57, %v3951_v58 }
 0x106   :  { %1299 = vmatmul.bf16.vlgmr.msrb.gmra.mxu0 %v6670_v56  ;;  %1325 = vmatmul.bf16.vlgmr.msrb.gmra.mxu2 %v6670_v56  ;;  %v4071_v11 = vld [vmem:[%s7493_s1 + $0x2b0] sm:$0xf0]  ;;  %v4037_v16 = vld [vmem:[%s7493_s1 + $0x250] sm:$0xf]  ;;  %v4210_v2 = vor.u32 %v5384_v59, %v4207_v60  ;;  %v5312_v6 = vld [vmem:[%s7493_s1 + $0x15c] sm:$0xf] }
 0x107   :  { %1343 = vmatpush.bf16.msra.mxu0 %v3974_v8  ;;  %1369 = vmatpush.bf16.msra.mxu2 %v3978_v18  ;;  %v5287_v8 = vld [vmem:[%s7493_s1 + $0x94] sm:$0xf]  ;;  %v4074_v18 = vor.u32 %v5351_v10, %v4071_v11  ;;  %v3749_v24 = vld [vmem:[%s7493_s1 + $0x10] sm:$0xf]  ;;  %v3919_v7 = vld [vmem:[%s7493_s1 + $0x178] sm:$0xf0] }
 0x108   :  { %1312 = vmatmul.bf16.vlgmr.msrb.gmra.mxu1 %v6695_v4  ;;  %1338 = vmatmul.bf16.vlgmr.msrb.gmra.mxu3 %v6695_v4  ;;  %v3818_v17 = vor.u32 %v5287_v8, %v3815_v9  ;;  %v5279_v20 = vld [vmem:[%s7493_s1 + $0x54] sm:$0xf]  ;;  %v4005_v28 = vld [vmem:[%s7493_s1 + $0x210] sm:$0xf]  ;;  %v5376_v8 = vld [vmem:[%s7493_s1 + $0x35c] sm:$0xf] }
 0x109   :  { %1356 = vmatpush.bf16.msra.mxu1 %v4230_v15  ;;  %1382 = vmatpush.bf16.msra.mxu3 %v4234_v19  ;;  %v5283_v15 = vld [vmem:[%s7493_s1 + $0x6c] sm:$0xf0]  ;;  %v3783_v21 = vld [vmem:[%s7493_s1 + $0x70] sm:$0xf0]  ;;  %v4175_v9 = vld [vmem:[%s7493_s1 + $0x378] sm:$0xf0] }
 0x10a   :  { %v5347_v19 = vld [vmem:[%s7493_s1 + $0x26c] sm:$0xf0]  ;;  %v5343_v22 = vld [vmem:[%s7493_s1 + $0x254] sm:$0xf]  ;;  %v3782_v25 = vor.u32 %v5283_v15, %v3781_v14  ;;  %v3922_v14 = vor.u32 %v5312_v6, %v3919_v7  ;;  %v4178_v15 = vor.u32 %v5376_v8, %v4175_v9  ;;  %v3821_v36 = vld [vmem:[%s7493_s1 + $0x98] sm:$0xf] }
 0x10b   :  { %1344 = vmatpush.bf16.msra.mxu0 %v3942_v26  ;;  %1370 = vmatpush.bf16.msra.mxu2 %v3946_v30  ;;  %v4039_v23 = vld [vmem:[%s7493_s1 + $0x270] sm:$0xf0]  ;;  %v4038_v26 = vor.u32 %v5347_v19, %v4037_v16  ;;  %v5339_v29 = vld [vmem:[%s7493_s1 + $0x22c] sm:$0xf0]  ;;  %v3786_v30 = vor.u32 %v5279_v20, %v3783_v21  ;;  %v4141_v16 = vld [vmem:[%s7493_s1 + $0x318] sm:$0xf] }
 0x10c   :  { %v5271_v32 = vld [vmem:[%s7493_s1 + $0x14] sm:$0xf]  ;;  %v3887_v19 = vld [vmem:[%s7493_s1 + $0x138] sm:$0xf0]  ;;  %v5292_v37 = vld [vmem:[%s7493_s1 + $0xb4] sm:$0xf0] }
 0x10d   :  { %1357 = vmatpush.bf16.msra.mxu1 %v4198_v27  ;;  %1383 = vmatpush.bf16.msra.mxu3 %v4202_v31  ;;  %v5275_v27 = vld [vmem:[%s7493_s1 + $0x2c] sm:$0xf0]  ;;  %v4042_v31 = vor.u32 %v5343_v22, %v4039_v23  ;;  %v3751_v33 = vld [vmem:[%s7493_s1 + $0x30] sm:$0xf0]  ;;  %v5368_v20 = vld [vmem:[%s7493_s1 + $0x31c] sm:$0xf] }
 0x10e   :  { %v5335_v34 = vld [vmem:[%s7493_s1 + $0x214] sm:$0xf]  ;;  %v3750_v41 = vor.u32 %v5275_v27, %v3749_v24  ;;  %v3754_v46 = vor.u32 %v5271_v32, %v3751_v33  ;;  %v4143_v21 = vld [vmem:[%s7493_s1 + $0x338] sm:$0xf0]  ;;  %v3853_v24 = vld [vmem:[%s7493_s1 + $0xd8] sm:$0xf] }
 0x10f   :  { %1345 = vmatpush.bf16.msra.mxu0 %v3910_v38  ;;  %1371 = vmatpush.bf16.msra.mxu2 %v3914_v42  ;;  %v4007_v35 = vld [vmem:[%s7493_s1 + $0x230] sm:$0xf0]  ;;  %v4237_v38 = vld [vmem:[%s7493_s1 + $0x3d8] sm:$0xf]  ;;  %v4006_v42 = vor.u32 %v5339_v29, %v4005_v28  ;;  %v4146_v27 = vor.u32 %v5368_v20, %v4143_v21  ;;  %v5360_v32 = vld [vmem:[%s7493_s1 + $0x2dc] sm:$0xf] }
 0x110   :  { %v4010_v47 = vor.u32 %v5335_v34, %v4007_v35  ;;  %v4109_v28 = vld [vmem:[%s7493_s1 + $0x2d8] sm:$0xf]  ;;  %v4111_v33 = vld [vmem:[%s7493_s1 + $0x2f8] sm:$0xf0]  ;;  %v5401_v21 = vld [vmem:[%s7495_s3 + $0x20] sm:$0xff] }
 0x111   :  { %1358 = vmatpush.bf16.msra.mxu1 %v4166_v39  ;;  %1384 = vmatpush.bf16.msra.mxu3 %v4170_v43  ;;  %v5396_v39 = vld [vmem:[%s7493_s1 + $0x3f4] sm:$0xf0]  ;;  %v3983_v43 = vld [vmem:[%s7493_s1 + $0x1f8] sm:$0xf0] }
 0x112   :  { %v4238_v49 = vor.u32 %v5396_v39, %v4237_v38  ;;  %v3986_v52 = vor.u32 %v5328_v40, %v3983_v43  ;;  %v5364_v29 = vld [vmem:[%s7493_s1 + $0x2f4] sm:$0xf0]  ;;  %v4114_v39 = vor.u32 %v5360_v32, %v4111_v33  ;;  %v3823_v43 = vld [vmem:[%s7493_s1 + $0xb8] sm:$0xf0]  ;;  %v5417_v32 = vld [vmem:[%s7495_s3 + $0xa0] sm:$0xff] }
 0x113   :  { %1346 = vmatpush.bf16.msra.mxu0 %v3878_v50  ;;  %1372 = vmatpush.bf16.msra.mxu2 %v3882_v54  ;;  %v3949_v50 = vld [vmem:[%s7493_s1 + $0x198] sm:$0xf]  ;;  %v4110_v35 = vor.u32 %v5364_v29, %v4109_v28  ;;  %v5352_v44 = vld [vmem:[%s7493_s1 + $0x29c] sm:$0xf]  ;;  %v5427_v29 = vld [vmem:[%s7495_s3 + $0xf0] sm:$0xff] }
 0x114   :  { %v4205_v54 = vld [vmem:[%s7493_s1 + $0x398] sm:$0xf]  ;;  %v4079_v45 = vld [vmem:[%s7493_s1 + $0x2b8] sm:$0xf0] }
 0x115   :  { %1359 = vmatpush.bf16.msra.mxu1 %v4134_v51  ;;  %1385 = vmatpush.bf16.msra.mxu3 %v4138_v55  ;;  %v5324_v51 = vld [vmem:[%s7493_s1 + $0x1b4] sm:$0xf0]  ;;  %v5344_v57 = vld [vmem:[%s7493_s1 + $0x25c] sm:$0xf] }
 0x116   :  { %v5388_v55 = vld [vmem:[%s7493_s1 + $0x3b4] sm:$0xf0]  ;;  %v3950_v61 = vor.u32 %v5324_v51, %v3949_v50  ;;  %v4082_v51 = vor.u32 %v5352_v44, %v4079_v45  ;;  %v4047_v58 = vld [vmem:[%s7493_s1 + $0x278] sm:$0xf0]  ;;  %v5398_v45 = vld [vmem:[%s7495_s3 + $0x8] sm:$0xff] }
 0x117   :  { %1347 = vmatpush.bf16.msra.mxu0 %v3846_v63  ;;  %1373 = vmatpush.bf16.msra.mxu2 %v3850_v3  ;;  %v4206_v62 = vor.u32 %v5388_v55, %v4205_v54  ;;  %v3917_v63 = vld [vmem:[%s7493_s1 + $0x158] sm:$0xf]  ;;  %v5280_v54 = vld [vmem:[%s7493_s1 + $0x5c] sm:$0xf] }
 0x118   :  { %v4173_v3 = vld [vmem:[%s7493_s1 + $0x358] sm:$0xf]  ;;  %v3791_v55 = vld [vmem:[%s7493_s1 + $0x78] sm:$0xf0] }
 0x119   :  { %1360 = vmatpush.bf16.msra.mxu1 %v4102_v0  ;;  %1386 = vmatpush.bf16.msra.mxu3 %v4106_v5  ;;  %v5316_v0 = vld [vmem:[%s7493_s1 + $0x174] sm:$0xf0]  ;;  %v5336_v6 = vld [vmem:[%s7493_s1 + $0x21c] sm:$0xf] }
 0x11a   :  { %v5380_v5 = vld [vmem:[%s7493_s1 + $0x374] sm:$0xf0]  ;;  %v3918_v10 = vor.u32 %v5316_v0, %v3917_v63  ;;  %v3794_v63 = vor.u32 %v5280_v54, %v3791_v55  ;;  %v4050_v0 = vor.u32 %v5344_v57, %v4047_v58  ;;  %v4015_v7 = vld [vmem:[%s7493_s1 + $0x238] sm:$0xf0]  ;;  %v5405_v57 = vld [vmem:[%s7495_s3 + $0x40] sm:$0xff] }
 0x11b   :  { %1348 = vmatpush.bf16.msra.mxu0 %v3814_v12  ;;  %1374 = vmatpush.bf16.msra.mxu2 %v3818_v17  ;;  %v4174_v11 = vor.u32 %v5380_v5, %v4173_v3  ;;  %v3885_v12 = vld [vmem:[%s7493_s1 + $0x118] sm:$0xf]  ;;  %v5272_v3 = vld [vmem:[%s7493_s1 + $0x1c] sm:$0xf]  ;;  %v5414_v58 = vld [vmem:[%s7495_s3 + $0x88] sm:$0xff] }
 0x11c   :  { %v5372_v17 = vld [vmem:[%s7493_s1 + $0x334] sm:$0xf0]  ;;  %v3759_v5 = vld [vmem:[%s7493_s1 + $0x38] sm:$0xf0] }
 0x11d   :  { %1361 = vmatpush.bf16.msra.mxu1 %v4070_v13  ;;  %1387 = vmatpush.bf16.msra.mxu3 %v4074_v18  ;;  %v5308_v13 = vld [vmem:[%s7493_s1 + $0x134] sm:$0xf0]  ;;  %v5304_v18 = vld [vmem:[%s7493_s1 + $0x11c] sm:$0xf]  ;;  %v4142_v23 = vor.u32 %v5372_v17, %v4141_v16  ;;  %v5402_v16 = vld [vmem:[%s7495_s3 + $0x28] sm:$0xff] }
 0x11e   :  { %v3886_v22 = vor.u32 %v5308_v13, %v3885_v12  ;;  %v4077_v40 = vld [vmem:[%s7493_s1 + $0x298] sm:$0xf] }
 0x11f   :  { %1349 = vmatpush.bf16.msra.mxu0 %v3782_v25  ;;  %1375 = vmatpush.bf16.msra.mxu2 %v3786_v30  ;;  %v5300_v25 = vld [vmem:[%s7493_s1 + $0xf4] sm:$0xf0]  ;;  %v5296_v30 = vld [vmem:[%s7493_s1 + $0xdc] sm:$0xf] }
 0x120   :  { %v3854_v34 = vor.u32 %v5300_v25, %v3853_v24  ;;  %v5404_v12 = vld [vmem:[%s7495_s3 + $0x38] sm:$0xff]  ;;  %v5409_v24 = vld [vmem:[%s7495_s3 + $0x60] sm:$0xff]  ;;  %v5418_v25 = vld [vmem:[%s7495_s3 + $0xa8] sm:$0xff] }
 0x121   :  { %1362 = vmatpush.bf16.msra.mxu1 %v4038_v26  ;;  %1388 = vmatpush.bf16.msra.mxu3 %v4042_v31  ;;  %v3890_v26 = vor.u32 %v5304_v18, %v3887_v19  ;;  %v3855_v31 = vld [vmem:[%s7493_s1 + $0xf8] sm:$0xf0]  ;;  %v5410_v18 = vld [vmem:[%s7495_s3 + $0x68] sm:$0xff]  ;;  %v5419_v19 = vld [vmem:[%s7495_s3 + $0xb0] sm:$0xff] }
 0x122   :  { %v3858_v38 = vor.u32 %v5296_v30, %v3855_v31  ;;  %v5412_v13 = vld [vmem:[%s7495_s3 + $0x78] sm:$0xff] }
 0x123   :  { %1350 = vmatpush.bf16.msra.mxu0 %v3750_v41  ;;  %1376 = vmatpush.bf16.msra.mxu2 %v3754_v46  ;;  %v5356_v41 = vld [vmem:[%s7493_s1 + $0x2b4] sm:$0xf0]  ;;  %v3822_v46 = vor.u32 %v5292_v37, %v3821_v36  ;;  %v5399_v37 = vld [vmem:[%s7495_s3 + $0x10] sm:$0xff] }
 0x124   :  { %v5400_v28 = vld [vmem:[%s7495_s3 + $0x18] sm:$0xff] }
 0x125   :  { %1363 = vmatpush.bf16.msra.mxu1 %v4006_v42  ;;  %1389 = vmatpush.bf16.msra.mxu3 %v4010_v47  ;;  %v5288_v42 = vld [vmem:[%s7493_s1 + $0x9c] sm:$0xf]  ;;  %v4078_v47 = vor.u32 %v5356_v41, %v4077_v40  ;;  %v5407_v40 = vld [vmem:[%s7495_s3 + $0x50] sm:$0xff] }
 0x126   :  { %1351 = vmatmul.bf16.vlgmr.msra.gmra.mxu0 %v6670_v56  ;;  %1377 = vmatmul.bf16.vlgmr.msra.gmra.mxu2 %v6670_v56  ;;  %v3826_v50 = vor.u32 %v5288_v42, %v3823_v43  ;;  %v5408_v31 = vld [vmem:[%s7495_s3 + $0x58] sm:$0xff] }
 0x127   :  { %1395 = vmatpush.bf16.msrb.mxu0 %v3982_v48  ;;  %1421 = vmatpush.bf16.msrb.mxu2 %v3986_v52  ;;  %v3789_v48 = vld [vmem:[%s7493_s1 + $0x58] sm:$0xf] }
 0x128   :  { %1364 = vmatmul.bf16.vlgmr.msra.gmra.mxu1 %v6695_v4  ;;  %1390 = vmatmul.bf16.vlgmr.msra.gmra.mxu3 %v6695_v4  ;;  %v4045_v52 = vld [vmem:[%s7493_s1 + $0x258] sm:$0xf] }
 0x129   :  { %1408 = vmatpush.bf16.msrb.mxu1 %v4238_v49  ;;  %1434 = vmatpush.bf16.msrb.mxu3 %v4242_v53  ;;  %v5284_v49 = vld [vmem:[%s7493_s1 + $0x74] sm:$0xf0] }
 0x12a   :  { %v5348_v53 = vld [vmem:[%s7493_s1 + $0x274] sm:$0xf0]  ;;  %v3790_v59 = vor.u32 %v5284_v49, %v3789_v48  ;;  %v5406_v48 = vld [vmem:[%s7495_s3 + $0x48] sm:$0xff]  ;;  %v5415_v49 = vld [vmem:[%s7495_s3 + $0x90] sm:$0xff] }
 0x12b   :  { %1396 = vmatpush.bf16.msrb.mxu0 %v3950_v61  ;;  %1422 = vmatpush.bf16.msrb.mxu2 %v3954_v1  ;;  %v4046_v60 = vor.u32 %v5348_v53, %v4045_v52  ;;  %v3757_v61 = vld [vmem:[%s7493_s1 + $0x18] sm:$0xf]  ;;  %v5397_v52 = vld [vmem:[%s7495_s3] sm:$0xff] }
 0x12c   :  { %v4013_v1 = vld [vmem:[%s7493_s1 + $0x218] sm:$0xf] }
 0x12d   :  { %1409 = vmatpush.bf16.msrb.mxu1 %v4206_v62  ;;  %1435 = vmatpush.bf16.msrb.mxu3 %v4210_v2  ;;  %v5276_v62 = vld [vmem:[%s7493_s1 + $0x34] sm:$0xf0] }
 0x12e   :  { %v5340_v2 = vld [vmem:[%s7493_s1 + $0x234] sm:$0xf0]  ;;  %v3758_v8 = vor.u32 %v5276_v62, %v3757_v61  ;;  %v5413_v61 = vld [vmem:[%s7495_s3 + $0x80] sm:$0xff] }
 0x12f   :  { %1397 = vmatpush.bf16.msrb.mxu0 %v3918_v10  ;;  %1423 = vmatpush.bf16.msrb.mxu2 %v3922_v14  ;;  %v4014_v9 = vor.u32 %v5340_v2, %v4013_v1  ;;  %v3762_v10 = vor.u32 %v5272_v3, %v3759_v5  ;;  %v5403_v14 = vld [vmem:[%s7495_s3 + $0x30] sm:$0xff]  ;;  %v5416_v41 = vld [vmem:[%s7495_s3 + $0x98] sm:$0xff] }
 0x130   :  { %v5424_v53 = vld [vmem:[%s7495_s3 + $0xd8] sm:$0xff] }
 0x131   :  { %1410 = vmatpush.bf16.msrb.mxu1 %v4174_v11  ;;  %1436 = vmatpush.bf16.msrb.mxu3 %v4178_v15  ;;  %v4018_v11 = vor.u32 %v5336_v6, %v4015_v7  ;;  %v5420_v15 = vld [vmem:[%s7495_s3 + $0xb8] sm:$0xff]  ;;  %v5435_v6 = vld [vmem:[%s7495_s3 + $0x130] sm:$0xff]  ;;  %v5421_v7 = vld [vmem:[%s7495_s3 + $0xc0] sm:$0xff] }
 0x132   :  { %v5436_v62 = vld [vmem:[%s7495_s3 + $0x138] sm:$0xff] }
 0x133   :  { %1398 = vmatpush.bf16.msrb.mxu0 %v3886_v22  ;;  %1424 = vmatpush.bf16.msrb.mxu2 %v3890_v26  ;;  %v5428_v22 = vld [vmem:[%s7495_s3 + $0xf8] sm:$0xff] }
 0x135   :  { %1411 = vmatpush.bf16.msrb.mxu1 %v4142_v23  ;;  %1437 = vmatpush.bf16.msrb.mxu3 %v4146_v27 }
 0x137   :  { %1399 = vmatpush.bf16.msrb.mxu0 %v3854_v34  ;;  %1425 = vmatpush.bf16.msrb.mxu2 %v3858_v38  ;;  %v5426_v38 = vld [vmem:[%s7495_s3 + $0xe8] sm:$0xff] }
 0x139   :  { %1412 = vmatpush.bf16.msrb.mxu1 %v4110_v35  ;;  %1438 = vmatpush.bf16.msrb.mxu3 %v4114_v39 }
 0x13b   :  { %1400 = vmatpush.bf16.msrb.mxu0 %v3822_v46  ;;  %1426 = vmatpush.bf16.msrb.mxu2 %v3826_v50  ;;  %v5425_v46 = vld [vmem:[%s7495_s3 + $0xe0] sm:$0xff] }
 0x13d   :  { %1413 = vmatpush.bf16.msrb.mxu1 %v4078_v47  ;;  %1439 = vmatpush.bf16.msrb.mxu3 %v4082_v51 }
 0x13f   :  { %1401 = vmatpush.bf16.msrb.mxu0 %v3790_v59  ;;  %1427 = vmatpush.bf16.msrb.mxu2 %v3794_v63 }
 0x141   :  { %1414 = vmatpush.bf16.msrb.mxu1 %v4046_v60  ;;  %1440 = vmatpush.bf16.msrb.mxu3 %v4050_v0  ;;  %v5423_v60 = vld [vmem:[%s7495_s3 + $0xd0] sm:$0xff]  ;;  %v5422_v0 = vld [vmem:[%s7495_s3 + $0xc8] sm:$0xff] }
 0x143   :  { %1402 = vmatpush.bf16.msrb.mxu0 %v3758_v8  ;;  %1428 = vmatpush.bf16.msrb.mxu2 %v3762_v10  ;;  %v5444_v8 = vld [vmem:[%s7495_s3 + $0x178] sm:$0xff] }
 0x145   :  { %1415 = vmatpush.bf16.msrb.mxu1 %v4014_v9  ;;  %1441 = vmatpush.bf16.msrb.mxu3 %v4018_v11 }
 0x146   :  { %1403 = vmatmul.bf16.vlgmr.msrb.gmra.mxu0 %v6670_v56  ;;  %1429 = vmatmul.bf16.vlgmr.msrb.gmra.mxu2 %v6670_v56  ;;  %v7227_v56 = vld [vmem:[%s7494_s2] sm:$0xff] }
 0x147   :  { %2011 = vmatpush.bf16.msra.mxu0 %v5404_v12  ;;  %2037 = vmatpush.bf16.msra.mxu2 %v5420_v15  ;;  %v583_v17 = vperm.slane %v7227_v56, 0  ;;  %v584_v27 = vperm.slane %v7227_v56, 1  ;;  %v585_v5 = vperm.slane %v7227_v56, 2  ;;  %v5434_v12 = vld [vmem:[%s7495_s3 + $0x128] sm:$0xff]  ;;  %v5443_v15 = vld [vmem:[%s7495_s3 + $0x170] sm:$0xff] }
 0x148   :  { %1416 = vmatmul.bf16.vlgmr.msrb.gmra.mxu1 %v6695_v4  ;;  %1442 = vmatmul.bf16.vlgmr.msrb.gmra.mxu3 %v6695_v4  ;;  %v5411_v4 = vld [vmem:[%s7495_s3 + $0x70] sm:$0xff] }
 0x149   :  { %2024 = vmatpush.bf16.msra.mxu1 %v5412_v13  ;;  %2050 = vmatpush.bf16.msra.mxu3 %v5428_v22 }
 0x14b   :  { %2012 = vmatpush.bf16.msra.mxu0 %v5403_v14  ;;  %2038 = vmatpush.bf16.msra.mxu2 %v5419_v19 }
 0x14d   :  { %2025 = vmatpush.bf16.msra.mxu1 %v5411_v4  ;;  %2051 = vmatpush.bf16.msra.mxu3 %v5427_v29  ;;  %v586_v4 = vperm.slane %v7227_v56, 3  ;;  %v5441_v29 = vld [vmem:[%s7495_s3 + $0x160] sm:$0xff] }
 0x14f   :  { %2013 = vmatpush.bf16.msra.mxu0 %v5402_v16  ;;  %2039 = vmatpush.bf16.msra.mxu2 %v5418_v25 }
 0x151   :  { %2026 = vmatpush.bf16.msra.mxu1 %v5410_v18  ;;  %2052 = vmatpush.bf16.msra.mxu3 %v5426_v38  ;;  %v5433_v18 = vld [vmem:[%s7495_s3 + $0x120] sm:$0xff]  ;;  %v5439_v38 = vld [vmem:[%s7495_s3 + $0x150] sm:$0xff] }
 0x153   :  { %2014 = vmatpush.bf16.msra.mxu0 %v5401_v21  ;;  %2040 = vmatpush.bf16.msra.mxu2 %v5417_v32 }
 0x155   :  { %2027 = vmatpush.bf16.msra.mxu1 %v5409_v24  ;;  %2053 = vmatpush.bf16.msra.mxu3 %v5425_v46  ;;  %v5451_v46 = vld [vmem:[%s7495_s3 + $0x1b0] sm:$0xff] }
 0x157   :  { %2015 = vmatpush.bf16.msra.mxu0 %v5400_v28  ;;  %2041 = vmatpush.bf16.msra.mxu2 %v5416_v41 }
 0x159   :  { %2028 = vmatpush.bf16.msra.mxu1 %v5408_v31  ;;  %2054 = vmatpush.bf16.msra.mxu3 %v5424_v53  ;;  %v5431_v31 = vld [vmem:[%s7495_s3 + $0x110] sm:$0xff] }
 0x15b   :  { %2016 = vmatpush.bf16.msra.mxu0 %v5399_v37  ;;  %2042 = vmatpush.bf16.msra.mxu2 %v5415_v49  ;;  %v5430_v37 = vld [vmem:[%s7495_s3 + $0x108] sm:$0xff]  ;;  %v5460_v49 = vld [vmem:[%s7495_s3 + $0x1f8] sm:$0xff] }
 0x15d   :  { %2029 = vmatpush.bf16.msra.mxu1 %v5407_v40  ;;  %2055 = vmatpush.bf16.msra.mxu3 %v5423_v60  ;;  %v5429_v40 = vld [vmem:[%s7495_s3 + $0x100] sm:$0xff] }
 0x15e   :  { %v5449_v60 = vld [vmem:[%s7495_s3 + $0x1a0] sm:$0xff] }
 0x15f   :  { %2017 = vmatpush.bf16.msra.mxu0 %v5398_v45  ;;  %2043 = vmatpush.bf16.msra.mxu2 %v5414_v58 }
 0x161   :  { %2030 = vmatpush.bf16.msra.mxu1 %v5406_v48  ;;  %2056 = vmatpush.bf16.msra.mxu3 %v5422_v0  ;;  %v5437_v48 = vld [vmem:[%s7495_s3 + $0x140] sm:$0xff] }
 0x163   :  { %v1248_v20 = vpop.f32.mrf.mxu0  ;;  %2018 = vmatpush.bf16.msra.mxu0 %v5397_v52  ;;  %2044 = vmatpush.bf16.msra.mxu2 %v5413_v61  ;;  %v5450_v52 = vld [vmem:[%s7495_s3 + $0x1a8] sm:$0xff] }
 0x164   :  { %v1249_v23 = vadd.f32 %v1248_v20, %v583_v17 }
 0x165   :  { %v1261_v26 = vpop.f32.mrf.mxu1  ;;  %2031 = vmatpush.bf16.msra.mxu1 %v5405_v57  ;;  %2057 = vmatpush.bf16.msra.mxu3 %v5421_v7  ;;  %v5459_v57 = vld [vmem:[%s7495_s3 + $0x1f0] sm:$0xff] }
 0x166   :  { %v1262_v30 = vadd.f32 %v1261_v26, %v1249_v23  ;;  %v5442_v23 = vld [vmem:[%s7495_s3 + $0x168] sm:$0xff] }
 0x167   :  { %2063 = vmatpush.bf16.msrb.mxu0 %v5436_v62 }
 0x168   :  { %v1447_v33 = vsub.f32 0.0, %v1262_v30 }
 0x169   :  { %v1274_v34 = vpop.f32.mrf.mxu2  ;;  %2076 = vmatpush.bf16.msrb.mxu1 %v5444_v8  ;;  %2102 = vmatpush.bf16.msrb.mxu3 %v5460_v49  ;;  %v5457_v8 = vld [vmem:[%s7495_s3 + $0x1e0] sm:$0xff] }
 0x16a   :  { %v1275_v35 = vadd.f32 %v1274_v34, %v584_v27  ;;  %v1455_v39 = vmul.f32 1.442695, %v1447_v33  ;;  %v5432_v27 = vld [vmem:[%s7495_s3 + $0x118] sm:$0xff] }
 0x16b   :  { %v1250_v36 = vpop.f32.mrf.mxu0  ;;  %v1287_v42 = vpop.f32.mrf.mxu3  ;;  %2064 = vmatpush.bf16.msrb.mxu0 %v5435_v6 }
 0x16c   :  { %5656 = vpow2.f32 %v1455_v39  ;;  %v1288_v43 = vadd.f32 %v1287_v42, %v1275_v35  ;;  %v5440_v35 = vld [vmem:[%s7495_s3 + $0x158] sm:$0xff] }
 0x16d   :  { %v1263_v44 = vpop.f32.mrf.mxu1  ;;  %2077 = vmatpush.bf16.msrb.mxu1 %v5443_v15  ;;  %v5452_v42 = vld [vmem:[%s7495_s3 + $0x1b8] sm:$0xff]  ;;  %2103 = vmatpush.bf16.msrb.mxu3 %v5459_v57 }
 0x16e   :  { %v1448_v47 = vsub.f32 0.0, %v1288_v43  ;;  %v5438_v43 = vld [vmem:[%s7495_s3 + $0x148] sm:$0xff]  ;;  %2089 = vmatpush.bf16.msrb.mxu2 %v5452_v42 }
 0x16f   :  { %2065 = vmatpush.bf16.msrb.mxu0 %v5434_v12 }
 0x170   :  { %v1457_v51 = vmul.f32 1.442695, %v1448_v47  ;;  %v587_v47 = vperm.slane %v7227_v56, 4 }
 0x171   :  { %v1276_v50 = vpop.f32.mrf.mxu2  ;;  %2078 = vmatpush.bf16.msrb.mxu1 %v5442_v23 }
 0x172   :  { %v5657_v54 = vpop.eup %5656  ;;  %5658 = vpow2.f32 %v1457_v51  ;;  %2090 = vmatpush.bf16.msrb.mxu2 %v5451_v46 }
 0x173   :  { %v1471_v55 = vadd.f32 1.0, %v5657_v54  ;;  %v1289_v59 = vpop.f32.mrf.mxu3  ;;  %2066 = vmatpush.bf16.msrb.mxu0 %v5433_v18  ;;  %v5445_v18 = vld [vmem:[%s7495_s3 + $0x180] sm:$0xff] }
 0x174   :  { %v588_v59 = vperm.slane %v7227_v56, 5 }
 0x175   :  { %5660 = vrcp.f32 %v1471_v55  ;;  %2079 = vmatpush.bf16.msrb.mxu1 %v5441_v29 }
 0x176   :  { %2091 = vmatpush.bf16.msrb.mxu2 %v5450_v52  ;;  %v5655_v52 = vld [vmem:[%s7496_s4] ss:$0 sm:$0xff] }
 0x177   :  { %2067 = vmatpush.bf16.msrb.mxu0 %v5432_v27 }
 0x178   :  { %v5659_v63 = vpop.eup %5658 }
 0x179   :  { %v1472_v1 = vadd.f32 1.0, %v5659_v63  ;;  %2080 = vmatpush.bf16.msrb.mxu1 %v5440_v35  ;;  %v5458_v63 = vld [vmem:[%s7495_s3 + $0x1e8] sm:$0xff] }
 0x17a   :  { %2092 = vmatpush.bf16.msrb.mxu2 %v5449_v60  ;;  %2104 = vmatpush.bf16.msrb.mxu3 %v5458_v63 }
 0x17b   :  { %v5661_v2 = vpop.eup %5660  ;;  %5662 = vrcp.f32 %v1472_v1  ;;  %2068 = vmatpush.bf16.msrb.mxu0 %v5431_v31 }
 0x17c   :  { %v1487_v3 = vpack.c.bf16 %v5661_v2, %v5661_v2 }
 0x17d   :  { %2081 = vmatpush.bf16.msrb.mxu1 %v5439_v38 }
 0x17e   :  { %2019 = vmatmul.bf16.vlgmr.msra.gmra.mxu0 %v1487_v3  ;;  %2105 = vmatpush.bf16.msrb.mxu3 %v5457_v8 }
 0x17f   :  { %2069 = vmatpush.bf16.msrb.mxu0 %v5430_v37 }
 0x181   :  { %v5663_v13 = vpop.eup %5662  ;;  %2082 = vmatpush.bf16.msrb.mxu1 %v5438_v43 }
 0x182   :  { %v1488_v16 = vpack.c.bf16 %v5663_v13, %v5663_v13  ;;  %v5456_v13 = vld [vmem:[%s7495_s3 + $0x1d8] sm:$0xff] }
 0x183   :  { %v1300_v9 = vpop.f32.mrf.mxu0  ;;  %2070 = vmatpush.bf16.msrb.mxu0 %v5429_v40  ;;  %2106 = vmatpush.bf16.msrb.mxu3 %v5456_v13 }
 0x184   :  { %v1301_v10 = vadd.f32 %v1300_v9, %v585_v5  ;;  %2032 = vmatmul.bf16.vlgmr.msra.gmra.mxu1 %v1488_v16  ;;  %v5448_v5 = vld [vmem:[%s7495_s3 + $0x198] sm:$0xff]  ;;  %v5446_v16 = vld [vmem:[%s7495_s3 + $0x188] sm:$0xff] }
 0x185   :  { %v1313_v11 = vpop.f32.mrf.mxu1  ;;  %2083 = vmatpush.bf16.msrb.mxu1 %v5437_v48  ;;  %2093 = vmatpush.bf16.msrb.mxu2 %v5448_v5 }
 0x186   :  { %v1314_v14 = vadd.f32 %v1313_v11, %v1301_v10  ;;  %v5447_v10 = vld [vmem:[%s7495_s3 + $0x190] sm:$0xff] }
 0x188   :  { %v1449_v17 = vsub.f32 0.0, %v1314_v14 }
 0x189   :  { %v1326_v19 = vpop.f32.mrf.mxu2  ;;  %2094 = vmatpush.bf16.msrb.mxu2 %v5447_v10 }
 0x18a   :  { %v1459_v20 = vmul.f32 1.442695, %v1449_v17  ;;  %v1327_v21 = vadd.f32 %v1326_v19, %v586_v4  ;;  %v5455_v17 = vld [vmem:[%s7495_s3 + $0x1d0] sm:$0xff] }
 0x18b   :  { %v1339_v22 = vpop.f32.mrf.mxu3  ;;  %v1302_v24 = vpop.f32.mrf.mxu0  ;;  %2107 = vmatpush.bf16.msrb.mxu3 %v5455_v17 }
 0x18c   :  { %5664 = vpow2.f32 %v1459_v20  ;;  %v1340_v25 = vadd.f32 %v1339_v22, %v1327_v21  ;;  %v5454_v21 = vld [vmem:[%s7495_s3 + $0x1c8] sm:$0xff]  ;;  %v589_v24 = vperm.slane %v7227_v56, 6 }
 0x18d   :  { %v1315_v26 = vpop.f32.mrf.mxu1  ;;  %2095 = vmatpush.bf16.msrb.mxu2 %v5446_v16 }
 0x18e   :  { %v1450_v28 = vsub.f32 0.0, %v1340_v25  ;;  %v5453_v25 = vld [vmem:[%s7495_s3 + $0x1c0] sm:$0xff] }
 0x18f   :  { %2108 = vmatpush.bf16.msrb.mxu3 %v5454_v21 }
 0x190   :  { %v1461_v30 = vmul.f32 1.442695, %v1450_v28 }
 0x191   :  { %v1328_v32 = vpop.f32.mrf.mxu2  ;;  %2096 = vmatpush.bf16.msrb.mxu2 %v5445_v18 }
 0x192   :  { %v5665_v33 = vpop.eup %5664  ;;  %5666 = vpow2.f32 %v1461_v30  ;;  %v590_v32 = vperm.slane %v7227_v56, 7 }
 0x193   :  { %v1341_v34 = vpop.f32.mrf.mxu3  ;;  %v1473_v36 = vadd.f32 1.0, %v5665_v33  ;;  %2109 = vmatpush.bf16.msrb.mxu3 %v5453_v25 }
 0x195   :  { %5668 = vrcp.f32 %v1473_v36 }
 0x198   :  { %v5667_v39 = vpop.eup %5666 }
 0x199   :  { %v1474_v41 = vadd.f32 1.0, %v5667_v39 }
 0x19b   :  { %v5669_v44 = vpop.eup %5668  ;;  %5670 = vrcp.f32 %v1474_v41 }
 0x19c   :  { %v1489_v45 = vpack.c.bf16 %v5669_v44, %v5669_v44 }
 0x19e   :  { %2045 = vmatmul.bf16.vlgmr.msra.gmra.mxu2 %v1489_v45 }
 0x1a1   :  { %v5671_v50 = vpop.eup %5670 }
 0x1a2   :  { %v1490_v53 = vpack.c.bf16 %v5671_v50, %v5671_v50 }
 0x1a3   :  { %v1352_v51 = vpop.f32.mrf.mxu0 }
 0x1a4   :  { %v1353_v54 = vadd.f32 %v1352_v51, %v587_v47  ;;  %2058 = vmatmul.bf16.vlgmr.msra.gmra.mxu3 %v1490_v53 }
 0x1a5   :  { %v1365_v55 = vpop.f32.mrf.mxu1 }
 0x1a6   :  { %v1366_v58 = vadd.f32 %v1365_v55, %v1353_v54 }
 0x1a8   :  { %v1451_v61 = vsub.f32 0.0, %v1366_v58 }
 0x1a9   :  { %v1378_v62 = vpop.f32.mrf.mxu2 }
 0x1aa   :  { %v1463_v0 = vmul.f32 1.442695, %v1451_v61  ;;  %v1379_v1 = vadd.f32 %v1378_v62, %v588_v59 }
 0x1ab   :  { %v1391_v2 = vpop.f32.mrf.mxu3  ;;  %v1354_v3 = vpop.f32.mrf.mxu0 }
 0x1ac   :  { %5672 = vpow2.f32 %v1463_v0  ;;  %v1392_v6 = vadd.f32 %v1391_v2, %v1379_v1 }
 0x1ad   :  { %v1367_v7 = vpop.f32.mrf.mxu1 }
 0x1ae   :  { %v1452_v9 = vsub.f32 0.0, %v1392_v6 }
 0x1b0   :  { %v1465_v11 = vmul.f32 1.442695, %v1452_v9 }
 0x1b1   :  { %v1380_v12 = vpop.f32.mrf.mxu2 }
 0x1b2   :  { %v5673_v14 = vpop.eup %5672  ;;  %5674 = vpow2.f32 %v1465_v11 }
 0x1b3   :  { %v1393_v4 = vpop.f32.mrf.mxu3  ;;  %v1475_v15 = vadd.f32 1.0, %v5673_v14 }
 0x1b5   :  { %5676 = vrcp.f32 %v1475_v15 }
 0x1b8   :  { %v5675_v19 = vpop.eup %5674 }
 0x1b9   :  { %v1476_v20 = vadd.f32 1.0, %v5675_v19 }
 0x1bb   :  { %v5677_v22 = vpop.eup %5676  ;;  %5678 = vrcp.f32 %v1476_v20 }
 0x1bc   :  { %v1491_v23 = vpack.c.bf16 %v5677_v22, %v5677_v22 }
 0x1be   :  { %2071 = vmatmul.bf16.vlgmr.msrb.gmra.mxu0 %v1491_v23 }
 0x1c1   :  { %v5679_v28 = vpop.eup %5678 }
 0x1c2   :  { %v1492_v30 = vpack.c.bf16 %v5679_v28, %v5679_v28 }
 0x1c3   :  { %v1404_v26 = vpop.f32.mrf.mxu0 }
 0x1c4   :  { %v1405_v29 = vadd.f32 %v1404_v26, %v589_v24  ;;  %2084 = vmatmul.bf16.vlgmr.msrb.gmra.mxu1 %v1492_v30 }
 0x1c5   :  { %v1417_v27 = vpop.f32.mrf.mxu1 }
 0x1c6   :  { %v1418_v31 = vadd.f32 %v1417_v27, %v1405_v29 }
 0x1c8   :  { %v1453_v33 = vsub.f32 0.0, %v1418_v31 }
 0x1c9   :  { %v1430_v35 = vpop.f32.mrf.mxu2 }
 0x1ca   :  { %v1467_v34 = vmul.f32 1.442695, %v1453_v33  ;;  %v1431_v37 = vadd.f32 %v1430_v35, %v590_v32 }
 0x1cb   :  { %v1443_v36 = vpop.f32.mrf.mxu3  ;;  %v1406_v38 = vpop.f32.mrf.mxu0 }
 0x1cc   :  { %5680 = vpow2.f32 %v1467_v34  ;;  %v1444_v40 = vadd.f32 %v1443_v36, %v1431_v37 }
 0x1cd   :  { %v1419_v39 = vpop.f32.mrf.mxu1 }
 0x1ce   :  { %v1454_v41 = vsub.f32 0.0, %v1444_v40 }
 0x1d0   :  { %v1469_v42 = vmul.f32 1.442695, %v1454_v41 }
 0x1d1   :  { %v1432_v44 = vpop.f32.mrf.mxu2 }
 0x1d2   :  { %v5681_v43 = vpop.eup %5680  ;;  %5682 = vpow2.f32 %v1469_v42 }
 0x1d3   :  { %v1445_v45 = vpop.f32.mrf.mxu3  ;;  %v1477_v46 = vadd.f32 1.0, %v5681_v43 }
 0x1d5   :  { %5684 = vrcp.f32 %v1477_v46 }
 0x1d8   :  { %v5683_v47 = vpop.eup %5682 }
 0x1d9   :  { %v1478_v48 = vadd.f32 1.0, %v5683_v47 }
 0x1db   :  { %v5685_v56 = vpop.eup %5684  ;;  %5686 = vrcp.f32 %v1478_v48 }
 0x1dc   :  { %v1493_v49 = vpack.c.bf16 %v5685_v56, %v5685_v56 }
 0x1de   :  { %2097 = vmatmul.bf16.vlgmr.msrb.gmra.mxu2 %v1493_v49 }
 0x1e1   :  { %v5687_v50 = vpop.eup %5686 }
 0x1e2   :  { %v1494_v51 = vpack.c.bf16 %v5687_v50, %v5687_v50 }
 0x1e4   :  { %2110 = vmatmul.bf16.vlgmr.msrb.gmra.mxu3 %v1494_v51 }
 0x1fb   :  { %v2020_v53 = vpop.f32.mrf.mxu0 }
 0x1fc   :  { %v2021_v54 = vadd.f32 %v5655_v52, %v2020_v53 }
 0x201   :  { %v2033_v55 = vpop.f32.mrf.mxu1 }
 0x202   :  { %v2034_v57 = vadd.f32 %v2033_v55, %v2021_v54 }
 0x203   :  { %v2022_v58 = vpop.f32.mrf.mxu0 }
 0x209   :  { %v2035_v59 = vpop.f32.mrf.mxu1 }
 0x221   :  { %v2046_v60 = vpop.f32.mrf.mxu2 }
 0x222   :  { %v2047_v5 = vadd.f32 %v2046_v60, %v2034_v57 }
 0x227   :  { %v2059_v61 = vpop.f32.mrf.mxu3 }
 0x228   :  { %v2060_v6 = vadd.f32 %v2059_v61, %v2047_v5 }
 0x229   :  { %v2048_v62 = vpop.f32.mrf.mxu2 }
 0x22f   :  { %v2061_v63 = vpop.f32.mrf.mxu3 }
 0x23b   :  { %v2072_v0 = vpop.f32.mrf.mxu0 }
 0x23c   :  { %v2073_v8 = vadd.f32 %v2072_v0, %v2060_v6 }
 0x241   :  { %v2085_v1 = vpop.f32.mrf.mxu1 }
 0x242   :  { %v2086_v9 = vadd.f32 %v2085_v1, %v2073_v8 }
 0x243   :  { %v2074_v2 = vpop.f32.mrf.mxu0 }
 0x249   :  { %v2087_v3 = vpop.f32.mrf.mxu1 }
 0x261   :  { %v2098_v7 = vpop.f32.mrf.mxu2 }
 0x262   :  { %v2099_v10 = vadd.f32 %v2098_v7, %v2086_v9 }
 0x267   :  { %v2111_v11 = vpop.f32.mrf.mxu3 }
 0x268   :  { %v2112_v12 = vadd.f32 %v2111_v11, %v2099_v10 }
 0x269   :  { %v2100_v13 = vpop.f32.mrf.mxu2 }
 0x26a   :  { %v2115_v14 = vsub.f32 0.0, %v2112_v12 }
 0x26c   :  { %v2116_v4 = vmul.f32 1.442695, %v2115_v14 }
 0x26e   :  { %5688 = vpow2.f32 %v2116_v4 }
 0x26f   :  { %v2113_v15 = vpop.f32.mrf.mxu3 }
 0x274   :  { %v5689_v16 = vpop.eup %5688 }
 0x275   :  { %v2118_v17 = vadd.f32 1.0, %v5689_v16 }
 0x277   :  { %5690 = vrcp.f32 %v2118_v17 }
 0x27d   :  { %v7423_v18 = vpop.eup %5690 }
 0x27e   :  { %2120 = vst [vmem:[#allocation5] sm:$0xff] %v7423_v18 }
 0x27f   :  { %5780 = dma.done.wait [#allocation4], 8192 }
 0x280   :  { %5781 = vsyncadd [#allocation4], 4294959104 }
 0x281   :  { %5782 = dma.done.wait [#allocation4 + $0x1], 16384 }
 0x282   :  { %5783 = vsyncadd [#allocation4 + $0x1], 4294950912  ;;  %v4725_v19 = vld [vmem:[#allocation2 + $0x1c0] sm:$0xf]  ;;  %v5517_v21 = vld [vmem:[#allocation2 + $0x1c4] sm:$0xf] }
 0x283   :  { %v5521_v20 = vld [vmem:[#allocation2 + $0x1dc] sm:$0xf0]  ;;  %v4727_v23 = vld [vmem:[#allocation2 + $0x1e0] sm:$0xf0]  ;;  %v4733_v24 = vld [vmem:[#allocation2 + $0x1c8] sm:$0xf] }
 0x284   :  { %v4726_v22 = vor.u32 %v5521_v20, %v4725_v19  ;;  %v5522_v25 = vld [vmem:[#allocation2 + $0x1e4] sm:$0xf0]  ;;  %v4730_v26 = vor.u32 %v5517_v21, %v4727_v23  ;;  %v5518_v28 = vld [vmem:[#allocation2 + $0x1cc] sm:$0xf]  ;;  %v4693_v30 = vld [vmem:[#allocation2 + $0x180] sm:$0xf] }
 0x285   :  { %v4734_v27 = vor.u32 %v5522_v25, %v4733_v24  ;;  %v4735_v29 = vld [vmem:[#allocation2 + $0x1e8] sm:$0xf0]  ;;  %v5513_v32 = vld [vmem:[#allocation2 + $0x19c] sm:$0xf0]  ;;  %v5509_v33 = vld [vmem:[#allocation2 + $0x184] sm:$0xf] }
 0x286   :  { %2660 = vmatpush.bf16.msra.mxu0 %v4726_v22  ;;  %v4738_v31 = vor.u32 %v5518_v28, %v4735_v29  ;;  %v4695_v34 = vld [vmem:[#allocation2 + $0x1a0] sm:$0xf0]  ;;  %2673 = vmatpush.bf16.msra.mxu1 %v4730_v26  ;;  %v4694_v35 = vor.u32 %v5513_v32, %v4693_v30  ;;  %v4701_v37 = vld [vmem:[#allocation2 + $0x188] sm:$0xf]  ;;  %v5510_v39 = vld [vmem:[#allocation2 + $0x18c] sm:$0xf] }
 0x287   :  { %2686 = vmatpush.bf16.msra.mxu2 %v4734_v27  ;;  %v4698_v36 = vor.u32 %v5509_v33, %v4695_v34  ;;  %v5514_v38 = vld [vmem:[#allocation2 + $0x1a4] sm:$0xf0]  ;;  %v4703_v41 = vld [vmem:[#allocation2 + $0x1a8] sm:$0xf0]  ;;  %v4661_v42 = vld [vmem:[#allocation2 + $0x140] sm:$0xf] }
 0x288   :  { %2699 = vmatpush.bf16.msra.mxu3 %v4738_v31  ;;  %v4702_v40 = vor.u32 %v5514_v38, %v4701_v37  ;;  %v5505_v43 = vld [vmem:[#allocation2 + $0x15c] sm:$0xf0]  ;;  %v4706_v44 = vor.u32 %v5510_v39, %v4703_v41  ;;  %v5501_v45 = vld [vmem:[#allocation2 + $0x144] sm:$0xf]  ;;  %v4669_v47 = vld [vmem:[#allocation2 + $0x148] sm:$0xf] }
 0x289   :  { %v4663_v46 = vld [vmem:[#allocation2 + $0x160] sm:$0xf0]  ;;  %v4662_v48 = vor.u32 %v5505_v43, %v4661_v42  ;;  %v5506_v56 = vld [vmem:[#allocation2 + $0x164] sm:$0xf0]  ;;  %v5502_v49 = vld [vmem:[#allocation2 + $0x14c] sm:$0xf] }
 0x28a   :  { %2661 = vmatpush.bf16.msra.mxu0 %v4694_v35  ;;  %v4671_v50 = vld [vmem:[#allocation2 + $0x168] sm:$0xf0]  ;;  %2674 = vmatpush.bf16.msra.mxu1 %v4698_v36  ;;  %v4666_v51 = vor.u32 %v5501_v45, %v4663_v46  ;;  %v4670_v52 = vor.u32 %v5506_v56, %v4669_v47  ;;  %v4629_v53 = vld [vmem:[#allocation2 + $0x100] sm:$0xf]  ;;  %v5493_v55 = vld [vmem:[#allocation2 + $0x104] sm:$0xf] }
 0x28b   :  { %2687 = vmatpush.bf16.msra.mxu2 %v4702_v40  ;;  %v5497_v54 = vld [vmem:[#allocation2 + $0x11c] sm:$0xf0]  ;;  %v4674_v57 = vor.u32 %v5502_v49, %v4671_v50  ;;  %v4631_v58 = vld [vmem:[#allocation2 + $0x120] sm:$0xf0]  ;;  %v4637_v59 = vld [vmem:[#allocation2 + $0x108] sm:$0xf] }
 0x28c   :  { %2700 = vmatpush.bf16.msra.mxu3 %v4706_v44  ;;  %v5498_v60 = vld [vmem:[#allocation2 + $0x124] sm:$0xf0]  ;;  %v5494_v61 = vld [vmem:[#allocation2 + $0x10c] sm:$0xf]  ;;  %v4630_v63 = vor.u32 %v5497_v54, %v4629_v53  ;;  %v4634_v0 = vor.u32 %v5493_v55, %v4631_v58  ;;  %v4597_v2 = vld [vmem:[#allocation2 + $0xc0] sm:$0xf] }
 0x28d   :  { %v4639_v62 = vld [vmem:[#allocation2 + $0x128] sm:$0xf0]  ;;  %v4638_v1 = vor.u32 %v5498_v60, %v4637_v59  ;;  %v5489_v3 = vld [vmem:[#allocation2 + $0xdc] sm:$0xf0]  ;;  %v5485_v5 = vld [vmem:[#allocation2 + $0xc4] sm:$0xf] }
 0x28e   :  { %2662 = vmatpush.bf16.msra.mxu0 %v4662_v48  ;;  %2675 = vmatpush.bf16.msra.mxu1 %v4666_v51  ;;  %v4642_v6 = vor.u32 %v5494_v61, %v4639_v62  ;;  %v4599_v7 = vld [vmem:[#allocation2 + $0xe0] sm:$0xf0]  ;;  %v4605_v8 = vld [vmem:[#allocation2 + $0xc8] sm:$0xf]  ;;  %v5486_v10 = vld [vmem:[#allocation2 + $0xcc] sm:$0xf]  ;;  %v4598_v12 = vor.u32 %v5489_v3, %v4597_v2  ;;  %v7428_v3 = vpack.c.bf16 %v7423_v18, %v7423_v18 }
 0x28f   :  { %2688 = vmatpush.bf16.msra.mxu2 %v4670_v52  ;;  %v5490_v9 = vld [vmem:[#allocation2 + $0xe4] sm:$0xf0]  ;;  %v4607_v11 = vld [vmem:[#allocation2 + $0xe8] sm:$0xf0]  ;;  %v4602_v13 = vor.u32 %v5485_v5, %v4599_v7  ;;  %v4565_v4 = vld [vmem:[#allocation2 + $0x80] sm:$0xf] }
 0x290   :  { %2701 = vmatpush.bf16.msra.mxu3 %v4674_v57  ;;  %v4606_v14 = vor.u32 %v5490_v9, %v4605_v8  ;;  %v5481_v15 = vld [vmem:[#allocation2 + $0x9c] sm:$0xf0]  ;;  %v5477_v16 = vld [vmem:[#allocation2 + $0x84] sm:$0xf]  ;;  %v4610_v17 = vor.u32 %v5486_v10, %v4607_v11  ;;  %v4573_v20 = vld [vmem:[#allocation2 + $0x88] sm:$0xf] }
 0x291   :  { %v4567_v19 = vld [vmem:[#allocation2 + $0xa0] sm:$0xf0]  ;;  %v5482_v21 = vld [vmem:[#allocation2 + $0xa4] sm:$0xf0]  ;;  %v5478_v22 = vld [vmem:[#allocation2 + $0x8c] sm:$0xf]  ;;  %v4566_v24 = vor.u32 %v5481_v15, %v4565_v4 }
 0x292   :  { %2663 = vmatpush.bf16.msra.mxu0 %v4630_v63  ;;  %2676 = vmatpush.bf16.msra.mxu1 %v4634_v0  ;;  %v4575_v23 = vld [vmem:[#allocation2 + $0xa8] sm:$0xf0]  ;;  %v4570_v25 = vor.u32 %v5477_v16, %v4567_v19  ;;  %v4574_v26 = vor.u32 %v5482_v21, %v4573_v20  ;;  %v4533_v27 = vld [vmem:[#allocation2 + $0x40] sm:$0xf]  ;;  %v5469_v29 = vld [vmem:[#allocation2 + $0x44] sm:$0xf] }
 0x293   :  { %2689 = vmatpush.bf16.msra.mxu2 %v4638_v1  ;;  %v5473_v28 = vld [vmem:[#allocation2 + $0x5c] sm:$0xf0]  ;;  %v4578_v30 = vor.u32 %v5478_v22, %v4575_v23  ;;  %v4535_v31 = vld [vmem:[#allocation2 + $0x60] sm:$0xf0]  ;;  %v4541_v32 = vld [vmem:[#allocation2 + $0x48] sm:$0xf] }
 0x294   :  { %2702 = vmatpush.bf16.msra.mxu3 %v4642_v6  ;;  %v5474_v33 = vld [vmem:[#allocation2 + $0x64] sm:$0xf0]  ;;  %v5470_v34 = vld [vmem:[#allocation2 + $0x4c] sm:$0xf]  ;;  %v4534_v36 = vor.u32 %v5473_v28, %v4533_v27  ;;  %v4501_v37 = vld [vmem:[#allocation2] sm:$0xf]  ;;  %v4538_v39 = vor.u32 %v5469_v29, %v4535_v31 }
 0x295   :  { %v4543_v35 = vld [vmem:[#allocation2 + $0x68] sm:$0xf0]  ;;  %v5465_v38 = vld [vmem:[#allocation2 + $0x1c] sm:$0xf0]  ;;  %v4542_v40 = vor.u32 %v5474_v33, %v4541_v32  ;;  %v5461_v41 = vld [vmem:[#allocation2 + $0x4] sm:$0xf] }
 0x296   :  { %2664 = vmatpush.bf16.msra.mxu0 %v4598_v12  ;;  %2677 = vmatpush.bf16.msra.mxu1 %v4602_v13  ;;  %v4503_v42 = vld [vmem:[#allocation2 + $0x20] sm:$0xf0]  ;;  %v4509_v43 = vld [vmem:[#allocation2 + $0x8] sm:$0xf]  ;;  %v4546_v44 = vor.u32 %v5470_v34, %v4543_v35  ;;  %v5462_v46 = vld [vmem:[#allocation2 + $0xc] sm:$0xf]  ;;  %v4502_v50 = vor.u32 %v5465_v38, %v4501_v37 }
 0x297   :  { %2690 = vmatpush.bf16.msra.mxu2 %v4606_v14  ;;  %v5466_v45 = vld [vmem:[#allocation2 + $0x24] sm:$0xf0]  ;;  %v4511_v47 = vld [vmem:[#allocation2 + $0x28] sm:$0xf0]  ;;  %v4741_v48 = vld [vmem:[#allocation2 + $0x1d0] sm:$0xf]  ;;  %v4506_v54 = vor.u32 %v5461_v41, %v4503_v42 }
 0x298   :  { %2703 = vmatpush.bf16.msra.mxu3 %v4610_v17  ;;  %v5523_v56 = vld [vmem:[#allocation2 + $0x1ec] sm:$0xf0]  ;;  %v5519_v49 = vld [vmem:[#allocation2 + $0x1d4] sm:$0xf]  ;;  %v4749_v52 = vld [vmem:[#allocation2 + $0x1d8] sm:$0xf]  ;;  %v4510_v55 = vor.u32 %v5466_v45, %v4509_v43  ;;  %v4514_v59 = vor.u32 %v5462_v46, %v4511_v47 }
 0x299   :  { %v4743_v51 = vld [vmem:[#allocation2 + $0x1f0] sm:$0xf0]  ;;  %v5524_v53 = vld [vmem:[#allocation2 + $0x1f4] sm:$0xf0]  ;;  %v5520_v57 = vld [vmem:[#allocation2 + $0x1dc] sm:$0xf]  ;;  %v4742_v60 = vor.u32 %v5523_v56, %v4741_v48 }
 0x29a   :  { %2665 = vmatpush.bf16.msra.mxu0 %v4566_v24  ;;  %2678 = vmatpush.bf16.msra.mxu1 %v4570_v25  ;;  %v4751_v58 = vld [vmem:[#allocation2 + $0x1f8] sm:$0xf0]  ;;  %v4746_v61 = vor.u32 %v5519_v49, %v4743_v51  ;;  %v4750_v62 = vor.u32 %v5524_v53, %v4749_v52  ;;  %v4709_v63 = vld [vmem:[#allocation2 + $0x190] sm:$0xf]  ;;  %v5511_v1 = vld [vmem:[#allocation2 + $0x194] sm:$0xf] }
 0x29b   :  { %2691 = vmatpush.bf16.msra.mxu2 %v4574_v26  ;;  %v5515_v0 = vld [vmem:[#allocation2 + $0x1ac] sm:$0xf0]  ;;  %v4754_v2 = vor.u32 %v5520_v57, %v4751_v58  ;;  %v4711_v5 = vld [vmem:[#allocation2 + $0x1b0] sm:$0xf0]  ;;  %v4717_v6 = vld [vmem:[#allocation2 + $0x198] sm:$0xf] }
 0x29c   :  { %2704 = vmatpush.bf16.msra.mxu3 %v4578_v30  ;;  %v5516_v7 = vld [vmem:[#allocation2 + $0x1b4] sm:$0xf0]  ;;  %v5512_v8 = vld [vmem:[#allocation2 + $0x19c] sm:$0xf]  ;;  %v4710_v10 = vor.u32 %v5515_v0, %v4709_v63  ;;  %v4714_v11 = vor.u32 %v5511_v1, %v4711_v5  ;;  %v4677_v13 = vld [vmem:[#allocation2 + $0x150] sm:$0xf] }
 0x29d   :  { %v4719_v9 = vld [vmem:[#allocation2 + $0x1b8] sm:$0xf0]  ;;  %v4718_v12 = vor.u32 %v5516_v7, %v4717_v6  ;;  %v5507_v14 = vld [vmem:[#allocation2 + $0x16c] sm:$0xf0]  ;;  %v5503_v4 = vld [vmem:[#allocation2 + $0x154] sm:$0xf] }
 0x29e   :  { %2666 = vmatpush.bf16.msra.mxu0 %v4534_v36  ;;  %2679 = vmatpush.bf16.msra.mxu1 %v4538_v39  ;;  %v4722_v18 = vor.u32 %v5512_v8, %v4719_v9  ;;  %v4679_v15 = vld [vmem:[#allocation2 + $0x170] sm:$0xf0]  ;;  %v4685_v16 = vld [vmem:[#allocation2 + $0x158] sm:$0xf]  ;;  %v5504_v19 = vld [vmem:[#allocation2 + $0x15c] sm:$0xf]  ;;  %v4678_v21 = vor.u32 %v5507_v14, %v4677_v13 }
 0x29f   :  { %2692 = vmatpush.bf16.msra.mxu2 %v4542_v40  ;;  %v5508_v17 = vld [vmem:[#allocation2 + $0x174] sm:$0xf0]  ;;  %v4687_v20 = vld [vmem:[#allocation2 + $0x178] sm:$0xf0]  ;;  %v4682_v22 = vor.u32 %v5503_v4, %v4679_v15  ;;  %v4645_v24 = vld [vmem:[#allocation2 + $0x110] sm:$0xf] }
 0x2a0   :  { %2705 = vmatpush.bf16.msra.mxu3 %v4546_v44  ;;  %v4686_v23 = vor.u32 %v5508_v17, %v4685_v16  ;;  %v5499_v25 = vld [vmem:[#allocation2 + $0x12c] sm:$0xf0]  ;;  %v5495_v26 = vld [vmem:[#allocation2 + $0x114] sm:$0xf]  ;;  %v4690_v27 = vor.u32 %v5504_v19, %v4687_v20  ;;  %v4653_v29 = vld [vmem:[#allocation2 + $0x118] sm:$0xf] }
 0x2a1   :  { %v4647_v28 = vld [vmem:[#allocation2 + $0x130] sm:$0xf0]  ;;  %v5500_v30 = vld [vmem:[#allocation2 + $0x134] sm:$0xf0]  ;;  %v5496_v31 = vld [vmem:[#allocation2 + $0x11c] sm:$0xf]  ;;  %v4646_v33 = vor.u32 %v5499_v25, %v4645_v24 }
 0x2a2   :  { %2667 = vmatpush.bf16.msra.mxu0 %v4502_v50  ;;  %2680 = vmatpush.bf16.msra.mxu1 %v4506_v54  ;;  %v4655_v32 = vld [vmem:[#allocation2 + $0x138] sm:$0xf0]  ;;  %v4650_v34 = vor.u32 %v5495_v26, %v4647_v28  ;;  %v4654_v35 = vor.u32 %v5500_v30, %v4653_v29  ;;  %v4613_v36 = vld [vmem:[#allocation2 + $0xd0] sm:$0xf]  ;;  %v5487_v38 = vld [vmem:[#allocation2 + $0xd4] sm:$0xf] }
 0x2a3   :  { %2693 = vmatpush.bf16.msra.mxu2 %v4510_v55  ;;  %v5491_v37 = vld [vmem:[#allocation2 + $0xec] sm:$0xf0]  ;;  %v4658_v39 = vor.u32 %v5496_v31, %v4655_v32  ;;  %v4615_v40 = vld [vmem:[#allocation2 + $0xf0] sm:$0xf0]  ;;  %v4621_v41 = vld [vmem:[#allocation2 + $0xd8] sm:$0xf] }
 0x2a4   :  { %2706 = vmatpush.bf16.msra.mxu3 %v4514_v59  ;;  %v5492_v42 = vld [vmem:[#allocation2 + $0xf4] sm:$0xf0]  ;;  %v5488_v43 = vld [vmem:[#allocation2 + $0xdc] sm:$0xf]  ;;  %v4614_v45 = vor.u32 %v5491_v37, %v4613_v36  ;;  %v4618_v46 = vor.u32 %v5487_v38, %v4615_v40  ;;  %v4581_v48 = vld [vmem:[#allocation2 + $0x90] sm:$0xf] }
 0x2a5   :  { %2668 = vmatmul.bf16.vlgmr.msra.gmra.mxu0 %v7428_v3  ;;  %2681 = vmatmul.bf16.vlgmr.msra.gmra.mxu1 %v7428_v3  ;;  %v4623_v44 = vld [vmem:[#allocation2 + $0xf8] sm:$0xf0]  ;;  %v4622_v47 = vor.u32 %v5492_v42, %v4621_v41  ;;  %v5483_v56 = vld [vmem:[#allocation2 + $0xac] sm:$0xf0]  ;;  %v5479_v49 = vld [vmem:[#allocation2 + $0x94] sm:$0xf] }
 0x2a6   :  { %2712 = vmatpush.bf16.msrb.mxu0 %v4742_v60  ;;  %2725 = vmatpush.bf16.msrb.mxu1 %v4746_v61  ;;  %v4626_v50 = vor.u32 %v5488_v43, %v4623_v44  ;;  %v4583_v51 = vld [vmem:[#allocation2 + $0xb0] sm:$0xf0]  ;;  %v4589_v52 = vld [vmem:[#allocation2 + $0x98] sm:$0xf]  ;;  %v5480_v54 = vld [vmem:[#allocation2 + $0x9c] sm:$0xf]  ;;  %v4582_v57 = vor.u32 %v5483_v56, %v4581_v48 }
 0x2a7   :  { %2738 = vmatpush.bf16.msrb.mxu2 %v4750_v62  ;;  %2707 = vmatmul.bf16.vlgmr.msra.gmra.mxu3 %v7428_v3  ;;  %v5484_v53 = vld [vmem:[#allocation2 + $0xb4] sm:$0xf0]  ;;  %v4591_v55 = vld [vmem:[#allocation2 + $0xb8] sm:$0xf0]  ;;  %v4586_v58 = vor.u32 %v5479_v49, %v4583_v51  ;;  %v4549_v60 = vld [vmem:[#allocation2 + $0x50] sm:$0xf] }
 0x2a8   :  { %2751 = vmatpush.bf16.msrb.mxu3 %v4754_v2  ;;  %2694 = vmatmul.bf16.vlgmr.msra.gmra.mxu2 %v7428_v3  ;;  %v4590_v59 = vor.u32 %v5484_v53, %v4589_v52  ;;  %v5475_v61 = vld [vmem:[#allocation2 + $0x6c] sm:$0xf0]  ;;  %v5471_v62 = vld [vmem:[#allocation2 + $0x54] sm:$0xf]  ;;  %v4594_v63 = vor.u32 %v5480_v54, %v4591_v55  ;;  %v4557_v1 = vld [vmem:[#allocation2 + $0x58] sm:$0xf] }
 0x2a9   :  { %v4551_v0 = vld [vmem:[#allocation2 + $0x70] sm:$0xf0]  ;;  %v5476_v2 = vld [vmem:[#allocation2 + $0x74] sm:$0xf0]  ;;  %v5472_v5 = vld [vmem:[#allocation2 + $0x5c] sm:$0xf]  ;;  %v4550_v7 = vor.u32 %v5475_v61, %v4549_v60 }
 0x2aa   :  { %2713 = vmatpush.bf16.msrb.mxu0 %v4710_v10  ;;  %2726 = vmatpush.bf16.msrb.mxu1 %v4714_v11  ;;  %v4559_v6 = vld [vmem:[#allocation2 + $0x78] sm:$0xf0]  ;;  %v4517_v8 = vld [vmem:[#allocation2 + $0x10] sm:$0xf]  ;;  %v4554_v9 = vor.u32 %v5471_v62, %v4551_v0  ;;  %v4558_v10 = vor.u32 %v5476_v2, %v4557_v1  ;;  %v4519_v13 = vld [vmem:[#allocation2 + $0x30] sm:$0xf0] }
 0x2ab   :  { %2739 = vmatpush.bf16.msrb.mxu2 %v4718_v12  ;;  %v5467_v11 = vld [vmem:[#allocation2 + $0x2c] sm:$0xf0]  ;;  %v5463_v12 = vld [vmem:[#allocation2 + $0x14] sm:$0xf]  ;;  %v4562_v14 = vor.u32 %v5472_v5, %v4559_v6  ;;  %v4525_v4 = vld [vmem:[#allocation2 + $0x18] sm:$0xf] }
 0x2ac   :  { %2752 = vmatpush.bf16.msrb.mxu3 %v4722_v18  ;;  %v5468_v18 = vld [vmem:[#allocation2 + $0x34] sm:$0xf0]  ;;  %v5464_v15 = vld [vmem:[#allocation2 + $0x1c] sm:$0xf]  ;;  %v4813_v17 = vld [vmem:[#allocation3 + $0x70] sm:$0xf]  ;;  %v4518_v20 = vor.u32 %v5467_v11, %v4517_v8 }
 0x2ad   :  { %v4527_v16 = vld [vmem:[#allocation2 + $0x38] sm:$0xf0]  ;;  %v5540_v19 = vld [vmem:[#allocation3 + $0x74] sm:$0xf0]  ;;  %v4526_v24 = vor.u32 %v5468_v18, %v4525_v4  ;;  %v4941_v28 = vld [vmem:[#allocation3 + $0x170] sm:$0xf] }
 0x2ae   :  { %2714 = vmatpush.bf16.msrb.mxu0 %v4678_v21  ;;  %2727 = vmatpush.bf16.msrb.mxu1 %v4682_v22  ;;  %v4877_v21 = vld [vmem:[#allocation3 + $0xf0] sm:$0xf]  ;;  %v5556_v22 = vld [vmem:[#allocation3 + $0xf4] sm:$0xf0]  ;;  %v4530_v25 = vor.u32 %v5464_v15, %v4527_v16  ;;  %v4814_v26 = vor.u32 %v5540_v19, %v4813_v17  ;;  %v5538_v31 = vld [vmem:[#allocation3 + $0x64] sm:$0xf0] }
 0x2af   :  { %2740 = vmatpush.bf16.msrb.mxu2 %v4686_v23  ;;  %v4522_v23 = vor.u32 %v5463_v12, %v4519_v13  ;;  %v5572_v29 = vld [vmem:[#allocation3 + $0x174] sm:$0xf0]  ;;  %v4878_v30 = vor.u32 %v5556_v22, %v4877_v21  ;;  %v5005_v32 = vld [vmem:[#allocation3 + $0x1f0] sm:$0xf]  ;;  %v4933_v40 = vld [vmem:[#allocation3 + $0x160] sm:$0xf] }
 0x2b0   :  { %2753 = vmatpush.bf16.msrb.mxu3 %v4690_v27  ;;  %v4805_v27 = vld [vmem:[#allocation3 + $0x60] sm:$0xf]  ;;  %v4942_v36 = vor.u32 %v5572_v29, %v4941_v28  ;;  %v5570_v41 = vld [vmem:[#allocation3 + $0x164] sm:$0xf0]  ;;  %v5536_v43 = vld [vmem:[#allocation3 + $0x54] sm:$0xf0] }
 0x2b1   :  { %v4806_v37 = vor.u32 %v5538_v31, %v4805_v27  ;;  %v4997_v44 = vld [vmem:[#allocation3 + $0x1e0] sm:$0xf]  ;;  %v4934_v48 = vor.u32 %v5570_v41, %v4933_v40  ;;  %v4925_v51 = vld [vmem:[#allocation3 + $0x150] sm:$0xf]  ;;  %v5568_v52 = vld [vmem:[#allocation3 + $0x154] sm:$0xf0] }
 0x2b2   :  { %2715 = vmatpush.bf16.msrb.mxu0 %v4646_v33  ;;  %2728 = vmatpush.bf16.msrb.mxu1 %v4650_v34  ;;  %v5588_v33 = vld [vmem:[#allocation3 + $0x1f4] sm:$0xf0]  ;;  %v4869_v34 = vld [vmem:[#allocation3 + $0xe0] sm:$0xf]  ;;  %v5534_v54 = vld [vmem:[#allocation3 + $0x44] sm:$0xf0]  ;;  %v4926_v60 = vor.u32 %v5568_v52, %v4925_v51 }
 0x2b3   :  { %2741 = vmatpush.bf16.msrb.mxu2 %v4654_v35  ;;  %v5554_v35 = vld [vmem:[#allocation3 + $0xe4] sm:$0xf0]  ;;  %v5006_v38 = vor.u32 %v5588_v33, %v5005_v32  ;;  %v4989_v55 = vld [vmem:[#allocation3 + $0x1d0] sm:$0xf]  ;;  %v5532_v2 = vld [vmem:[#allocation3 + $0x34] sm:$0xf0] }
 0x2b4   :  { %2754 = vmatpush.bf16.msrb.mxu3 %v4658_v39  ;;  %v4797_v39 = vld [vmem:[#allocation3 + $0x50] sm:$0xf]  ;;  %v4870_v42 = vor.u32 %v5554_v35, %v4869_v34  ;;  %v5566_v0 = vld [vmem:[#allocation3 + $0x144] sm:$0xf0]  ;;  %v4981_v5 = vld [vmem:[#allocation3 + $0x1c0] sm:$0xf] }
 0x2b5   :  { %v4798_v56 = vor.u32 %v5536_v43, %v4797_v39  ;;  %v4781_v62 = vld [vmem:[#allocation3 + $0x30] sm:$0xf]  ;;  %v5582_v6 = vld [vmem:[#allocation3 + $0x1c4] sm:$0xf0]  ;;  %v5548_v8 = vld [vmem:[#allocation3 + $0xb4] sm:$0xf0] }
 0x2b6   :  { %2716 = vmatpush.bf16.msrb.mxu0 %v4614_v45  ;;  %2729 = vmatpush.bf16.msrb.mxu1 %v4618_v46  ;;  %v5586_v45 = vld [vmem:[#allocation3 + $0x1e4] sm:$0xf0]  ;;  %v4861_v46 = vld [vmem:[#allocation3 + $0xd0] sm:$0xf]  ;;  %v4982_v11 = vor.u32 %v5582_v6, %v4981_v5  ;;  %v4773_v12 = vld [vmem:[#allocation3 + $0x20] sm:$0xf] }
 0x2b7   :  { %2742 = vmatpush.bf16.msrb.mxu2 %v4622_v47  ;;  %v5552_v47 = vld [vmem:[#allocation3 + $0xd4] sm:$0xf0]  ;;  %v4998_v49 = vor.u32 %v5586_v45, %v4997_v44  ;;  %v4909_v13 = vld [vmem:[#allocation3 + $0x130] sm:$0xf]  ;;  %v5530_v18 = vld [vmem:[#allocation3 + $0x24] sm:$0xf0] }
 0x2b8   :  { %2755 = vmatpush.bf16.msrb.mxu3 %v4626_v50  ;;  %v4789_v50 = vld [vmem:[#allocation3 + $0x40] sm:$0xf]  ;;  %v4862_v53 = vor.u32 %v5552_v47, %v4861_v46  ;;  %v4973_v15 = vld [vmem:[#allocation3 + $0x1b0] sm:$0xf]  ;;  %v5580_v16 = vld [vmem:[#allocation3 + $0x1b4] sm:$0xf0]  ;;  %v4774_v21 = vor.u32 %v5530_v18, %v4773_v12 }
 0x2b9   :  { %v4837_v17 = vld [vmem:[#allocation3 + $0xa0] sm:$0xf]  ;;  %v5546_v19 = vld [vmem:[#allocation3 + $0xa4] sm:$0xf0]  ;;  %v4974_v22 = vor.u32 %v5580_v16, %v4973_v15  ;;  %v5528_v27 = vld [vmem:[#allocation3 + $0x14] sm:$0xf0] }
 0x2ba   :  { %2717 = vmatpush.bf16.msrb.mxu0 %v4582_v57  ;;  %2730 = vmatpush.bf16.msrb.mxu1 %v4586_v58  ;;  %v5584_v57 = vld [vmem:[#allocation3 + $0x1d4] sm:$0xf0]  ;;  %v4853_v58 = vld [vmem:[#allocation3 + $0xc0] sm:$0xf]  ;;  %v5578_v29 = vld [vmem:[#allocation3 + $0x1a4] sm:$0xf0] }
 0x2bb   :  { %2743 = vmatpush.bf16.msrb.mxu2 %v4590_v59  ;;  %v5550_v59 = vld [vmem:[#allocation3 + $0xc4] sm:$0xf0]  ;;  %v4990_v61 = vor.u32 %v5584_v57, %v4989_v55  ;;  %v4965_v28 = vld [vmem:[#allocation3 + $0x1a0] sm:$0xf]  ;;  %v5544_v31 = vld [vmem:[#allocation3 + $0x94] sm:$0xf0] }
 0x2bc   :  { %2756 = vmatpush.bf16.msrb.mxu3 %v4594_v63  ;;  %v4917_v63 = vld [vmem:[#allocation3 + $0x140] sm:$0xf]  ;;  %v4854_v1 = vor.u32 %v5550_v59, %v4853_v58  ;;  %v4966_v35 = vor.u32 %v5578_v29, %v4965_v28  ;;  %v4957_v41 = vld [vmem:[#allocation3 + $0x190] sm:$0xf]  ;;  %v5542_v43 = vld [vmem:[#allocation3 + $0x84] sm:$0xf0] }
 0x2bd   :  { %v4757_v33 = vld [vmem:[#allocation3] sm:$0xf]  ;;  %v5069_v44 = vld [vmem:[#allocation3 + $0x270] sm:$0xf]  ;;  %v5604_v45 = vld [vmem:[#allocation3 + $0x274] sm:$0xf0] }
 0x2be   :  { %2718 = vmatpush.bf16.msrb.mxu0 %v4550_v7  ;;  %2731 = vmatpush.bf16.msrb.mxu1 %v4554_v9  ;;  %v4845_v7 = vld [vmem:[#allocation3 + $0xb0] sm:$0xf]  ;;  %v4918_v9 = vor.u32 %v5566_v0, %v4917_v63  ;;  %v4821_v40 = vld [vmem:[#allocation3 + $0x80] sm:$0xf]  ;;  %v5620_v47 = vld [vmem:[#allocation3 + $0x2f4] sm:$0xf0]  ;;  %v5070_v51 = vor.u32 %v5604_v45, %v5069_v44 }
 0x2bf   :  { %2744 = vmatpush.bf16.msrb.mxu2 %v4558_v10  ;;  %v4782_v10 = vor.u32 %v5532_v2, %v4781_v62  ;;  %v4846_v4 = vor.u32 %v5548_v8, %v4845_v7  ;;  %v5133_v46 = vld [vmem:[#allocation3 + $0x2f0] sm:$0xf]  ;;  %v5125_v55 = vld [vmem:[#allocation3 + $0x2e0] sm:$0xf]  ;;  %v5618_v58 = vld [vmem:[#allocation3 + $0x2e4] sm:$0xf0] }
 0x2c0   :  { %2757 = vmatpush.bf16.msrb.mxu3 %v4562_v14  ;;  %v5564_v14 = vld [vmem:[#allocation3 + $0x134] sm:$0xf0]  ;;  %v5134_v52 = vor.u32 %v5620_v47, %v5133_v46  ;;  %v4885_v59 = vld [vmem:[#allocation3 + $0x100] sm:$0xf]  ;;  %v5574_v63 = vld [vmem:[#allocation3 + $0x184] sm:$0xf0] }
 0x2c1   :  { %v4949_v62 = vld [vmem:[#allocation3 + $0x180] sm:$0xf]  ;;  %v5636_v2 = vld [vmem:[#allocation3 + $0x374] sm:$0xf0]  ;;  %v5261_v5 = vld [vmem:[#allocation3 + $0x3f0] sm:$0xf] }
 0x2c2   :  { %2719 = vmatpush.bf16.msrb.mxu0 %v4518_v20  ;;  %2732 = vmatpush.bf16.msrb.mxu1 %v4522_v23  ;;  %v4910_v20 = vor.u32 %v5564_v14, %v4909_v13  ;;  %v4765_v23 = vld [vmem:[#allocation3 + $0x10] sm:$0xf]  ;;  %v4950_v0 = vor.u32 %v5574_v63, %v4949_v62  ;;  %v5652_v7 = vld [vmem:[#allocation3 + $0x3f4] sm:$0xf0]  ;;  %v5634_v18 = vld [vmem:[#allocation3 + $0x364] sm:$0xf0] }
 0x2c3   :  { %2745 = vmatpush.bf16.msrb.mxu2 %v4526_v24  ;;  %v4901_v24 = vld [vmem:[#allocation3 + $0x120] sm:$0xf]  ;;  %v4766_v34 = vor.u32 %v5528_v27, %v4765_v23  ;;  %v5053_v8 = vld [vmem:[#allocation3 + $0x250] sm:$0xf]  ;;  %v5616_v13 = vld [vmem:[#allocation3 + $0x2d4] sm:$0xf0] }
 0x2c4   :  { %2758 = vmatpush.bf16.msrb.mxu3 %v4530_v25  ;;  %v5562_v25 = vld [vmem:[#allocation3 + $0x124] sm:$0xf0]  ;;  %v5117_v12 = vld [vmem:[#allocation3 + $0x2d0] sm:$0xf]  ;;  %v5253_v15 = vld [vmem:[#allocation3 + $0x3e0] sm:$0xf] }
 0x2c5   :  { %2720 = vmatmul.bf16.vlgmr.msrb.gmra.mxu0 %v7428_v3  ;;  %2733 = vmatmul.bf16.vlgmr.msrb.gmra.mxu1 %v7428_v3  ;;  %v4902_v32 = vor.u32 %v5562_v25, %v4901_v24  ;;  %v5118_v14 = vor.u32 %v5616_v13, %v5117_v12  ;;  %v5614_v24 = vld [vmem:[#allocation3 + $0x2c4] sm:$0xf0]  ;;  %v5632_v27 = vld [vmem:[#allocation3 + $0x354] sm:$0xf0]  ;;  %v5245_v28 = vld [vmem:[#allocation3 + $0x3d0] sm:$0xf] }
 0x2c6   :  { %3458 = vmatpush.bf16.msra.mxu0 %v4814_v26  ;;  %3471 = vmatpush.bf16.msra.mxu1 %v4878_v30  ;;  %v4838_v26 = vor.u32 %v5546_v19, %v4837_v17  ;;  %v4829_v30 = vld [vmem:[#allocation3 + $0x90] sm:$0xf]  ;;  %v5650_v17 = vld [vmem:[#allocation3 + $0x3e4] sm:$0xf0]  ;;  %v5029_v44 = vld [vmem:[#allocation3 + $0x220] sm:$0xf] }
 0x2c7   :  { %2746 = vmatmul.bf16.vlgmr.msrb.gmra.mxu2 %v7428_v3  ;;  %2759 = vmatmul.bf16.vlgmr.msrb.gmra.mxu3 %v7428_v3  ;;  %v4790_v3 = vor.u32 %v5534_v54, %v4789_v50  ;;  %v4830_v39 = vor.u32 %v5544_v31, %v4829_v30  ;;  %v4822_v50 = vor.u32 %v5542_v43, %v4821_v40  ;;  %v5602_v54 = vld [vmem:[#allocation3 + $0x264] sm:$0xf0]  ;;  %v5648_v30 = vld [vmem:[#allocation3 + $0x3d4] sm:$0xf0]  ;;  %v5237_v40 = vld [vmem:[#allocation3 + $0x3c0] sm:$0xf] }
 0x2c8   :  { %3484 = vmatpush.bf16.msra.mxu2 %v4942_v36  ;;  %3497 = vmatpush.bf16.msra.mxu3 %v5006_v38  ;;  %v5526_v36 = vld [vmem:[#allocation3 + $0x4] sm:$0xf0]  ;;  %v5560_v38 = vld [vmem:[#allocation3 + $0x114] sm:$0xf0]  ;;  %v5254_v19 = vor.u32 %v5650_v17, %v5253_v15  ;;  %v5246_v31 = vor.u32 %v5648_v30, %v5245_v28  ;;  %v5093_v46 = vld [vmem:[#allocation3 + $0x2a0] sm:$0xf] }
 0x2c9   :  { %v5594_v45 = vld [vmem:[#allocation3 + $0x224] sm:$0xf0]  ;;  %v5221_v63 = vld [vmem:[#allocation3 + $0x3a0] sm:$0xf]  ;;  %v5149_v12 = vld [vmem:[#allocation3 + $0x310] sm:$0xf] }
 0x2ca   :  { %3459 = vmatpush.bf16.msra.mxu0 %v4806_v37  ;;  %3472 = vmatpush.bf16.msra.mxu1 %v4870_v42  ;;  %v4893_v37 = vld [vmem:[#allocation3 + $0x110] sm:$0xf]  ;;  %v5576_v42 = vld [vmem:[#allocation3 + $0x194] sm:$0xf0]  ;;  %v5030_v47 = vor.u32 %v5594_v45, %v5029_v44  ;;  %v5626_v62 = vld [vmem:[#allocation3 + $0x324] sm:$0xf0] }
 0x2cb   :  { %v5624_v13 = vld [vmem:[#allocation3 + $0x314] sm:$0xf0]  ;;  %s3685_s5 = sshll.u32 %s7501_s9, 4  ;;  %s3696_s11 = sshll.u32 %s7502_s10, 4  ;;  %s3686_s5 = int_to_ptr.hbm [resolvable:$true] %s3685_s5  ;;  %s3697_s11 = int_to_ptr.hbm [resolvable:$true] %s3696_s11 }
 0x2cc   :  { %3485 = vmatpush.bf16.msra.mxu2 %v4934_v48  ;;  %3498 = vmatpush.bf16.msra.mxu3 %v4998_v49  ;;  %v4894_v48 = vor.u32 %v5560_v38, %v4893_v37  ;;  %v4958_v49 = vor.u32 %v5576_v42, %v4957_v41  ;;  %v5173_v38 = vld [vmem:[#allocation3 + $0x340] sm:$0xf]  ;;  %v5646_v42 = vld [vmem:[#allocation3 + $0x3c4] sm:$0xf0] }
 0x2cd   :  { %v5238_v43 = vor.u32 %v5646_v42, %v5237_v40 }
 0x2ce   :  { %3460 = vmatpush.bf16.msra.mxu0 %v4798_v56  ;;  %3473 = vmatpush.bf16.msra.mxu1 %v4862_v53  ;;  %v4758_v56 = vor.u32 %v5526_v36, %v4757_v33  ;;  %v5061_v53 = vld [vmem:[#allocation3 + $0x260] sm:$0xf]  ;;  %v5596_v33 = vld [vmem:[#allocation3 + $0x234] sm:$0xf0] }
 0x2cf   :  { %v5062_v57 = vor.u32 %v5602_v54, %v5061_v53  ;;  %v5612_v36 = vld [vmem:[#allocation3 + $0x2b4] sm:$0xf0] }
 0x2d0   :  { %3486 = vmatpush.bf16.msra.mxu2 %v4926_v60  ;;  %3499 = vmatpush.bf16.msra.mxu3 %v4990_v61  ;;  %v5558_v60 = vld [vmem:[#allocation3 + $0x104] sm:$0xf0]  ;;  %v5644_v53 = vld [vmem:[#allocation3 + $0x3b4] sm:$0xf0] }
 0x2d1   :  { %v4886_v61 = vor.u32 %v5558_v60, %v4885_v59  ;;  %v5608_v60 = vld [vmem:[#allocation3 + $0x294] sm:$0xf0] }
 0x2d2   :  { %3461 = vmatpush.bf16.msra.mxu0 %v4790_v3  ;;  %3474 = vmatpush.bf16.msra.mxu1 %v4854_v1  ;;  %v5126_v3 = vor.u32 %v5618_v58, %v5125_v55  ;;  %v5197_v1 = vld [vmem:[#allocation3 + $0x370] sm:$0xf] }
 0x2d3   :  { %v5198_v6 = vor.u32 %v5636_v2, %v5197_v1  ;;  %v5021_v55 = vld [vmem:[#allocation3 + $0x210] sm:$0xf]  ;;  %v5642_v1 = vld [vmem:[#allocation3 + $0x3a4] sm:$0xf0] }
 0x2d4   :  { %3487 = vmatpush.bf16.msra.mxu2 %v4918_v9  ;;  %3500 = vmatpush.bf16.msra.mxu3 %v4982_v11  ;;  %v5600_v9 = vld [vmem:[#allocation3 + $0x254] sm:$0xf0]  ;;  %v5085_v58 = vld [vmem:[#allocation3 + $0x290] sm:$0xf]  ;;  %v5222_v2 = vor.u32 %v5642_v1, %v5221_v63  ;;  %v5537_v63 = vld [vmem:[#allocation3 + $0x64] sm:$0xf] }
 0x2d5   :  { %v5054_v11 = vor.u32 %v5600_v9, %v5053_v8  ;;  %v5606_v9 = vld [vmem:[#allocation3 + $0x284] sm:$0xf0]  ;;  %v5553_v1 = vld [vmem:[#allocation3 + $0xe4] sm:$0xf] }
 0x2d6   :  { %3462 = vmatpush.bf16.msra.mxu0 %v4782_v10  ;;  %3475 = vmatpush.bf16.msra.mxu1 %v4846_v4  ;;  %v5262_v10 = vor.u32 %v5652_v7, %v5261_v5  ;;  %v5189_v4 = vld [vmem:[#allocation3 + $0x360] sm:$0xf] }
 0x2d7   :  { %v5190_v16 = vor.u32 %v5634_v18, %v5189_v4  ;;  %v5013_v5 = vld [vmem:[#allocation3 + $0x200] sm:$0xf]  ;;  %v5640_v4 = vld [vmem:[#allocation3 + $0x394] sm:$0xf0]  ;;  %v5150_v18 = vor.u32 %v5624_v13, %v5149_v12 }
 0x2d8   :  { %3488 = vmatpush.bf16.msra.mxu2 %v4910_v20  ;;  %3501 = vmatpush.bf16.msra.mxu3 %v4974_v22  ;;  %v5045_v20 = vld [vmem:[#allocation3 + $0x240] sm:$0xf] }
 0x2d9   :  { %v5109_v22 = vld [vmem:[#allocation3 + $0x2c0] sm:$0xf] }
 0x2da   :  { %3463 = vmatpush.bf16.msra.mxu0 %v4774_v21  ;;  %3476 = vmatpush.bf16.msra.mxu1 %v4838_v26  ;;  %v5598_v21 = vld [vmem:[#allocation3 + $0x244] sm:$0xf0]  ;;  %v5110_v25 = vor.u32 %v5614_v24, %v5109_v22  ;;  %v5181_v26 = vld [vmem:[#allocation3 + $0x350] sm:$0xf]  ;;  %v5077_v7 = vld [vmem:[#allocation3 + $0x280] sm:$0xf] }
 0x2db   :  { %v5046_v23 = vor.u32 %v5598_v21, %v5045_v20  ;;  %v5182_v29 = vor.u32 %v5632_v27, %v5181_v26  ;;  %v5622_v20 = vld [vmem:[#allocation3 + $0x304] sm:$0xf0]  ;;  %v5205_v21 = vld [vmem:[#allocation3 + $0x380] sm:$0xf] }
 0x2dc   :  { %3489 = vmatpush.bf16.msra.mxu2 %v4902_v32  ;;  %3502 = vmatpush.bf16.msra.mxu3 %v4966_v35  ;;  %v5037_v32 = vld [vmem:[#allocation3 + $0x230] sm:$0xf]  ;;  %v5638_v22 = vld [vmem:[#allocation3 + $0x384] sm:$0xf0] }
 0x2dd   :  { %v5038_v35 = vor.u32 %v5596_v33, %v5037_v32  ;;  %v5206_v24 = vor.u32 %v5638_v22, %v5205_v21  ;;  %v5551_v22 = vld [vmem:[#allocation3 + $0xd4] sm:$0xf] }
 0x2de   :  { %3464 = vmatpush.bf16.msra.mxu0 %v4766_v34  ;;  %3477 = vmatpush.bf16.msra.mxu1 %v4830_v39  ;;  %v5101_v34 = vld [vmem:[#allocation3 + $0x2b0] sm:$0xf]  ;;  %v5630_v39 = vld [vmem:[#allocation3 + $0x344] sm:$0xf0] }
 0x2df   :  { %v5102_v37 = vor.u32 %v5612_v36, %v5101_v34  ;;  %v5174_v41 = vor.u32 %v5630_v39, %v5173_v38 }
 0x2e0   :  { %3490 = vmatpush.bf16.msra.mxu2 %v4894_v48  ;;  %3503 = vmatpush.bf16.msra.mxu3 %v4958_v49  ;;  %v5610_v48 = vld [vmem:[#allocation3 + $0x2a4] sm:$0xf0]  ;;  %v5165_v49 = vld [vmem:[#allocation3 + $0x330] sm:$0xf] }
 0x2e2   :  { %3465 = vmatpush.bf16.msra.mxu0 %v4758_v56  ;;  %3478 = vmatpush.bf16.msra.mxu1 %v4822_v50  ;;  %v5094_v56 = vor.u32 %v5610_v48, %v5093_v46  ;;  %v5628_v50 = vld [vmem:[#allocation3 + $0x334] sm:$0xf0] }
 0x2e4   :  { %3491 = vmatpush.bf16.msra.mxu2 %v4886_v61  ;;  %3504 = vmatpush.bf16.msra.mxu3 %v4950_v0  ;;  %v5157_v61 = vld [vmem:[#allocation3 + $0x320] sm:$0xf] }
 0x2e5   :  { %v5158_v0 = vor.u32 %v5626_v62, %v5157_v61 }
 0x2e6   :  { %3510 = vmatpush.bf16.msrb.mxu0 %v5070_v51  ;;  %3523 = vmatpush.bf16.msrb.mxu1 %v5134_v52  ;;  %v5229_v51 = vld [vmem:[#allocation3 + $0x3b0] sm:$0xf]  ;;  %v5166_v52 = vor.u32 %v5628_v50, %v5165_v49 }
 0x2e7   :  { %v5230_v54 = vor.u32 %v5644_v53, %v5229_v51  ;;  %v5539_v53 = vld [vmem:[#allocation3 + $0x74] sm:$0xf] }
 0x2e8   :  { %3536 = vmatpush.bf16.msrb.mxu2 %v5198_v6  ;;  %3549 = vmatpush.bf16.msrb.mxu3 %v5262_v10  ;;  %v5590_v6 = vld [vmem:[#allocation3 + $0x204] sm:$0xf0]  ;;  %v7441_v10 = vld [vmem:[%s7498_s6] sm:$0xff]  ;;  %s5788_s6 = smov [#allocation5]  }
 0x2e9   :  { %v5014_v8 = vor.u32 %v5590_v6, %v5013_v5  ;;  %v2325_v17 = vperm.slane %v7441_v10, 1  ;;  %v2328_v5 = vperm.slane %v7441_v10, 4  ;;  %v4871_v6 = vld [vmem:[#allocation3 + $0xe8] sm:$0xf0]  ;;  %v2329_v12 = vperm.slane %v7441_v10, 5  ;;  %s3683_s26 = sshll.u32 %s5788_s6, 4  ;;  %s3684_s26 = int_to_ptr.vmem [resolvable:$true] %s3683_s26 }
 0x2ea   :  { %3511 = vmatpush.bf16.msrb.mxu0 %v5062_v57  ;;  %3524 = vmatpush.bf16.msrb.mxu1 %v5126_v3  ;;  %v5592_v57 = vld [vmem:[#allocation3 + $0x214] sm:$0xf0]  ;;  %v5086_v3 = vor.u32 %v5608_v60, %v5085_v58  ;;  %v4879_v58 = vld [vmem:[#allocation3 + $0xf8] sm:$0xf0]  ;;  %3688 = dma.vmem_to_hbm [thread:$0]  %s3684_s26, 128, %s3686_s5, [#allocation6]  }
 0x2eb   :  { %v5022_v59 = vor.u32 %v5592_v57, %v5021_v55  ;;  %v5555_v57 = vld [vmem:[#allocation3 + $0xf4] sm:$0xf] }
 0x2ec   :  { %3537 = vmatpush.bf16.msrb.mxu2 %v5190_v16  ;;  %3550 = vmatpush.bf16.msrb.mxu3 %v5254_v19  ;;  %v2324_v16 = vperm.slane %v7441_v10, 0  ;;  %v5141_v19 = vld [vmem:[#allocation3 + $0x300] sm:$0xf]  ;;  %v4882_v62 = vor.u32 %v5555_v57, %v4879_v58 }
 0x2ee   :  { %3512 = vmatpush.bf16.msrb.mxu0 %v5054_v11  ;;  %3525 = vmatpush.bf16.msrb.mxu1 %v5118_v14  ;;  %v5078_v11 = vor.u32 %v5606_v9, %v5077_v7  ;;  %v5213_v14 = vld [vmem:[#allocation3 + $0x390] sm:$0xf]  ;;  %v5571_v7 = vld [vmem:[#allocation3 + $0x174] sm:$0xf] }
 0x2ef   :  { %v5214_v15 = vor.u32 %v5640_v4, %v5213_v14  ;;  %v5587_v9 = vld [vmem:[#allocation3 + $0x1f4] sm:$0xf]  ;;  %v4874_v4 = vor.u32 %v5553_v1, %v4871_v6  ;;  %v5581_v1 = vld [vmem:[#allocation3 + $0x1c4] sm:$0xf] }
 0x2f0   :  { %3538 = vmatpush.bf16.msrb.mxu2 %v5182_v29  ;;  %3551 = vmatpush.bf16.msrb.mxu3 %v5246_v31  ;;  %v2326_v29 = vperm.slane %v7441_v10, 2  ;;  %v2327_v31 = vperm.slane %v7441_v10, 3 }
 0x2f2   :  { %3513 = vmatpush.bf16.msrb.mxu0 %v5046_v23  ;;  %3526 = vmatpush.bf16.msrb.mxu1 %v5110_v25  ;;  %v5142_v23 = vor.u32 %v5622_v20, %v5141_v19 }
 0x2f4   :  { %3539 = vmatpush.bf16.msrb.mxu2 %v5174_v41  ;;  %3552 = vmatpush.bf16.msrb.mxu3 %v5238_v43 }
 0x2f6   :  { %3514 = vmatpush.bf16.msrb.mxu0 %v5038_v35  ;;  %3527 = vmatpush.bf16.msrb.mxu1 %v5102_v37 }
 0x2f8   :  { %3540 = vmatpush.bf16.msrb.mxu2 %v5166_v52  ;;  %3553 = vmatpush.bf16.msrb.mxu3 %v5230_v54  ;;  %v4815_v54 = vld [vmem:[#allocation3 + $0x78] sm:$0xf0] }
 0x2f9   :  { %v4818_v60 = vor.u32 %v5539_v53, %v4815_v54  ;;  %v4783_v53 = vld [vmem:[#allocation3 + $0x38] sm:$0xf0] }
 0x2fa   :  { %3515 = vmatpush.bf16.msrb.mxu0 %v5030_v47  ;;  %3528 = vmatpush.bf16.msrb.mxu1 %v5094_v56 }
 0x2fc   :  { %3541 = vmatpush.bf16.msrb.mxu2 %v5158_v0  ;;  %3554 = vmatpush.bf16.msrb.mxu3 %v5222_v2  ;;  %v4807_v0 = vld [vmem:[#allocation3 + $0x68] sm:$0xf0] }
 0x2fd   :  { %v4810_v13 = vor.u32 %v5537_v63, %v4807_v0  ;;  %v4919_v0 = vld [vmem:[#allocation3 + $0x148] sm:$0xf0] }
 0x2fe   :  { %3516 = vmatpush.bf16.msrb.mxu0 %v5022_v59  ;;  %3529 = vmatpush.bf16.msrb.mxu1 %v5086_v3 }
 0x300   :  { %3542 = vmatpush.bf16.msrb.mxu2 %v5150_v18  ;;  %3555 = vmatpush.bf16.msrb.mxu3 %v5214_v15  ;;  %v5535_v18 = vld [vmem:[#allocation3 + $0x54] sm:$0xf]  ;;  %v4799_v15 = vld [vmem:[#allocation3 + $0x58] sm:$0xf0] }
 0x302   :  { %3517 = vmatpush.bf16.msrb.mxu0 %v5014_v8  ;;  %3530 = vmatpush.bf16.msrb.mxu1 %v5078_v11  ;;  %v4943_v8 = vld [vmem:[#allocation3 + $0x178] sm:$0xf0] }
 0x303   :  { %v5007_v11 = vld [vmem:[#allocation3 + $0x1f8] sm:$0xf0]  ;;  %v4946_v20 = vor.u32 %v5571_v7, %v4943_v8  ;;  %v5529_v8 = vld [vmem:[#allocation3 + $0x24] sm:$0xf] }
 0x304   :  { %3543 = vmatpush.bf16.msrb.mxu2 %v5142_v23  ;;  %3556 = vmatpush.bf16.msrb.mxu3 %v5206_v24  ;;  %v5010_v21 = vor.u32 %v5587_v9, %v5007_v11  ;;  %v4863_v23 = vld [vmem:[#allocation3 + $0xd8] sm:$0xf0]  ;;  %v5569_v24 = vld [vmem:[#allocation3 + $0x164] sm:$0xf]  ;;  %v4775_v9 = vld [vmem:[#allocation3 + $0x28] sm:$0xf0] }
 0x322   :  { %v2669_v25 = vpop.f32.mrf.mxu0  ;;  %v2682_v27 = vpop.f32.mrf.mxu1 }
 0x323   :  { %v2670_v26 = vadd.f32 %v2669_v25, %v2324_v16  ;;  %v2683_v28 = vadd.f32 %v2682_v27, %v2325_v17 }
 0x325   :  { %v2764_v30 = vsub.f32 0.0, %v2670_v26  ;;  %v2765_v32 = vsub.f32 0.0, %v2683_v28  ;;  %v4935_v28 = vld [vmem:[#allocation3 + $0x168] sm:$0xf0] }
 0x327   :  { %v2772_v33 = vmul.f32 1.442695, %v2764_v30  ;;  %v2774_v35 = vmul.f32 1.442695, %v2765_v32  ;;  %v4999_v30 = vld [vmem:[#allocation3 + $0x1e8] sm:$0xf0]  ;;  %v4802_v32 = vor.u32 %v5535_v18, %v4799_v15 }
 0x329   :  { %5692 = vpow2.f32 %v2772_v33  ;;  %v5533_v33 = vld [vmem:[#allocation3 + $0x44] sm:$0xf] }
 0x32a   :  { %v2708_v37 = vpop.f32.mrf.mxu3  ;;  %5694 = vpow2.f32 %v2774_v35  ;;  %v2671_v40 = vpop.f32.mrf.mxu0 }
 0x32b   :  { %v2695_v34 = vpop.f32.mrf.mxu2  ;;  %v2709_v38 = vadd.f32 %v2708_v37, %v2327_v31  ;;  %v2684_v42 = vpop.f32.mrf.mxu1  ;;  %v2330_v37 = vperm.slane %v7441_v10, 6 }
 0x32c   :  { %v2696_v36 = vadd.f32 %v2695_v34, %v2326_v29  ;;  %v5585_v29 = vld [vmem:[#allocation3 + $0x1e4] sm:$0xf]  ;;  %v4791_v34 = vld [vmem:[#allocation3 + $0x48] sm:$0xf0]  ;;  %v4938_v42 = vor.u32 %v5569_v24, %v4935_v28 }
 0x32d   :  { %v2767_v41 = vsub.f32 0.0, %v2709_v38  ;;  %v5549_v38 = vld [vmem:[#allocation3 + $0xc4] sm:$0xf] }
 0x32e   :  { %v2766_v39 = vsub.f32 0.0, %v2696_v36  ;;  %v4866_v36 = vor.u32 %v5551_v22, %v4863_v23  ;;  %v5579_v22 = vld [vmem:[#allocation3 + $0x1b4] sm:$0xf]  ;;  %v4975_v23 = vld [vmem:[#allocation3 + $0x1b8] sm:$0xf0] }
 0x32f   :  { %v2778_v44 = vmul.f32 1.442695, %v2767_v41  ;;  %v5693_v45 = vpop.eup %5692  ;;  %v2331_v41 = vperm.slane %v7441_v10, 7 }
 0x330   :  { %v2776_v43 = vmul.f32 1.442695, %v2766_v39  ;;  %v5695_v47 = vpop.eup %5694  ;;  %v2788_v48 = vadd.f32 1.0, %v5693_v45  ;;  %v4855_v39 = vld [vmem:[#allocation3 + $0xc8] sm:$0xf0] }
 0x331   :  { %v2789_v49 = vadd.f32 1.0, %v5695_v47  ;;  %v4927_v45 = vld [vmem:[#allocation3 + $0x158] sm:$0xf0]  ;;  %v5583_v47 = vld [vmem:[#allocation3 + $0x1d4] sm:$0xf] }
 0x332   :  { %5696 = vpow2.f32 %v2776_v43  ;;  %v2710_v56 = vpop.f32.mrf.mxu3  ;;  %v5002_v43 = vor.u32 %v5585_v29, %v4999_v30 }
 0x333   :  { %5698 = vpow2.f32 %v2778_v44  ;;  %v2697_v46 = vpop.f32.mrf.mxu2  ;;  %v5567_v44 = vld [vmem:[#allocation3 + $0x154] sm:$0xf] }
 0x334   :  { %5700 = vrcp.f32 %v2788_v48  ;;  %v4991_v48 = vld [vmem:[#allocation3 + $0x1d8] sm:$0xf0]  ;;  %v4930_v57 = vor.u32 %v5567_v44, %v4927_v45  ;;  %v4759_v44 = vld [vmem:[#allocation3 + $0x8] sm:$0xf0] }
 0x335   :  { %5702 = vrcp.f32 %v2789_v49  ;;  %v4794_v49 = vor.u32 %v5533_v33, %v4791_v34  ;;  %v4994_v58 = vor.u32 %v5583_v47, %v4991_v48  ;;  %v4823_v47 = vld [vmem:[#allocation3 + $0x88] sm:$0xf0]  ;;  %v5603_v48 = vld [vmem:[#allocation3 + $0x274] sm:$0xf] }
 0x338   :  { %v5697_v50 = vpop.eup %5696 }
 0x339   :  { %v5699_v51 = vpop.eup %5698  ;;  %v2790_v52 = vadd.f32 1.0, %v5697_v50 }
 0x33a   :  { %v2791_v55 = vadd.f32 1.0, %v5699_v51  ;;  %v5701_v59 = vpop.eup %5700  ;;  %v4858_v51 = vor.u32 %v5549_v38, %v4855_v39  ;;  %v5561_v38 = vld [vmem:[#allocation3 + $0x124] sm:$0xf]  ;;  %v4903_v39 = vld [vmem:[#allocation3 + $0x128] sm:$0xf0] }
 0x33b   :  { %5704 = vrcp.f32 %v2790_v52  ;;  %v5703_v3 = vpop.eup %5702  ;;  %v7447_v61 = vpack.c.bf16 %v5701_v59, %v5701_v59  ;;  %v5531_v52 = vld [vmem:[#allocation3 + $0x34] sm:$0xf] }
 0x33c   :  { %5706 = vrcp.f32 %v2791_v55  ;;  %v7449_v2 = vpack.c.bf16 %v5703_v3, %v5703_v3  ;;  %v5547_v59 = vld [vmem:[#allocation3 + $0xb4] sm:$0xf]  ;;  %v5565_v3 = vld [vmem:[#allocation3 + $0x144] sm:$0xf]  ;;  %v4786_v7 = vor.u32 %v5531_v52, %v4783_v53  ;;  %v5135_v53 = vld [vmem:[#allocation3 + $0x2f8] sm:$0xf0] }
 0x33d   :  { %3466 = vmatmul.bf16.vlgmr.msra.gmra.mxu0 %v7447_v61  ;;  %v4922_v18 = vor.u32 %v5565_v3, %v4919_v0  ;;  %v5619_v52 = vld [vmem:[#allocation3 + $0x2f4] sm:$0xf] }
 0x33e   :  { %3479 = vmatmul.bf16.vlgmr.msra.gmra.mxu1 %v7449_v2  ;;  %3562 = vmatpush.bf16.msra.mxu0 %v4818_v60  ;;  %v4847_v60 = vld [vmem:[#allocation3 + $0xb8] sm:$0xf0]  ;;  %v5575_v3 = vld [vmem:[#allocation3 + $0x194] sm:$0xf] }
 0x33f   :  { %3575 = vmatpush.bf16.msra.mxu1 %v4882_v62 }
 0x341   :  { %v5705_v14 = vpop.eup %5704 }
 0x342   :  { %v5707_v16 = vpop.eup %5706  ;;  %v7455_v17 = vpack.c.bf16 %v5705_v14, %v5705_v14  ;;  %v2721_v19 = vpop.f32.mrf.mxu0  ;;  %3563 = vmatpush.bf16.msra.mxu0 %v4810_v13  ;;  %v5545_v13 = vld [vmem:[#allocation3 + $0xa4] sm:$0xf]  ;;  %v4839_v14 = vld [vmem:[#allocation3 + $0xa8] sm:$0xf0] }
 0x343   :  { %v7457_v25 = vpack.c.bf16 %v5707_v16, %v5707_v16  ;;  %v2722_v26 = vadd.f32 %v2721_v19, %v2328_v5  ;;  %v2734_v27 = vpop.f32.mrf.mxu1  ;;  %3576 = vmatpush.bf16.msra.mxu1 %v4874_v4  ;;  %v4983_v5 = vld [vmem:[#allocation3 + $0x1c8] sm:$0xf0]  ;;  %v5563_v16 = vld [vmem:[#allocation3 + $0x134] sm:$0xf]  ;;  %v4911_v19 = vld [vmem:[#allocation3 + $0x138] sm:$0xf0]  ;;  %v4842_v30 = vor.u32 %v5545_v13, %v4839_v14 }
 0x344   :  { %v2735_v31 = vadd.f32 %v2734_v27, %v2329_v12  ;;  %3492 = vmatmul.bf16.vlgmr.msra.gmra.mxu2 %v7455_v17  ;;  %v4850_v12 = vor.u32 %v5547_v59, %v4847_v60  ;;  %v4986_v15 = vor.u32 %v5581_v1, %v4983_v5  ;;  %v4778_v27 = vor.u32 %v5529_v8, %v4775_v9  ;;  %v5601_v9 = vld [vmem:[#allocation3 + $0x264] sm:$0xf]  ;;  %v5127_v14 = vld [vmem:[#allocation3 + $0x2e8] sm:$0xf0] }
 0x345   :  { %v2768_v35 = vsub.f32 0.0, %v2722_v26  ;;  %3505 = vmatmul.bf16.vlgmr.msra.gmra.mxu3 %v7457_v25  ;;  %3588 = vmatpush.bf16.msra.mxu2 %v4946_v20  ;;  %v4914_v34 = vor.u32 %v5563_v16, %v4911_v19  ;;  %v5617_v13 = vld [vmem:[#allocation3 + $0x2e4] sm:$0xf]  ;;  %v4951_v16 = vld [vmem:[#allocation3 + $0x188] sm:$0xf0] }
 0x346   :  { %v2769_v40 = vsub.f32 0.0, %v2735_v31  ;;  %3601 = vmatpush.bf16.msra.mxu3 %v5010_v21  ;;  %3564 = vmatpush.bf16.msra.mxu0 %v4802_v32  ;;  %v5527_v31 = vld [vmem:[#allocation3 + $0x14] sm:$0xf]  ;;  %v4767_v32 = vld [vmem:[#allocation3 + $0x18] sm:$0xf0] }
 0x347   :  { %v2780_v46 = vmul.f32 1.442695, %v2768_v35  ;;  %3577 = vmatpush.bf16.msra.mxu1 %v4866_v36  ;;  %v4978_v35 = vor.u32 %v5579_v22, %v4975_v23  ;;  %v5543_v36 = vld [vmem:[#allocation3 + $0x94] sm:$0xf]  ;;  %v5130_v23 = vor.u32 %v5617_v13, %v5127_v14 }
 0x348   :  { %v2782_v56 = vmul.f32 1.442695, %v2769_v40  ;;  %v5577_v40 = vld [vmem:[#allocation3 + $0x1a4] sm:$0xf]  ;;  %v5651_v22 = vld [vmem:[#allocation3 + $0x3f4] sm:$0xf] }
 0x349   :  { %5708 = vpow2.f32 %v2780_v46  ;;  %3589 = vmatpush.bf16.msra.mxu2 %v4938_v42  ;;  %v4770_v42 = vor.u32 %v5527_v31, %v4767_v32  ;;  %v5541_v46 = vld [vmem:[#allocation3 + $0x84] sm:$0xf]  ;;  %v5119_v31 = vld [vmem:[#allocation3 + $0x2d8] sm:$0xf0] }
 0x34a   :  { %v2747_v50 = vpop.f32.mrf.mxu2  ;;  %5710 = vpow2.f32 %v2782_v56  ;;  %v2760_v55 = vpop.f32.mrf.mxu3  ;;  %3602 = vmatpush.bf16.msra.mxu3 %v5002_v43  ;;  %3565 = vmatpush.bf16.msra.mxu0 %v4794_v49  ;;  %v5525_v43 = vld [vmem:[#allocation3 + $0x4] sm:$0xf]  ;;  %v4906_v49 = vor.u32 %v5561_v38, %v4903_v39  ;;  %v4826_v1 = vor.u32 %v5541_v46, %v4823_v47  ;;  %v5111_v47 = vld [vmem:[#allocation3 + $0x2c8] sm:$0xf0] }
 0x34b   :  { %v2748_v54 = vadd.f32 %v2747_v50, %v2330_v37  ;;  %v2723_v10 = vpop.f32.mrf.mxu0  ;;  %v2761_v62 = vadd.f32 %v2760_v55, %v2331_v41  ;;  %v2736_v63 = vpop.f32.mrf.mxu1  ;;  %3578 = vmatpush.bf16.msra.mxu1 %v4858_v51  ;;  %v4831_v37 = vld [vmem:[#allocation3 + $0x98] sm:$0xf0]  ;;  %v4967_v41 = vld [vmem:[#allocation3 + $0x1a8] sm:$0xf0]  ;;  %v4762_v60 = vor.u32 %v5525_v43, %v4759_v44  ;;  %v5633_v39 = vld [vmem:[#allocation3 + $0x364] sm:$0xf] }
 0x34c   :  { %v4834_v45 = vor.u32 %v5543_v36, %v4831_v37  ;;  %v4970_v50 = vor.u32 %v5577_v40, %v4967_v41  ;;  %v5071_v51 = vld [vmem:[#allocation3 + $0x278] sm:$0xf0]  ;;  %v5559_v10 = vld [vmem:[#allocation3 + $0x114] sm:$0xf]  ;;  %v5191_v40 = vld [vmem:[#allocation3 + $0x368] sm:$0xf0] }
 0x34d   :  { %v2770_v6 = vsub.f32 0.0, %v2748_v54  ;;  %v2771_v11 = vsub.f32 0.0, %v2761_v62  ;;  %3590 = vmatpush.bf16.msra.mxu2 %v4930_v57  ;;  %v4895_v57 = vld [vmem:[#allocation3 + $0x118] sm:$0xf0]  ;;  %v5074_v5 = vor.u32 %v5603_v48, %v5071_v51  ;;  %v5649_v41 = vld [vmem:[#allocation3 + $0x3e4] sm:$0xf]  ;;  %v5194_v48 = vor.u32 %v5633_v39, %v5191_v40 }
 0x34e   :  { %3603 = vmatpush.bf16.msra.mxu3 %v4994_v58  ;;  %3566 = vmatpush.bf16.msra.mxu0 %v4786_v7  ;;  %v4959_v62 = vld [vmem:[#allocation3 + $0x198] sm:$0xf0]  ;;  %v5138_v7 = vor.u32 %v5619_v52, %v5135_v53  ;;  %v4898_v8 = vor.u32 %v5559_v10, %v4895_v57  ;;  %v5255_v43 = vld [vmem:[#allocation3 + $0x3e8] sm:$0xf0]  ;;  %v5597_v44 = vld [vmem:[#allocation3 + $0x244] sm:$0xf] }
 0x34f   :  { %v2784_v4 = vmul.f32 1.442695, %v2770_v6  ;;  %v5709_v20 = vpop.eup %5708  ;;  %v2786_v21 = vmul.f32 1.442695, %v2771_v11  ;;  %3579 = vmatpush.bf16.msra.mxu1 %v4850_v12  ;;  %v5063_v11 = vld [vmem:[#allocation3 + $0x268] sm:$0xf0]  ;;  %v4962_v12 = vor.u32 %v5575_v3, %v4959_v62 }
 0x350   :  { %v5711_v24 = vpop.eup %5710  ;;  %v2792_v26 = vadd.f32 1.0, %v5709_v20  ;;  %v5066_v19 = vor.u32 %v5601_v9, %v5063_v11  ;;  %v5635_v20 = vld [vmem:[#allocation3 + $0x374] sm:$0xf]  ;;  %v5613_v46 = vld [vmem:[#allocation3 + $0x2c4] sm:$0xf] }
 0x351   :  { %5712 = vpow2.f32 %v2784_v4  ;;  %v2793_v28 = vadd.f32 1.0, %v5711_v24  ;;  %3591 = vmatpush.bf16.msra.mxu2 %v4922_v18  ;;  %v5557_v4 = vld [vmem:[#allocation3 + $0x104] sm:$0xf]  ;;  %v4887_v18 = vld [vmem:[#allocation3 + $0x108] sm:$0xf0]  ;;  %v5114_v53 = vor.u32 %v5613_v46, %v5111_v47 }
 0x352   :  { %5714 = vpow2.f32 %v2786_v21  ;;  %v2749_v29 = vpop.f32.mrf.mxu2  ;;  %v2762_v33 = vpop.f32.mrf.mxu3  ;;  %3604 = vmatpush.bf16.msra.mxu3 %v4986_v15  ;;  %3567 = vmatpush.bf16.msra.mxu0 %v4778_v27  ;;  %v5573_v15 = vld [vmem:[#allocation3 + $0x184] sm:$0xf]  ;;  %v5199_v21 = vld [vmem:[#allocation3 + $0x378] sm:$0xf0]  ;;  %v5647_v52 = vld [vmem:[#allocation3 + $0x3d4] sm:$0xf] }
 0x353   :  { %5716 = vrcp.f32 %v2792_v26  ;;  %3580 = vmatpush.bf16.msra.mxu1 %v4842_v30  ;;  %v5263_v24 = vld [vmem:[#allocation3 + $0x3f8] sm:$0xf0]  ;;  %v5599_v26 = vld [vmem:[#allocation3 + $0x254] sm:$0xf]  ;;  %v4890_v29 = vor.u32 %v5557_v4, %v4887_v18  ;;  %v5629_v62 = vld [vmem:[#allocation3 + $0x344] sm:$0xf] }
 0x354   :  { %5718 = vrcp.f32 %v2793_v28  ;;  %v5055_v27 = vld [vmem:[#allocation3 + $0x258] sm:$0xf0]  ;;  %v5615_v30 = vld [vmem:[#allocation3 + $0x2d4] sm:$0xf]  ;;  %v5266_v37 = vor.u32 %v5651_v22, %v5263_v24  ;;  %v5031_v9 = vld [vmem:[#allocation3 + $0x228] sm:$0xf0] }
 0x355   :  { %3592 = vmatpush.bf16.msra.mxu2 %v4914_v34  ;;  %v4954_v34 = vor.u32 %v5573_v15, %v4951_v16  ;;  %v5058_v38 = vor.u32 %v5599_v26, %v5055_v27  ;;  %v5183_v51 = vld [vmem:[#allocation3 + $0x358] sm:$0xf0]  ;;  %v5611_v57 = vld [vmem:[#allocation3 + $0x2b4] sm:$0xf]  ;;  %v5609_v11 = vld [vmem:[#allocation3 + $0x2a4] sm:$0xf] }
 0x356   :  { %3605 = vmatpush.bf16.msra.mxu3 %v4978_v35  ;;  %3568 = vmatpush.bf16.msra.mxu0 %v4770_v42  ;;  %v5202_v35 = vor.u32 %v5635_v20, %v5199_v21  ;;  %v5122_v42 = vor.u32 %v5615_v30, %v5119_v31  ;;  %v5039_v10 = vld [vmem:[#allocation3 + $0x238] sm:$0xf0]  ;;  %v5627_v18 = vld [vmem:[#allocation3 + $0x334] sm:$0xf]  ;;  %v5625_v27 = vld [vmem:[#allocation3 + $0x324] sm:$0xf] }
 0x357   :  { %v5713_v56 = vpop.eup %5712  ;;  %3581 = vmatpush.bf16.msra.mxu1 %v4834_v45  ;;  %v5047_v45 = vld [vmem:[#allocation3 + $0x248] sm:$0xf0]  ;;  %v5167_v15 = vld [vmem:[#allocation3 + $0x338] sm:$0xf0]  ;;  %v5643_v16 = vld [vmem:[#allocation3 + $0x3b4] sm:$0xf] }
 0x358   :  { %v5715_v54 = vpop.eup %5714  ;;  %v2794_v55 = vadd.f32 1.0, %v5713_v56  ;;  %v5258_v56 = vor.u32 %v5649_v41, %v5255_v43  ;;  %v5231_v20 = vld [vmem:[#allocation3 + $0x3b8] sm:$0xf0]  ;;  %v5591_v21 = vld [vmem:[#allocation3 + $0x214] sm:$0xf]  ;;  %v5170_v24 = vor.u32 %v5627_v18, %v5167_v15 }
 0x359   :  { %v5717_v58 = vpop.eup %5716  ;;  %v2795_v59 = vadd.f32 1.0, %v5715_v54  ;;  %3593 = vmatpush.bf16.msra.mxu2 %v4906_v49  ;;  %v5050_v49 = vor.u32 %v5597_v44, %v5047_v45  ;;  %v5247_v54 = vld [vmem:[#allocation3 + $0x3d8] sm:$0xf0]  ;;  %v5223_v31 = vld [vmem:[#allocation3 + $0x3a8] sm:$0xf0] }
 0x35a   :  { %v5719_v63 = vpop.eup %5718  ;;  %v7463_v0 = vpack.c.bf16 %v5717_v58, %v5717_v58  ;;  %5720 = vrcp.f32 %v2794_v55  ;;  %3606 = vmatpush.bf16.msra.mxu3 %v4970_v50  ;;  %3569 = vmatpush.bf16.msra.mxu0 %v4762_v60  ;;  %v5631_v50 = vld [vmem:[#allocation3 + $0x354] sm:$0xf]  ;;  %v5103_v58 = vld [vmem:[#allocation3 + $0x2b8] sm:$0xf0]  ;;  %v5250_v60 = vor.u32 %v5647_v52, %v5247_v54  ;;  %v5143_v47 = vld [vmem:[#allocation3 + $0x308] sm:$0xf0] }
 0x35b   :  { %v7465_v6 = vpack.c.bf16 %v5719_v63, %v5719_v63  ;;  %5722 = vrcp.f32 %v2795_v59  ;;  %3582 = vmatpush.bf16.msra.mxu1 %v4826_v1  ;;  %v5595_v55 = vld [vmem:[#allocation3 + $0x234] sm:$0xf]  ;;  %v5186_v59 = vor.u32 %v5631_v50, %v5183_v51  ;;  %v5175_v63 = vld [vmem:[#allocation3 + $0x348] sm:$0xf0]  ;;  %v5645_v1 = vld [vmem:[#allocation3 + $0x3c4] sm:$0xf] }
 0x35c   :  { %3518 = vmatmul.bf16.vlgmr.msrb.gmra.mxu0 %v7463_v0  ;;  %v5042_v3 = vor.u32 %v5595_v55, %v5039_v10  ;;  %v5178_v13 = vor.u32 %v5629_v62, %v5175_v63  ;;  %v5023_v22 = vld [vmem:[#allocation3 + $0x218] sm:$0xf0]  ;;  %v5623_v41 = vld [vmem:[#allocation3 + $0x314] sm:$0xf] }
 0x35d   :  { %3531 = vmatmul.bf16.vlgmr.msrb.gmra.mxu1 %v7465_v6  ;;  %3594 = vmatpush.bf16.msra.mxu2 %v4898_v8  ;;  %v5593_v8 = vld [vmem:[#allocation3 + $0x224] sm:$0xf]  ;;  %v5026_v26 = vor.u32 %v5591_v21, %v5023_v22  ;;  %v5639_v44 = vld [vmem:[#allocation3 + $0x394] sm:$0xf] }
 0x35e   :  { %3614 = vmatpush.bf16.msrb.mxu0 %v5074_v5  ;;  %3607 = vmatpush.bf16.msra.mxu3 %v4962_v12  ;;  %v5106_v5 = vor.u32 %v5611_v57, %v5103_v58  ;;  %v5095_v12 = vld [vmem:[#allocation3 + $0x2a8] sm:$0xf0]  ;;  %v5034_v4 = vor.u32 %v5593_v8, %v5031_v9 }
 0x35f   :  { %3627 = vmatpush.bf16.msrb.mxu1 %v5138_v7  ;;  %v5239_v7 = vld [vmem:[#allocation3 + $0x3c8] sm:$0xf0] }
 0x360   :  { %v5721_v28 = vpop.eup %5720  ;;  %v5242_v14 = vor.u32 %v5645_v1, %v5239_v7 }
 0x361   :  { %v5723_v32 = vpop.eup %5722  ;;  %v7469_v33 = vpack.c.bf16 %v5721_v28, %v5721_v28  ;;  %3595 = vmatpush.bf16.msra.mxu2 %v4890_v29  ;;  %v5159_v28 = vld [vmem:[#allocation3 + $0x328] sm:$0xf0]  ;;  %v5641_v29 = vld [vmem:[#allocation3 + $0x3a4] sm:$0xf] }
 0x362   :  { %v7471_v36 = vpack.c.bf16 %v5723_v32, %v5723_v32  ;;  %3615 = vmatpush.bf16.msrb.mxu0 %v5066_v19  ;;  %3608 = vmatpush.bf16.msra.mxu3 %v4954_v34  ;;  %v5098_v19 = vor.u32 %v5609_v11, %v5095_v12  ;;  %v5589_v32 = vld [vmem:[#allocation3 + $0x204] sm:$0xf]  ;;  %v5015_v34 = vld [vmem:[#allocation3 + $0x208] sm:$0xf0]  ;;  %v5226_v39 = vor.u32 %v5641_v29, %v5223_v31 }
 0x363   :  { %3628 = vmatpush.bf16.msrb.mxu1 %v5130_v23  ;;  %3544 = vmatmul.bf16.vlgmr.msrb.gmra.mxu2 %v7469_v33  ;;  %v5607_v23 = vld [vmem:[#allocation3 + $0x294] sm:$0xf]  ;;  %v5018_v40 = vor.u32 %v5589_v32, %v5015_v34 }
 0x364   :  { %3557 = vmatmul.bf16.vlgmr.msrb.gmra.mxu3 %v7471_v36 }
 0x365   :  { %3640 = vmatpush.bf16.msrb.mxu2 %v5202_v35  ;;  %v5605_v35 = vld [vmem:[#allocation3 + $0x284] sm:$0xf] }
 0x366   :  { %3653 = vmatpush.bf16.msrb.mxu3 %v5266_v37  ;;  %3616 = vmatpush.bf16.msrb.mxu0 %v5058_v38  ;;  %v5079_v37 = vld [vmem:[#allocation3 + $0x288] sm:$0xf0]  ;;  %v5162_v38 = vor.u32 %v5625_v27, %v5159_v28 }
 0x367   :  { %3629 = vmatpush.bf16.msrb.mxu1 %v5122_v42  ;;  %v5151_v42 = vld [vmem:[#allocation3 + $0x318] sm:$0xf0]  ;;  %v5082_v43 = vor.u32 %v5605_v35, %v5079_v37 }
 0x368   :  { %v5154_v45 = vor.u32 %v5623_v41, %v5151_v42 }
 0x369   :  { %3641 = vmatpush.bf16.msrb.mxu2 %v5194_v48  ;;  %v5637_v48 = vld [vmem:[#allocation3 + $0x384] sm:$0xf] }
 0x36a   :  { %3654 = vmatpush.bf16.msrb.mxu3 %v5258_v56  ;;  %3617 = vmatpush.bf16.msrb.mxu0 %v5050_v49  ;;  %v5207_v56 = vld [vmem:[#allocation3 + $0x388] sm:$0xf0] }
 0x36b   :  { %3630 = vmatpush.bf16.msrb.mxu1 %v5114_v53  ;;  %v5210_v50 = vor.u32 %v5637_v48, %v5207_v56 }
 0x36c   :  { %3570 = vmatmul.bf16.vlgmr.msra.gmra.mxu0 %v7447_v61  ;;  %v5087_v61 = vld [vmem:[#allocation3 + $0x298] sm:$0xf0] }
 0x36d   :  { %3642 = vmatpush.bf16.msrb.mxu2 %v5186_v59  ;;  %3583 = vmatmul.bf16.vlgmr.msra.gmra.mxu1 %v7449_v2  ;;  %v5234_v2 = vor.u32 %v5643_v16, %v5231_v20  ;;  %v5090_v30 = vor.u32 %v5607_v23, %v5087_v61 }
 0x36e   :  { %3655 = vmatpush.bf16.msrb.mxu3 %v5250_v60  ;;  %3618 = vmatpush.bf16.msrb.mxu0 %v5042_v3 }
 0x36f   :  { %3631 = vmatpush.bf16.msrb.mxu1 %v5106_v5 }
 0x371   :  { %3643 = vmatpush.bf16.msrb.mxu2 %v5178_v13 }
 0x372   :  { %3656 = vmatpush.bf16.msrb.mxu3 %v5242_v14  ;;  %3619 = vmatpush.bf16.msrb.mxu0 %v5034_v4 }
 0x373   :  { %3632 = vmatpush.bf16.msrb.mxu1 %v5098_v19  ;;  %3596 = vmatmul.bf16.vlgmr.msra.gmra.mxu2 %v7455_v17  ;;  %v5215_v17 = vld [vmem:[#allocation3 + $0x398] sm:$0xf0] }
 0x374   :  { %3609 = vmatmul.bf16.vlgmr.msra.gmra.mxu3 %v7457_v25  ;;  %v5218_v46 = vor.u32 %v5639_v44, %v5215_v17  ;;  %v5621_v25 = vld [vmem:[#allocation3 + $0x304] sm:$0xf] }
 0x375   :  { %3644 = vmatpush.bf16.msrb.mxu2 %v5170_v24  ;;  %v5146_v49 = vor.u32 %v5621_v25, %v5143_v47 }
 0x376   :  { %3657 = vmatpush.bf16.msrb.mxu3 %v5234_v2  ;;  %3620 = vmatpush.bf16.msrb.mxu0 %v5026_v26 }
 0x377   :  { %3633 = vmatpush.bf16.msrb.mxu1 %v5090_v30 }
 0x379   :  { %3645 = vmatpush.bf16.msrb.mxu2 %v5162_v38 }
 0x37a   :  { %3658 = vmatpush.bf16.msrb.mxu3 %v5226_v39  ;;  %3621 = vmatpush.bf16.msrb.mxu0 %v5018_v40 }
 0x37b   :  { %3634 = vmatpush.bf16.msrb.mxu1 %v5082_v43 }
 0x37d   :  { %3646 = vmatpush.bf16.msrb.mxu2 %v5154_v45  ;;  %3622 = vmatmul.bf16.vlgmr.msrb.gmra.mxu0 %v7463_v0 }
 0x37e   :  { %3659 = vmatpush.bf16.msrb.mxu3 %v5218_v46  ;;  %3635 = vmatmul.bf16.vlgmr.msrb.gmra.mxu1 %v7465_v6 }
 0x381   :  { %3647 = vmatpush.bf16.msrb.mxu2 %v5146_v49 }
 0x382   :  { %3660 = vmatpush.bf16.msrb.mxu3 %v5210_v50 }
 0x384   :  { %3648 = vmatmul.bf16.vlgmr.msrb.gmra.mxu2 %v7469_v33  ;;  %v2812_v33 = vld [vmem:[%s7500_s8] sm:$0x3]  ;;  %s5789_s8 = smov [#allocation7]  }
 0x385   :  { %3661 = vmatmul.bf16.vlgmr.msrb.gmra.mxu3 %v7471_v36  ;;  %v2814_v36 = vperm.slane %v2812_v33, 0  ;;  %v2815_v19 = vperm.slane %v2812_v33, 1  ;;  %s3694_s9 = sshll.u32 %s5789_s8, 4  ;;  %s3695_s9 = int_to_ptr.vmem [resolvable:$true] %s3694_s9 }
 0x3ba   :  { %v3467_v0 = vpop.f32.mrf.mxu0 }
 0x3bb   :  { %v3480_v51 = vpop.f32.mrf.mxu1  ;;  %v3468_v57 = vadd.f32 %v3467_v0, %v2814_v36 }
 0x3bd   :  { %v3481_v58 = vadd.f32 %v3480_v51, %v3468_v57 }
 0x3c2   :  { %v3469_v52 = vpop.f32.mrf.mxu0 }
 0x3c3   :  { %v3482_v6 = vpop.f32.mrf.mxu1 }
 0x3c7   :  { %v3493_v53 = vpop.f32.mrf.mxu2 }
 0x3c8   :  { %v3506_v54 = vpop.f32.mrf.mxu3  ;;  %v3494_v3 = vadd.f32 %v3493_v53, %v3481_v58 }
 0x3ca   :  { %v3507_v62 = vadd.f32 %v3506_v54, %v3494_v3 }
 0x3cf   :  { %v3495_v55 = vpop.f32.mrf.mxu2 }
 0x3d0   :  { %v3508_v10 = vpop.f32.mrf.mxu3 }
 0x3d9   :  { %v3519_v59 = vpop.f32.mrf.mxu0 }
 0x3da   :  { %v3532_v60 = vpop.f32.mrf.mxu1  ;;  %v3520_v63 = vadd.f32 %v3519_v59, %v3507_v62 }
 0x3dc   :  { %v3533_v7 = vadd.f32 %v3532_v60, %v3520_v63 }
 0x3e1   :  { %v3521_v1 = vpop.f32.mrf.mxu0 }
 0x3e2   :  { %v3534_v5 = vpop.f32.mrf.mxu1 }
 0x3e6   :  { %v3545_v8 = vpop.f32.mrf.mxu2 }
 0x3e7   :  { %v3546_v9 = vadd.f32 %v3545_v8, %v3533_v7  ;;  %v3558_v11 = vpop.f32.mrf.mxu3 }
 0x3e9   :  { %v3559_v12 = vadd.f32 %v3558_v11, %v3546_v9  ;;  %v3571_v13 = vpop.f32.mrf.mxu0 }
 0x3ea   :  { %v3584_v14 = vpop.f32.mrf.mxu1  ;;  %v3572_v22 = vadd.f32 %v3571_v13, %v2815_v19 }
 0x3eb   :  { %v3666_v4 = vsub.f32 0.0, %v3559_v12 }
 0x3ec   :  { %v3585_v26 = vadd.f32 %v3584_v14, %v3572_v22 }
 0x3ed   :  { %v3668_v18 = vmul.f32 1.442695, %v3666_v4 }
 0x3ee   :  { %v3547_v15 = vpop.f32.mrf.mxu2 }
 0x3ef   :  { %5724 = vpow2.f32 %v3668_v18  ;;  %v3560_v16 = vpop.f32.mrf.mxu3 }
 0x3f1   :  { %v3573_v20 = vpop.f32.mrf.mxu0 }
 0x3f2   :  { %v3586_v21 = vpop.f32.mrf.mxu1 }
 0x3f5   :  { %v5725_v23 = vpop.eup %5724 }
 0x3f6   :  { %v3672_v61 = vadd.f32 1.0, %v5725_v23  ;;  %v3597_v24 = vpop.f32.mrf.mxu2 }
 0x3f7   :  { %v3610_v2 = vpop.f32.mrf.mxu3  ;;  %v3598_v27 = vadd.f32 %v3597_v24, %v3585_v26 }
 0x3f8   :  { %5726 = vrcp.f32 %v3672_v61 }
 0x3f9   :  { %v3611_v31 = vadd.f32 %v3610_v2, %v3598_v27 }
 0x3fa   :  { %v3623_v28 = vpop.f32.mrf.mxu0 }
 0x3fb   :  { %v3636_v29 = vpop.f32.mrf.mxu1  ;;  %v3624_v35 = vadd.f32 %v3623_v28, %v3611_v31 }
 0x3fd   :  { %v3637_v39 = vadd.f32 %v3636_v29, %v3624_v35 }
 0x3fe   :  { %v5727_v30 = vpop.eup %5726  ;;  %v3599_v32 = vpop.f32.mrf.mxu2 }
 0x3ff   :  { %3676 = vst [vmem:[#allocation7] sm:$0xff] %v5727_v30  ;;  %v3612_v34 = vpop.f32.mrf.mxu3 }
 0x402   :  { %v3625_v37 = vpop.f32.mrf.mxu0 }
 0x403   :  { %v3638_v38 = vpop.f32.mrf.mxu1 }
 0x407   :  { %v3649_v40 = vpop.f32.mrf.mxu2 }
 0x408   :  { %v3650_v41 = vadd.f32 %v3649_v40, %v3637_v39  ;;  %v3662_v42 = vpop.f32.mrf.mxu3 }
 0x40a   :  { %v3663_v43 = vadd.f32 %v3662_v42, %v3650_v41 }
 0x40c   :  { %v3667_v44 = vsub.f32 0.0, %v3663_v43 }
 0x40e   :  { %v3670_v17 = vmul.f32 1.442695, %v3667_v44 }
 0x40f   :  { %v3651_v45 = vpop.f32.mrf.mxu2 }
 0x410   :  { %5728 = vpow2.f32 %v3670_v17  ;;  %v3664_v46 = vpop.f32.mrf.mxu3 }
 0x416   :  { %v5729_v25 = vpop.eup %5728 }
 0x417   :  { %v3673_v47 = vadd.f32 1.0, %v5729_v25 }
 0x419   :  { %5730 = vrcp.f32 %v3673_v47 }
 0x41f   :  { %v5731_v48 = vpop.eup %5730 }
 0x420   :  { %3677 = vst [vmem:[#allocation7 + $0x8] sm:$0xff] %v5731_v48 }
 0x421   :  { %3699 = dma.vmem_to_hbm [thread:$0]  %s3695_s9, 256, %s3697_s11, [#allocation8]  }
 0x422   :  { %5784 = dma.done.wait [#allocation6], 128  }
 0x423   :  { %5785 = vsyncadd [#allocation6], 4294967168 }
 0x424   :  { %5786 = dma.done.wait [#allocation8], 256  }
 0x425   :  { %5787 = vsyncadd [#allocation8], 4294967040 }
 0x426   :  { %3708 = vsyncpa [#allocation6], 1 }
 0x427   :  { %3709 = vsyncpa [#allocation8], 1 }
 0x428   :  { %3710 = vsyncmov [#allocation4] }
 0x42b   :  { %s3711_s7 = vpop.sfrf %3710 }
 0x42c   :  { %p5267_p0 = scmp.ne.s32.totalorder %s3711_s7, 0 }
 0x42e   :  { %3715 = shalt.err (%p5267_p0)  }
 0x42f   :  { %3717 = vsyncmov [#allocation4 + $0x1] }
 0x432   :  { %s3718_s12 = vpop.sfrf %3717 }
 0x433   :  { %p5268_p1 = scmp.ne.s32.totalorder %s3718_s12, 0 }
 0x435   :  { %3722 = shalt.err (%p5268_p1)  }

// kernel: autoencoder_forward.1
= control target key start
LH: loop header
LB: loop body
LE: loop exit
PB: predicated region body
PF: predicated region fallthrough
CT: control target
= control target key end

     0   :  { %16 = vsyncpa [#allocation3], 0  ;;  %s7630_s0 = inlined_call_operand.vmem [shape: f32[8,256], index: 0, kind: input, shape index: {}]   ;;  %s7631_s1 = inlined_call_operand.vmem [shape: bf16[256,1024], index: 1, kind: input, shape index: {}]   ;;  %s7632_s2 = inlined_call_operand.vmem [shape: f32[1,1024], index: 2, kind: input, shape index: {}]   ;;  %s7633_s3 = inlined_call_operand.vmem [shape: bf16[1024,128], index: 3, kind: input, shape index: {}]   ;;  %s7634_s4 = inlined_call_operand.vmem [shape: f32[1,128], index: 4, kind: input, shape index: {}]   ;;  %s7635_s5 = inlined_call_operand.vmem [shape: bf16[128,1024], index: 5, kind: input, shape index: {}]   ;;  %s7636_s6 = inlined_call_operand.vmem [shape: f32[1,1024], index: 6, kind: input, shape index: {}]   ;;  %s7637_s7 = inlined_call_operand.vmem [shape: bf16[1024,256], index: 7, kind: input, shape index: {}]   ;;  %s7638_s8 = inlined_call_operand.vmem [shape: f32[1,256], index: 8, kind: input, shape index: {}]   ;;  %s7639_s9 = inlined_call_operand.hbm [shape: f32[8,128], index: 9, kind: output, shape index: {0}]   ;;  %s7640_s10 = inlined_call_operand.hbm [shape: f32[8,256], index: 10, kind: output, shape index: {1}]  }
   0x1   :  { %v3515_v0 = vld [vmem:[%s7631_s1 + $0x1c0] sm:$0xf]  ;;  %v4881_v5 = vld [vmem:[%s7631_s1 + $0x1c4] sm:$0xf] }
   0x2   :  { %v4885_v1 = vld [vmem:[%s7631_s1 + $0x1dc] sm:$0xf0]  ;;  %v3517_v6 = vld [vmem:[%s7631_s1 + $0x1e0] sm:$0xf0] }
   0x3   :  { %v3771_v2 = vld [vmem:[%s7631_s1 + $0x3c0] sm:$0xf]  ;;  %v3516_v3 = vor.u32 %v4885_v1, %v3515_v0  ;;  %v3520_v8 = vor.u32 %v4881_v5, %v3517_v6  ;;  %v4945_v9 = vld [vmem:[%s7631_s1 + $0x3c4] sm:$0xf] }
   0x4   :  { %v4949_v4 = vld [vmem:[%s7631_s1 + $0x3dc] sm:$0xf0]  ;;  %v3773_v10 = vld [vmem:[%s7631_s1 + $0x3e0] sm:$0xf0] }
   0x5   :  { %v3772_v7 = vor.u32 %v4949_v4, %v3771_v2  ;;  %v3483_v11 = vld [vmem:[%s7631_s1 + $0x180] sm:$0xf]  ;;  %826 = vmatpush.bf16.msra.mxu0 %v3516_v3  ;;  %v3776_v12 = vor.u32 %v4945_v9, %v3773_v10  ;;  %852 = vmatpush.bf16.msra.mxu2 %v3520_v8  ;;  %v4873_v18 = vld [vmem:[%s7631_s1 + $0x184] sm:$0xf] }
   0x6   :  { %v4877_v13 = vld [vmem:[%s7631_s1 + $0x19c] sm:$0xf0]  ;;  %v3485_v19 = vld [vmem:[%s7631_s1 + $0x1a0] sm:$0xf0] }
   0x7   :  { %v3739_v14 = vld [vmem:[%s7631_s1 + $0x380] sm:$0xf]  ;;  %839 = vmatpush.bf16.msra.mxu1 %v3772_v7  ;;  %v3484_v16 = vor.u32 %v4877_v13, %v3483_v11  ;;  %v4937_v20 = vld [vmem:[%s7631_s1 + $0x384] sm:$0xf]  ;;  %865 = vmatpush.bf16.msra.mxu3 %v3776_v12  ;;  %v3488_v21 = vor.u32 %v4873_v18, %v3485_v19 }
   0x8   :  { %v4941_v15 = vld [vmem:[%s7631_s1 + $0x39c] sm:$0xf0]  ;;  %v3741_v22 = vld [vmem:[%s7631_s1 + $0x3a0] sm:$0xf0] }
   0x9   :  { %v3740_v17 = vor.u32 %v4941_v15, %v3739_v14  ;;  %v3451_v23 = vld [vmem:[%s7631_s1 + $0x140] sm:$0xf]  ;;  %v3744_v25 = vor.u32 %v4937_v20, %v3741_v22  ;;  %v4865_v28 = vld [vmem:[%s7631_s1 + $0x144] sm:$0xf]  ;;  %827 = vmatpush.bf16.msra.mxu0 %v3484_v16  ;;  %853 = vmatpush.bf16.msra.mxu2 %v3488_v21 }
   0xa   :  { %v4869_v24 = vld [vmem:[%s7631_s1 + $0x15c] sm:$0xf0]  ;;  %v3453_v30 = vld [vmem:[%s7631_s1 + $0x160] sm:$0xf0] }
   0xb   :  { %v3707_v26 = vld [vmem:[%s7631_s1 + $0x340] sm:$0xf]  ;;  %v3452_v29 = vor.u32 %v4869_v24, %v3451_v23  ;;  %v4929_v31 = vld [vmem:[%s7631_s1 + $0x344] sm:$0xf]  ;;  %840 = vmatpush.bf16.msra.mxu1 %v3740_v17  ;;  %v3456_v34 = vor.u32 %v4865_v28, %v3453_v30  ;;  %866 = vmatpush.bf16.msra.mxu3 %v3744_v25  ;;  %v3523_v28 = vld [vmem:[%s7631_s1 + $0x1c8] sm:$0xf] }
   0xc   :  { %v4933_v27 = vld [vmem:[%s7631_s1 + $0x35c] sm:$0xf0]  ;;  %v3709_v32 = vld [vmem:[%s7631_s1 + $0x360] sm:$0xf0]  ;;  %v3779_v30 = vld [vmem:[%s7631_s1 + $0x3c8] sm:$0xf] }
   0xd   :  { %v3708_v33 = vor.u32 %v4933_v27, %v3707_v26  ;;  %v3419_v35 = vld [vmem:[%s7631_s1 + $0x100] sm:$0xf]  ;;  %v3712_v38 = vor.u32 %v4929_v31, %v3709_v32  ;;  %v4857_v40 = vld [vmem:[%s7631_s1 + $0x104] sm:$0xf]  ;;  %828 = vmatpush.bf16.msra.mxu0 %v3452_v29  ;;  %854 = vmatpush.bf16.msra.mxu2 %v3456_v34  ;;  %v4886_v29 = vld [vmem:[%s7631_s1 + $0x1e4] sm:$0xf0] }
   0xe   :  { %v4861_v36 = vld [vmem:[%s7631_s1 + $0x11c] sm:$0xf0]  ;;  %v3421_v41 = vld [vmem:[%s7631_s1 + $0x120] sm:$0xf0]  ;;  %v4950_v32 = vld [vmem:[%s7631_s1 + $0x3e4] sm:$0xf0] }
   0xf   :  { %v3675_v37 = vld [vmem:[%s7631_s1 + $0x300] sm:$0xf]  ;;  %v4921_v42 = vld [vmem:[%s7631_s1 + $0x304] sm:$0xf]  ;;  %v3420_v44 = vor.u32 %v4861_v36, %v3419_v35  ;;  %841 = vmatpush.bf16.msra.mxu1 %v3708_v33  ;;  %v3424_v46 = vor.u32 %v4857_v40, %v3421_v41  ;;  %867 = vmatpush.bf16.msra.mxu3 %v3712_v38  ;;  %v4882_v33 = vld [vmem:[%s7631_s1 + $0x1cc] sm:$0xf]  ;;  %v3524_v40 = vor.u32 %v4886_v29, %v3523_v28 }
  0x10   :  { %v4925_v39 = vld [vmem:[%s7631_s1 + $0x31c] sm:$0xf0]  ;;  %v3677_v43 = vld [vmem:[%s7631_s1 + $0x320] sm:$0xf0]  ;;  %v3525_v34 = vld [vmem:[%s7631_s1 + $0x1e8] sm:$0xf0]  ;;  %v3780_v41 = vor.u32 %v4950_v32, %v3779_v30 }
  0x11   :  { %v3676_v45 = vor.u32 %v4925_v39, %v3675_v37  ;;  %v3387_v47 = vld [vmem:[%s7631_s1 + $0xc0] sm:$0xf]  ;;  %v3680_v50 = vor.u32 %v4921_v42, %v3677_v43  ;;  %v4849_v52 = vld [vmem:[%s7631_s1 + $0xc4] sm:$0xf]  ;;  %829 = vmatpush.bf16.msra.mxu0 %v3420_v44  ;;  %855 = vmatpush.bf16.msra.mxu2 %v3424_v46  ;;  %v4946_v37 = vld [vmem:[%s7631_s1 + $0x3cc] sm:$0xf]  ;;  %v3528_v42 = vor.u32 %v4882_v33, %v3525_v34 }
  0x12   :  { %v4853_v48 = vld [vmem:[%s7631_s1 + $0xdc] sm:$0xf0]  ;;  %v3389_v53 = vld [vmem:[%s7631_s1 + $0xe0] sm:$0xf0]  ;;  %v3781_v38 = vld [vmem:[%s7631_s1 + $0x3e8] sm:$0xf0] }
  0x13   :  { %v3643_v49 = vld [vmem:[%s7631_s1 + $0x2c0] sm:$0xf]  ;;  %v4913_v54 = vld [vmem:[%s7631_s1 + $0x2c4] sm:$0xf]  ;;  %v3388_v56 = vor.u32 %v4853_v48, %v3387_v47  ;;  %842 = vmatpush.bf16.msra.mxu1 %v3676_v45  ;;  %v3392_v58 = vor.u32 %v4849_v52, %v3389_v53  ;;  %868 = vmatpush.bf16.msra.mxu3 %v3680_v50  ;;  %v3491_v43 = vld [vmem:[%s7631_s1 + $0x188] sm:$0xf]  ;;  %v3784_v46 = vor.u32 %v4946_v37, %v3781_v38 }
  0x14   :  { %v4917_v51 = vld [vmem:[%s7631_s1 + $0x2dc] sm:$0xf0]  ;;  %v3645_v55 = vld [vmem:[%s7631_s1 + $0x2e0] sm:$0xf0]  ;;  %v4878_v44 = vld [vmem:[%s7631_s1 + $0x1a4] sm:$0xf0] }
  0x15   :  { %v3644_v57 = vor.u32 %v4917_v51, %v3643_v49  ;;  %v3355_v59 = vld [vmem:[%s7631_s1 + $0x80] sm:$0xf]  ;;  %v3648_v62 = vor.u32 %v4913_v54, %v3645_v55  ;;  %v4841_v0 = vld [vmem:[%s7631_s1 + $0x84] sm:$0xf]  ;;  %830 = vmatpush.bf16.msra.mxu0 %v3388_v56  ;;  %856 = vmatpush.bf16.msra.mxu2 %v3392_v58  ;;  %v3747_v45 = vld [vmem:[%s7631_s1 + $0x388] sm:$0xf]  ;;  %v3492_v53 = vor.u32 %v4878_v44, %v3491_v43 }
  0x16   :  { %v4845_v60 = vld [vmem:[%s7631_s1 + $0x9c] sm:$0xf0]  ;;  %v3357_v1 = vld [vmem:[%s7631_s1 + $0xa0] sm:$0xf0]  ;;  %v4942_v47 = vld [vmem:[%s7631_s1 + $0x3a4] sm:$0xf0] }
  0x17   :  { %v3611_v61 = vld [vmem:[%s7631_s1 + $0x280] sm:$0xf]  ;;  %v4905_v2 = vld [vmem:[%s7631_s1 + $0x284] sm:$0xf]  ;;  %v3356_v4 = vor.u32 %v4845_v60, %v3355_v59  ;;  %843 = vmatpush.bf16.msra.mxu1 %v3644_v57  ;;  %v3360_v6 = vor.u32 %v4841_v0, %v3357_v1  ;;  %869 = vmatpush.bf16.msra.mxu3 %v3648_v62  ;;  %v4874_v48 = vld [vmem:[%s7631_s1 + $0x18c] sm:$0xf]  ;;  %v3748_v56 = vor.u32 %v4942_v47, %v3747_v45 }
  0x18   :  { %v4909_v63 = vld [vmem:[%s7631_s1 + $0x29c] sm:$0xf0]  ;;  %v3613_v3 = vld [vmem:[%s7631_s1 + $0x2a0] sm:$0xf0]  ;;  %v3493_v49 = vld [vmem:[%s7631_s1 + $0x1a8] sm:$0xf0] }
  0x19   :  { %v3612_v5 = vor.u32 %v4909_v63, %v3611_v61  ;;  %v3323_v7 = vld [vmem:[%s7631_s1 + $0x40] sm:$0xf]  ;;  %v3616_v10 = vor.u32 %v4905_v2, %v3613_v3  ;;  %v4833_v12 = vld [vmem:[%s7631_s1 + $0x44] sm:$0xf]  ;;  %831 = vmatpush.bf16.msra.mxu0 %v3356_v4  ;;  %857 = vmatpush.bf16.msra.mxu2 %v3360_v6  ;;  %v4938_v50 = vld [vmem:[%s7631_s1 + $0x38c] sm:$0xf]  ;;  %v3496_v57 = vor.u32 %v4874_v48, %v3493_v49 }
  0x1a   :  { %v4837_v8 = vld [vmem:[%s7631_s1 + $0x5c] sm:$0xf0]  ;;  %v3325_v13 = vld [vmem:[%s7631_s1 + $0x60] sm:$0xf0]  ;;  %v3749_v51 = vld [vmem:[%s7631_s1 + $0x3a8] sm:$0xf0] }
  0x1b   :  { %v3579_v9 = vld [vmem:[%s7631_s1 + $0x240] sm:$0xf]  ;;  %v4897_v14 = vld [vmem:[%s7631_s1 + $0x244] sm:$0xf]  ;;  %v3324_v16 = vor.u32 %v4837_v8, %v3323_v7  ;;  %844 = vmatpush.bf16.msra.mxu1 %v3612_v5  ;;  %v3328_v20 = vor.u32 %v4833_v12, %v3325_v13  ;;  %870 = vmatpush.bf16.msra.mxu3 %v3616_v10  ;;  %v3459_v54 = vld [vmem:[%s7631_s1 + $0x148] sm:$0xf]  ;;  %v3752_v61 = vor.u32 %v4938_v50, %v3749_v51 }
  0x1c   :  { %v4901_v11 = vld [vmem:[%s7631_s1 + $0x25c] sm:$0xf0]  ;;  %v3581_v15 = vld [vmem:[%s7631_s1 + $0x260] sm:$0xf0]  ;;  %v4870_v58 = vld [vmem:[%s7631_s1 + $0x164] sm:$0xf0] }
  0x1d   :  { %v3291_v17 = vld [vmem:[%s7631_s1] sm:$0xf]  ;;  %v3580_v19 = vor.u32 %v4901_v11, %v3579_v9  ;;  %v4825_v23 = vld [vmem:[%s7631_s1 + $0x4] sm:$0xf]  ;;  %v3584_v24 = vor.u32 %v4897_v14, %v3581_v15  ;;  %832 = vmatpush.bf16.msra.mxu0 %v3324_v16  ;;  %858 = vmatpush.bf16.msra.mxu2 %v3328_v20  ;;  %v3715_v59 = vld [vmem:[%s7631_s1 + $0x348] sm:$0xf]  ;;  %v3460_v4 = vor.u32 %v4870_v58, %v3459_v54 }
  0x1e   :  { %v4829_v18 = vld [vmem:[%s7631_s1 + $0x1c] sm:$0xf0]  ;;  %v3293_v25 = vld [vmem:[%s7631_s1 + $0x20] sm:$0xf0]  ;;  %v4934_v60 = vld [vmem:[%s7631_s1 + $0x364] sm:$0xf0] }
  0x1f   :  { %v3547_v21 = vld [vmem:[%s7631_s1 + $0x200] sm:$0xf]  ;;  %v4889_v26 = vld [vmem:[%s7631_s1 + $0x204] sm:$0xf]  ;;  %v3292_v31 = vor.u32 %v4829_v18, %v3291_v17  ;;  %845 = vmatpush.bf16.msra.mxu1 %v3580_v19  ;;  %v3296_v36 = vor.u32 %v4825_v23, %v3293_v25  ;;  %871 = vmatpush.bf16.msra.mxu3 %v3584_v24  ;;  %v4866_v62 = vld [vmem:[%s7631_s1 + $0x14c] sm:$0xf]  ;;  %v3716_v5 = vor.u32 %v4934_v60, %v3715_v59 }
  0x20   :  { %v4893_v22 = vld [vmem:[%s7631_s1 + $0x21c] sm:$0xf0]  ;;  %v3549_v27 = vld [vmem:[%s7631_s1 + $0x220] sm:$0xf0]  ;;  %v3461_v63 = vld [vmem:[%s7631_s1 + $0x168] sm:$0xf0] }
  0x21   :  { %v3548_v35 = vor.u32 %v4893_v22, %v3547_v21  ;;  %v3552_v39 = vor.u32 %v4889_v26, %v3549_v27  ;;  %833 = vmatpush.bf16.msra.mxu0 %v3292_v31  ;;  %859 = vmatpush.bf16.msra.mxu2 %v3296_v36  ;;  %v36_v52 = vld [vmem:[%s7630_s0] sm:$0xff]  ;;  %v37_v0 = vld [vmem:[%s7630_s0 + $0x8] sm:$0xff]  ;;  %v3464_v6 = vor.u32 %v4866_v62, %v3461_v63 }
  0x22   :  { %v5643_v55 = vpack.c.bf16 %v36_v52, %v36_v52  ;;  %v4930_v1 = vld [vmem:[%s7631_s1 + $0x34c] sm:$0xf]  ;;  %v5671_v3 = vpack.c.bf16 %v37_v0, %v37_v0  ;;  %v3427_v7 = vld [vmem:[%s7631_s1 + $0x108] sm:$0xf] }
  0x23   :  { %846 = vmatpush.bf16.msra.mxu1 %v3548_v35  ;;  %872 = vmatpush.bf16.msra.mxu3 %v3552_v39  ;;  %v3717_v2 = vld [vmem:[%s7631_s1 + $0x368] sm:$0xf0]  ;;  %v4862_v8 = vld [vmem:[%s7631_s1 + $0x124] sm:$0xf0] }
  0x24   :  { %834 = vmatmul.bf16.vlgmr.msra.gmra.mxu0 %v5643_v55  ;;  %860 = vmatmul.bf16.vlgmr.msra.gmra.mxu2 %v5643_v55  ;;  %v3683_v9 = vld [vmem:[%s7631_s1 + $0x308] sm:$0xf]  ;;  %v3720_v10 = vor.u32 %v4930_v1, %v3717_v2  ;;  %v4858_v12 = vld [vmem:[%s7631_s1 + $0x10c] sm:$0xf]  ;;  %v3428_v16 = vor.u32 %v4862_v8, %v3427_v7  ;;  %v3531_v1 = vld [vmem:[%s7631_s1 + $0x1d0] sm:$0xf] }
  0x25   :  { %878 = vmatpush.bf16.msrb.mxu0 %v3524_v40  ;;  %904 = vmatpush.bf16.msrb.mxu2 %v3528_v42  ;;  %v4926_v11 = vld [vmem:[%s7631_s1 + $0x324] sm:$0xf0]  ;;  %v3429_v13 = vld [vmem:[%s7631_s1 + $0x128] sm:$0xf0]  ;;  %v4887_v2 = vld [vmem:[%s7631_s1 + $0x1ec] sm:$0xf0] }
  0x26   :  { %847 = vmatmul.bf16.vlgmr.msra.gmra.mxu1 %v5671_v3  ;;  %v4922_v14 = vld [vmem:[%s7631_s1 + $0x30c] sm:$0xf]  ;;  %873 = vmatmul.bf16.vlgmr.msra.gmra.mxu3 %v5671_v3  ;;  %v3684_v17 = vor.u32 %v4926_v11, %v3683_v9  ;;  %v3432_v18 = vor.u32 %v4858_v12, %v3429_v13  ;;  %v3395_v19 = vld [vmem:[%s7631_s1 + $0xc8] sm:$0xf]  ;;  %v4883_v7 = vld [vmem:[%s7631_s1 + $0x1d4] sm:$0xf] }
  0x27   :  { %891 = vmatpush.bf16.msrb.mxu1 %v3780_v41  ;;  %917 = vmatpush.bf16.msrb.mxu3 %v3784_v46  ;;  %v3685_v15 = vld [vmem:[%s7631_s1 + $0x328] sm:$0xf0]  ;;  %v4854_v20 = vld [vmem:[%s7631_s1 + $0xe4] sm:$0xf0]  ;;  %v3533_v8 = vld [vmem:[%s7631_s1 + $0x1f0] sm:$0xf0] }
  0x28   :  { %v3651_v21 = vld [vmem:[%s7631_s1 + $0x2c8] sm:$0xf]  ;;  %v3688_v22 = vor.u32 %v4922_v14, %v3685_v15  ;;  %v4850_v24 = vld [vmem:[%s7631_s1 + $0xcc] sm:$0xf]  ;;  %v3396_v28 = vor.u32 %v4854_v20, %v3395_v19  ;;  %v4947_v11 = vld [vmem:[%s7631_s1 + $0x3d4] sm:$0xf]  ;;  %v3532_v14 = vor.u32 %v4887_v2, %v3531_v1 }
  0x29   :  { %879 = vmatpush.bf16.msrb.mxu0 %v3492_v53  ;;  %905 = vmatpush.bf16.msrb.mxu2 %v3496_v57  ;;  %v4918_v23 = vld [vmem:[%s7631_s1 + $0x2e4] sm:$0xf0]  ;;  %v3397_v25 = vld [vmem:[%s7631_s1 + $0xe8] sm:$0xf0]  ;;  %v3789_v12 = vld [vmem:[%s7631_s1 + $0x3f0] sm:$0xf0] }
  0x2a   :  { %v4914_v26 = vld [vmem:[%s7631_s1 + $0x2cc] sm:$0xf]  ;;  %v3652_v29 = vor.u32 %v4918_v23, %v3651_v21  ;;  %v3400_v30 = vor.u32 %v4850_v24, %v3397_v25  ;;  %v3363_v31 = vld [vmem:[%s7631_s1 + $0x88] sm:$0xf]  ;;  %v3755_v19 = vld [vmem:[%s7631_s1 + $0x390] sm:$0xf]  ;;  %v3792_v20 = vor.u32 %v4947_v11, %v3789_v12 }
  0x2b   :  { %892 = vmatpush.bf16.msrb.mxu1 %v3748_v56  ;;  %918 = vmatpush.bf16.msrb.mxu3 %v3752_v61  ;;  %v3653_v27 = vld [vmem:[%s7631_s1 + $0x2e8] sm:$0xf0]  ;;  %v4846_v32 = vld [vmem:[%s7631_s1 + $0xa4] sm:$0xf0]  ;;  %v4943_v21 = vld [vmem:[%s7631_s1 + $0x3ac] sm:$0xf0] }
  0x2c   :  { %v3619_v33 = vld [vmem:[%s7631_s1 + $0x288] sm:$0xf]  ;;  %v3656_v34 = vor.u32 %v4914_v26, %v3653_v27  ;;  %v4842_v36 = vld [vmem:[%s7631_s1 + $0x8c] sm:$0xf]  ;;  %v3364_v40 = vor.u32 %v4846_v32, %v3363_v31  ;;  %v3501_v23 = vld [vmem:[%s7631_s1 + $0x1b0] sm:$0xf0]  ;;  %v3756_v27 = vor.u32 %v4943_v21, %v3755_v19 }
  0x2d   :  { %880 = vmatpush.bf16.msrb.mxu0 %v3460_v4  ;;  %906 = vmatpush.bf16.msrb.mxu2 %v3464_v6  ;;  %v4910_v35 = vld [vmem:[%s7631_s1 + $0x2a4] sm:$0xf0]  ;;  %v3365_v37 = vld [vmem:[%s7631_s1 + $0xa8] sm:$0xf0]  ;;  %v3787_v4 = vld [vmem:[%s7631_s1 + $0x3d0] sm:$0xf] }
  0x2e   :  { %v4906_v38 = vld [vmem:[%s7631_s1 + $0x28c] sm:$0xf]  ;;  %v3620_v41 = vor.u32 %v4910_v35, %v3619_v33  ;;  %v3368_v42 = vor.u32 %v4842_v36, %v3365_v37  ;;  %v3331_v43 = vld [vmem:[%s7631_s1 + $0x48] sm:$0xf]  ;;  %v4951_v6 = vld [vmem:[%s7631_s1 + $0x3ec] sm:$0xf0] }
  0x2f   :  { %893 = vmatpush.bf16.msrb.mxu1 %v3716_v5  ;;  %919 = vmatpush.bf16.msrb.mxu3 %v3720_v10  ;;  %v3621_v39 = vld [vmem:[%s7631_s1 + $0x2a8] sm:$0xf0]  ;;  %v4838_v44 = vld [vmem:[%s7631_s1 + $0x64] sm:$0xf0]  ;;  %v3788_v15 = vor.u32 %v4951_v6, %v3787_v4  ;;  %v4939_v24 = vld [vmem:[%s7631_s1 + $0x394] sm:$0xf] }
  0x30   :  { %v3587_v45 = vld [vmem:[%s7631_s1 + $0x248] sm:$0xf]  ;;  %v3624_v46 = vor.u32 %v4906_v38, %v3621_v39  ;;  %v4834_v48 = vld [vmem:[%s7631_s1 + $0x4c] sm:$0xf]  ;;  %v3332_v52 = vor.u32 %v4838_v44, %v3331_v43  ;;  %v3757_v25 = vld [vmem:[%s7631_s1 + $0x3b0] sm:$0xf0] }
  0x31   :  { %881 = vmatpush.bf16.msrb.mxu0 %v3428_v16  ;;  %907 = vmatpush.bf16.msrb.mxu2 %v3432_v18  ;;  %v4902_v47 = vld [vmem:[%s7631_s1 + $0x264] sm:$0xf0]  ;;  %v3333_v49 = vld [vmem:[%s7631_s1 + $0x68] sm:$0xf0]  ;;  %v3536_v16 = vor.u32 %v4883_v7, %v3533_v8  ;;  %v4879_v18 = vld [vmem:[%s7631_s1 + $0x1ac] sm:$0xf0]  ;;  %v3760_v32 = vor.u32 %v4939_v24, %v3757_v25 }
  0x32   :  { %v4898_v50 = vld [vmem:[%s7631_s1 + $0x24c] sm:$0xf]  ;;  %v3299_v53 = vld [vmem:[%s7631_s1 + $0x8] sm:$0xf]  ;;  %v3588_v56 = vor.u32 %v4902_v47, %v3587_v45  ;;  %v3336_v57 = vor.u32 %v4834_v48, %v3333_v49  ;;  %v3723_v31 = vld [vmem:[%s7631_s1 + $0x350] sm:$0xf] }
  0x33   :  { %894 = vmatpush.bf16.msrb.mxu1 %v3684_v17  ;;  %920 = vmatpush.bf16.msrb.mxu3 %v3688_v22  ;;  %v3589_v51 = vld [vmem:[%s7631_s1 + $0x268] sm:$0xf0]  ;;  %v4830_v54 = vld [vmem:[%s7631_s1 + $0x24] sm:$0xf0]  ;;  %v3499_v17 = vld [vmem:[%s7631_s1 + $0x190] sm:$0xf] }
  0x34   :  { %v3555_v58 = vld [vmem:[%s7631_s1 + $0x208] sm:$0xf]  ;;  %v4826_v60 = vld [vmem:[%s7631_s1 + $0xc] sm:$0xf]  ;;  %v3592_v61 = vor.u32 %v4898_v50, %v3589_v51  ;;  %v3300_v5 = vor.u32 %v4830_v54, %v3299_v53  ;;  %v4875_v22 = vld [vmem:[%s7631_s1 + $0x194] sm:$0xf]  ;;  %v3500_v26 = vor.u32 %v4879_v18, %v3499_v17 }
  0x35   :  { %882 = vmatpush.bf16.msrb.mxu0 %v3396_v28  ;;  %908 = vmatpush.bf16.msrb.mxu2 %v3400_v30  ;;  %v4894_v59 = vld [vmem:[%s7631_s1 + $0x224] sm:$0xf0]  ;;  %v3301_v62 = vld [vmem:[%s7631_s1 + $0x28] sm:$0xf0]  ;;  %v3504_v28 = vor.u32 %v4875_v22, %v3501_v23  ;;  %v4871_v30 = vld [vmem:[%s7631_s1 + $0x16c] sm:$0xf0] }
  0x36   :  { %v4890_v63 = vld [vmem:[%s7631_s1 + $0x20c] sm:$0xf]  ;;  %v3556_v9 = vor.u32 %v4894_v59, %v3555_v58  ;;  %v3304_v10 = vor.u32 %v4826_v60, %v3301_v62  ;;  %v4935_v33 = vld [vmem:[%s7631_s1 + $0x36c] sm:$0xf0]  ;;  %v3469_v35 = vld [vmem:[%s7631_s1 + $0x170] sm:$0xf0] }
  0x37   :  { %895 = vmatpush.bf16.msrb.mxu1 %v3652_v29  ;;  %921 = vmatpush.bf16.msrb.mxu3 %v3656_v34  ;;  %v3557_v0 = vld [vmem:[%s7631_s1 + $0x228] sm:$0xf0]  ;;  %v3467_v29 = vld [vmem:[%s7631_s1 + $0x150] sm:$0xf]  ;;  %v4867_v34 = vld [vmem:[%s7631_s1 + $0x154] sm:$0xf]  ;;  %v3724_v39 = vor.u32 %v4935_v33, %v3723_v31 }
  0x38   :  { %v3560_v13 = vor.u32 %v4890_v63, %v3557_v0  ;;  %v4931_v36 = vld [vmem:[%s7631_s1 + $0x354] sm:$0xf]  ;;  %v3468_v38 = vor.u32 %v4871_v30, %v3467_v29  ;;  %v3691_v43 = vld [vmem:[%s7631_s1 + $0x310] sm:$0xf] }
  0x39   :  { %883 = vmatpush.bf16.msrb.mxu0 %v3364_v40  ;;  %909 = vmatpush.bf16.msrb.mxu2 %v3368_v42  ;;  %v3725_v37 = vld [vmem:[%s7631_s1 + $0x370] sm:$0xf0]  ;;  %v3472_v40 = vor.u32 %v4867_v34, %v3469_v35  ;;  %v4863_v42 = vld [vmem:[%s7631_s1 + $0x12c] sm:$0xf0] }
  0x3a   :  { %v3728_v44 = vor.u32 %v4931_v36, %v3725_v37  ;;  %v4927_v45 = vld [vmem:[%s7631_s1 + $0x32c] sm:$0xf0]  ;;  %v3437_v47 = vld [vmem:[%s7631_s1 + $0x130] sm:$0xf0] }
  0x3b   :  { %896 = vmatpush.bf16.msrb.mxu1 %v3620_v41  ;;  %922 = vmatpush.bf16.msrb.mxu3 %v3624_v46  ;;  %v3435_v41 = vld [vmem:[%s7631_s1 + $0x110] sm:$0xf]  ;;  %v4859_v46 = vld [vmem:[%s7631_s1 + $0x114] sm:$0xf]  ;;  %v3692_v51 = vor.u32 %v4927_v45, %v3691_v43 }
  0x3c   :  { %v4923_v48 = vld [vmem:[%s7631_s1 + $0x314] sm:$0xf]  ;;  %v3436_v50 = vor.u32 %v4863_v42, %v3435_v41  ;;  %v3403_v53 = vld [vmem:[%s7631_s1 + $0xd0] sm:$0xf] }
  0x3d   :  { %884 = vmatpush.bf16.msrb.mxu0 %v3332_v52  ;;  %910 = vmatpush.bf16.msrb.mxu2 %v3336_v57  ;;  %v3693_v49 = vld [vmem:[%s7631_s1 + $0x330] sm:$0xf0]  ;;  %v3440_v52 = vor.u32 %v4859_v46, %v3437_v47  ;;  %v4855_v54 = vld [vmem:[%s7631_s1 + $0xec] sm:$0xf0] }
  0x3e   :  { %v3696_v57 = vor.u32 %v4923_v48, %v3693_v49  ;;  %v4919_v58 = vld [vmem:[%s7631_s1 + $0x2ec] sm:$0xf0]  ;;  %v4851_v59 = vld [vmem:[%s7631_s1 + $0xd4] sm:$0xf]  ;;  %v3404_v63 = vor.u32 %v4855_v54, %v3403_v53 }
  0x3f   :  { %897 = vmatpush.bf16.msrb.mxu1 %v3588_v56  ;;  %923 = vmatpush.bf16.msrb.mxu3 %v3592_v61  ;;  %v3659_v56 = vld [vmem:[%s7631_s1 + $0x2d0] sm:$0xf]  ;;  %v3405_v60 = vld [vmem:[%s7631_s1 + $0xf0] sm:$0xf0] }
  0x40   :  { %v4915_v61 = vld [vmem:[%s7631_s1 + $0x2d4] sm:$0xf]  ;;  %v3371_v0 = vld [vmem:[%s7631_s1 + $0x90] sm:$0xf]  ;;  %v3660_v1 = vor.u32 %v4919_v58, %v3659_v56  ;;  %v3408_v2 = vor.u32 %v4851_v59, %v3405_v60 }
  0x41   :  { %885 = vmatpush.bf16.msrb.mxu0 %v3300_v5  ;;  %911 = vmatpush.bf16.msrb.mxu2 %v3304_v10  ;;  %v3661_v62 = vld [vmem:[%s7631_s1 + $0x2f0] sm:$0xf0]  ;;  %v4847_v4 = vld [vmem:[%s7631_s1 + $0xac] sm:$0xf0] }
  0x42   :  { %v3627_v5 = vld [vmem:[%s7631_s1 + $0x290] sm:$0xf]  ;;  %v3664_v7 = vor.u32 %v4915_v61, %v3661_v62  ;;  %v4843_v8 = vld [vmem:[%s7631_s1 + $0x94] sm:$0xf] }
  0x43   :  { %898 = vmatpush.bf16.msrb.mxu1 %v3556_v9  ;;  %924 = vmatpush.bf16.msrb.mxu3 %v3560_v13  ;;  %v4911_v6 = vld [vmem:[%s7631_s1 + $0x2ac] sm:$0xf0]  ;;  %v3373_v9 = vld [vmem:[%s7631_s1 + $0xb0] sm:$0xf0] }
  0x44   :  { %886 = vmatmul.bf16.vlgmr.msrb.gmra.mxu0 %v5643_v55  ;;  %912 = vmatmul.bf16.vlgmr.msrb.gmra.mxu2 %v5643_v55  ;;  %v4907_v10 = vld [vmem:[%s7631_s1 + $0x294] sm:$0xf] }
  0x45   :  { %930 = vmatpush.bf16.msra.mxu0 %v3532_v14  ;;  %956 = vmatpush.bf16.msra.mxu2 %v3536_v16  ;;  %v3629_v11 = vld [vmem:[%s7631_s1 + $0x2b0] sm:$0xf0] }
  0x46   :  { %899 = vmatmul.bf16.vlgmr.msrb.gmra.mxu1 %v5671_v3  ;;  %925 = vmatmul.bf16.vlgmr.msrb.gmra.mxu3 %v5671_v3 }
  0x47   :  { %943 = vmatpush.bf16.msra.mxu1 %v3788_v15  ;;  %969 = vmatpush.bf16.msra.mxu3 %v3792_v20 }
  0x49   :  { %931 = vmatpush.bf16.msra.mxu0 %v3500_v26  ;;  %957 = vmatpush.bf16.msra.mxu2 %v3504_v28 }
  0x4b   :  { %944 = vmatpush.bf16.msra.mxu1 %v3756_v27  ;;  %970 = vmatpush.bf16.msra.mxu3 %v3760_v32 }
  0x4d   :  { %932 = vmatpush.bf16.msra.mxu0 %v3468_v38  ;;  %958 = vmatpush.bf16.msra.mxu2 %v3472_v40 }
  0x4f   :  { %945 = vmatpush.bf16.msra.mxu1 %v3724_v39  ;;  %971 = vmatpush.bf16.msra.mxu3 %v3728_v44 }
  0x51   :  { %933 = vmatpush.bf16.msra.mxu0 %v3436_v50  ;;  %959 = vmatpush.bf16.msra.mxu2 %v3440_v52 }
  0x53   :  { %946 = vmatpush.bf16.msra.mxu1 %v3692_v51  ;;  %972 = vmatpush.bf16.msra.mxu3 %v3696_v57 }
  0x54   :  { %17 = vsyncpa [#allocation5], 0  ;;  %v3372_v12 = vor.u32 %v4847_v4, %v3371_v0  ;;  %v3628_v13 = vor.u32 %v4911_v6, %v3627_v5  ;;  %v3376_v14 = vor.u32 %v4843_v8, %v3373_v9  ;;  %v3339_v15 = vld [vmem:[%s7631_s1 + $0x50] sm:$0xf]  ;;  %v3632_v18 = vor.u32 %v4907_v10, %v3629_v11  ;;  %v4835_v20 = vld [vmem:[%s7631_s1 + $0x54] sm:$0xf] }
  0x55   :  { %934 = vmatpush.bf16.msra.mxu0 %v3404_v63  ;;  %960 = vmatpush.bf16.msra.mxu2 %v3408_v2  ;;  %v4839_v16 = vld [vmem:[%s7631_s1 + $0x6c] sm:$0xf0]  ;;  %v3341_v21 = vld [vmem:[%s7631_s1 + $0x70] sm:$0xf0]  ;;  %v3539_v36 = vld [vmem:[%s7631_s1 + $0x1d8] sm:$0xf] }
  0x56   :  { %v3595_v17 = vld [vmem:[%s7631_s1 + $0x250] sm:$0xf]  ;;  %v4899_v22 = vld [vmem:[%s7631_s1 + $0x254] sm:$0xf]  ;;  %v3340_v24 = vor.u32 %v4839_v16, %v3339_v15  ;;  %v3344_v28 = vor.u32 %v4835_v20, %v3341_v21  ;;  %v4888_v37 = vld [vmem:[%s7631_s1 + $0x1f4] sm:$0xf0] }
  0x57   :  { %947 = vmatpush.bf16.msra.mxu1 %v3660_v1  ;;  %973 = vmatpush.bf16.msra.mxu3 %v3664_v7  ;;  %v4903_v19 = vld [vmem:[%s7631_s1 + $0x26c] sm:$0xf0]  ;;  %v3597_v23 = vld [vmem:[%s7631_s1 + $0x270] sm:$0xf0]  ;;  %v3795_v38 = vld [vmem:[%s7631_s1 + $0x3d8] sm:$0xf]  ;;  %v3540_v48 = vor.u32 %v4888_v37, %v3539_v36 }
  0x58   :  { %v3307_v25 = vld [vmem:[%s7631_s1 + $0x10] sm:$0xf]  ;;  %v3596_v27 = vor.u32 %v4903_v19, %v3595_v17  ;;  %v4827_v31 = vld [vmem:[%s7631_s1 + $0x14] sm:$0xf]  ;;  %v3600_v32 = vor.u32 %v4899_v22, %v3597_v23  ;;  %v4952_v40 = vld [vmem:[%s7631_s1 + $0x3f4] sm:$0xf0] }
  0x59   :  { %935 = vmatpush.bf16.msra.mxu0 %v3372_v12  ;;  %v4831_v26 = vld [vmem:[%s7631_s1 + $0x2c] sm:$0xf0]  ;;  %961 = vmatpush.bf16.msra.mxu2 %v3376_v14  ;;  %v3309_v33 = vld [vmem:[%s7631_s1 + $0x30] sm:$0xf0]  ;;  %v4884_v41 = vld [vmem:[%s7631_s1 + $0x1dc] sm:$0xf]  ;;  %v3796_v49 = vor.u32 %v4952_v40, %v3795_v38 }
  0x5a   :  { %v3563_v29 = vld [vmem:[%s7631_s1 + $0x210] sm:$0xf]  ;;  %v4891_v34 = vld [vmem:[%s7631_s1 + $0x214] sm:$0xf]  ;;  %v3308_v39 = vor.u32 %v4831_v26, %v3307_v25  ;;  %v3541_v42 = vld [vmem:[%s7631_s1 + $0x1f8] sm:$0xf0]  ;;  %v3312_v44 = vor.u32 %v4827_v31, %v3309_v33 }
  0x5b   :  { %948 = vmatpush.bf16.msra.mxu1 %v3628_v13  ;;  %v4895_v30 = vld [vmem:[%s7631_s1 + $0x22c] sm:$0xf0]  ;;  %974 = vmatpush.bf16.msra.mxu3 %v3632_v18  ;;  %v3565_v35 = vld [vmem:[%s7631_s1 + $0x230] sm:$0xf0]  ;;  %v4948_v45 = vld [vmem:[%s7631_s1 + $0x3dc] sm:$0xf]  ;;  %v3544_v50 = vor.u32 %v4884_v41, %v3541_v42 }
  0x5c   :  { %v3564_v43 = vor.u32 %v4895_v30, %v3563_v29  ;;  %v3797_v46 = vld [vmem:[%s7631_s1 + $0x3f8] sm:$0xf0]  ;;  %v3568_v47 = vor.u32 %v4891_v34, %v3565_v35  ;;  %v3507_v51 = vld [vmem:[%s7631_s1 + $0x198] sm:$0xf]  ;;  %s5340_s18 = smov [#allocation2]  }
  0x5d   :  { %936 = vmatpush.bf16.msra.mxu0 %v3340_v24  ;;  %962 = vmatpush.bf16.msra.mxu2 %v3344_v28  ;;  %v4880_v52 = vld [vmem:[%s7631_s1 + $0x1b4] sm:$0xf0]  ;;  %v3800_v54 = vor.u32 %v4948_v45, %v3797_v46  ;;  %v4876_v57 = vld [vmem:[%s7631_s1 + $0x19c] sm:$0xf]  ;;  %s3262_s19 = sshll.u32 %s5340_s18, 4  ;;  %s3263_s19 = int_to_ptr.vmem [resolvable:$true] %s3262_s19 }
  0x5e   :  { %v3763_v53 = vld [vmem:[%s7631_s1 + $0x398] sm:$0xf]  ;;  %v3509_v58 = vld [vmem:[%s7631_s1 + $0x1b8] sm:$0xf0]  ;;  %v3508_v61 = vor.u32 %v4880_v52, %v3507_v51 }
  0x5f   :  { %949 = vmatpush.bf16.msra.mxu1 %v3596_v27  ;;  %975 = vmatpush.bf16.msra.mxu3 %v3600_v32  ;;  %v4944_v56 = vld [vmem:[%s7631_s1 + $0x3b4] sm:$0xf0]  ;;  %v4940_v59 = vld [vmem:[%s7631_s1 + $0x39c] sm:$0xf]  ;;  %v3512_v63 = vor.u32 %v4876_v57, %v3509_v58 }
  0x60   :  { %v3765_v60 = vld [vmem:[%s7631_s1 + $0x3b8] sm:$0xf0]  ;;  %v3764_v62 = vor.u32 %v4944_v56, %v3763_v53  ;;  %v3475_v0 = vld [vmem:[%s7631_s1 + $0x158] sm:$0xf] }
  0x61   :  { %937 = vmatpush.bf16.msra.mxu0 %v3308_v39  ;;  %963 = vmatpush.bf16.msra.mxu2 %v3312_v44  ;;  %v4872_v1 = vld [vmem:[%s7631_s1 + $0x174] sm:$0xf0]  ;;  %v3768_v4 = vor.u32 %v4940_v59, %v3765_v60  ;;  %v4868_v6 = vld [vmem:[%s7631_s1 + $0x15c] sm:$0xf] }
  0x62   :  { %v3731_v2 = vld [vmem:[%s7631_s1 + $0x358] sm:$0xf]  ;;  %v3477_v7 = vld [vmem:[%s7631_s1 + $0x178] sm:$0xf0]  ;;  %v3476_v10 = vor.u32 %v4872_v1, %v3475_v0 }
  0x63   :  { %950 = vmatpush.bf16.msra.mxu1 %v3564_v43  ;;  %976 = vmatpush.bf16.msra.mxu3 %v3568_v47  ;;  %v4936_v5 = vld [vmem:[%s7631_s1 + $0x374] sm:$0xf0]  ;;  %v4932_v8 = vld [vmem:[%s7631_s1 + $0x35c] sm:$0xf]  ;;  %v3480_v12 = vor.u32 %v4868_v6, %v3477_v7 }
  0x64   :  { %938 = vmatmul.bf16.vlgmr.msra.gmra.mxu0 %v5643_v55  ;;  %964 = vmatmul.bf16.vlgmr.msra.gmra.mxu2 %v5643_v55  ;;  %v3733_v9 = vld [vmem:[%s7631_s1 + $0x378] sm:$0xf0]  ;;  %v3732_v11 = vor.u32 %v4936_v5, %v3731_v2  ;;  %v3443_v13 = vld [vmem:[%s7631_s1 + $0x118] sm:$0xf] }
  0x65   :  { %982 = vmatpush.bf16.msrb.mxu0 %v3540_v48  ;;  %1008 = vmatpush.bf16.msrb.mxu2 %v3544_v50  ;;  %v4864_v14 = vld [vmem:[%s7631_s1 + $0x134] sm:$0xf0]  ;;  %v3736_v16 = vor.u32 %v4932_v8, %v3733_v9  ;;  %v4860_v18 = vld [vmem:[%s7631_s1 + $0x11c] sm:$0xf] }
  0x66   :  { %951 = vmatmul.bf16.vlgmr.msra.gmra.mxu1 %v5671_v3  ;;  %977 = vmatmul.bf16.vlgmr.msra.gmra.mxu3 %v5671_v3  ;;  %v3699_v15 = vld [vmem:[%s7631_s1 + $0x318] sm:$0xf]  ;;  %v3445_v19 = vld [vmem:[%s7631_s1 + $0x138] sm:$0xf0]  ;;  %v3444_v22 = vor.u32 %v4864_v14, %v3443_v13  ;;  %v4959_v14 = vld [vmem:[%s7633_s3 + $0x30] sm:$0xff] }
  0x67   :  { %995 = vmatpush.bf16.msrb.mxu1 %v3796_v49  ;;  %1021 = vmatpush.bf16.msrb.mxu3 %v3800_v54  ;;  %v4928_v17 = vld [vmem:[%s7631_s1 + $0x334] sm:$0xf0]  ;;  %v4924_v20 = vld [vmem:[%s7631_s1 + $0x31c] sm:$0xf]  ;;  %v3448_v24 = vor.u32 %v4860_v18, %v3445_v19  ;;  %v4966_v18 = vld [vmem:[%s7633_s3 + $0x68] sm:$0xff] }
  0x68   :  { %v3701_v21 = vld [vmem:[%s7631_s1 + $0x338] sm:$0xf0]  ;;  %v3700_v23 = vor.u32 %v4928_v17, %v3699_v15  ;;  %v3411_v25 = vld [vmem:[%s7631_s1 + $0xd8] sm:$0xf]  ;;  %v4958_v17 = vld [vmem:[%s7633_s3 + $0x28] sm:$0xff] }
  0x69   :  { %983 = vmatpush.bf16.msrb.mxu0 %v3508_v61  ;;  %1009 = vmatpush.bf16.msrb.mxu2 %v3512_v63  ;;  %v4856_v26 = vld [vmem:[%s7631_s1 + $0xf4] sm:$0xf0]  ;;  %v3704_v28 = vor.u32 %v4924_v20, %v3701_v21  ;;  %v4852_v30 = vld [vmem:[%s7631_s1 + $0xdc] sm:$0xf]  ;;  %v4975_v19 = vld [vmem:[%s7633_s3 + $0xb0] sm:$0xff] }
  0x6a   :  { %v3667_v27 = vld [vmem:[%s7631_s1 + $0x2d8] sm:$0xf]  ;;  %v3413_v31 = vld [vmem:[%s7631_s1 + $0xf8] sm:$0xf0]  ;;  %v3412_v34 = vor.u32 %v4856_v26, %v3411_v25  ;;  %v4974_v25 = vld [vmem:[%s7633_s3 + $0xa8] sm:$0xff] }
  0x6b   :  { %996 = vmatpush.bf16.msrb.mxu1 %v3764_v62  ;;  %1022 = vmatpush.bf16.msrb.mxu3 %v3768_v4  ;;  %v4920_v29 = vld [vmem:[%s7631_s1 + $0x2f4] sm:$0xf0]  ;;  %v4916_v32 = vld [vmem:[%s7631_s1 + $0x2dc] sm:$0xf]  ;;  %v3416_v36 = vor.u32 %v4852_v30, %v3413_v31  ;;  %v4983_v30 = vld [vmem:[%s7633_s3 + $0xf0] sm:$0xff] }
  0x6c   :  { %v3669_v33 = vld [vmem:[%s7631_s1 + $0x2f8] sm:$0xf0]  ;;  %v3668_v35 = vor.u32 %v4920_v29, %v3667_v27  ;;  %v3379_v37 = vld [vmem:[%s7631_s1 + $0x98] sm:$0xf] }
  0x6d   :  { %984 = vmatpush.bf16.msrb.mxu0 %v3476_v10  ;;  %1010 = vmatpush.bf16.msrb.mxu2 %v3480_v12  ;;  %v4848_v38 = vld [vmem:[%s7631_s1 + $0xb4] sm:$0xf0]  ;;  %v3672_v40 = vor.u32 %v4916_v32, %v3669_v33  ;;  %v4844_v42 = vld [vmem:[%s7631_s1 + $0x9c] sm:$0xf] }
  0x6e   :  { %v3635_v39 = vld [vmem:[%s7631_s1 + $0x298] sm:$0xf]  ;;  %v3381_v43 = vld [vmem:[%s7631_s1 + $0xb8] sm:$0xf0]  ;;  %v3380_v46 = vor.u32 %v4848_v38, %v3379_v37  ;;  %v4955_v38 = vld [vmem:[%s7633_s3 + $0x10] sm:$0xff] }
  0x6f   :  { %997 = vmatpush.bf16.msrb.mxu1 %v3732_v11  ;;  %1023 = vmatpush.bf16.msrb.mxu3 %v3736_v16  ;;  %v4912_v41 = vld [vmem:[%s7631_s1 + $0x2b4] sm:$0xf0]  ;;  %v4908_v44 = vld [vmem:[%s7631_s1 + $0x29c] sm:$0xf]  ;;  %v3384_v48 = vor.u32 %v4844_v42, %v3381_v43 }
  0x70   :  { %v3637_v45 = vld [vmem:[%s7631_s1 + $0x2b8] sm:$0xf0]  ;;  %v3636_v47 = vor.u32 %v4912_v41, %v3635_v39  ;;  %v3347_v49 = vld [vmem:[%s7631_s1 + $0x58] sm:$0xf]  ;;  %v4982_v39 = vld [vmem:[%s7633_s3 + $0xe8] sm:$0xff] }
  0x71   :  { %985 = vmatpush.bf16.msrb.mxu0 %v3444_v22  ;;  %1011 = vmatpush.bf16.msrb.mxu2 %v3448_v24  ;;  %v4840_v50 = vld [vmem:[%s7631_s1 + $0x74] sm:$0xf0]  ;;  %v3640_v52 = vor.u32 %v4908_v44, %v3637_v45  ;;  %v4836_v54 = vld [vmem:[%s7631_s1 + $0x5c] sm:$0xf]  ;;  %v4957_v22 = vld [vmem:[%s7633_s3 + $0x20] sm:$0xff] }
  0x72   :  { %v3603_v51 = vld [vmem:[%s7631_s1 + $0x258] sm:$0xf]  ;;  %v3349_v56 = vld [vmem:[%s7631_s1 + $0x78] sm:$0xf0]  ;;  %v3348_v59 = vor.u32 %v4840_v50, %v3347_v49  ;;  %v4965_v24 = vld [vmem:[%s7633_s3 + $0x60] sm:$0xff] }
  0x73   :  { %998 = vmatpush.bf16.msrb.mxu1 %v3700_v23  ;;  %1024 = vmatpush.bf16.msrb.mxu3 %v3704_v28  ;;  %v4904_v53 = vld [vmem:[%s7631_s1 + $0x274] sm:$0xf0]  ;;  %v4900_v57 = vld [vmem:[%s7631_s1 + $0x25c] sm:$0xf]  ;;  %v3352_v61 = vor.u32 %v4836_v54, %v3349_v56  ;;  %v4963_v41 = vld [vmem:[%s7633_s3 + $0x50] sm:$0xff] }
  0x74   :  { %v3605_v58 = vld [vmem:[%s7631_s1 + $0x278] sm:$0xf0]  ;;  %v3604_v60 = vor.u32 %v4904_v53, %v3603_v51  ;;  %v3315_v62 = vld [vmem:[%s7631_s1 + $0x18] sm:$0xf]  ;;  %v4954_v45 = vld [vmem:[%s7633_s3 + $0x8] sm:$0xff] }
  0x75   :  { %986 = vmatpush.bf16.msrb.mxu0 %v3412_v34  ;;  %1012 = vmatpush.bf16.msrb.mxu2 %v3416_v36  ;;  %v4832_v63 = vld [vmem:[%s7631_s1 + $0x34] sm:$0xf0]  ;;  %v3608_v1 = vor.u32 %v4900_v57, %v3605_v58  ;;  %v4828_v4 = vld [vmem:[%s7631_s1 + $0x1c] sm:$0xf]  ;;  %v4973_v34 = vld [vmem:[%s7633_s3 + $0xa0] sm:$0xff] }
  0x76   :  { %v3571_v0 = vld [vmem:[%s7631_s1 + $0x218] sm:$0xf]  ;;  %v3317_v5 = vld [vmem:[%s7631_s1 + $0x38] sm:$0xf0]  ;;  %v3316_v8 = vor.u32 %v4832_v63, %v3315_v62  ;;  %v4962_v49 = vld [vmem:[%s7633_s3 + $0x48] sm:$0xff] }
  0x77   :  { %999 = vmatpush.bf16.msrb.mxu1 %v3668_v35  ;;  %1025 = vmatpush.bf16.msrb.mxu3 %v3672_v40  ;;  %v4896_v2 = vld [vmem:[%s7631_s1 + $0x234] sm:$0xf0]  ;;  %v4892_v6 = vld [vmem:[%s7631_s1 + $0x21c] sm:$0xf]  ;;  %v3320_v10 = vor.u32 %v4828_v4, %v3317_v5  ;;  %v4971_v50 = vld [vmem:[%s7633_s3 + $0x90] sm:$0xff] }
  0x78   :  { %v3573_v7 = vld [vmem:[%s7631_s1 + $0x238] sm:$0xf0]  ;;  %v3572_v9 = vor.u32 %v4896_v2, %v3571_v0  ;;  %v4953_v53 = vld [vmem:[%s7633_s3] sm:$0xff] }
  0x79   :  { %987 = vmatpush.bf16.msrb.mxu0 %v3380_v46  ;;  %1013 = vmatpush.bf16.msrb.mxu2 %v3384_v48  ;;  %v3576_v11 = vor.u32 %v4892_v6, %v3573_v7  ;;  %v4960_v12 = vld [vmem:[%s7633_s3 + $0x38] sm:$0xff]  ;;  %v4981_v46 = vld [vmem:[%s7633_s3 + $0xe0] sm:$0xff]  ;;  %v4991_v6 = vld [vmem:[%s7633_s3 + $0x130] sm:$0xff] }
  0x7a   :  { %v4968_v13 = vld [vmem:[%s7633_s3 + $0x78] sm:$0xff]  ;;  %v4961_v58 = vld [vmem:[%s7633_s3 + $0x40] sm:$0xff] }
  0x7b   :  { %1000 = vmatpush.bf16.msrb.mxu1 %v3636_v47  ;;  %1026 = vmatpush.bf16.msrb.mxu3 %v3640_v52  ;;  %v4976_v15 = vld [vmem:[%s7633_s3 + $0xb8] sm:$0xff]  ;;  %v4977_v7 = vld [vmem:[%s7633_s3 + $0xc0] sm:$0xff] }
  0x7c   :  { %v4984_v23 = vld [vmem:[%s7633_s3 + $0xf8] sm:$0xff] }
  0x7d   :  { %988 = vmatpush.bf16.msrb.mxu0 %v3348_v59  ;;  %1014 = vmatpush.bf16.msrb.mxu2 %v3352_v61  ;;  %v4956_v29 = vld [vmem:[%s7633_s3 + $0x18] sm:$0xff]  ;;  %v4970_v59 = vld [vmem:[%s7633_s3 + $0x88] sm:$0xff]  ;;  %v4969_v61 = vld [vmem:[%s7633_s3 + $0x80] sm:$0xff] }
  0x7e   :  { %v4964_v33 = vld [vmem:[%s7633_s3 + $0x58] sm:$0xff] }
  0x7f   :  { %1001 = vmatpush.bf16.msrb.mxu1 %v3604_v60  ;;  %1027 = vmatpush.bf16.msrb.mxu3 %v3608_v1  ;;  %v4972_v42 = vld [vmem:[%s7633_s3 + $0x98] sm:$0xff]  ;;  %v4979_v60 = vld [vmem:[%s7633_s3 + $0xd0] sm:$0xff]  ;;  %v4978_v1 = vld [vmem:[%s7633_s3 + $0xc8] sm:$0xff] }
  0x80   :  { %v4980_v54 = vld [vmem:[%s7633_s3 + $0xd8] sm:$0xff] }
  0x81   :  { %989 = vmatpush.bf16.msrb.mxu0 %v3316_v8  ;;  %1015 = vmatpush.bf16.msrb.mxu2 %v3320_v10  ;;  %v4992_v63 = vld [vmem:[%s7633_s3 + $0x138] sm:$0xff] }
  0x83   :  { %1002 = vmatpush.bf16.msrb.mxu1 %v3572_v9  ;;  %1028 = vmatpush.bf16.msrb.mxu3 %v3576_v11  ;;  %v5000_v9 = vld [vmem:[%s7633_s3 + $0x178] sm:$0xff] }
  0x84   :  { %990 = vmatmul.bf16.vlgmr.msrb.gmra.mxu0 %v5643_v55  ;;  %1016 = vmatmul.bf16.vlgmr.msrb.gmra.mxu2 %v5643_v55  ;;  %v6203_v55 = vld [vmem:[%s7632_s2] sm:$0xff]  ;;  %s3275_s2 = sshll.u32 %s7640_s10, 4  ;;  %s3276_s2 = int_to_ptr.hbm [resolvable:$true] %s3275_s2 }
  0x85   :  { %1598 = vmatpush.bf16.msra.mxu0 %v4960_v12  ;;  %v170_v16 = vperm.slane %v6203_v55, 0  ;;  %1624 = vmatpush.bf16.msra.mxu2 %v4976_v15  ;;  %v171_v27 = vperm.slane %v6203_v55, 1  ;;  %v172_v5 = vperm.slane %v6203_v55, 2  ;;  %v4990_v12 = vld [vmem:[%s7633_s3 + $0x128] sm:$0xff]  ;;  %v173_v15 = vperm.slane %v6203_v55, 3 }
  0x86   :  { %1003 = vmatmul.bf16.vlgmr.msrb.gmra.mxu1 %v5671_v3  ;;  %1029 = vmatmul.bf16.vlgmr.msrb.gmra.mxu3 %v5671_v3  ;;  %v4967_v3 = vld [vmem:[%s7633_s3 + $0x70] sm:$0xff] }
  0x87   :  { %1611 = vmatpush.bf16.msra.mxu1 %v4968_v13  ;;  %1637 = vmatpush.bf16.msra.mxu3 %v4984_v23 }
  0x89   :  { %1599 = vmatpush.bf16.msra.mxu0 %v4959_v14  ;;  %1625 = vmatpush.bf16.msra.mxu2 %v4975_v19 }
  0x8b   :  { %1612 = vmatpush.bf16.msra.mxu1 %v4967_v3  ;;  %1638 = vmatpush.bf16.msra.mxu3 %v4983_v30 }
  0x8d   :  { %1600 = vmatpush.bf16.msra.mxu0 %v4958_v17  ;;  %1626 = vmatpush.bf16.msra.mxu2 %v4974_v25 }
  0x8f   :  { %1613 = vmatpush.bf16.msra.mxu1 %v4966_v18  ;;  %1639 = vmatpush.bf16.msra.mxu3 %v4982_v39  ;;  %v4989_v18 = vld [vmem:[%s7633_s3 + $0x120] sm:$0xff] }
  0x91   :  { %1601 = vmatpush.bf16.msra.mxu0 %v4957_v22  ;;  %1627 = vmatpush.bf16.msra.mxu2 %v4973_v34 }
  0x93   :  { %1614 = vmatpush.bf16.msra.mxu1 %v4965_v24  ;;  %1640 = vmatpush.bf16.msra.mxu3 %v4981_v46  ;;  %v4998_v24 = vld [vmem:[%s7633_s3 + $0x168] sm:$0xff]  ;;  %v174_v46 = vperm.slane %v6203_v55, 4 }
  0x95   :  { %1602 = vmatpush.bf16.msra.mxu0 %v4956_v29  ;;  %1628 = vmatpush.bf16.msra.mxu2 %v4972_v42  ;;  %v4997_v29 = vld [vmem:[%s7633_s3 + $0x160] sm:$0xff]  ;;  %v5008_v42 = vld [vmem:[%s7633_s3 + $0x1b8] sm:$0xff] }
  0x97   :  { %1615 = vmatpush.bf16.msra.mxu1 %v4964_v33  ;;  %1641 = vmatpush.bf16.msra.mxu3 %v4980_v54  ;;  %v5006_v54 = vld [vmem:[%s7633_s3 + $0x1a8] sm:$0xff] }
  0x99   :  { %1603 = vmatpush.bf16.msra.mxu0 %v4955_v38  ;;  %1629 = vmatpush.bf16.msra.mxu2 %v4971_v50  ;;  %v4995_v38 = vld [vmem:[%s7633_s3 + $0x150] sm:$0xff] }
  0x9b   :  { %1616 = vmatpush.bf16.msra.mxu1 %v4963_v41  ;;  %1642 = vmatpush.bf16.msra.mxu3 %v4979_v60 }
  0x9d   :  { %1604 = vmatpush.bf16.msra.mxu0 %v4954_v45  ;;  %1630 = vmatpush.bf16.msra.mxu2 %v4970_v59  ;;  %v175_v59 = vperm.slane %v6203_v55, 5 }
  0x9f   :  { %1617 = vmatpush.bf16.msra.mxu1 %v4962_v49  ;;  %1643 = vmatpush.bf16.msra.mxu3 %v4978_v1  ;;  %v5016_v49 = vld [vmem:[%s7633_s3 + $0x1f8] sm:$0xff] }
  0xa1   :  { %v835_v20 = vpop.f32.mrf.mxu0  ;;  %1605 = vmatpush.bf16.msra.mxu0 %v4953_v53  ;;  %1631 = vmatpush.bf16.msra.mxu2 %v4969_v61  ;;  %v5005_v61 = vld [vmem:[%s7633_s3 + $0x1a0] sm:$0xff] }
  0xa2   :  { %v836_v21 = vadd.f32 %v835_v20, %v170_v16  ;;  %v4999_v16 = vld [vmem:[%s7633_s3 + $0x170] sm:$0xff] }
  0xa3   :  { %v848_v26 = vpop.f32.mrf.mxu1  ;;  %1618 = vmatpush.bf16.msra.mxu1 %v4961_v58  ;;  %1644 = vmatpush.bf16.msra.mxu3 %v4977_v7  ;;  %v5015_v58 = vld [vmem:[%s7633_s3 + $0x1f0] sm:$0xff] }
  0xa4   :  { %v849_v28 = vadd.f32 %v848_v26, %v836_v21 }
  0xa5   :  { %1650 = vmatpush.bf16.msrb.mxu0 %v4992_v63  ;;  %1676 = vmatpush.bf16.msrb.mxu2 %v5008_v42 }
  0xa6   :  { %v1034_v31 = vsub.f32 0.0, %v849_v28 }
  0xa7   :  { %v861_v32 = vpop.f32.mrf.mxu2  ;;  %1663 = vmatpush.bf16.msrb.mxu1 %v5000_v9  ;;  %1689 = vmatpush.bf16.msrb.mxu3 %v5016_v49 }
  0xa8   :  { %v862_v35 = vadd.f32 %v861_v32, %v171_v27  ;;  %v1042_v37 = vmul.f32 1.442695, %v1034_v31  ;;  %v4988_v27 = vld [vmem:[%s7633_s3 + $0x118] sm:$0xff]  ;;  %v4987_v31 = vld [vmem:[%s7633_s3 + $0x110] sm:$0xff] }
  0xa9   :  { %v837_v36 = vpop.f32.mrf.mxu0  ;;  %v874_v40 = vpop.f32.mrf.mxu3  ;;  %1651 = vmatpush.bf16.msrb.mxu0 %v4991_v6  ;;  %v5004_v6 = vld [vmem:[%s7633_s3 + $0x198] sm:$0xff] }
  0xaa   :  { %5212 = vpow2.f32 %v1042_v37  ;;  %v875_v43 = vadd.f32 %v874_v40, %v862_v35  ;;  %v4996_v36 = vld [vmem:[%s7633_s3 + $0x158] sm:$0xff]  ;;  %v4986_v37 = vld [vmem:[%s7633_s3 + $0x108] sm:$0xff]  ;;  %v4985_v40 = vld [vmem:[%s7633_s3 + $0x100] sm:$0xff] }
  0xab   :  { %v850_v44 = vpop.f32.mrf.mxu1  ;;  %1664 = vmatpush.bf16.msrb.mxu1 %v4999_v16  ;;  %1690 = vmatpush.bf16.msrb.mxu3 %v5015_v58  ;;  %v5002_v16 = vld [vmem:[%s7633_s3 + $0x188] sm:$0xff] }
  0xac   :  { %v1035_v47 = vsub.f32 0.0, %v875_v43  ;;  %v4994_v44 = vld [vmem:[%s7633_s3 + $0x148] sm:$0xff] }
  0xad   :  { %1652 = vmatpush.bf16.msrb.mxu0 %v4990_v12 }
  0xae   :  { %v1044_v51 = vmul.f32 1.442695, %v1035_v47  ;;  %v5007_v47 = vld [vmem:[%s7633_s3 + $0x1b0] sm:$0xff] }
  0xaf   :  { %v863_v48 = vpop.f32.mrf.mxu2  ;;  %1665 = vmatpush.bf16.msrb.mxu1 %v4998_v24  ;;  %1677 = vmatpush.bf16.msrb.mxu2 %v5007_v47  ;;  %v176_v24 = vperm.slane %v6203_v55, 6 }
  0xb0   :  { %v5213_v52 = vpop.eup %5212  ;;  %5214 = vpow2.f32 %v1044_v51  ;;  %v4993_v48 = vld [vmem:[%s7633_s3 + $0x140] sm:$0xff] }
  0xb1   :  { %v1058_v56 = vadd.f32 1.0, %v5213_v52  ;;  %v876_v57 = vpop.f32.mrf.mxu3  ;;  %1653 = vmatpush.bf16.msrb.mxu0 %v4989_v18  ;;  %v5001_v18 = vld [vmem:[%s7633_s3 + $0x180] sm:$0xff] }
  0xb3   :  { %5216 = vrcp.f32 %v1058_v56  ;;  %1666 = vmatpush.bf16.msrb.mxu1 %v4997_v29  ;;  %1678 = vmatpush.bf16.msrb.mxu2 %v5006_v54 }
  0xb5   :  { %1654 = vmatpush.bf16.msrb.mxu0 %v4988_v27 }
  0xb6   :  { %v5215_v62 = vpop.eup %5214 }
  0xb7   :  { %v1059_v0 = vadd.f32 1.0, %v5215_v62  ;;  %1667 = vmatpush.bf16.msrb.mxu1 %v4996_v36  ;;  %1679 = vmatpush.bf16.msrb.mxu2 %v5005_v61 }
  0xb9   :  { %v5217_v2 = vpop.eup %5216  ;;  %5218 = vrcp.f32 %v1059_v0  ;;  %1655 = vmatpush.bf16.msrb.mxu0 %v4987_v31  ;;  %v5014_v0 = vld [vmem:[%s7633_s3 + $0x1e8] sm:$0xff] }
  0xba   :  { %v1074_v4 = vpack.c.bf16 %v5217_v2, %v5217_v2  ;;  %1691 = vmatpush.bf16.msrb.mxu3 %v5014_v0  ;;  %v5073_v0 = vld [vmem:[%s7635_s5 + $0x1c4] sm:$0xf] }
  0xbb   :  { %1668 = vmatpush.bf16.msrb.mxu1 %v4995_v38  ;;  %1680 = vmatpush.bf16.msrb.mxu2 %v5004_v6  ;;  %v5078_v6 = vld [vmem:[%s7635_s5 + $0x1e4] sm:$0xf0] }
  0xbc   :  { %1606 = vmatmul.bf16.vlgmr.msra.gmra.mxu0 %v1074_v4 }
  0xbd   :  { %1656 = vmatpush.bf16.msrb.mxu0 %v4986_v37 }
  0xbf   :  { %v5219_v13 = vpop.eup %5218  ;;  %1669 = vmatpush.bf16.msrb.mxu1 %v4994_v44 }
  0xc0   :  { %v1075_v3 = vpack.c.bf16 %v5219_v13, %v5219_v13 }
  0xc1   :  { %v887_v8 = vpop.f32.mrf.mxu0  ;;  %1657 = vmatpush.bf16.msrb.mxu0 %v4985_v40 }
  0xc2   :  { %v888_v10 = vadd.f32 %v887_v8, %v172_v5  ;;  %1619 = vmatmul.bf16.vlgmr.msra.gmra.mxu1 %v1075_v3  ;;  %v5013_v8 = vld [vmem:[%s7633_s3 + $0x1e0] sm:$0xff] }
  0xc3   :  { %v900_v11 = vpop.f32.mrf.mxu1  ;;  %1670 = vmatpush.bf16.msrb.mxu1 %v4993_v48  ;;  %1692 = vmatpush.bf16.msrb.mxu3 %v5013_v8 }
  0xc4   :  { %v901_v14 = vadd.f32 %v900_v11, %v888_v10  ;;  %v5003_v10 = vld [vmem:[%s7633_s3 + $0x190] sm:$0xff] }
  0xc5   :  { %1681 = vmatpush.bf16.msrb.mxu2 %v5003_v10  ;;  %v4293_v10 = vld [vmem:[%s7635_s5 + $0x1e8] sm:$0xf0] }
  0xc6   :  { %v1036_v17 = vsub.f32 0.0, %v901_v14  ;;  %v5012_v14 = vld [vmem:[%s7633_s3 + $0x1d8] sm:$0xff] }
  0xc7   :  { %v913_v20 = vpop.f32.mrf.mxu2  ;;  %1693 = vmatpush.bf16.msrb.mxu3 %v5012_v14  ;;  %v5065_v14 = vld [vmem:[%s7635_s5 + $0x184] sm:$0xf] }
  0xc8   :  { %v1046_v19 = vmul.f32 1.442695, %v1036_v17  ;;  %v914_v21 = vadd.f32 %v913_v20, %v173_v15  ;;  %v5011_v17 = vld [vmem:[%s7633_s3 + $0x1d0] sm:$0xff] }
  0xc9   :  { %v926_v22 = vpop.f32.mrf.mxu3  ;;  %v889_v23 = vpop.f32.mrf.mxu0  ;;  %1682 = vmatpush.bf16.msrb.mxu2 %v5002_v16 }
  0xca   :  { %5220 = vpow2.f32 %v1046_v19  ;;  %v927_v26 = vadd.f32 %v926_v22, %v914_v21  ;;  %v5010_v21 = vld [vmem:[%s7633_s3 + $0x1c8] sm:$0xff] }
  0xcb   :  { %v902_v25 = vpop.f32.mrf.mxu1  ;;  %1694 = vmatpush.bf16.msrb.mxu3 %v5011_v17  ;;  %v4259_v17 = vld [vmem:[%s7635_s5 + $0x188] sm:$0xf] }
  0xcc   :  { %v1037_v28 = vsub.f32 0.0, %v927_v26  ;;  %v5009_v25 = vld [vmem:[%s7633_s3 + $0x1c0] sm:$0xff] }
  0xcd   :  { %1683 = vmatpush.bf16.msrb.mxu2 %v5001_v18  ;;  %v5070_v18 = vld [vmem:[%s7635_s5 + $0x1a4] sm:$0xf0] }
  0xce   :  { %v1048_v30 = vmul.f32 1.442695, %v1037_v28 }
  0xcf   :  { %v915_v33 = vpop.f32.mrf.mxu2  ;;  %1695 = vmatpush.bf16.msrb.mxu3 %v5010_v21  ;;  %v4261_v21 = vld [vmem:[%s7635_s5 + $0x1a8] sm:$0xf0] }
  0xd0   :  { %v5221_v32 = vpop.eup %5220  ;;  %5222 = vpow2.f32 %v1048_v30 }
  0xd1   :  { %v1060_v34 = vadd.f32 1.0, %v5221_v32  ;;  %v928_v35 = vpop.f32.mrf.mxu3  ;;  %v177_v32 = vperm.slane %v6203_v55, 7 }
  0xd3   :  { %5224 = vrcp.f32 %v1060_v34  ;;  %1696 = vmatpush.bf16.msrb.mxu3 %v5009_v25  ;;  %v5057_v25 = vld [vmem:[%s7635_s5 + $0x144] sm:$0xf] }
  0xd6   :  { %v5223_v39 = vpop.eup %5222 }
  0xd7   :  { %v1061_v41 = vadd.f32 1.0, %v5223_v39 }
  0xd9   :  { %v5225_v43 = vpop.eup %5224  ;;  %5226 = vrcp.f32 %v1061_v41 }
  0xda   :  { %v1076_v45 = vpack.c.bf16 %v5225_v43, %v5225_v43 }
  0xdc   :  { %1632 = vmatmul.bf16.vlgmr.msra.gmra.mxu2 %v1076_v45 }
  0xdf   :  { %v5227_v51 = vpop.eup %5226 }
  0xe0   :  { %v1077_v56 = vpack.c.bf16 %v5227_v51, %v5227_v51 }
  0xe1   :  { %v939_v50 = vpop.f32.mrf.mxu0 }
  0xe2   :  { %v940_v52 = vadd.f32 %v939_v50, %v174_v46  ;;  %1645 = vmatmul.bf16.vlgmr.msra.gmra.mxu3 %v1077_v56 }
  0xe3   :  { %v952_v53 = vpop.f32.mrf.mxu1 }
  0xe4   :  { %v953_v57 = vadd.f32 %v952_v53, %v940_v52  ;;  %v5211_v52 = vld [vmem:[%s7634_s4] ss:$0 sm:$0xff] }
  0xe6   :  { %v1038_v60 = vsub.f32 0.0, %v953_v57 }
  0xe7   :  { %v965_v63 = vpop.f32.mrf.mxu2 }
  0xe8   :  { %v1050_v62 = vmul.f32 1.442695, %v1038_v60  ;;  %v966_v1 = vadd.f32 %v965_v63, %v175_v59  ;;  %v5077_v63 = vld [vmem:[%s7635_s5 + $0x1dc] sm:$0xf0] }
  0xe9   :  { %v978_v2 = vpop.f32.mrf.mxu3  ;;  %v941_v4 = vpop.f32.mrf.mxu0 }
  0xea   :  { %5228 = vpow2.f32 %v1050_v62  ;;  %v979_v7 = vadd.f32 %v978_v2, %v966_v1  ;;  %v4283_v62 = vld [vmem:[%s7635_s5 + $0x1c0] sm:$0xf]  ;;  %v4285_v4 = vld [vmem:[%s7635_s5 + $0x1e0] sm:$0xf0] }
  0xeb   :  { %v954_v5 = vpop.f32.mrf.mxu1  ;;  %v4284_v2 = vor.u32 %v5077_v63, %v4283_v62  ;;  %v4165_v62 = vld [vmem:[%s7635_s5 + $0xe8] sm:$0xf0] }
  0xec   :  { %v1039_v9 = vsub.f32 0.0, %v979_v7  ;;  %v4291_v5 = vld [vmem:[%s7635_s5 + $0x1c8] sm:$0xf]  ;;  %v4288_v7 = vor.u32 %v5073_v0, %v4285_v4  ;;  %v5037_v4 = vld [vmem:[%s7635_s5 + $0x9c] sm:$0xf0] }
  0xed   :  { %v4292_v8 = vor.u32 %v5078_v6, %v4291_v5  ;;  %2239 = vmatpush.bf16.msra.mxu0 %v4284_v2  ;;  %v4123_v2 = vld [vmem:[%s7635_s5 + $0x80] sm:$0xf]  ;;  %v5033_v5 = vld [vmem:[%s7635_s5 + $0x84] sm:$0xf] }
  0xee   :  { %v1052_v11 = vmul.f32 1.442695, %v1039_v9  ;;  %v5074_v9 = vld [vmem:[%s7635_s5 + $0x1cc] sm:$0xf]  ;;  %2252 = vmatpush.bf16.msra.mxu1 %v4288_v7  ;;  %v4124_v6 = vor.u32 %v5037_v4, %v4123_v2  ;;  %v4125_v7 = vld [vmem:[%s7635_s5 + $0xa0] sm:$0xf0] }
  0xef   :  { %v967_v13 = vpop.f32.mrf.mxu2  ;;  %2265 = vmatpush.bf16.msra.mxu2 %v4292_v8  ;;  %v4131_v8 = vld [vmem:[%s7635_s5 + $0x88] sm:$0xf] }
  0xf0   :  { %v5229_v12 = vpop.eup %5228  ;;  %5230 = vpow2.f32 %v1052_v11  ;;  %v4251_v11 = vld [vmem:[%s7635_s5 + $0x180] sm:$0xf] }
  0xf1   :  { %v1062_v3 = vadd.f32 1.0, %v5229_v12  ;;  %v980_v15 = vpop.f32.mrf.mxu3  ;;  %v4296_v12 = vor.u32 %v5074_v9, %v4293_v10  ;;  %v5069_v13 = vld [vmem:[%s7635_s5 + $0x19c] sm:$0xf0]  ;;  %v5038_v9 = vld [vmem:[%s7635_s5 + $0xa4] sm:$0xf0]  ;;  %v4128_v10 = vor.u32 %v5033_v5, %v4125_v7 }
  0xf2   :  { %v4252_v15 = vor.u32 %v5069_v13, %v4251_v11  ;;  %v4132_v11 = vor.u32 %v5038_v9, %v4131_v8  ;;  %v4133_v13 = vld [vmem:[%s7635_s5 + $0xa8] sm:$0xf0]  ;;  %v4235_v5 = vld [vmem:[%s7635_s5 + $0x150] sm:$0xf]  ;;  %v5059_v7 = vld [vmem:[%s7635_s5 + $0x154] sm:$0xf] }
  0xf3   :  { %5232 = vrcp.f32 %v1062_v3  ;;  %v4253_v3 = vld [vmem:[%s7635_s5 + $0x1a0] sm:$0xf0]  ;;  %2278 = vmatpush.bf16.msra.mxu3 %v4296_v12  ;;  %v5034_v12 = vld [vmem:[%s7635_s5 + $0x8c] sm:$0xf]  ;;  %v4237_v9 = vld [vmem:[%s7635_s5 + $0x170] sm:$0xf0] }
  0xf4   :  { %v4256_v16 = vor.u32 %v5065_v14, %v4253_v3  ;;  %2240 = vmatpush.bf16.msra.mxu0 %v4252_v15  ;;  %v4136_v14 = vor.u32 %v5034_v12, %v4133_v13  ;;  %v4091_v3 = vld [vmem:[%s7635_s5 + $0x40] sm:$0xf]  ;;  %v4240_v12 = vor.u32 %v5059_v7, %v4237_v9 }
  0xf5   :  { %v5029_v15 = vld [vmem:[%s7635_s5 + $0x5c] sm:$0xf0] }
  0xf6   :  { %v5231_v19 = vpop.eup %5230  ;;  %2253 = vmatpush.bf16.msra.mxu1 %v4256_v16  ;;  %v5025_v16 = vld [vmem:[%s7635_s5 + $0x44] sm:$0xf] }
  0xf7   :  { %v1063_v20 = vadd.f32 1.0, %v5231_v19  ;;  %v5066_v19 = vld [vmem:[%s7635_s5 + $0x18c] sm:$0xf] }
  0xf9   :  { %v5233_v22 = vpop.eup %5232  ;;  %5234 = vrcp.f32 %v1063_v20  ;;  %v4260_v20 = vor.u32 %v5070_v18, %v4259_v17  ;;  %v4092_v17 = vor.u32 %v5029_v15, %v4091_v3  ;;  %v4093_v18 = vld [vmem:[%s7635_s5 + $0x60] sm:$0xf0]  ;;  %v4245_v3 = vld [vmem:[%s7635_s5 + $0x178] sm:$0xf0] }
  0xfa   :  { %v1078_v23 = vpack.c.bf16 %v5233_v22, %v5233_v22  ;;  %v4219_v22 = vld [vmem:[%s7635_s5 + $0x140] sm:$0xf] }
  0xfb   :  { %2266 = vmatpush.bf16.msra.mxu2 %v4260_v20  ;;  %v5030_v20 = vld [vmem:[%s7635_s5 + $0x64] sm:$0xf0] }
  0xfc   :  { %1658 = vmatmul.bf16.vlgmr.msrb.gmra.mxu0 %v1078_v23  ;;  %v5061_v23 = vld [vmem:[%s7635_s5 + $0x15c] sm:$0xf0] }
  0xff   :  { %v5235_v29 = vpop.eup %5234 }
 0x100   :  { %v1079_v30 = vpack.c.bf16 %v5235_v29, %v5235_v29  ;;  %v5062_v29 = vld [vmem:[%s7635_s5 + $0x164] sm:$0xf0] }
 0x101   :  { %v991_v26 = vpop.f32.mrf.mxu0 }
 0x102   :  { %v992_v27 = vadd.f32 %v991_v26, %v176_v24  ;;  %1671 = vmatmul.bf16.vlgmr.msrb.gmra.mxu1 %v1079_v30  ;;  %v4264_v24 = vor.u32 %v5066_v19, %v4261_v21  ;;  %v4221_v26 = vld [vmem:[%s7635_s5 + $0x160] sm:$0xf0]  ;;  %v5058_v30 = vld [vmem:[%s7635_s5 + $0x14c] sm:$0xf]  ;;  %v4099_v19 = vld [vmem:[%s7635_s5 + $0x48] sm:$0xf] }
 0x103   :  { %v1004_v28 = vpop.f32.mrf.mxu1 }
 0x104   :  { %v1005_v31 = vadd.f32 %v1004_v28, %v992_v27  ;;  %v4227_v27 = vld [vmem:[%s7635_s5 + $0x148] sm:$0xf]  ;;  %v4220_v28 = vor.u32 %v5061_v23, %v4219_v22  ;;  %2279 = vmatpush.bf16.msra.mxu3 %v4264_v24  ;;  %v4096_v22 = vor.u32 %v5025_v16, %v4093_v18  ;;  %v4100_v23 = vor.u32 %v5030_v20, %v4099_v19  ;;  %v5026_v24 = vld [vmem:[%s7635_s5 + $0x4c] sm:$0xf]  ;;  %v4203_v16 = vld [vmem:[%s7635_s5 + $0x110] sm:$0xf] }
 0x105   :  { %v5051_v18 = vld [vmem:[%s7635_s5 + $0x114] sm:$0xf] }
 0x106   :  { %v1040_v33 = vsub.f32 0.0, %v1005_v31  ;;  %v4229_v31 = vld [vmem:[%s7635_s5 + $0x168] sm:$0xf0]  ;;  %2241 = vmatpush.bf16.msra.mxu0 %v4220_v28  ;;  %v5021_v28 = vld [vmem:[%s7635_s5 + $0x1c] sm:$0xf0] }
 0x107   :  { %v1017_v35 = vpop.f32.mrf.mxu2  ;;  %v4205_v20 = vld [vmem:[%s7635_s5 + $0x130] sm:$0xf0] }
 0x108   :  { %v1054_v34 = vmul.f32 1.442695, %v1040_v33  ;;  %v1018_v36 = vadd.f32 %v1017_v35, %v177_v32  ;;  %v4224_v33 = vor.u32 %v5057_v25, %v4221_v26  ;;  %v4187_v35 = vld [vmem:[%s7635_s5 + $0x100] sm:$0xf]  ;;  %v4101_v25 = vld [vmem:[%s7635_s5 + $0x68] sm:$0xf0] }
 0x109   :  { %v1030_v37 = vpop.f32.mrf.mxu3  ;;  %v993_v38 = vpop.f32.mrf.mxu0  ;;  %v4104_v26 = vor.u32 %v5026_v24, %v4101_v25  ;;  %v5052_v25 = vld [vmem:[%s7635_s5 + $0x11c] sm:$0xf] }
 0x10a   :  { %5236 = vpow2.f32 %v1054_v34  ;;  %v1031_v40 = vadd.f32 %v1030_v37, %v1018_v36  ;;  %v4228_v34 = vor.u32 %v5062_v29, %v4227_v27  ;;  %v5053_v36 = vld [vmem:[%s7635_s5 + $0x11c] sm:$0xf0]  ;;  %v5049_v37 = vld [vmem:[%s7635_s5 + $0x104] sm:$0xf]  ;;  %v4232_v38 = vor.u32 %v5058_v30, %v4229_v31  ;;  %2254 = vmatpush.bf16.msra.mxu1 %v4224_v33  ;;  %v5022_v33 = vld [vmem:[%s7635_s5 + $0x24] sm:$0xf0] }
 0x10b   :  { %v1006_v39 = vpop.f32.mrf.mxu1  ;;  %v4059_v27 = vld [vmem:[%s7635_s5] sm:$0xf]  ;;  %v5017_v29 = vld [vmem:[%s7635_s5 + $0x4] sm:$0xf] }
 0x10c   :  { %v1041_v41 = vsub.f32 0.0, %v1031_v40  ;;  %v4189_v39 = vld [vmem:[%s7635_s5 + $0x120] sm:$0xf0]  ;;  %v4195_v40 = vld [vmem:[%s7635_s5 + $0x108] sm:$0xf]  ;;  %2267 = vmatpush.bf16.msra.mxu2 %v4228_v34  ;;  %2280 = vmatpush.bf16.msra.mxu3 %v4232_v38  ;;  %v4060_v30 = vor.u32 %v5021_v28, %v4059_v27 }
 0x10d   :  { %v4061_v31 = vld [vmem:[%s7635_s5 + $0x20] sm:$0xf0]  ;;  %v4299_v38 = vld [vmem:[%s7635_s5 + $0x1d0] sm:$0xf] }
 0x10e   :  { %v1056_v42 = vmul.f32 1.442695, %v1041_v41  ;;  %v5054_v41 = vld [vmem:[%s7635_s5 + $0x124] sm:$0xf0]  ;;  %v4064_v34 = vor.u32 %v5017_v29, %v4061_v31  ;;  %v4171_v29 = vld [vmem:[%s7635_s5 + $0xd0] sm:$0xf] }
 0x10f   :  { %v1019_v44 = vpop.f32.mrf.mxu2  ;;  %v5043_v31 = vld [vmem:[%s7635_s5 + $0xd4] sm:$0xf] }
 0x110   :  { %v5237_v43 = vpop.eup %5236  ;;  %5238 = vpow2.f32 %v1056_v42  ;;  %v5050_v42 = vld [vmem:[%s7635_s5 + $0x10c] sm:$0xf]  ;;  %v4188_v44 = vor.u32 %v5053_v36, %v4187_v35 }
 0x111   :  { %v1064_v45 = vadd.f32 1.0, %v5237_v43  ;;  %v1032_v46 = vpop.f32.mrf.mxu3  ;;  %v4197_v43 = vld [vmem:[%s7635_s5 + $0x128] sm:$0xf0] }
 0x112   :  { %v4196_v46 = vor.u32 %v5054_v41, %v4195_v40  ;;  %2242 = vmatpush.bf16.msra.mxu0 %v4188_v44  ;;  %v5018_v36 = vld [vmem:[%s7635_s5 + $0xc] sm:$0xf]  ;;  %v5079_v40 = vld [vmem:[%s7635_s5 + $0x1ec] sm:$0xf0]  ;;  %v5075_v41 = vld [vmem:[%s7635_s5 + $0x1d4] sm:$0xf] }
 0x113   :  { %5240 = vrcp.f32 %v1064_v45  ;;  %v4192_v45 = vor.u32 %v5049_v37, %v4189_v39  ;;  %v4069_v37 = vld [vmem:[%s7635_s5 + $0x28] sm:$0xf0] }
 0x114   :  { %2268 = vmatpush.bf16.msra.mxu2 %v4196_v46  ;;  %v4072_v39 = vor.u32 %v5018_v36, %v4069_v37  ;;  %v5080_v46 = vld [vmem:[%s7635_s5 + $0x1f4] sm:$0xf0] }
 0x115   :  { %2255 = vmatpush.bf16.msra.mxu1 %v4192_v45  ;;  %v4307_v45 = vld [vmem:[%s7635_s5 + $0x1d8] sm:$0xf] }
 0x116   :  { %v5239_v47 = vpop.eup %5238 }
 0x117   :  { %v1065_v55 = vadd.f32 1.0, %v5239_v47  ;;  %v4200_v47 = vor.u32 %v5050_v42, %v4197_v43  ;;  %v4301_v42 = vld [vmem:[%s7635_s5 + $0x1f0] sm:$0xf0]  ;;  %v4300_v43 = vor.u32 %v5079_v40, %v4299_v38  ;;  %v4181_v38 = vld [vmem:[%s7635_s5 + $0xf8] sm:$0xf0] }
 0x118   :  { %v4304_v44 = vor.u32 %v5075_v41, %v4301_v42  ;;  %v5039_v42 = vld [vmem:[%s7635_s5 + $0xac] sm:$0xf0] }
 0x119   :  { %v5241_v48 = vpop.eup %5240  ;;  %5242 = vrcp.f32 %v1065_v55  ;;  %2281 = vmatpush.bf16.msra.mxu3 %v4200_v47  ;;  %v5076_v47 = vld [vmem:[%s7635_s5 + $0x1dc] sm:$0xf] }
 0x11a   :  { %v1080_v49 = vpack.c.bf16 %v5241_v48, %v5241_v48  ;;  %v4155_v48 = vld [vmem:[%s7635_s5 + $0xc0] sm:$0xf] }
 0x11c   :  { %1684 = vmatmul.bf16.vlgmr.msrb.gmra.mxu2 %v1080_v49  ;;  %v5045_v49 = vld [vmem:[%s7635_s5 + $0xdc] sm:$0xf0] }
 0x11f   :  { %v5243_v50 = vpop.eup %5242 }
 0x120   :  { %v1081_v51 = vpack.c.bf16 %v5243_v50, %v5243_v50  ;;  %v5041_v50 = vld [vmem:[%s7635_s5 + $0xc4] sm:$0xf] }
 0x122   :  { %1697 = vmatmul.bf16.vlgmr.msrb.gmra.mxu3 %v1081_v51  ;;  %v4156_v51 = vor.u32 %v5045_v49, %v4155_v48  ;;  %v4308_v48 = vor.u32 %v5080_v46, %v4307_v45  ;;  %v4309_v49 = vld [vmem:[%s7635_s5 + $0x1f8] sm:$0xf0]  ;;  %v4147_v45 = vld [vmem:[%s7635_s5 + $0x98] sm:$0xf] }
 0x123   :  { %v5036_v46 = vld [vmem:[%s7635_s5 + $0x9c] sm:$0xf] }
 0x124   :  { %2243 = vmatpush.bf16.msra.mxu0 %v4156_v51  ;;  %v5071_v51 = vld [vmem:[%s7635_s5 + $0x1ac] sm:$0xf0] }
 0x128   :  { %2244 = vmatpush.bf16.msra.mxu0 %v4124_v6  ;;  %v5063_v6 = vld [vmem:[%s7635_s5 + $0x16c] sm:$0xf0] }
 0x129   :  { %v4236_v8 = vor.u32 %v5063_v6, %v4235_v5 }
 0x12c   :  { %2245 = vmatpush.bf16.msra.mxu0 %v4092_v17  ;;  %v5055_v17 = vld [vmem:[%s7635_s5 + $0x12c] sm:$0xf0] }
 0x12d   :  { %v4204_v19 = vor.u32 %v5055_v17, %v4203_v16  ;;  %v5020_v16 = vld [vmem:[%s7635_s5 + $0x1c] sm:$0xf] }
 0x12e   :  { %v4085_v17 = vld [vmem:[%s7635_s5 + $0x38] sm:$0xf0] }
 0x130   :  { %2246 = vmatpush.bf16.msra.mxu0 %v4060_v30  ;;  %v5047_v30 = vld [vmem:[%s7635_s5 + $0xec] sm:$0xf0] }
 0x134   :  { %2291 = vmatpush.bf16.msrb.mxu0 %v4300_v43  ;;  %v5035_v43 = vld [vmem:[%s7635_s5 + $0x94] sm:$0xf] }
 0x139   :  { %v1607_v53 = vpop.f32.mrf.mxu0 }
 0x13a   :  { %v1608_v54 = vadd.f32 %v5211_v52, %v1607_v53  ;;  %v4157_v52 = vld [vmem:[%s7635_s5 + $0xe0] sm:$0xf0]  ;;  %v4163_v53 = vld [vmem:[%s7635_s5 + $0xc8] sm:$0xf] }
 0x13f   :  { %v1620_v56 = vpop.f32.mrf.mxu1 }
 0x140   :  { %v6399_v57 = vadd.f32 %v1620_v56, %v1608_v54  ;;  %v5046_v54 = vld [vmem:[%s7635_s5 + $0xe4] sm:$0xf0]  ;;  %v4160_v56 = vor.u32 %v5041_v50, %v4157_v52  ;;  %v4267_v50 = vld [vmem:[%s7635_s5 + $0x190] sm:$0xf]  ;;  %v4312_v52 = vor.u32 %v5076_v47, %v4309_v49 }
 0x141   :  { %v1609_v58 = vpop.f32.mrf.mxu0 }
 0x142   :  { %v4164_v58 = vor.u32 %v5046_v54, %v4163_v53  ;;  %2256 = vmatpush.bf16.msra.mxu1 %v4160_v56  ;;  %v4268_v53 = vor.u32 %v5071_v51, %v4267_v50  ;;  %v5067_v54 = vld [vmem:[%s7635_s5 + $0x194] sm:$0xf]  ;;  %v4149_v50 = vld [vmem:[%s7635_s5 + $0xb8] sm:$0xf0]  ;;  %v4107_v51 = vld [vmem:[%s7635_s5 + $0x50] sm:$0xf] }
 0x143   :  { %v4269_v56 = vld [vmem:[%s7635_s5 + $0x1b0] sm:$0xf0] }
 0x144   :  { %2269 = vmatpush.bf16.msra.mxu2 %v4164_v58  ;;  %v4275_v58 = vld [vmem:[%s7635_s5 + $0x198] sm:$0xf]  ;;  %2292 = vmatpush.bf16.msrb.mxu0 %v4268_v53  ;;  %v5031_v53 = vld [vmem:[%s7635_s5 + $0x6c] sm:$0xf0] }
 0x145   :  { %v4108_v6 = vor.u32 %v5031_v53, %v4107_v51  ;;  %v5124_v53 = vld [vmem:[%s7637_s7 + $0x154] sm:$0xf0] }
 0x146   :  { %2257 = vmatpush.bf16.msra.mxu1 %v4128_v10  ;;  %v4243_v10 = vld [vmem:[%s7635_s5 + $0x158] sm:$0xf] }
 0x147   :  { %v1622_v59 = vpop.f32.mrf.mxu1 }
 0x148   :  { %v5042_v59 = vld [vmem:[%s7635_s5 + $0xcc] sm:$0xf]  ;;  %2270 = vmatpush.bf16.msra.mxu2 %v4132_v11  ;;  %v5064_v11 = vld [vmem:[%s7635_s5 + $0x174] sm:$0xf0]  ;;  %2293 = vmatpush.bf16.msrb.mxu0 %v4236_v8  ;;  %v4075_v8 = vld [vmem:[%s7635_s5 + $0x10] sm:$0xf] }
 0x149   :  { %v4168_v0 = vor.u32 %v5042_v59, %v4165_v62  ;;  %v4272_v59 = vor.u32 %v5067_v54, %v4269_v56  ;;  %v5072_v62 = vld [vmem:[%s7635_s5 + $0x1b4] sm:$0xf0]  ;;  %v4244_v13 = vor.u32 %v5064_v11, %v4243_v10  ;;  %v4109_v54 = vld [vmem:[%s7635_s5 + $0x70] sm:$0xf0]  ;;  %v5023_v10 = vld [vmem:[%s7635_s5 + $0x2c] sm:$0xf0] }
 0x14a   :  { %2258 = vmatpush.bf16.msra.mxu1 %v4096_v22  ;;  %v4276_v2 = vor.u32 %v5072_v62, %v4275_v58  ;;  %v5056_v22 = vld [vmem:[%s7635_s5 + $0x134] sm:$0xf0]  ;;  %v4152_v58 = vor.u32 %v5036_v46, %v4149_v50  ;;  %v5019_v11 = vld [vmem:[%s7635_s5 + $0x14] sm:$0xf]  ;;  %v4355_v46 = vld [vmem:[%s7637_s7 + $0x50] sm:$0xf] }
 0x14b   :  { %2282 = vmatpush.bf16.msra.mxu3 %v4168_v0  ;;  %v5068_v0 = vld [vmem:[%s7635_s5 + $0x19c] sm:$0xf]  ;;  %v5032_v62 = vld [vmem:[%s7635_s5 + $0x74] sm:$0xf0] }
 0x14c   :  { %2271 = vmatpush.bf16.msra.mxu2 %v4100_v23  ;;  %v4208_v23 = vor.u32 %v5051_v18, %v4205_v20  ;;  %2294 = vmatpush.bf16.msrb.mxu0 %v4204_v19  ;;  %v4076_v19 = vor.u32 %v5023_v10, %v4075_v8  ;;  %v5138_v8 = vld [vmem:[%s7637_s7 + $0x1c4] sm:$0xf0] }
 0x14e   :  { %2259 = vmatpush.bf16.msra.mxu1 %v4064_v34  ;;  %v4179_v34 = vld [vmem:[%s7635_s5 + $0xd8] sm:$0xf] }
 0x14f   :  { %2283 = vmatpush.bf16.msra.mxu3 %v4136_v14  ;;  %v5060_v14 = vld [vmem:[%s7635_s5 + $0x15c] sm:$0xf] }
 0x150   :  { %v4248_v15 = vor.u32 %v5060_v14, %v4245_v3  ;;  %v4083_v3 = vld [vmem:[%s7635_s5 + $0x18] sm:$0xf] }
 0x152   :  { %2304 = vmatpush.bf16.msrb.mxu1 %v4304_v44  ;;  %v4141_v44 = vld [vmem:[%s7635_s5 + $0xb0] sm:$0xf0] }
 0x153   :  { %2284 = vmatpush.bf16.msra.mxu3 %v4104_v26  ;;  %v4213_v26 = vld [vmem:[%s7635_s5 + $0x138] sm:$0xf0]  ;;  %v4144_v49 = vor.u32 %v5035_v43, %v4141_v44  ;;  %v4555_v43 = vld [vmem:[%s7637_s7 + $0x1e0] sm:$0xf]  ;;  %v5142_v44 = vld [vmem:[%s7637_s7 + $0x1e4] sm:$0xf0] }
 0x154   :  { %v4216_v28 = vor.u32 %v5052_v25, %v4213_v26  ;;  %v4371_v26 = vld [vmem:[%s7637_s7 + $0x70] sm:$0xf]  ;;  %v4556_v51 = vor.u32 %v5142_v44, %v4555_v43  ;;  %v4315_v43 = vld [vmem:[%s7637_s7] sm:$0xf]  ;;  %v5082_v44 = vld [vmem:[%s7637_s7 + $0x4] sm:$0xf0] }
 0x156   :  { %2305 = vmatpush.bf16.msrb.mxu1 %v4272_v59  ;;  %v4115_v59 = vld [vmem:[%s7635_s5 + $0x58] sm:$0xf] }
 0x157   :  { %2285 = vmatpush.bf16.msra.mxu3 %v4072_v39  ;;  %v4139_v39 = vld [vmem:[%s7635_s5 + $0x90] sm:$0xf]  ;;  %v4116_v9 = vor.u32 %v5032_v62, %v4115_v59  ;;  %v4347_v59 = vld [vmem:[%s7637_s7 + $0x40] sm:$0xf]  ;;  %v5090_v62 = vld [vmem:[%s7637_s7 + $0x44] sm:$0xf0] }
 0x15a   :  { %2306 = vmatpush.bf16.msrb.mxu1 %v4240_v12  ;;  %v4077_v12 = vld [vmem:[%s7635_s5 + $0x30] sm:$0xf0] }
 0x15b   :  { %2330 = vmatpush.bf16.msrb.mxu3 %v4312_v52  ;;  %v4080_v20 = vor.u32 %v5019_v11, %v4077_v12  ;;  %v4339_v11 = vld [vmem:[%s7637_s7 + $0x30] sm:$0xf]  ;;  %v5088_v12 = vld [vmem:[%s7637_s7 + $0x34] sm:$0xf0] }
 0x15e   :  { %2307 = vmatpush.bf16.msrb.mxu1 %v4208_v23 }
 0x15f   :  { %v6401_v60 = vpop.f32.mrf.mxu2 }
 0x160   :  { %v1634_v27 = vadd.f32 %v6401_v60, %v6399_v57  ;;  %v4172_v57 = vor.u32 %v5047_v30, %v4171_v29  ;;  %v4173_v60 = vld [vmem:[%s7635_s5 + $0xf0] sm:$0xf0]  ;;  %v5112_v29 = vld [vmem:[%s7637_s7 + $0xf4] sm:$0xf0]  ;;  %v4499_v30 = vld [vmem:[%s7637_s7 + $0x170] sm:$0xf] }
 0x161   :  { %v4176_v36 = vor.u32 %v5043_v31, %v4173_v60  ;;  %v5128_v31 = vld [vmem:[%s7637_s7 + $0x174] sm:$0xf0] }
 0x162   :  { %2295 = vmatpush.bf16.msrb.mxu0 %v4172_v57 }
 0x163   :  { %2308 = vmatpush.bf16.msrb.mxu1 %v4176_v36  ;;  %v4363_v36 = vld [vmem:[%s7637_s7 + $0x60] sm:$0xf] }
 0x165   :  { %v6403_v61 = vpop.f32.mrf.mxu3 }
 0x167   :  { %v1635_v1 = vpop.f32.mrf.mxu2  ;;  %2309 = vmatpush.bf16.msrb.mxu1 %v4144_v49  ;;  %v5108_v49 = vld [vmem:[%s7637_s7 + $0xd4] sm:$0xf0] }
 0x16d   :  { %v1648_v32 = vpop.f32.mrf.mxu3 }
 0x16e   :  { %v4067_v32 = vld [vmem:[%s7635_s5 + $0x8] sm:$0xf] }
 0x16f   :  { %v4068_v35 = vor.u32 %v5022_v33, %v4067_v32  ;;  %v1647_v32 = vadd.f32 %v6403_v61, %v1634_v27  ;;  %v5044_v61 = vld [vmem:[%s7635_s5 + $0xdc] sm:$0xf]  ;;  %v5096_v27 = vld [vmem:[%s7637_s7 + $0x74] sm:$0xf0] }
 0x170   :  { %v4184_v41 = vor.u32 %v5044_v61, %v4181_v38  ;;  %v4427_v61 = vld [vmem:[%s7637_s7 + $0xe0] sm:$0xf]  ;;  %v5110_v38 = vld [vmem:[%s7637_s7 + $0xe4] sm:$0xf0] }
 0x171   :  { %2272 = vmatpush.bf16.msra.mxu2 %v4068_v35  ;;  %v5048_v35 = vld [vmem:[%s7635_s5 + $0xf4] sm:$0xf0] }
 0x172   :  { %v4180_v37 = vor.u32 %v5048_v35, %v4179_v34  ;;  %v4372_v34 = vor.u32 %v5096_v27, %v4371_v26 }
 0x175   :  { %2317 = vmatpush.bf16.msrb.mxu2 %v4308_v48  ;;  %v4140_v48 = vor.u32 %v5039_v42, %v4139_v39  ;;  %v4500_v39 = vor.u32 %v5128_v31, %v4499_v30  ;;  %v5126_v42 = vld [vmem:[%s7637_s7 + $0x164] sm:$0xf0]  ;;  %v4523_v30 = vld [vmem:[%s7637_s7 + $0x1a0] sm:$0xf] }
 0x176   :  { %v5134_v31 = vld [vmem:[%s7637_s7 + $0x1a4] sm:$0xf0] }
 0x177   :  { %2296 = vmatpush.bf16.msrb.mxu0 %v4140_v48  ;;  %v4419_v48 = vld [vmem:[%s7637_s7 + $0xd0] sm:$0xf] }
 0x179   :  { %v6501_v55 = vpop.f32.mrf.mxu0  ;;  %2318 = vmatpush.bf16.msrb.mxu2 %v4276_v2  ;;  %v4117_v2 = vld [vmem:[%s7635_s5 + $0x78] sm:$0xf0] }
 0x17a   :  { %v1660_v40 = vadd.f32 %v6501_v55, %v1647_v32  ;;  %v5040_v55 = vld [vmem:[%s7635_s5 + $0xb4] sm:$0xf0]  ;;  %v4563_v32 = vld [vmem:[%s7637_s7 + $0x1f0] sm:$0xf] }
 0x17b   :  { %v4148_v52 = vor.u32 %v5040_v55, %v4147_v45  ;;  %2297 = vmatpush.bf16.msrb.mxu0 %v4108_v6  ;;  %v4428_v55 = vor.u32 %v5110_v38, %v4427_v61  ;;  %v5122_v6 = vld [vmem:[%s7637_s7 + $0x144] sm:$0xf0]  ;;  %v4451_v61 = vld [vmem:[%s7637_s7 + $0x110] sm:$0xf]  ;;  %v5116_v38 = vld [vmem:[%s7637_s7 + $0x114] sm:$0xf0] }
 0x17d   :  { %2319 = vmatpush.bf16.msrb.mxu2 %v4244_v13 }
 0x17f   :  { %v6527_v63 = vpop.f32.mrf.mxu1  ;;  %2298 = vmatpush.bf16.msrb.mxu0 %v4076_v19  ;;  %v5136_v19 = vld [vmem:[%s7637_s7 + $0x1b4] sm:$0xf0] }
 0x180   :  { %v1673_v47 = vadd.f32 %v6527_v63, %v1660_v40  ;;  %v5027_v63 = vld [vmem:[%s7635_s5 + $0x54] sm:$0xf] }
 0x181   :  { %v1661_v1 = vpop.f32.mrf.mxu0  ;;  %v4112_v7 = vor.u32 %v5027_v63, %v4109_v54  ;;  %v4547_v63 = vld [vmem:[%s7637_s7 + $0x1d0] sm:$0xf]  ;;  %v5140_v54 = vld [vmem:[%s7637_s7 + $0x1d4] sm:$0xf0] }
 0x182   :  { %v4277_v1 = vld [vmem:[%s7635_s5 + $0x1b8] sm:$0xf0] }
 0x183   :  { %v4280_v4 = vor.u32 %v5068_v0, %v4277_v1  ;;  %v5028_v1 = vld [vmem:[%s7635_s5 + $0x5c] sm:$0xf]  ;;  %2310 = vmatpush.bf16.msrb.mxu1 %v4112_v7  ;;  %v4539_v7 = vld [vmem:[%s7637_s7 + $0x1c0] sm:$0xf] }
 0x184   :  { %v4120_v14 = vor.u32 %v5028_v1, %v4117_v2  ;;  %v5106_v1 = vld [vmem:[%s7637_s7 + $0xc4] sm:$0xf0] }
 0x185   :  { %2331 = vmatpush.bf16.msrb.mxu3 %v4280_v4 }
 0x187   :  { %v1674_v21 = vpop.f32.mrf.mxu1  ;;  %2311 = vmatpush.bf16.msrb.mxu1 %v4080_v20  ;;  %v4340_v20 = vor.u32 %v5088_v12, %v4339_v11  ;;  %v4819_v11 = vld [vmem:[%s7637_s7 + $0x3f0] sm:$0xf] }
 0x188   :  { %v4211_v21 = vld [vmem:[%s7635_s5 + $0x118] sm:$0xf] }
 0x189   :  { %v4212_v24 = vor.u32 %v5056_v22, %v4211_v21  ;;  %2332 = vmatpush.bf16.msrb.mxu3 %v4248_v15  ;;  %v5024_v15 = vld [vmem:[%s7635_s5 + $0x34] sm:$0xf0]  ;;  %v4088_v22 = vor.u32 %v5020_v16, %v4085_v17  ;;  %v4467_v16 = vld [vmem:[%s7637_s7 + $0x130] sm:$0xf] }
 0x18a   :  { %v4084_v21 = vor.u32 %v5024_v15, %v4083_v3  ;;  %v4540_v15 = vor.u32 %v5138_v8, %v4539_v7  ;;  %v5120_v17 = vld [vmem:[%s7637_s7 + $0x134] sm:$0xf0]  ;;  %v5130_v7 = vld [vmem:[%s7637_s7 + $0x184] sm:$0xf0] }
 0x18b   :  { %2320 = vmatpush.bf16.msrb.mxu2 %v4212_v24  ;;  %v4468_v26 = vor.u32 %v5120_v17, %v4467_v16  ;;  %v4675_v17 = vld [vmem:[%s7637_s7 + $0x2d0] sm:$0xf] }
 0x18d   :  { %2333 = vmatpush.bf16.msrb.mxu3 %v4216_v28  ;;  %v4435_v28 = vld [vmem:[%s7637_s7 + $0xf0] sm:$0xf] }
 0x18e   :  { %v4436_v35 = vor.u32 %v5112_v29, %v4435_v28  ;;  %v4459_v28 = vld [vmem:[%s7637_s7 + $0x120] sm:$0xf]  ;;  %v5118_v29 = vld [vmem:[%s7637_s7 + $0x124] sm:$0xf0] }
 0x18f   :  { %2321 = vmatpush.bf16.msrb.mxu2 %v4180_v37  ;;  %v5094_v37 = vld [vmem:[%s7637_s7 + $0x64] sm:$0xf0] }
 0x190   :  { %v4364_v45 = vor.u32 %v5094_v37, %v4363_v36  ;;  %v4460_v36 = vor.u32 %v5118_v29, %v4459_v28  ;;  %v4524_v37 = vor.u32 %v5134_v31, %v4523_v30  ;;  %v4667_v28 = vld [vmem:[%s7637_s7 + $0x2c0] sm:$0xf]  ;;  %v5170_v30 = vld [vmem:[%s7637_s7 + $0x2c4] sm:$0xf0] }
 0x191   :  { %2334 = vmatpush.bf16.msrb.mxu3 %v4184_v41  ;;  %v4491_v41 = vld [vmem:[%s7637_s7 + $0x160] sm:$0xf]  ;;  %v4668_v31 = vor.u32 %v5170_v30, %v4667_v28 }
 0x192   :  { %v4492_v50 = vor.u32 %v5126_v42, %v4491_v41  ;;  %v4763_v28 = vld [vmem:[%s7637_s7 + $0x380] sm:$0xf] }
 0x193   :  { %2322 = vmatpush.bf16.msrb.mxu2 %v4148_v52  ;;  %v4483_v52 = vld [vmem:[%s7637_s7 + $0x150] sm:$0xf] }
 0x194   :  { %v4484_v2 = vor.u32 %v5124_v53, %v4483_v52  ;;  %v4316_v52 = vor.u32 %v5082_v44, %v4315_v43  ;;  %v4795_v43 = vld [vmem:[%s7637_s7 + $0x3c0] sm:$0xf] }
 0x195   :  { %2335 = vmatpush.bf16.msrb.mxu3 %v4152_v58  ;;  %v4420_v58 = vor.u32 %v5108_v49, %v4419_v48  ;;  %v5160_v49 = vld [vmem:[%s7637_s7 + $0x274] sm:$0xf0] }
 0x197   :  { %2323 = vmatpush.bf16.msrb.mxu2 %v4116_v9  ;;  %v4348_v9 = vor.u32 %v5090_v62, %v4347_v59  ;;  %v4683_v59 = vld [vmem:[%s7637_s7 + $0x2e0] sm:$0xf] }
 0x199   :  { %2336 = vmatpush.bf16.msrb.mxu3 %v4120_v14  ;;  %v5104_v14 = vld [vmem:[%s7637_s7 + $0xb4] sm:$0xf0] }
 0x19b   :  { %2324 = vmatpush.bf16.msrb.mxu2 %v4084_v21 }
 0x19d   :  { %2337 = vmatpush.bf16.msrb.mxu3 %v4088_v22  ;;  %v4331_v22 = vld [vmem:[%s7637_s7 + $0x20] sm:$0xf] }
 0x19f   :  { %v1685_v33 = vpop.f32.mrf.mxu2 }
 0x1a0   :  { %v1686_v56 = vadd.f32 %v1685_v33, %v1673_v47  ;;  %v5144_v33 = vld [vmem:[%s7637_s7 + $0x1f4] sm:$0xf0] }
 0x1a1   :  { %v4564_v40 = vor.u32 %v5144_v33, %v4563_v32  ;;  %v5092_v47 = vld [vmem:[%s7637_s7 + $0x54] sm:$0xf0] }
 0x1a5   :  { %v1698_v0 = vpop.f32.mrf.mxu3 }
 0x1a6   :  { %v1699_v4 = vadd.f32 %v1698_v0, %v1686_v56  ;;  %v4356_v56 = vor.u32 %v5092_v47, %v4355_v46  ;;  %v4411_v0 = vld [vmem:[%s7637_s7 + $0xc0] sm:$0xf]  ;;  %v4627_v46 = vld [vmem:[%s7637_s7 + $0x270] sm:$0xf]  ;;  %v4452_v47 = vor.u32 %v5116_v38, %v4451_v61 }
 0x1a7   :  { %v1687_v5 = vpop.f32.mrf.mxu2  ;;  %v4412_v10 = vor.u32 %v5106_v1, %v4411_v0  ;;  %v5174_v0 = vld [vmem:[%s7637_s7 + $0x2e4] sm:$0xf0]  ;;  %v4443_v1 = vld [vmem:[%s7637_s7 + $0x100] sm:$0xf]  ;;  %v4659_v61 = vld [vmem:[%s7637_s7 + $0x2b0] sm:$0xf] }
 0x1a8   :  { %v1702_v13 = vsub.f32 0.0, %v1699_v4  ;;  %v4548_v4 = vor.u32 %v5140_v54, %v4547_v63  ;;  %v4475_v5 = vld [vmem:[%s7637_s7 + $0x140] sm:$0xf]  ;;  %v4628_v63 = vor.u32 %v5160_v49, %v4627_v46 }
 0x1a9   :  { %v4476_v3 = vor.u32 %v5122_v6, %v4475_v5  ;;  %v4507_v6 = vld [vmem:[%s7637_s7 + $0x180] sm:$0xf] }
 0x1aa   :  { %v1703_v18 = vmul.f32 1.442695, %v1702_v13  ;;  %v4403_v13 = vld [vmem:[%s7637_s7 + $0xb0] sm:$0xf]  ;;  %v4508_v8 = vor.u32 %v5130_v7, %v4507_v6  ;;  %v4587_v46 = vld [vmem:[%s7637_s7 + $0x220] sm:$0xf] }
 0x1ab   :  { %v4404_v21 = vor.u32 %v5104_v14, %v4403_v13  ;;  %v5208_v13 = vld [vmem:[%s7637_s7 + $0x3f4] sm:$0xf0]  ;;  %v4611_v14 = vld [vmem:[%s7637_s7 + $0x250] sm:$0xf]  ;;  %v5182_v6 = vld [vmem:[%s7637_s7 + $0x324] sm:$0xf0] }
 0x1ac   :  { %5244 = vpow2.f32 %v1703_v18  ;;  %v4531_v18 = vld [vmem:[%s7637_s7 + $0x1b0] sm:$0xf]  ;;  %v4779_v7 = vld [vmem:[%s7637_s7 + $0x3a0] sm:$0xf] }
 0x1ad   :  { %v1700_v23 = vpop.f32.mrf.mxu3  ;;  %v4532_v27 = vor.u32 %v5136_v19, %v4531_v18  ;;  %v5172_v18 = vld [vmem:[%s7637_s7 + $0x2d4] sm:$0xf0] }
 0x1ae   :  { %v5086_v23 = vld [vmem:[%s7637_s7 + $0x24] sm:$0xf0]  ;;  %v4676_v19 = vor.u32 %v5172_v18, %v4675_v17  ;;  %v4707_v17 = vld [vmem:[%s7637_s7 + $0x310] sm:$0xf]  ;;  %v5180_v18 = vld [vmem:[%s7637_s7 + $0x314] sm:$0xf0] }
 0x1af   :  { %v4332_v32 = vor.u32 %v5086_v23, %v4331_v22  ;;  %v4811_v22 = vld [vmem:[%s7637_s7 + $0x3e0] sm:$0xf] }
 0x1b2   :  { %v5245_v24 = vpop.eup %5244 }
 0x1b3   :  { %v1705_v25 = vadd.f32 1.0, %v5245_v24  ;;  %v4395_v24 = vld [vmem:[%s7637_s7 + $0xa0] sm:$0xf] }
 0x1b5   :  { %5246 = vrcp.f32 %v1705_v25  ;;  %v5102_v25 = vld [vmem:[%s7637_s7 + $0xa4] sm:$0xf0] }
 0x1b6   :  { %v4396_v33 = vor.u32 %v5102_v25, %v4395_v24  ;;  %v5206_v24 = vld [vmem:[%s7637_s7 + $0x3e4] sm:$0xf0] }
 0x1b7   :  { %v4812_v25 = vor.u32 %v5206_v24, %v4811_v22 }
 0x1bb   :  { %v5247_v57 = vpop.eup %5246 }
 0x1bc   :  { %v6822_v60 = vpack.c.bf16 %v5247_v57, %v5247_v57  ;;  %1707 = vst [vmem:[#allocation2] sm:$0xff] %v5247_v57  ;;  %v4323_v57 = vld [vmem:[%s7637_s7 + $0x10] sm:$0xf] }
 0x1be   :  { %2247 = vmatmul.bf16.vlgmr.msra.gmra.mxu0 %v6822_v60  ;;  %2260 = vmatmul.bf16.vlgmr.msra.gmra.mxu1 %v6822_v60 }
 0x1bf   :  { %2273 = vmatmul.bf16.vlgmr.msra.gmra.mxu2 %v6822_v60  ;;  %2286 = vmatmul.bf16.vlgmr.msra.gmra.mxu3 %v6822_v60 }
 0x1c0   :  { %3037 = vmatpush.bf16.msra.mxu0 %v4372_v34  ;;  %3050 = vmatpush.bf16.msra.mxu1 %v4436_v35  ;;  %v5084_v34 = vld [vmem:[%s7637_s7 + $0x14] sm:$0xf0]  ;;  %v4387_v35 = vld [vmem:[%s7637_s7 + $0x90] sm:$0xf] }
 0x1c1   :  { %3063 = vmatpush.bf16.msra.mxu2 %v4500_v39  ;;  %3076 = vmatpush.bf16.msra.mxu3 %v4564_v40  ;;  %v4515_v39 = vld [vmem:[%s7637_s7 + $0x190] sm:$0xf]  ;;  %v5132_v40 = vld [vmem:[%s7637_s7 + $0x194] sm:$0xf0]  ;;  %v4324_v41 = vor.u32 %v5084_v34, %v4323_v57 }
 0x1c2   :  { %v4516_v48 = vor.u32 %v5132_v40, %v4515_v39  ;;  %v4803_v57 = vld [vmem:[%s7637_s7 + $0x3d0] sm:$0xf]  ;;  %v5168_v39 = vld [vmem:[%s7637_s7 + $0x2b4] sm:$0xf0] }
 0x1c3   :  { %v4660_v40 = vor.u32 %v5168_v39, %v4659_v61 }
 0x1c4   :  { %3038 = vmatpush.bf16.msra.mxu0 %v4364_v45  ;;  %3051 = vmatpush.bf16.msra.mxu1 %v4428_v55  ;;  %v4379_v45 = vld [vmem:[%s7637_s7 + $0x80] sm:$0xf]  ;;  %v5098_v55 = vld [vmem:[%s7637_s7 + $0x84] sm:$0xf0] }
 0x1c5   :  { %3064 = vmatpush.bf16.msra.mxu2 %v4492_v50  ;;  %3077 = vmatpush.bf16.msra.mxu3 %v4556_v51  ;;  %v4691_v50 = vld [vmem:[%s7637_s7 + $0x2f0] sm:$0xf]  ;;  %v5176_v51 = vld [vmem:[%s7637_s7 + $0x2f4] sm:$0xf0]  ;;  %v4380_v53 = vor.u32 %v5098_v55, %v4379_v45  ;;  %v5202_v45 = vld [vmem:[%s7637_s7 + $0x3c4] sm:$0xf0] }
 0x1c6   :  { %v4692_v54 = vor.u32 %v5176_v51, %v4691_v50  ;;  %v4796_v55 = vor.u32 %v5202_v45, %v4795_v43  ;;  %v5166_v50 = vld [vmem:[%s7637_s7 + $0x2a4] sm:$0xf0] }
 0x1c8   :  { %3039 = vmatpush.bf16.msra.mxu0 %v4356_v56  ;;  %3052 = vmatpush.bf16.msra.mxu1 %v4420_v58  ;;  %v4619_v56 = vld [vmem:[%s7637_s7 + $0x260] sm:$0xf]  ;;  %v5158_v58 = vld [vmem:[%s7637_s7 + $0x264] sm:$0xf0] }
 0x1c9   :  { %3065 = vmatpush.bf16.msra.mxu2 %v4484_v2  ;;  %3078 = vmatpush.bf16.msra.mxu3 %v4548_v4  ;;  %v4620_v62 = vor.u32 %v5158_v58, %v4619_v56  ;;  %v5114_v2 = vld [vmem:[%s7637_s7 + $0x104] sm:$0xf0]  ;;  %v4684_v4 = vor.u32 %v5174_v0, %v4683_v59  ;;  %v5200_v56 = vld [vmem:[%s7637_s7 + $0x3b4] sm:$0xf0]  ;;  %v4579_v59 = vld [vmem:[%s7637_s7 + $0x210] sm:$0xf] }
 0x1ca   :  { %v4444_v5 = vor.u32 %v5114_v2, %v4443_v1  ;;  %v4643_v0 = vld [vmem:[%s7637_s7 + $0x290] sm:$0xf]  ;;  %v5164_v2 = vld [vmem:[%s7637_s7 + $0x294] sm:$0xf0] }
 0x1cc   :  { %3040 = vmatpush.bf16.msra.mxu0 %v4348_v9  ;;  %3053 = vmatpush.bf16.msra.mxu1 %v4412_v10  ;;  %v4755_v9 = vld [vmem:[%s7637_s7 + $0x370] sm:$0xf]  ;;  %v5192_v10 = vld [vmem:[%s7637_s7 + $0x374] sm:$0xf0] }
 0x1cd   :  { %3066 = vmatpush.bf16.msra.mxu2 %v4476_v3  ;;  %3079 = vmatpush.bf16.msra.mxu3 %v4540_v15  ;;  %v4756_v12 = vor.u32 %v5192_v10, %v4755_v9  ;;  %v5156_v3 = vld [vmem:[%s7637_s7 + $0x254] sm:$0xf0]  ;;  %v4820_v15 = vor.u32 %v5208_v13, %v4819_v11  ;;  %v5198_v9 = vld [vmem:[%s7637_s7 + $0x3a4] sm:$0xf0]  ;;  %v4571_v11 = vld [vmem:[%s7637_s7 + $0x200] sm:$0xf] }
 0x1ce   :  { %2299 = vmatmul.bf16.vlgmr.msrb.gmra.mxu0 %v6822_v60  ;;  %2312 = vmatmul.bf16.vlgmr.msrb.gmra.mxu1 %v6822_v60  ;;  %v4612_v16 = vor.u32 %v5156_v3, %v4611_v14  ;;  %v4780_v10 = vor.u32 %v5198_v9, %v4779_v7  ;;  %v4635_v14 = vld [vmem:[%s7637_s7 + $0x280] sm:$0xf]  ;;  %v5162_v3 = vld [vmem:[%s7637_s7 + $0x284] sm:$0xf0]  ;;  %v5111_v7 = vld [vmem:[%s7637_s7 + $0xf4] sm:$0xf] }
 0x1cf   :  { %2325 = vmatmul.bf16.vlgmr.msrb.gmra.mxu2 %v6822_v60  ;;  %2338 = vmatmul.bf16.vlgmr.msrb.gmra.mxu3 %v6822_v60  ;;  %v5100_v60 = vld [vmem:[%s7637_s7 + $0x94] sm:$0xf0] }
 0x1d0   :  { %3041 = vmatpush.bf16.msra.mxu0 %v4340_v20  ;;  %3054 = vmatpush.bf16.msra.mxu1 %v4404_v21  ;;  %v4388_v42 = vor.u32 %v5100_v60, %v4387_v35  ;;  %v4747_v20 = vld [vmem:[%s7637_s7 + $0x360] sm:$0xf]  ;;  %v5190_v21 = vld [vmem:[%s7637_s7 + $0x364] sm:$0xf0]  ;;  %v5204_v35 = vld [vmem:[%s7637_s7 + $0x3d4] sm:$0xf0] }
 0x1d1   :  { %3067 = vmatpush.bf16.msra.mxu2 %v4468_v26  ;;  %3080 = vmatpush.bf16.msra.mxu3 %v4532_v27  ;;  %v4748_v23 = vor.u32 %v5190_v21, %v4747_v20  ;;  %v4603_v26 = vld [vmem:[%s7637_s7 + $0x240] sm:$0xf]  ;;  %v5154_v27 = vld [vmem:[%s7637_s7 + $0x244] sm:$0xf0]  ;;  %v4804_v60 = vor.u32 %v5204_v35, %v4803_v57  ;;  %v4708_v20 = vor.u32 %v5180_v18, %v4707_v17  ;;  %v5196_v21 = vld [vmem:[%s7637_s7 + $0x394] sm:$0xf0] }
 0x1d2   :  { %v4604_v29 = vor.u32 %v5154_v27, %v4603_v26  ;;  %v5178_v26 = vld [vmem:[%s7637_s7 + $0x304] sm:$0xf0] }
 0x1d4   :  { %3042 = vmatpush.bf16.msra.mxu0 %v4332_v32  ;;  %3055 = vmatpush.bf16.msra.mxu1 %v4396_v33  ;;  %v4739_v32 = vld [vmem:[%s7637_s7 + $0x350] sm:$0xf]  ;;  %v5188_v33 = vld [vmem:[%s7637_s7 + $0x354] sm:$0xf0] }
 0x1d5   :  { %3068 = vmatpush.bf16.msra.mxu2 %v4460_v36  ;;  %3081 = vmatpush.bf16.msra.mxu3 %v4524_v37  ;;  %v4740_v34 = vor.u32 %v5188_v33, %v4739_v32  ;;  %v4595_v36 = vld [vmem:[%s7637_s7 + $0x230] sm:$0xf]  ;;  %v5152_v37 = vld [vmem:[%s7637_s7 + $0x234] sm:$0xf0] }
 0x1d6   :  { %v4596_v38 = vor.u32 %v5152_v37, %v4595_v36 }
 0x1d8   :  { %3043 = vmatpush.bf16.msra.mxu0 %v4324_v41  ;;  %3056 = vmatpush.bf16.msra.mxu1 %v4388_v42  ;;  %v4731_v41 = vld [vmem:[%s7637_s7 + $0x340] sm:$0xf]  ;;  %v5186_v42 = vld [vmem:[%s7637_s7 + $0x344] sm:$0xf0] }
 0x1d9   :  { %3069 = vmatpush.bf16.msra.mxu2 %v4452_v47  ;;  %3082 = vmatpush.bf16.msra.mxu3 %v4516_v48  ;;  %v4732_v44 = vor.u32 %v5186_v42, %v4731_v41  ;;  %v5150_v47 = vld [vmem:[%s7637_s7 + $0x224] sm:$0xf0]  ;;  %v4651_v48 = vld [vmem:[%s7637_s7 + $0x2a0] sm:$0xf] }
 0x1da   :  { %v4588_v49 = vor.u32 %v5150_v47, %v4587_v46  ;;  %v4652_v51 = vor.u32 %v5166_v50, %v4651_v48 }
 0x1dc   :  { %3044 = vmatpush.bf16.msra.mxu0 %v4316_v52  ;;  %3057 = vmatpush.bf16.msra.mxu1 %v4380_v53  ;;  %v4723_v52 = vld [vmem:[%s7637_s7 + $0x330] sm:$0xf]  ;;  %v5184_v53 = vld [vmem:[%s7637_s7 + $0x334] sm:$0xf0] }
 0x1dd   :  { %3070 = vmatpush.bf16.msra.mxu2 %v4444_v5  ;;  %3083 = vmatpush.bf16.msra.mxu3 %v4508_v8  ;;  %v4715_v5 = vld [vmem:[%s7637_s7 + $0x320] sm:$0xf] }
 0x1de   :  { %v4716_v8 = vor.u32 %v5182_v6, %v4715_v5 }
 0x1e0   :  { %3089 = vmatpush.bf16.msrb.mxu0 %v4628_v63  ;;  %3102 = vmatpush.bf16.msrb.mxu1 %v4692_v54  ;;  %v4787_v63 = vld [vmem:[%s7637_s7 + $0x3b0] sm:$0xf]  ;;  %v4724_v54 = vor.u32 %v5184_v53, %v4723_v52 }
 0x1e1   :  { %3115 = vmatpush.bf16.msrb.mxu2 %v4756_v12  ;;  %3128 = vmatpush.bf16.msrb.mxu3 %v4820_v15  ;;  %v4788_v58 = vor.u32 %v5200_v56, %v4787_v63  ;;  %v5146_v12 = vld [vmem:[%s7637_s7 + $0x204] sm:$0xf0]  ;;  %v7171_v15 = vld [vmem:[%s7636_s6] sm:$0xff] }
 0x1e2   :  { %v4572_v13 = vor.u32 %v5146_v12, %v4571_v11  ;;  %v1903_v22 = vperm.slane %v7171_v15, 0  ;;  %v1906_v36 = vperm.slane %v7171_v15, 3  ;;  %v1907_v48 = vperm.slane %v7171_v15, 4 }
 0x1e3   :  { %v1909_v5 = vperm.slane %v7171_v15, 6  ;;  %v1910_v6 = vperm.slane %v7171_v15, 7 }
 0x1e4   :  { %3090 = vmatpush.bf16.msrb.mxu0 %v4620_v62  ;;  %3103 = vmatpush.bf16.msrb.mxu1 %v4684_v4  ;;  %v5148_v62 = vld [vmem:[%s7637_s7 + $0x214] sm:$0xf0]  ;;  %v4644_v4 = vor.u32 %v5164_v2, %v4643_v0  ;;  %v4373_v2 = vld [vmem:[%s7637_s7 + $0x78] sm:$0xf0] }
 0x1e5   :  { %3116 = vmatpush.bf16.msrb.mxu2 %v4748_v23  ;;  %3129 = vmatpush.bf16.msrb.mxu3 %v4812_v25  ;;  %v4580_v1 = vor.u32 %v5148_v62, %v4579_v59  ;;  %v1904_v23 = vperm.slane %v7171_v15, 1  ;;  %v4699_v25 = vld [vmem:[%s7637_s7 + $0x300] sm:$0xf] }
 0x1e6   :  { %v4700_v27 = vor.u32 %v5178_v26, %v4699_v25 }
 0x1e8   :  { %3091 = vmatpush.bf16.msrb.mxu0 %v4612_v16  ;;  %3104 = vmatpush.bf16.msrb.mxu1 %v4676_v19  ;;  %v4636_v16 = vor.u32 %v5162_v3, %v4635_v14  ;;  %v4771_v19 = vld [vmem:[%s7637_s7 + $0x390] sm:$0xf] }
 0x1e9   :  { %3117 = vmatpush.bf16.msrb.mxu2 %v4740_v34  ;;  %3130 = vmatpush.bf16.msrb.mxu3 %v4804_v60  ;;  %v4772_v24 = vor.u32 %v5196_v21, %v4771_v19  ;;  %v1905_v60 = vperm.slane %v7171_v15, 2  ;;  %v4365_v21 = vld [vmem:[%s7637_s7 + $0x68] sm:$0xf0] }
 0x1ec   :  { %3092 = vmatpush.bf16.msrb.mxu0 %v4604_v29  ;;  %3105 = vmatpush.bf16.msrb.mxu1 %v4668_v31  ;;  %v5194_v29 = vld [vmem:[%s7637_s7 + $0x384] sm:$0xf0] }
 0x1ed   :  { %3118 = vmatpush.bf16.msrb.mxu2 %v4732_v44  ;;  %3131 = vmatpush.bf16.msrb.mxu3 %v4796_v55  ;;  %v4764_v32 = vor.u32 %v5194_v29, %v4763_v28  ;;  %v4429_v28 = vld [vmem:[%s7637_s7 + $0xe8] sm:$0xf0]  ;;  %v5127_v29 = vld [vmem:[%s7637_s7 + $0x174] sm:$0xf] }
 0x1f0   :  { %3093 = vmatpush.bf16.msrb.mxu0 %v4596_v38  ;;  %3106 = vmatpush.bf16.msrb.mxu1 %v4660_v40 }
 0x1f1   :  { %3119 = vmatpush.bf16.msrb.mxu2 %v4724_v54  ;;  %3132 = vmatpush.bf16.msrb.mxu3 %v4788_v58 }
 0x1f4   :  { %3094 = vmatpush.bf16.msrb.mxu0 %v4588_v49  ;;  %3107 = vmatpush.bf16.msrb.mxu1 %v4652_v51  ;;  %v1908_v49 = vperm.slane %v7171_v15, 5 }
 0x1f5   :  { %3120 = vmatpush.bf16.msrb.mxu2 %v4716_v8  ;;  %3133 = vmatpush.bf16.msrb.mxu3 %v4780_v10  ;;  %v4437_v8 = vld [vmem:[%s7637_s7 + $0xf8] sm:$0xf0] }
 0x1f6   :  { %v4440_v19 = vor.u32 %v5111_v7, %v4437_v8  ;;  %v5139_v7 = vld [vmem:[%s7637_s7 + $0x1d4] sm:$0xf] }
 0x1f8   :  { %3095 = vmatpush.bf16.msrb.mxu0 %v4580_v1  ;;  %3108 = vmatpush.bf16.msrb.mxu1 %v4644_v4  ;;  %v5095_v1 = vld [vmem:[%s7637_s7 + $0x74] sm:$0xf] }
 0x1f9   :  { %3121 = vmatpush.bf16.msrb.mxu2 %v4708_v20  ;;  %3134 = vmatpush.bf16.msrb.mxu3 %v4772_v24  ;;  %v4376_v3 = vor.u32 %v5095_v1, %v4373_v2  ;;  %v5093_v20 = vld [vmem:[%s7637_s7 + $0x64] sm:$0xf] }
 0x1fc   :  { %3096 = vmatpush.bf16.msrb.mxu0 %v4572_v13  ;;  %3109 = vmatpush.bf16.msrb.mxu1 %v4636_v16 }
 0x1fd   :  { %3122 = vmatpush.bf16.msrb.mxu2 %v4700_v27  ;;  %3135 = vmatpush.bf16.msrb.mxu3 %v4764_v32  ;;  %v5109_v27 = vld [vmem:[%s7637_s7 + $0xe4] sm:$0xf] }
 0x23b   :  { %v2248_v30 = vpop.f32.mrf.mxu0  ;;  %v2261_v31 = vpop.f32.mrf.mxu1 }
 0x23c   :  { %v2249_v33 = vadd.f32 %v2248_v30, %v1903_v22  ;;  %v2262_v57 = vadd.f32 %v2261_v31, %v1904_v23  ;;  %v4501_v30 = vld [vmem:[%s7637_s7 + $0x178] sm:$0xf0] }
 0x23e   :  { %v2343_v34 = vsub.f32 0.0, %v2249_v33  ;;  %v2344_v35 = vsub.f32 0.0, %v2262_v57  ;;  %v4368_v33 = vor.u32 %v5093_v20, %v4365_v21  ;;  %v5143_v57 = vld [vmem:[%s7637_s7 + $0x1f4] sm:$0xf] }
 0x240   :  { %v2351_v37 = vmul.f32 1.442695, %v2343_v34  ;;  %v2353_v61 = vmul.f32 1.442695, %v2344_v35  ;;  %v4565_v34 = vld [vmem:[%s7637_s7 + $0x1f8] sm:$0xf0]  ;;  %v4432_v35 = vor.u32 %v5109_v27, %v4429_v28 }
 0x241   :  { %v5085_v27 = vld [vmem:[%s7637_s7 + $0x24] sm:$0xf]  ;;  %v4333_v28 = vld [vmem:[%s7637_s7 + $0x28] sm:$0xf0] }
 0x242   :  { %5248 = vpow2.f32 %v2351_v37  ;;  %v2274_v38 = vpop.f32.mrf.mxu2  ;;  %v2287_v39 = vpop.f32.mrf.mxu3  ;;  %v5107_v37 = vld [vmem:[%s7637_s7 + $0xd4] sm:$0xf] }
 0x243   :  { %5250 = vpow2.f32 %v2353_v61  ;;  %v2275_v40 = vadd.f32 %v2274_v38, %v1905_v60  ;;  %v2288_v41 = vadd.f32 %v2287_v39, %v1906_v36  ;;  %v2250_v42 = vpop.f32.mrf.mxu0  ;;  %v2263_v43 = vpop.f32.mrf.mxu1  ;;  %v5091_v60 = vld [vmem:[%s7637_s7 + $0x54] sm:$0xf]  ;;  %v4357_v36 = vld [vmem:[%s7637_s7 + $0x58] sm:$0xf0] }
 0x244   :  { %v4421_v39 = vld [vmem:[%s7637_s7 + $0xd8] sm:$0xf0] }
 0x245   :  { %v2345_v44 = vsub.f32 0.0, %v2275_v40  ;;  %v2346_v45 = vsub.f32 0.0, %v2288_v41  ;;  %v4504_v41 = vor.u32 %v5127_v29, %v4501_v30  ;;  %v5101_v30 = vld [vmem:[%s7637_s7 + $0xa4] sm:$0xf] }
 0x247   :  { %v2355_v55 = vmul.f32 1.442695, %v2345_v44  ;;  %v2357_v46 = vmul.f32 1.442695, %v2346_v45  ;;  %v4568_v44 = vor.u32 %v5143_v57, %v4565_v34  ;;  %v4360_v45 = vor.u32 %v5091_v60, %v4357_v36  ;;  %v5119_v36 = vld [vmem:[%s7637_s7 + $0x134] sm:$0xf] }
 0x248   :  { %v5249_v47 = vpop.eup %5248  ;;  %v4336_v60 = vor.u32 %v5085_v27, %v4333_v28  ;;  %v5191_v27 = vld [vmem:[%s7637_s7 + $0x374] sm:$0xf]  ;;  %v4757_v28 = vld [vmem:[%s7637_s7 + $0x378] sm:$0xf0] }
 0x249   :  { %v5251_v50 = vpop.eup %5250  ;;  %v2367_v51 = vadd.f32 1.0, %v5249_v47  ;;  %5252 = vpow2.f32 %v2355_v55  ;;  %v5125_v55 = vld [vmem:[%s7637_s7 + $0x164] sm:$0xf] }
 0x24a   :  { %v2368_v52 = vadd.f32 1.0, %v5251_v50  ;;  %5254 = vpow2.f32 %v2357_v46  ;;  %v2276_v53 = vpop.f32.mrf.mxu2  ;;  %v2289_v63 = vpop.f32.mrf.mxu3  ;;  %v4493_v46 = vld [vmem:[%s7637_s7 + $0x168] sm:$0xf0]  ;;  %v5141_v47 = vld [vmem:[%s7637_s7 + $0x1e4] sm:$0xf] }
 0x24b   :  { %5256 = vrcp.f32 %v2367_v51  ;;  %v2300_v54 = vpop.f32.mrf.mxu0  ;;  %v2313_v56 = vpop.f32.mrf.mxu1  ;;  %v4557_v53 = vld [vmem:[%s7637_s7 + $0x1e8] sm:$0xf0]  ;;  %v5089_v63 = vld [vmem:[%s7637_s7 + $0x44] sm:$0xf]  ;;  %v4496_v1 = vor.u32 %v5125_v55, %v4493_v46 }
 0x24c   :  { %5258 = vrcp.f32 %v2368_v52  ;;  %v2301_v58 = vadd.f32 %v2300_v54, %v1907_v48  ;;  %v2314_v59 = vadd.f32 %v2313_v56, %v1908_v49  ;;  %v4424_v52 = vor.u32 %v5107_v37, %v4421_v39  ;;  %v4349_v54 = vld [vmem:[%s7637_s7 + $0x48] sm:$0xf0]  ;;  %v4469_v37 = vld [vmem:[%s7637_s7 + $0x138] sm:$0xf0]  ;;  %v5117_v46 = vld [vmem:[%s7637_s7 + $0x124] sm:$0xf] }
 0x24d   :  { %v4560_v2 = vor.u32 %v5141_v47, %v4557_v53  ;;  %v4533_v39 = vld [vmem:[%s7637_s7 + $0x1b8] sm:$0xf0]  ;;  %v4472_v55 = vor.u32 %v5119_v36, %v4469_v37  ;;  %v5133_v53 = vld [vmem:[%s7637_s7 + $0x1a4] sm:$0xf]  ;;  %v4760_v37 = vor.u32 %v5191_v27, %v4757_v28 }
 0x24e   :  { %v2347_v62 = vsub.f32 0.0, %v2301_v58  ;;  %v2348_v0 = vsub.f32 0.0, %v2314_v59  ;;  %v5105_v59 = vld [vmem:[%s7637_s7 + $0xc4] sm:$0xf]  ;;  %v4645_v27 = vld [vmem:[%s7637_s7 + $0x298] sm:$0xf0] }
 0x24f   :  { %v5253_v4 = vpop.eup %5252 }
 0x250   :  { %v5255_v9 = vpop.eup %5254  ;;  %v2369_v10 = vadd.f32 1.0, %v5253_v4  ;;  %v2359_v11 = vmul.f32 1.442695, %v2347_v62  ;;  %v2361_v14 = vmul.f32 1.442695, %v2348_v0  ;;  %v4352_v4 = vor.u32 %v5089_v63, %v4349_v54 }
 0x251   :  { %v5257_v12 = vpop.eup %5256  ;;  %v2370_v13 = vadd.f32 1.0, %v5255_v9  ;;  %v4413_v62 = vld [vmem:[%s7637_s7 + $0xc8] sm:$0xf0]  ;;  %v4549_v9 = vld [vmem:[%s7637_s7 + $0x1d8] sm:$0xf0] }
 0x252   :  { %v5259_v16 = vpop.eup %5258  ;;  %v7217_v17 = vpack.c.bf16 %v5257_v12, %v5257_v12  ;;  %5260 = vrcp.f32 %v2369_v10  ;;  %v2326_v15 = vpop.f32.mrf.mxu2  ;;  %v4416_v8 = vor.u32 %v5105_v59, %v4413_v62  ;;  %v5087_v10 = vld [vmem:[%s7637_s7 + $0x34] sm:$0xf]  ;;  %v4552_v20 = vor.u32 %v5139_v7, %v4549_v9  ;;  %v4525_v63 = vld [vmem:[%s7637_s7 + $0x1a8] sm:$0xf0]  ;;  %v5097_v62 = vld [vmem:[%s7637_s7 + $0x84] sm:$0xf] }
 0x253   :  { %v2339_v18 = vpop.f32.mrf.mxu3  ;;  %v7225_v22 = vpack.c.bf16 %v5259_v16, %v5259_v16  ;;  %5262 = vrcp.f32 %v2370_v13  ;;  %v2327_v23 = vadd.f32 %v2326_v15, %v1909_v5  ;;  %v2302_v25 = vpop.f32.mrf.mxu0  ;;  %v5123_v5 = vld [vmem:[%s7637_s7 + $0x154] sm:$0xf]  ;;  %v4317_v59 = vld [vmem:[%s7637_s7 + $0x8] sm:$0xf0]  ;;  %v4528_v7 = vor.u32 %v5133_v53, %v4525_v63  ;;  %v4741_v53 = vld [vmem:[%s7637_s7 + $0x358] sm:$0xf0] }
 0x254   :  { %v2340_v24 = vadd.f32 %v2339_v18, %v1910_v6  ;;  %v2315_v26 = vpop.f32.mrf.mxu1  ;;  %5264 = vpow2.f32 %v2359_v11  ;;  %3045 = vmatmul.bf16.vlgmr.msra.gmra.mxu0 %v7217_v17  ;;  %v4485_v6 = vld [vmem:[%s7637_s7 + $0x158] sm:$0xf0]  ;;  %v5103_v13 = vld [vmem:[%s7637_s7 + $0xb4] sm:$0xf]  ;;  %v5121_v18 = vld [vmem:[%s7637_s7 + $0x144] sm:$0xf] }
 0x255   :  { %5266 = vpow2.f32 %v2361_v14  ;;  %v2349_v31 = vsub.f32 0.0, %v2327_v23  ;;  %3058 = vmatmul.bf16.vlgmr.msra.gmra.mxu1 %v7225_v22  ;;  %3141 = vmatpush.bf16.msra.mxu0 %v4376_v3  ;;  %v4341_v11 = vld [vmem:[%s7637_s7 + $0x38] sm:$0xf0]  ;;  %v4488_v15 = vor.u32 %v5123_v5, %v4485_v6  ;;  %v4477_v23 = vld [vmem:[%s7637_s7 + $0x148] sm:$0xf0] }
 0x256   :  { %v2350_v32 = vsub.f32 0.0, %v2340_v24  ;;  %3154 = vmatpush.bf16.msra.mxu1 %v4440_v19  ;;  %v4405_v14 = vld [vmem:[%s7637_s7 + $0xb8] sm:$0xf0]  ;;  %v4344_v21 = vor.u32 %v5087_v10, %v4341_v11  ;;  %v5137_v24 = vld [vmem:[%s7637_s7 + $0x1c4] sm:$0xf]  ;;  %v4480_v57 = vor.u32 %v5121_v18, %v4477_v23 }
 0x257   :  { %v2363_v61 = vmul.f32 1.442695, %v2349_v31  ;;  %v4408_v25 = vor.u32 %v5103_v13, %v4405_v14  ;;  %v4541_v26 = vld [vmem:[%s7637_s7 + $0x1c8] sm:$0xf0]  ;;  %v5175_v5 = vld [vmem:[%s7637_s7 + $0x2f4] sm:$0xf] }
 0x258   :  { %v2365_v38 = vmul.f32 1.442695, %v2350_v32  ;;  %v5261_v40 = vpop.eup %5260  ;;  %v4397_v31 = vld [vmem:[%s7637_s7 + $0xa8] sm:$0xf0]  ;;  %v4693_v6 = vld [vmem:[%s7637_s7 + $0x2f8] sm:$0xf0] }
 0x259   :  { %v5263_v42 = vpop.eup %5262  ;;  %v7259_v43 = vpack.c.bf16 %v5261_v40, %v5261_v40  ;;  %5268 = vpow2.f32 %v2363_v61  ;;  %3142 = vmatpush.bf16.msra.mxu0 %v4368_v33  ;;  %v5135_v61 = vld [vmem:[%s7637_s7 + $0x1b4] sm:$0xf]  ;;  %v4453_v10 = vld [vmem:[%s7637_s7 + $0x118] sm:$0xf0]  ;;  %v4621_v18 = vld [vmem:[%s7637_s7 + $0x268] sm:$0xf0] }
 0x25a   :  { %v5265_v48 = vpop.eup %5264  ;;  %v7270_v49 = vpack.c.bf16 %v5263_v42, %v5263_v42  ;;  %5270 = vpow2.f32 %v2365_v38  ;;  %3155 = vmatpush.bf16.msra.mxu1 %v4432_v35  ;;  %v2328_v50 = vpop.f32.mrf.mxu2  ;;  %v4544_v35 = vor.u32 %v5137_v24, %v4541_v26  ;;  %v4400_v38 = vor.u32 %v5101_v30, %v4397_v31  ;;  %v5083_v40 = vld [vmem:[%s7637_s7 + $0x14] sm:$0xf]  ;;  %v4517_v14 = vld [vmem:[%s7637_s7 + $0x198] sm:$0xf0]  ;;  %v5113_v23 = vld [vmem:[%s7637_s7 + $0x104] sm:$0xf] }
 0x25b   :  { %v2341_v51 = vpop.f32.mrf.mxu3  ;;  %v5267_v56 = vpop.eup %5266  ;;  %v2371_v58 = vadd.f32 1.0, %v5265_v48  ;;  %3071 = vmatmul.bf16.vlgmr.msra.gmra.mxu2 %v7259_v43  ;;  %v5099_v42 = vld [vmem:[%s7637_s7 + $0x94] sm:$0xf]  ;;  %v4536_v50 = vor.u32 %v5135_v61, %v4533_v39  ;;  %v4445_v24 = vld [vmem:[%s7637_s7 + $0x108] sm:$0xf0] }
 0x25c   :  { %v2372_v0 = vadd.f32 1.0, %v5267_v56  ;;  %3084 = vmatmul.bf16.vlgmr.msra.gmra.mxu3 %v7270_v49  ;;  %3167 = vmatpush.bf16.msra.mxu2 %v4504_v41  ;;  %v4325_v41 = vld [vmem:[%s7637_s7 + $0x18] sm:$0xf0]  ;;  %v5115_v9 = vld [vmem:[%s7637_s7 + $0x114] sm:$0xf] }
 0x25d   :  { %5272 = vrcp.f32 %v2371_v58  ;;  %3180 = vmatpush.bf16.msra.mxu3 %v4568_v44  ;;  %3143 = vmatpush.bf16.msra.mxu0 %v4360_v45  ;;  %v4389_v44 = vld [vmem:[%s7637_s7 + $0x98] sm:$0xf0]  ;;  %v4328_v51 = vor.u32 %v5083_v40, %v4325_v41  ;;  %v5081_v58 = vld [vmem:[%s7637_s7 + $0x4] sm:$0xf]  ;;  %v5131_v13 = vld [vmem:[%s7637_s7 + $0x194] sm:$0xf] }
 0x25e   :  { %5274 = vrcp.f32 %v2372_v0  ;;  %3156 = vmatpush.bf16.msra.mxu1 %v4424_v52  ;;  %v4461_v52 = vld [vmem:[%s7637_s7 + $0x128] sm:$0xf0]  ;;  %v4392_v56 = vor.u32 %v5099_v42, %v4389_v44  ;;  %v5207_v30 = vld [vmem:[%s7637_s7 + $0x3f4] sm:$0xf]  ;;  %v4821_v31 = vld [vmem:[%s7637_s7 + $0x3f8] sm:$0xf0] }
 0x25f   :  { %v5269_v12 = vpop.eup %5268  ;;  %v4381_v0 = vld [vmem:[%s7637_s7 + $0x88] sm:$0xf0]  ;;  %v5171_v61 = vld [vmem:[%s7637_s7 + $0x2d4] sm:$0xf]  ;;  %v4824_v39 = vor.u32 %v5207_v30, %v4821_v31  ;;  %v5189_v40 = vld [vmem:[%s7637_s7 + $0x364] sm:$0xf] }
 0x260   :  { %v5271_v3 = vpop.eup %5270  ;;  %v2373_v16 = vadd.f32 1.0, %v5269_v12  ;;  %3168 = vmatpush.bf16.msra.mxu2 %v4496_v1  ;;  %v5159_v1 = vld [vmem:[%s7637_s7 + $0x274] sm:$0xf]  ;;  %v4384_v11 = vor.u32 %v5097_v62, %v4381_v0  ;;  %v4509_v26 = vld [vmem:[%s7637_s7 + $0x188] sm:$0xf0] }
 0x261   :  { %v2374_v19 = vadd.f32 1.0, %v5271_v3  ;;  %3181 = vmatpush.bf16.msra.mxu3 %v4560_v2  ;;  %3144 = vmatpush.bf16.msra.mxu0 %v4352_v4  ;;  %v4629_v2 = vld [vmem:[%s7637_s7 + $0x278] sm:$0xf0]  ;;  %v4464_v4 = vor.u32 %v5117_v46, %v4461_v52  ;;  %v4696_v3 = vor.u32 %v5175_v5, %v4693_v6  ;;  %v4749_v41 = vld [vmem:[%s7637_s7 + $0x368] sm:$0xf0] }
 0x262   :  { %5276 = vrcp.f32 %v2373_v16  ;;  %3157 = vmatpush.bf16.msra.mxu1 %v4416_v8  ;;  %v4320_v8 = vor.u32 %v5081_v58, %v4317_v59  ;;  %v4632_v12 = vor.u32 %v5159_v1, %v4629_v2  ;;  %v5157_v16 = vld [vmem:[%s7637_s7 + $0x264] sm:$0xf]  ;;  %v4752_v46 = vor.u32 %v5189_v40, %v4749_v41  ;;  %v5187_v52 = vld [vmem:[%s7637_s7 + $0x354] sm:$0xf]  ;;  %v4805_v58 = vld [vmem:[%s7637_s7 + $0x3d8] sm:$0xf0] }
 0x263   :  { %v5273_v29 = vpop.eup %5272  ;;  %5278 = vrcp.f32 %v2374_v19  ;;  %v5173_v19 = vld [vmem:[%s7637_s7 + $0x2e4] sm:$0xf]  ;;  %v5151_v62 = vld [vmem:[%s7637_s7 + $0x234] sm:$0xf]  ;;  %v4744_v0 = vor.u32 %v5187_v52, %v4741_v53  ;;  %v4661_v2 = vld [vmem:[%s7637_s7 + $0x2b8] sm:$0xf0] }
 0x264   :  { %v5275_v32 = vpop.eup %5274  ;;  %v7337_v33 = vpack.c.bf16 %v5273_v29, %v5273_v29  ;;  %3169 = vmatpush.bf16.msra.mxu2 %v4488_v15  ;;  %v4456_v15 = vor.u32 %v5115_v9, %v4453_v10  ;;  %v4624_v29 = vor.u32 %v5157_v16, %v4621_v18  ;;  %v5205_v44 = vld [vmem:[%s7637_s7 + $0x3e4] sm:$0xf]  ;;  %v5167_v1 = vld [vmem:[%s7637_s7 + $0x2b4] sm:$0xf]  ;;  %v4733_v5 = vld [vmem:[%s7637_s7 + $0x348] sm:$0xf0] }
 0x265   :  { %v7339_v34 = vpack.c.bf16 %v5275_v32, %v5275_v32  ;;  %3182 = vmatpush.bf16.msra.mxu3 %v4552_v20  ;;  %3145 = vmatpush.bf16.msra.mxu0 %v4344_v21  ;;  %v4685_v20 = vld [vmem:[%s7637_s7 + $0x2e8] sm:$0xf0]  ;;  %v4520_v21 = vor.u32 %v5131_v13, %v4517_v14  ;;  %v4664_v9 = vor.u32 %v5167_v1, %v4661_v2  ;;  %v5149_v10 = vld [vmem:[%s7637_s7 + $0x224] sm:$0xf]  ;;  %v5183_v16 = vld [vmem:[%s7637_s7 + $0x334] sm:$0xf] }
 0x266   :  { %3097 = vmatmul.bf16.vlgmr.msrb.gmra.mxu0 %v7337_v33  ;;  %3158 = vmatpush.bf16.msra.mxu1 %v4408_v25  ;;  %v5129_v25 = vld [vmem:[%s7637_s7 + $0x184] sm:$0xf]  ;;  %v4688_v32 = vor.u32 %v5173_v19, %v4685_v20  ;;  %v4653_v14 = vld [vmem:[%s7637_s7 + $0x2a8] sm:$0xf0]  ;;  %v5199_v19 = vld [vmem:[%s7637_s7 + $0x3b4] sm:$0xf] }
 0x267   :  { %3110 = vmatmul.bf16.vlgmr.msrb.gmra.mxu1 %v7339_v34  ;;  %v4512_v36 = vor.u32 %v5129_v25, %v4509_v26  ;;  %v5165_v13 = vld [vmem:[%s7637_s7 + $0x2a4] sm:$0xf]  ;;  %v4789_v20 = vld [vmem:[%s7637_s7 + $0x3b8] sm:$0xf0]  ;;  %v5163_v26 = vld [vmem:[%s7637_s7 + $0x294] sm:$0xf] }
 0x268   :  { %v5277_v45 = vpop.eup %5276  ;;  %3170 = vmatpush.bf16.msra.mxu2 %v4480_v57  ;;  %v4448_v57 = vor.u32 %v5113_v23, %v4445_v24  ;;  %v5147_v23 = vld [vmem:[%s7637_s7 + $0x214] sm:$0xf]  ;;  %v4581_v24 = vld [vmem:[%s7637_s7 + $0x218] sm:$0xf0]  ;;  %v4792_v28 = vor.u32 %v5199_v19, %v4789_v20  ;;  %v4717_v30 = vld [vmem:[%s7637_s7 + $0x328] sm:$0xf0] }
 0x269   :  { %v5279_v47 = vpop.eup %5278  ;;  %v7370_v48 = vpack.c.bf16 %v5277_v45, %v5277_v45  ;;  %3183 = vmatpush.bf16.msra.mxu3 %v4544_v35  ;;  %3146 = vmatpush.bf16.msra.mxu0 %v4336_v60  ;;  %v5155_v35 = vld [vmem:[%s7637_s7 + $0x254] sm:$0xf]  ;;  %v4613_v60 = vld [vmem:[%s7637_s7 + $0x258] sm:$0xf0]  ;;  %v4584_v31 = vor.u32 %v5147_v23, %v4581_v24 }
 0x26a   :  { %v7381_v54 = vpack.c.bf16 %v5279_v47, %v5279_v47  ;;  %3159 = vmatpush.bf16.msra.mxu1 %v4400_v38  ;;  %v4677_v38 = vld [vmem:[%s7637_s7 + $0x2d8] sm:$0xf0]  ;;  %v4616_v42 = vor.u32 %v5155_v35, %v4613_v60  ;;  %v5169_v47 = vld [vmem:[%s7637_s7 + $0x2c4] sm:$0xf]  ;;  %v4648_v35 = vor.u32 %v5163_v26, %v4645_v27  ;;  %v5179_v40 = vld [vmem:[%s7637_s7 + $0x314] sm:$0xf] }
 0x26b   :  { %3123 = vmatmul.bf16.vlgmr.msrb.gmra.mxu2 %v7370_v48  ;;  %v4680_v45 = vor.u32 %v5171_v61, %v4677_v38  ;;  %v5145_v60 = vld [vmem:[%s7637_s7 + $0x204] sm:$0xf]  ;;  %v4637_v38 = vld [vmem:[%s7637_s7 + $0x288] sm:$0xf0]  ;;  %v4709_v41 = vld [vmem:[%s7637_s7 + $0x318] sm:$0xf0] }
 0x26c   :  { %3136 = vmatmul.bf16.vlgmr.msrb.gmra.mxu3 %v7381_v54  ;;  %3171 = vmatpush.bf16.msra.mxu2 %v4472_v55  ;;  %v5153_v55 = vld [vmem:[%s7637_s7 + $0x244] sm:$0xf] }
 0x26d   :  { %3184 = vmatpush.bf16.msra.mxu3 %v4536_v50  ;;  %3147 = vmatpush.bf16.msra.mxu0 %v4328_v51  ;;  %v4669_v50 = vld [vmem:[%s7637_s7 + $0x2c8] sm:$0xf0]  ;;  %v5161_v61 = vld [vmem:[%s7637_s7 + $0x284] sm:$0xf] }
 0x26e   :  { %3160 = vmatpush.bf16.msra.mxu1 %v4392_v56  ;;  %v5203_v56 = vld [vmem:[%s7637_s7 + $0x3d4] sm:$0xf]  ;;  %v4672_v59 = vor.u32 %v5169_v47, %v4669_v50  ;;  %v4701_v47 = vld [vmem:[%s7637_s7 + $0x308] sm:$0xf0]  ;;  %v5193_v50 = vld [vmem:[%s7637_s7 + $0x384] sm:$0xf] }
 0x270   :  { %3172 = vmatpush.bf16.msra.mxu2 %v4464_v4  ;;  %v5185_v4 = vld [vmem:[%s7637_s7 + $0x344] sm:$0xf] }
 0x271   :  { %3185 = vmatpush.bf16.msra.mxu3 %v4528_v7  ;;  %3148 = vmatpush.bf16.msra.mxu0 %v4320_v8  ;;  %v5201_v7 = vld [vmem:[%s7637_s7 + $0x3c4] sm:$0xf]  ;;  %v4797_v8 = vld [vmem:[%s7637_s7 + $0x3c8] sm:$0xf0] }
 0x272   :  { %3161 = vmatpush.bf16.msra.mxu1 %v4384_v11  ;;  %v4589_v11 = vld [vmem:[%s7637_s7 + $0x228] sm:$0xf0] }
 0x273   :  { %v4592_v18 = vor.u32 %v5149_v10, %v4589_v11 }
 0x274   :  { %3173 = vmatpush.bf16.msra.mxu2 %v4456_v15  ;;  %v4725_v15 = vld [vmem:[%s7637_s7 + $0x338] sm:$0xf0] }
 0x275   :  { %3193 = vmatpush.bf16.msrb.mxu0 %v4632_v12  ;;  %3186 = vmatpush.bf16.msra.mxu3 %v4520_v21  ;;  %v4736_v12 = vor.u32 %v5185_v4, %v4733_v5  ;;  %v4656_v21 = vor.u32 %v5165_v13, %v4653_v14  ;;  %v4728_v25 = vor.u32 %v5183_v16, %v4725_v15 }
 0x276   :  { %3206 = vmatpush.bf16.msrb.mxu1 %v4696_v3  ;;  %3149 = vmatmul.bf16.vlgmr.msra.gmra.mxu0 %v7217_v17  ;;  %v4813_v17 = vld [vmem:[%s7637_s7 + $0x3e8] sm:$0xf0]  ;;  %v4800_v3 = vor.u32 %v5201_v7, %v4797_v8 }
 0x277   :  { %3162 = vmatmul.bf16.vlgmr.msra.gmra.mxu1 %v7225_v22  ;;  %v4605_v22 = vld [vmem:[%s7637_s7 + $0x248] sm:$0xf0]  ;;  %v4816_v51 = vor.u32 %v5205_v44, %v4813_v17  ;;  %v5195_v44 = vld [vmem:[%s7637_s7 + $0x394] sm:$0xf]  ;;  %v4773_v17 = vld [vmem:[%s7637_s7 + $0x398] sm:$0xf0] }
 0x278   :  { %3174 = vmatpush.bf16.msra.mxu2 %v4448_v57  ;;  %v4608_v63 = vor.u32 %v5153_v55, %v4605_v22  ;;  %v4781_v57 = vld [vmem:[%s7637_s7 + $0x3a8] sm:$0xf0]  ;;  %v4712_v55 = vor.u32 %v5179_v40, %v4709_v41  ;;  %v4776_v22 = vor.u32 %v5195_v44, %v4773_v17 }
 0x279   :  { %3194 = vmatpush.bf16.msrb.mxu0 %v4624_v29  ;;  %3187 = vmatpush.bf16.msra.mxu3 %v4512_v36  ;;  %v5181_v29 = vld [vmem:[%s7637_s7 + $0x324] sm:$0xf]  ;;  %v4573_v36 = vld [vmem:[%s7637_s7 + $0x208] sm:$0xf0] }
 0x27a   :  { %3207 = vmatpush.bf16.msrb.mxu1 %v4688_v32  ;;  %v5197_v32 = vld [vmem:[%s7637_s7 + $0x3a4] sm:$0xf] }
 0x27b   :  { %3175 = vmatmul.bf16.vlgmr.msra.gmra.mxu2 %v7259_v43  ;;  %v4597_v43 = vld [vmem:[%s7637_s7 + $0x238] sm:$0xf0] }
 0x27c   :  { %3219 = vmatpush.bf16.msrb.mxu2 %v4760_v37  ;;  %3188 = vmatmul.bf16.vlgmr.msra.gmra.mxu3 %v7270_v49  ;;  %v4808_v49 = vor.u32 %v5203_v56, %v4805_v58  ;;  %v4600_v6 = vor.u32 %v5151_v62, %v4597_v43  ;;  %v4720_v37 = vor.u32 %v5181_v29, %v4717_v30 }
 0x27d   :  { %3232 = vmatpush.bf16.msrb.mxu3 %v4824_v39  ;;  %3195 = vmatpush.bf16.msrb.mxu0 %v4616_v42  ;;  %v4784_v39 = vor.u32 %v5197_v32, %v4781_v57  ;;  %v4576_v42 = vor.u32 %v5145_v60, %v4573_v36 }
 0x27e   :  { %3208 = vmatpush.bf16.msrb.mxu1 %v4680_v45  ;;  %v4640_v45 = vor.u32 %v5161_v61, %v4637_v38 }
 0x280   :  { %3220 = vmatpush.bf16.msrb.mxu2 %v4752_v46  ;;  %v5177_v46 = vld [vmem:[%s7637_s7 + $0x304] sm:$0xf] }
 0x281   :  { %3233 = vmatpush.bf16.msrb.mxu3 %v4816_v51  ;;  %3196 = vmatpush.bf16.msrb.mxu0 %v4608_v63  ;;  %v4765_v51 = vld [vmem:[%s7637_s7 + $0x388] sm:$0xf0]  ;;  %v4704_v52 = vor.u32 %v5177_v46, %v4701_v47  ;;  %s3264_s7 = sshll.u32 %s7639_s9, 4  ;;  %s3265_s7 = int_to_ptr.hbm [resolvable:$true] %s3264_s7 }
 0x282   :  { %3209 = vmatpush.bf16.msrb.mxu1 %v4672_v59  ;;  %v4768_v53 = vor.u32 %v5193_v50, %v4765_v51  ;;  %3267 = dma.vmem_to_hbm [thread:$0]  %s3263_s19, 128, %s3265_s7, [#allocation3]  }
 0x284   :  { %3221 = vmatpush.bf16.msrb.mxu2 %v4744_v0 }
 0x285   :  { %3234 = vmatpush.bf16.msrb.mxu3 %v4808_v49  ;;  %3197 = vmatpush.bf16.msrb.mxu0 %v4600_v6 }
 0x286   :  { %3210 = vmatpush.bf16.msrb.mxu1 %v4664_v9 }
 0x288   :  { %3222 = vmatpush.bf16.msrb.mxu2 %v4736_v12 }
 0x289   :  { %3235 = vmatpush.bf16.msrb.mxu3 %v4800_v3  ;;  %3198 = vmatpush.bf16.msrb.mxu0 %v4592_v18 }
 0x28a   :  { %3211 = vmatpush.bf16.msrb.mxu1 %v4656_v21 }
 0x28c   :  { %3223 = vmatpush.bf16.msrb.mxu2 %v4728_v25 }
 0x28d   :  { %3236 = vmatpush.bf16.msrb.mxu3 %v4792_v28  ;;  %3199 = vmatpush.bf16.msrb.mxu0 %v4584_v31 }
 0x28e   :  { %3212 = vmatpush.bf16.msrb.mxu1 %v4648_v35 }
 0x290   :  { %3224 = vmatpush.bf16.msrb.mxu2 %v4720_v37 }
 0x291   :  { %3237 = vmatpush.bf16.msrb.mxu3 %v4784_v39  ;;  %3200 = vmatpush.bf16.msrb.mxu0 %v4576_v42 }
 0x292   :  { %3213 = vmatpush.bf16.msrb.mxu1 %v4640_v45 }
 0x294   :  { %3225 = vmatpush.bf16.msrb.mxu2 %v4712_v55  ;;  %3201 = vmatmul.bf16.vlgmr.msrb.gmra.mxu0 %v7337_v33 }
 0x295   :  { %3238 = vmatpush.bf16.msrb.mxu3 %v4776_v22  ;;  %3214 = vmatmul.bf16.vlgmr.msrb.gmra.mxu1 %v7339_v34  ;;  %v2391_v34 = vld [vmem:[%s7638_s8] sm:$0x3]  ;;  %s5341_s8 = smov [#allocation4]  }
 0x296   :  { %v2393_v56 = vperm.slane %v2391_v34, 0  ;;  %v2394_v28 = vperm.slane %v2391_v34, 1  ;;  %s3273_s9 = sshll.u32 %s5341_s8, 4  ;;  %s3274_s9 = int_to_ptr.vmem [resolvable:$true] %s3273_s9 }
 0x298   :  { %3226 = vmatpush.bf16.msrb.mxu2 %v4704_v52 }
 0x299   :  { %3239 = vmatpush.bf16.msrb.mxu3 %v4768_v53 }
 0x29b   :  { %3227 = vmatmul.bf16.vlgmr.msrb.gmra.mxu2 %v7370_v48 }
 0x29c   :  { %3240 = vmatmul.bf16.vlgmr.msrb.gmra.mxu3 %v7381_v54 }
 0x2d1   :  { %v3046_v63 = vpop.f32.mrf.mxu0 }
 0x2d2   :  { %v3059_v33 = vpop.f32.mrf.mxu1  ;;  %v3047_v59 = vadd.f32 %v3046_v63, %v2393_v56 }
 0x2d4   :  { %v3060_v62 = vadd.f32 %v3059_v33, %v3047_v59 }
 0x2d9   :  { %v3048_v58 = vpop.f32.mrf.mxu0 }
 0x2da   :  { %v3061_v48 = vpop.f32.mrf.mxu1 }
 0x2de   :  { %v3072_v54 = vpop.f32.mrf.mxu2 }
 0x2df   :  { %v3085_v43 = vpop.f32.mrf.mxu3  ;;  %v3073_v0 = vadd.f32 %v3072_v54, %v3060_v62 }
 0x2e1   :  { %v3086_v49 = vadd.f32 %v3085_v43, %v3073_v0 }
 0x2e3   :  { %v3098_v1 = vpop.f32.mrf.mxu0 }
 0x2e4   :  { %v3111_v2 = vpop.f32.mrf.mxu1  ;;  %v3099_v6 = vadd.f32 %v3098_v1, %v3086_v49 }
 0x2e6   :  { %v3074_v4 = vpop.f32.mrf.mxu2  ;;  %v3112_v9 = vadd.f32 %v3111_v2, %v3099_v6 }
 0x2e7   :  { %v3087_v5 = vpop.f32.mrf.mxu3 }
 0x2eb   :  { %v3100_v7 = vpop.f32.mrf.mxu0 }
 0x2ec   :  { %v3113_v8 = vpop.f32.mrf.mxu1 }
 0x2ee   :  { %v3124_v10 = vpop.f32.mrf.mxu2 }
 0x2ef   :  { %v3125_v11 = vadd.f32 %v3124_v10, %v3112_v9  ;;  %v3137_v12 = vpop.f32.mrf.mxu3 }
 0x2f1   :  { %v3138_v13 = vadd.f32 %v3137_v12, %v3125_v11 }
 0x2f3   :  { %v3245_v14 = vsub.f32 0.0, %v3138_v13  ;;  %v3150_v3 = vpop.f32.mrf.mxu0 }
 0x2f4   :  { %v3163_v16 = vpop.f32.mrf.mxu1  ;;  %v3151_v31 = vadd.f32 %v3150_v3, %v2394_v28 }
 0x2f5   :  { %v3247_v15 = vmul.f32 1.442695, %v3245_v14 }
 0x2f6   :  { %v3126_v18 = vpop.f32.mrf.mxu2  ;;  %v3164_v32 = vadd.f32 %v3163_v16, %v3151_v31 }
 0x2f7   :  { %5280 = vpow2.f32 %v3247_v15  ;;  %v3139_v19 = vpop.f32.mrf.mxu3 }
 0x2fb   :  { %v3152_v20 = vpop.f32.mrf.mxu0 }
 0x2fc   :  { %v3165_v21 = vpop.f32.mrf.mxu1 }
 0x2fd   :  { %v5281_v23 = vpop.eup %5280 }
 0x2fe   :  { %v3251_v24 = vadd.f32 1.0, %v5281_v23  ;;  %v3176_v25 = vpop.f32.mrf.mxu2 }
 0x2ff   :  { %v3189_v26 = vpop.f32.mrf.mxu3  ;;  %v3177_v35 = vadd.f32 %v3176_v25, %v3164_v32 }
 0x300   :  { %5282 = vrcp.f32 %v3251_v24 }
 0x301   :  { %v3190_v36 = vadd.f32 %v3189_v26, %v3177_v35 }
 0x306   :  { %v5283_v27 = vpop.eup %5282  ;;  %v3178_v29 = vpop.f32.mrf.mxu2 }
 0x307   :  { %3255 = vst [vmem:[#allocation4] sm:$0xff] %v5283_v27  ;;  %v3191_v30 = vpop.f32.mrf.mxu3 }
 0x311   :  { %v3202_v57 = vpop.f32.mrf.mxu0 }
 0x312   :  { %v3215_v60 = vpop.f32.mrf.mxu1  ;;  %v3203_v37 = vadd.f32 %v3202_v57, %v3190_v36 }
 0x314   :  { %v3216_v39 = vadd.f32 %v3215_v60, %v3203_v37 }
 0x319   :  { %v3204_v61 = vpop.f32.mrf.mxu0 }
 0x31a   :  { %v3217_v38 = vpop.f32.mrf.mxu1 }
 0x31e   :  { %v3228_v40 = vpop.f32.mrf.mxu2 }
 0x31f   :  { %v3229_v41 = vadd.f32 %v3228_v40, %v3216_v39  ;;  %v3241_v42 = vpop.f32.mrf.mxu3 }
 0x321   :  { %v3242_v44 = vadd.f32 %v3241_v42, %v3229_v41 }
 0x323   :  { %v3246_v17 = vsub.f32 0.0, %v3242_v44 }
 0x325   :  { %v3249_v45 = vmul.f32 1.442695, %v3246_v17 }
 0x326   :  { %v3230_v55 = vpop.f32.mrf.mxu2 }
 0x327   :  { %5284 = vpow2.f32 %v3249_v45  ;;  %v3243_v22 = vpop.f32.mrf.mxu3 }
 0x32d   :  { %v5285_v46 = vpop.eup %5284 }
 0x32e   :  { %v3252_v47 = vadd.f32 1.0, %v5285_v46 }
 0x330   :  { %5286 = vrcp.f32 %v3252_v47 }
 0x336   :  { %v5287_v50 = vpop.eup %5286 }
 0x337   :  { %3256 = vst [vmem:[#allocation4 + $0x8] sm:$0xff] %v5287_v50 }
 0x338   :  { %3278 = dma.vmem_to_hbm [thread:$0]  %s3274_s9, 256, %s3276_s2, [#allocation5]  }
 0x339   :  { %5336 = dma.done.wait [#allocation3], 128  }
 0x33a   :  { %5337 = vsyncadd [#allocation3], 4294967168 }
 0x33b   :  { %5338 = dma.done.wait [#allocation5], 256  }
 0x33c   :  { %5339 = vsyncadd [#allocation5], 4294967040 }
 0x33d   :  { %3287 = vsyncpa [#allocation3], 1 }
 0x33e   :  { %3288 = vsyncpa [#allocation5], 1 }

</bundles_post_ra>
